<compile_context>
chip_gen: v5e
topology: v5e:2x2
jax: 0.10.0
libtpu: 0.0.40
codegen_flags: <defaults>
</compile_context>

<pallas_src>
import numpy as np

import jax
import jax.numpy as jnp
from jax import lax
from jax.experimental import pallas as pl
from jax.experimental.pallas import tpu as pltpu

# ----------------------- small, module-consistent config -----------------------
B = 2                                         # batch
CNN_IN, CNN_OUT, CNN_K = 1, 32, 5             # ConvLayer (stride 1)
IMG_H = IMG_W = 16                            # input spatial
C1_H = C1_W = IMG_H - CNN_K + 1               # 12
PC_CAPS, PC_OUT, PC_K, PC_STRIDE = 8, 8, 5, 2  # PrimaryCaps (stride 2)
PC_H = PC_W = (C1_H - PC_K) // PC_STRIDE + 1   # 4
PC_OC = PC_CAPS * PC_OUT                      # 64 fused PrimaryCaps out channels
WC_IN = 8                                     # WaferCaps in_channels
NUM_ROUTES = PC_CAPS * PC_OUT * PC_H * PC_W // WC_IN   # 128
WC_CAPS, WC_OUT = 10, 16                      # WaferCaps capsules / out_channels
CO = WC_CAPS * WC_OUT                         # 160
C_PAD = 16                                    # capsule dim padded for alignment
ENC_HID = 512                                 # Encoder hardcodes 512
NUM_CLS = 9                                   # round(100/100 * 9)

KK1 = CNN_K * CNN_K                           # 25 conv1 taps
K1_PAD = 32                                   # 25 taps + 1 ones col + 6 zero pad
KK2 = PC_K * PC_K                             # 25 PrimaryCaps taps
N_POS2 = B * PC_H * PC_W                      # 32 PrimaryCaps output positions
N_BIG = KK2 * N_POS2                          # 800 (tap, position) conv1 sites
NQ = (PC_H * PC_W) // WC_IN                   # 2 spatial halves per route group


# =============================== fused Pallas kernel ===============================

def _capsnet_kernel(xbig_ref, w1_ref, pcw_ref, pcb_ref, eexp_ref, ered_ref,
                    eb1_ref, ew2_ref, eb2_ref,          # auto-DMA'd VMEM inputs
                    wt_hbm, ew1_hbm,                    # ANY (HBM) late-use weights
                    out_ref,                            # (B, 9) output
                    wt_buf, ew1_buf, sems):             # scratch
    f32 = jnp.float32
    bf16 = jnp.bfloat16

    # Prefetch the late-use weights; their DMA overlaps conv1/PrimaryCaps/squash.
    wt_cp = pltpu.make_async_copy(wt_hbm, wt_buf, sems.at[0])
    ew1_cp = pltpu.make_async_copy(ew1_hbm, ew1_buf, sems.at[1])
    wt_cp.start()
    ew1_cp.start()

    # --- ConvLayer: Conv2d(1->32,k=5,s=1)+ReLU, evaluated at the 800
    #     (PC-tap dd, PC-pos) sites.  Bias folded in via a ones column. --------
    h_big = jnp.maximum(
        jnp.dot(xbig_ref[...], w1_ref[...], preferred_element_type=f32), 0.0)  # (800, 32) f32
    hb = h_big.astype(bf16)

    # --- PrimaryCaps stride-2 conv: per-tap rows are contiguous 32-row slabs of
    #     h_big, so no gather matrix; 25 small bf16 MXU dots with f32 acc. ------
    acc = jnp.zeros((N_POS2, PC_OC), f32)
    for dd in range(KK2):
        acc = acc + jnp.dot(hb[dd * N_POS2:(dd + 1) * N_POS2, :], pcw_ref[dd],
                            preferred_element_type=f32)                        # (32, 64)
    y = acc + pcb_ref[...]                                                      # (32, 64)

    # --- rearrange to routing layout: routes in the LANE dim ------------------
    # r' = q*64 + cap*8 + oc (a fixed route relabeling; wt is permuted
    # identically at prep time; dynamic routing is invariant under it).
    per_batch = []
    for b in range(B):
        base = b * (PC_H * PC_W)
        qs = [y[base + q * WC_IN: base + (q + 1) * WC_IN, :] for q in range(NQ)]
        per_batch.append(jnp.concatenate(qs, axis=1)[None])                     # (1, 8, 128)
    uT = jnp.concatenate(per_batch, axis=0)                                      # (2, 8, 128)

    # PrimaryCaps.squash over the 8-dim capsule axis:  x * sqrt(|x|^2)/(1+|x|^2)
    sq = jnp.sum(uT * uT, axis=1, keepdims=True)                                 # (2, 1, 128)
    xT = uT * (jnp.sqrt(sq) / (1.0 + sq))                                        # (2, 8, 128)

    # --- WaferCaps u_hat: 8 sublane-broadcast MACs (per-lane 160x8 contraction)
    wt_cp.wait()
    u_hat = xT[:, 0:1, :] * wt_buf[0].astype(f32)[None]
    for i in range(1, WC_IN):
        u_hat = u_hat + xT[:, i:i + 1, :] * wt_buf[i].astype(f32)[None]          # (2, 160, 128)

    e_exp = eexp_ref[...]                                                         # (160, 16)
    e_red = ered_ref[...]                                                         # (16, 160)

    def coupling(b_cr):
        # exact softmax over routes (lane axis) per capsule row, then expand each
        # capsule coefficient to its 16 output slots via a tiny constant matmul.
        m = jnp.max(b_cr, axis=1, keepdims=True)
        e = jnp.exp(b_cr - m)
        c_cr = e / jnp.sum(e, axis=1, keepdims=True)
        return jnp.dot(e_exp, c_cr, preferred_element_type=jnp.float32)          # (160, 128)

    # --- dynamic routing: 3 iterations (last one needs no b_ij update) ---------
    b_cr = jnp.zeros((C_PAD, NUM_ROUTES), f32)
    for _ in range(2):
        c_full = coupling(b_cr)
        s = jnp.sum(c_full[None] * u_hat, axis=2, keepdims=True)                 # (2, 160, 1)
        v = s * jnp.abs(s) / (1.0 + s * s)                                        # scalar squash
        t = jnp.mean(u_hat * v, axis=0)                                           # (160, 128)
        b_cr = b_cr + jnp.dot(e_red, t, preferred_element_type=f32)               # (16, 128)

    c_full = coupling(b_cr)
    s = jnp.sum(c_full[None] * u_hat, axis=2)                                     # (2, 160)
    v = s * jnp.abs(s) / (1.0 + s * s)                                             # (2, 160)

    # --- Encoder: Linear(160,512)+ReLU+Dropout+Linear(512,9)+Sigmoid -----------
    # TODO(synk): Dropout(p=0.5) treated as inference-mode identity (add pltpu.prng_* masking for train parity).
    ew1_cp.wait()
    hid = jnp.maximum(
        jnp.dot(v.astype(bf16), ew1_buf[...], preferred_element_type=f32)
        + eb1_ref[...], 0.0)                                                      # (2, 512)
    z = jnp.dot(hid.astype(bf16), ew2_ref[...],
                preferred_element_type=f32) + eb2_ref[...]                        # (2, 9)
    out_ref[...] = 1.0 / (1.0 + jnp.exp(-z))                                       # exact sigmoid


_VMEM = pl.BlockSpec(memory_space=pltpu.MemorySpace.VMEM)
_ANY = pl.BlockSpec(memory_space=pl.ANY)


def fused_capsnet(xbig, kp):
    """Single grid-less pallas_call for the entire CapsNet forward pass."""
    return pl.pallas_call(
        _capsnet_kernel,
        out_shape=jax.ShapeDtypeStruct((B, NUM_CLS), jnp.float32),
        in_specs=[_VMEM] * 9 + [_ANY, _ANY],
        out_specs=_VMEM,
        scratch_shapes=[
            pltpu.VMEM((WC_IN, CO, NUM_ROUTES), jnp.bfloat16),   # wt landing buffer
            pltpu.VMEM((CO, ENC_HID), jnp.bfloat16),             # enc_w1 landing buffer
            pltpu.SemaphoreType.DMA((2,)),
        ],
    )(xbig, kp["w1"], kp["pcw"], kp["pcb"], kp["e_exp"], kp["e_red"],
      kp["enc_b1"], kp["enc_w2"], kp["enc_b2"], kp["wt"], kp["enc_w1"])


# ================================ wrapper / prep ================================

def _build_patches(x):
    """(B,1,16,16) -> (800, 32) bf16 conv1 im2col evaluated at every
    (PrimaryCaps tap dd=di2*5+dj2, PrimaryCaps position b*16+h*4+w) site.
    Column t1=di1*5+dj1 holds x[b, 2h+di2+di1, 2w+dj2+dj1]; column 25 is ones
    (carries conv1's bias); columns 26..31 are zero padding."""
    img = x[:, 0]                                                    # (B, 16, 16)
    span = PC_K + CNN_K - 1                                          # 9
    base = {}
    for a in range(span):
        for bb in range(span):
            base[(a, bb)] = img[:, a:a + 2 * PC_H:2, bb:bb + 2 * PC_W:2]   # (B, 4, 4)
    ones = jnp.ones((N_POS2, 1), jnp.float32)
    zeros = jnp.zeros((N_POS2, K1_PAD - KK1 - 1), jnp.float32)
    blocks = []
    for di2 in range(PC_K):
        for dj2 in range(PC_K):
            taps = [base[(di2 + di1, dj2 + dj1)]
                    for di1 in range(CNN_K) for dj1 in range(CNN_K)]
            blk = jnp.stack(taps, axis=-1).reshape(N_POS2, KK1)      # (32, 25)
            blocks.append(jnp.concatenate([blk, ones, zeros], axis=1))
    return jnp.concatenate(blocks, axis=0).astype(jnp.bfloat16)      # (800, 32)


def _make_route_constants():
    # capsule-coefficient expansion (capsule -> its 16 output slots) + reduction.
    e_exp = np.zeros((CO, C_PAD), np.float32)
    for c in range(WC_CAPS):
        e_exp[c * WC_OUT:(c + 1) * WC_OUT, c] = 1.0
    e_red = np.ascontiguousarray(e_exp.T)
    return jnp.asarray(e_exp), jnp.asarray(e_red)


def init_params(key):
    ks = jax.random.split(key, 8)
    p = {}
    p["conv1_w"] = 0.1 * jax.random.normal(ks[0], (CNN_OUT, CNN_IN, CNN_K, CNN_K), jnp.float32)
    p["conv1_b"] = 0.01 * jax.random.normal(ks[1], (CNN_OUT,), jnp.float32)
    p["pc_w"] = 0.1 * jax.random.normal(ks[2], (PC_CAPS, PC_OUT, CNN_OUT, PC_K, PC_K), jnp.float32)
    p["pc_b"] = 0.01 * jax.random.normal(ks[3], (PC_CAPS, PC_OUT), jnp.float32)
    # WaferCaps.W ~ torch.randn(1, num_routes, num_capsules, out_channels, in_channels)
    p["wc_W"] = jax.random.normal(ks[4], (NUM_ROUTES, WC_CAPS, WC_OUT, WC_IN), jnp.float32)
    p["enc_w1"] = 0.05 * jax.random.normal(ks[5], (WC_OUT * WC_CAPS, ENC_HID), jnp.float32)
    p["enc_b1"] = jnp.zeros((ENC_HID,), jnp.float32)
    p["enc_w2"] = 0.05 * jax.random.normal(ks[6], (ENC_HID, NUM_CLS), jnp.float32)
    p["enc_b2"] = jnp.zeros((NUM_CLS,), jnp.float32)
    return p


def prepare_params(p):
    """One-time re-layout / bf16 cast of torch-convention weights (off the hot path)."""
    e_exp, e_red = _make_route_constants()
    bf16 = jnp.bfloat16

    # conv1: (32, 32) matmul weight, bias folded in as row 25, zero-pad to 32 rows.
    w1 = p["conv1_w"].reshape(CNN_OUT, KK1).T                                  # (25, 32)
    w1 = jnp.concatenate(
        [w1, p["conv1_b"][None, :],
         jnp.zeros((K1_PAD - KK1 - 1, CNN_OUT), jnp.float32)], axis=0)         # (32, 32)

    # PrimaryCaps weights per tap: pcw[dd, c, cap*8+oc]
    pcw = p["pc_w"].reshape(PC_OC, CNN_OUT, KK2).transpose(2, 1, 0)            # (25, 32, 64)
    pcb = p["pc_b"].reshape(1, PC_OC)                                          # (1, 64)

    # WaferCaps W with routes in the lane dim, permuted to r' = q*64 + cap*8 + oc
    # (original route r = cap*16 + oc*2 + q).
    w6 = p["wc_W"].reshape(PC_CAPS, PC_OUT, NQ, WC_CAPS, WC_OUT, WC_IN)
    wt = w6.transpose(5, 3, 4, 2, 0, 1).reshape(WC_IN, CO, NUM_ROUTES)         # (8, 160, 128)

    return {
        "w1": w1.astype(bf16), "pcw": pcw.astype(bf16), "pcb": pcb,
        "wt": wt.astype(bf16), "e_exp": e_exp, "e_red": e_red,
        "enc_w1": p["enc_w1"].astype(bf16),
        "enc_b1": p["enc_b1"].reshape(1, ENC_HID),
        "enc_w2": p["enc_w2"].astype(bf16),
        "enc_b2": p["enc_b2"].reshape(1, NUM_CLS),
    }


@jax.jit
def capsnet_forward(kernel_params, x):
    # Only per-call XLA glue: one tiny fusion building the 50 KB bf16 patch matrix.
    xbig = _build_patches(x)
    return fused_capsnet(xbig, kernel_params)


# ------------------------ pure-JAX reference (torch semantics) ------------------------

@jax.jit
def reference_forward(p, x):
    h1 = lax.conv_general_dilated(x, p["conv1_w"], (1, 1), "VALID",
                                  dimension_numbers=("NCHW", "OIHW", "NCHW"))
    h1 = jax.nn.relu(h1 + p["conv1_b"][None, :, None, None])
    us = []
    for cap in range(PC_CAPS):
        u = lax.conv_general_dilated(h1, p["pc_w"][cap], (2, 2), "VALID",
                                     dimension_numbers=("NCHW", "OIHW", "NCHW"))
        us.append(u + p["pc_b"][cap][None, :, None, None])
    u = jnp.stack(us, axis=1).reshape(B, NUM_ROUTES, WC_IN)
    sqn = jnp.sum(u * u, axis=-1, keepdims=True)
    u = u * jnp.sqrt(sqn) / (1.0 + sqn)
    u_hat = jnp.einsum('rcoi,bri->brco', p["wc_W"], u)                # (B,128,10,16)
    b_ij = jnp.zeros((NUM_ROUTES, WC_CAPS), jnp.float32)
    v_j = None
    for it in range(3):
        c_ij = jax.nn.softmax(b_ij, axis=0)
        s_j = jnp.einsum('rc,brco->bco', c_ij, u_hat)                 # (B,10,16)
        v_j = s_j * jnp.abs(s_j) / (1.0 + s_j * s_j)
        if it < 2:
            a_ij = jnp.einsum('brco,bco->brc', u_hat, v_j)
            b_ij = b_ij + jnp.mean(a_ij, axis=0)
    v = v_j.reshape(B, WC_CAPS * WC_OUT)
    hid = jax.nn.relu(v @ p["enc_w1"] + p["enc_b1"])
    z = hid @ p["enc_w2"] + p["enc_b2"]
    return jax.nn.sigmoid(z)


if __name__ == "__main__":
    key = jax.random.PRNGKey(0)
    kparam_key, kx = jax.random.split(key)
    params = init_params(kparam_key)
    kernel_params = prepare_params(params)          # one-time weight re-layout / bf16 cast
    x = jax.random.normal(kx, (B, CNN_IN, IMG_H, IMG_W), jnp.float32)

    out = capsnet_forward(kernel_params, x)
    out = jax.block_until_ready(out)

    assert out.shape == (B, NUM_CLS), out.shape
    assert bool(jnp.all(jnp.isfinite(out)))
    assert bool(jnp.all((out >= 0.0) & (out <= 1.0)))          # sigmoid output range

    ref = jax.block_until_ready(reference_forward(params, x))   # f32 torch-semantics reference
    max_diff = float(jnp.max(jnp.abs(out - ref)))
    assert max_diff < 8e-2, f"kernel/reference mismatch: {max_diff}"

    print("KERNEL_OK")
</pallas_src>

<mosaic_0001>
module attributes {stable_mosaic.version = 11 : i64} {
  func.func @_capsnet_kernel(%arg0: memref<800x32xbf16, #tpu.memory_space<vmem>>, %arg1: memref<32x32xbf16, #tpu.memory_space<vmem>>, %arg2: memref<25x32x64xbf16, #tpu.memory_space<vmem>>, %arg3: memref<1x64xf32, #tpu.memory_space<vmem>>, %arg4: memref<160x16xf32, #tpu.memory_space<vmem>>, %arg5: memref<16x160xf32, #tpu.memory_space<vmem>>, %arg6: memref<1x512xf32, #tpu.memory_space<vmem>>, %arg7: memref<512x9xbf16, #tpu.memory_space<vmem>>, %arg8: memref<1x9xf32, #tpu.memory_space<vmem>>, %arg9: memref<8x160x128xbf16, #tpu.memory_space<any>>, %arg10: memref<160x512xbf16, #tpu.memory_space<any>>, %arg11: memref<2x9xf32, #tpu.memory_space<vmem>>, %arg12: memref<8x160x128xbf16, #tpu.memory_space<vmem>>, %arg13: memref<160x512xbf16, #tpu.memory_space<vmem>>, %arg14: memref<2x!tpu.dma_semaphore, #tpu.memory_space<semaphore_mem>>) attributes {dimension_semantics = [], scalar_prefetch = 0 : i64, scratch_operands = 3 : i64, tpu.core_type = #tpu.core_type<tc>} {
    %c0_i32 = arith.constant 0 : i32
    %0 = tpu.memref_slice %arg14[%c0_i32] : memref<2x!tpu.dma_semaphore, #tpu.memory_space<semaphore_mem>> -> memref<1x!tpu.dma_semaphore, #tpu.memory_space<semaphore_mem>>
    %1 = tpu.memref_squeeze %0 : memref<1x!tpu.dma_semaphore, #tpu.memory_space<semaphore_mem>> -> memref<!tpu.dma_semaphore, #tpu.memory_space<semaphore_mem>>
    tpu.enqueue_dma source(%arg9 : memref<8x160x128xbf16, #tpu.memory_space<any>>) target(%arg12 : memref<8x160x128xbf16, #tpu.memory_space<vmem>>) target_semaphore(%1 : memref<!tpu.dma_semaphore, #tpu.memory_space<semaphore_mem>>)
    %c1_i32 = arith.constant 1 : i32
    %2 = tpu.memref_slice %arg14[%c1_i32] : memref<2x!tpu.dma_semaphore, #tpu.memory_space<semaphore_mem>> -> memref<1x!tpu.dma_semaphore, #tpu.memory_space<semaphore_mem>>
    %3 = tpu.memref_squeeze %2 : memref<1x!tpu.dma_semaphore, #tpu.memory_space<semaphore_mem>> -> memref<!tpu.dma_semaphore, #tpu.memory_space<semaphore_mem>>
    tpu.enqueue_dma source(%arg10 : memref<160x512xbf16, #tpu.memory_space<any>>) target(%arg13 : memref<160x512xbf16, #tpu.memory_space<vmem>>) target_semaphore(%3 : memref<!tpu.dma_semaphore, #tpu.memory_space<semaphore_mem>>)
    %c0 = arith.constant 0 : index
    %c0_0 = arith.constant 0 : index
    %4 = vector.load %arg0[%c0, %c0_0] : memref<800x32xbf16, #tpu.memory_space<vmem>>, vector<800x32xbf16>
    %c0_1 = arith.constant 0 : index
    %c0_2 = arith.constant 0 : index
    %5 = vector.load %arg1[%c0_1, %c0_2] : memref<32x32xbf16, #tpu.memory_space<vmem>>, vector<32x32xbf16>
    %cst = arith.constant dense<0.000000e+00> : vector<800x32xf32>
    %6 = tpu.matmul %4, %5, %cst {dimension_numbers = #tpu.dot_dimension_numbers<[1], [0], [0], [1], [0, 0, 1, 1], [], []>} : vector<800x32xbf16>, vector<32x32xbf16>, vector<800x32xf32> -> vector<800x32xf32>
    %cst_3 = arith.constant 0.000000e+00 : f32
    %7 = vector.broadcast %cst_3 : f32 to vector<800x32xf32>
    %8 = arith.maximumf %6, %7 : vector<800x32xf32>
    %9 = arith.truncf %8 : vector<800x32xf32> to vector<800x32xbf16>
    %cst_4 = arith.constant 0.000000e+00 : f32
    %10 = vector.broadcast %cst_4 : f32 to vector<32x64xf32>
    %11 = vector.extract_strided_slice %9 {offsets = [0, 0], sizes = [32, 32], strides = [1, 1]} : vector<800x32xbf16> to vector<32x32xbf16>
    %c0_5 = arith.constant 0 : index
    %c0_6 = arith.constant 0 : index
    %c0_7 = arith.constant 0 : index
    %12 = vector.load %arg2[%c0_5, %c0_6, %c0_7] : memref<25x32x64xbf16, #tpu.memory_space<vmem>>, vector<1x32x64xbf16>
    %13 = vector.shape_cast %12 : vector<1x32x64xbf16> to vector<32x64xbf16>
    %cst_8 = arith.constant dense<0.000000e+00> : vector<32x64xf32>
    %14 = tpu.matmul %11, %13, %cst_8 {dimension_numbers = #tpu.dot_dimension_numbers<[1], [0], [0], [1], [0, 0, 1, 1], [], []>} : vector<32x32xbf16>, vector<32x64xbf16>, vector<32x64xf32> -> vector<32x64xf32>
    %15 = arith.addf %10, %14 : vector<32x64xf32>
    %16 = vector.extract_strided_slice %9 {offsets = [32, 0], sizes = [32, 32], strides = [1, 1]} : vector<800x32xbf16> to vector<32x32xbf16>
    %c1 = arith.constant 1 : index
    %c0_9 = arith.constant 0 : index
    %c0_10 = arith.constant 0 : index
    %17 = vector.load %arg2[%c1, %c0_9, %c0_10] : memref<25x32x64xbf16, #tpu.memory_space<vmem>>, vector<1x32x64xbf16>
    %18 = vector.shape_cast %17 : vector<1x32x64xbf16> to vector<32x64xbf16>
    %cst_11 = arith.constant dense<0.000000e+00> : vector<32x64xf32>
    %19 = tpu.matmul %16, %18, %cst_11 {dimension_numbers = #tpu.dot_dimension_numbers<[1], [0], [0], [1], [0, 0, 1, 1], [], []>} : vector<32x32xbf16>, vector<32x64xbf16>, vector<32x64xf32> -> vector<32x64xf32>
    %20 = arith.addf %15, %19 : vector<32x64xf32>
    %21 = vector.extract_strided_slice %9 {offsets = [64, 0], sizes = [32, 32], strides = [1, 1]} : vector<800x32xbf16> to vector<32x32xbf16>
    %c2 = arith.constant 2 : index
    %c0_12 = arith.constant 0 : index
    %c0_13 = arith.constant 0 : index
    %22 = vector.load %arg2[%c2, %c0_12, %c0_13] : memref<25x32x64xbf16, #tpu.memory_space<vmem>>, vector<1x32x64xbf16>
    %23 = vector.shape_cast %22 : vector<1x32x64xbf16> to vector<32x64xbf16>
    %cst_14 = arith.constant dense<0.000000e+00> : vector<32x64xf32>
    %24 = tpu.matmul %21, %23, %cst_14 {dimension_numbers = #tpu.dot_dimension_numbers<[1], [0], [0], [1], [0, 0, 1, 1], [], []>} : vector<32x32xbf16>, vector<32x64xbf16>, vector<32x64xf32> -> vector<32x64xf32>
    %25 = arith.addf %20, %24 : vector<32x64xf32>
    %26 = vector.extract_strided_slice %9 {offsets = [96, 0], sizes = [32, 32], strides = [1, 1]} : vector<800x32xbf16> to vector<32x32xbf16>
    %c3 = arith.constant 3 : index
    %c0_15 = arith.constant 0 : index
    %c0_16 = arith.constant 0 : index
    %27 = vector.load %arg2[%c3, %c0_15, %c0_16] : memref<25x32x64xbf16, #tpu.memory_space<vmem>>, vector<1x32x64xbf16>
    %28 = vector.shape_cast %27 : vector<1x32x64xbf16> to vector<32x64xbf16>
    %cst_17 = arith.constant dense<0.000000e+00> : vector<32x64xf32>
    %29 = tpu.matmul %26, %28, %cst_17 {dimension_numbers = #tpu.dot_dimension_numbers<[1], [0], [0], [1], [0, 0, 1, 1], [], []>} : vector<32x32xbf16>, vector<32x64xbf16>, vector<32x64xf32> -> vector<32x64xf32>
    %30 = arith.addf %25, %29 : vector<32x64xf32>
    %31 = vector.extract_strided_slice %9 {offsets = [128, 0], sizes = [32, 32], strides = [1, 1]} : vector<800x32xbf16> to vector<32x32xbf16>
    %c4 = arith.constant 4 : index
    %c0_18 = arith.constant 0 : index
    %c0_19 = arith.constant 0 : index
    %32 = vector.load %arg2[%c4, %c0_18, %c0_19] : memref<25x32x64xbf16, #tpu.memory_space<vmem>>, vector<1x32x64xbf16>
    %33 = vector.shape_cast %32 : vector<1x32x64xbf16> to vector<32x64xbf16>
    %cst_20 = arith.constant dense<0.000000e+00> : vector<32x64xf32>
    %34 = tpu.matmul %31, %33, %cst_20 {dimension_numbers = #tpu.dot_dimension_numbers<[1], [0], [0], [1], [0, 0, 1, 1], [], []>} : vector<32x32xbf16>, vector<32x64xbf16>, vector<32x64xf32> -> vector<32x64xf32>
    %35 = arith.addf %30, %34 : vector<32x64xf32>
    %36 = vector.extract_strided_slice %9 {offsets = [160, 0], sizes = [32, 32], strides = [1, 1]} : vector<800x32xbf16> to vector<32x32xbf16>
    %c5 = arith.constant 5 : index
    %c0_21 = arith.constant 0 : index
    %c0_22 = arith.constant 0 : index
    %37 = vector.load %arg2[%c5, %c0_21, %c0_22] : memref<25x32x64xbf16, #tpu.memory_space<vmem>>, vector<1x32x64xbf16>
    %38 = vector.shape_cast %37 : vector<1x32x64xbf16> to vector<32x64xbf16>
    %cst_23 = arith.constant dense<0.000000e+00> : vector<32x64xf32>
    %39 = tpu.matmul %36, %38, %cst_23 {dimension_numbers = #tpu.dot_dimension_numbers<[1], [0], [0], [1], [0, 0, 1, 1], [], []>} : vector<32x32xbf16>, vector<32x64xbf16>, vector<32x64xf32> -> vector<32x64xf32>
    %40 = arith.addf %35, %39 : vector<32x64xf32>
    %41 = vector.extract_strided_slice %9 {offsets = [192, 0], sizes = [32, 32], strides = [1, 1]} : vector<800x32xbf16> to vector<32x32xbf16>
    %c6 = arith.constant 6 : index
    %c0_24 = arith.constant 0 : index
    %c0_25 = arith.constant 0 : index
    %42 = vector.load %arg2[%c6, %c0_24, %c0_25] : memref<25x32x64xbf16, #tpu.memory_space<vmem>>, vector<1x32x64xbf16>
    %43 = vector.shape_cast %42 : vector<1x32x64xbf16> to vector<32x64xbf16>
    %cst_26 = arith.constant dense<0.000000e+00> : vector<32x64xf32>
    %44 = tpu.matmul %41, %43, %cst_26 {dimension_numbers = #tpu.dot_dimension_numbers<[1], [0], [0], [1], [0, 0, 1, 1], [], []>} : vector<32x32xbf16>, vector<32x64xbf16>, vector<32x64xf32> -> vector<32x64xf32>
    %45 = arith.addf %40, %44 : vector<32x64xf32>
    %46 = vector.extract_strided_slice %9 {offsets = [224, 0], sizes = [32, 32], strides = [1, 1]} : vector<800x32xbf16> to vector<32x32xbf16>
    %c7 = arith.constant 7 : index
    %c0_27 = arith.constant 0 : index
    %c0_28 = arith.constant 0 : index
    %47 = vector.load %arg2[%c7, %c0_27, %c0_28] : memref<25x32x64xbf16, #tpu.memory_space<vmem>>, vector<1x32x64xbf16>
    %48 = vector.shape_cast %47 : vector<1x32x64xbf16> to vector<32x64xbf16>
    %cst_29 = arith.constant dense<0.000000e+00> : vector<32x64xf32>
    %49 = tpu.matmul %46, %48, %cst_29 {dimension_numbers = #tpu.dot_dimension_numbers<[1], [0], [0], [1], [0, 0, 1, 1], [], []>} : vector<32x32xbf16>, vector<32x64xbf16>, vector<32x64xf32> -> vector<32x64xf32>
    %50 = arith.addf %45, %49 : vector<32x64xf32>
    %51 = vector.extract_strided_slice %9 {offsets = [256, 0], sizes = [32, 32], strides = [1, 1]} : vector<800x32xbf16> to vector<32x32xbf16>
    %c8 = arith.constant 8 : index
    %c0_30 = arith.constant 0 : index
    %c0_31 = arith.constant 0 : index
    %52 = vector.load %arg2[%c8, %c0_30, %c0_31] : memref<25x32x64xbf16, #tpu.memory_space<vmem>>, vector<1x32x64xbf16>
    %53 = vector.shape_cast %52 : vector<1x32x64xbf16> to vector<32x64xbf16>
    %cst_32 = arith.constant dense<0.000000e+00> : vector<32x64xf32>
    %54 = tpu.matmul %51, %53, %cst_32 {dimension_numbers = #tpu.dot_dimension_numbers<[1], [0], [0], [1], [0, 0, 1, 1], [], []>} : vector<32x32xbf16>, vector<32x64xbf16>, vector<32x64xf32> -> vector<32x64xf32>
    %55 = arith.addf %50, %54 : vector<32x64xf32>
    %56 = vector.extract_strided_slice %9 {offsets = [288, 0], sizes = [32, 32], strides = [1, 1]} : vector<800x32xbf16> to vector<32x32xbf16>
    %c9 = arith.constant 9 : index
    %c0_33 = arith.constant 0 : index
    %c0_34 = arith.constant 0 : index
    %57 = vector.load %arg2[%c9, %c0_33, %c0_34] : memref<25x32x64xbf16, #tpu.memory_space<vmem>>, vector<1x32x64xbf16>
    %58 = vector.shape_cast %57 : vector<1x32x64xbf16> to vector<32x64xbf16>
    %cst_35 = arith.constant dense<0.000000e+00> : vector<32x64xf32>
    %59 = tpu.matmul %56, %58, %cst_35 {dimension_numbers = #tpu.dot_dimension_numbers<[1], [0], [0], [1], [0, 0, 1, 1], [], []>} : vector<32x32xbf16>, vector<32x64xbf16>, vector<32x64xf32> -> vector<32x64xf32>
    %60 = arith.addf %55, %59 : vector<32x64xf32>
    %61 = vector.extract_strided_slice %9 {offsets = [320, 0], sizes = [32, 32], strides = [1, 1]} : vector<800x32xbf16> to vector<32x32xbf16>
    %c10 = arith.constant 10 : index
    %c0_36 = arith.constant 0 : index
    %c0_37 = arith.constant 0 : index
    %62 = vector.load %arg2[%c10, %c0_36, %c0_37] : memref<25x32x64xbf16, #tpu.memory_space<vmem>>, vector<1x32x64xbf16>
    %63 = vector.shape_cast %62 : vector<1x32x64xbf16> to vector<32x64xbf16>
    %cst_38 = arith.constant dense<0.000000e+00> : vector<32x64xf32>
    %64 = tpu.matmul %61, %63, %cst_38 {dimension_numbers = #tpu.dot_dimension_numbers<[1], [0], [0], [1], [0, 0, 1, 1], [], []>} : vector<32x32xbf16>, vector<32x64xbf16>, vector<32x64xf32> -> vector<32x64xf32>
    %65 = arith.addf %60, %64 : vector<32x64xf32>
    %66 = vector.extract_strided_slice %9 {offsets = [352, 0], sizes = [32, 32], strides = [1, 1]} : vector<800x32xbf16> to vector<32x32xbf16>
    %c11 = arith.constant 11 : index
    %c0_39 = arith.constant 0 : index
    %c0_40 = arith.constant 0 : index
    %67 = vector.load %arg2[%c11, %c0_39, %c0_40] : memref<25x32x64xbf16, #tpu.memory_space<vmem>>, vector<1x32x64xbf16>
    %68 = vector.shape_cast %67 : vector<1x32x64xbf16> to vector<32x64xbf16>
    %cst_41 = arith.constant dense<0.000000e+00> : vector<32x64xf32>
    %69 = tpu.matmul %66, %68, %cst_41 {dimension_numbers = #tpu.dot_dimension_numbers<[1], [0], [0], [1], [0, 0, 1, 1], [], []>} : vector<32x32xbf16>, vector<32x64xbf16>, vector<32x64xf32> -> vector<32x64xf32>
    %70 = arith.addf %65, %69 : vector<32x64xf32>
    %71 = vector.extract_strided_slice %9 {offsets = [384, 0], sizes = [32, 32], strides = [1, 1]} : vector<800x32xbf16> to vector<32x32xbf16>
    %c12 = arith.constant 12 : index
    %c0_42 = arith.constant 0 : index
    %c0_43 = arith.constant 0 : index
    %72 = vector.load %arg2[%c12, %c0_42, %c0_43] : memref<25x32x64xbf16, #tpu.memory_space<vmem>>, vector<1x32x64xbf16>
    %73 = vector.shape_cast %72 : vector<1x32x64xbf16> to vector<32x64xbf16>
    %cst_44 = arith.constant dense<0.000000e+00> : vector<32x64xf32>
    %74 = tpu.matmul %71, %73, %cst_44 {dimension_numbers = #tpu.dot_dimension_numbers<[1], [0], [0], [1], [0, 0, 1, 1], [], []>} : vector<32x32xbf16>, vector<32x64xbf16>, vector<32x64xf32> -> vector<32x64xf32>
    %75 = arith.addf %70, %74 : vector<32x64xf32>
    %76 = vector.extract_strided_slice %9 {offsets = [416, 0], sizes = [32, 32], strides = [1, 1]} : vector<800x32xbf16> to vector<32x32xbf16>
    %c13 = arith.constant 13 : index
    %c0_45 = arith.constant 0 : index
    %c0_46 = arith.constant 0 : index
    %77 = vector.load %arg2[%c13, %c0_45, %c0_46] : memref<25x32x64xbf16, #tpu.memory_space<vmem>>, vector<1x32x64xbf16>
    %78 = vector.shape_cast %77 : vector<1x32x64xbf16> to vector<32x64xbf16>
    %cst_47 = arith.constant dense<0.000000e+00> : vector<32x64xf32>
    %79 = tpu.matmul %76, %78, %cst_47 {dimension_numbers = #tpu.dot_dimension_numbers<[1], [0], [0], [1], [0, 0, 1, 1], [], []>} : vector<32x32xbf16>, vector<32x64xbf16>, vector<32x64xf32> -> vector<32x64xf32>
    %80 = arith.addf %75, %79 : vector<32x64xf32>
    %81 = vector.extract_strided_slice %9 {offsets = [448, 0], sizes = [32, 32], strides = [1, 1]} : vector<800x32xbf16> to vector<32x32xbf16>
    %c14 = arith.constant 14 : index
    %c0_48 = arith.constant 0 : index
    %c0_49 = arith.constant 0 : index
    %82 = vector.load %arg2[%c14, %c0_48, %c0_49] : memref<25x32x64xbf16, #tpu.memory_space<vmem>>, vector<1x32x64xbf16>
    %83 = vector.shape_cast %82 : vector<1x32x64xbf16> to vector<32x64xbf16>
    %cst_50 = arith.constant dense<0.000000e+00> : vector<32x64xf32>
    %84 = tpu.matmul %81, %83, %cst_50 {dimension_numbers = #tpu.dot_dimension_numbers<[1], [0], [0], [1], [0, 0, 1, 1], [], []>} : vector<32x32xbf16>, vector<32x64xbf16>, vector<32x64xf32> -> vector<32x64xf32>
    %85 = arith.addf %80, %84 : vector<32x64xf32>
    %86 = vector.extract_strided_slice %9 {offsets = [480, 0], sizes = [32, 32], strides = [1, 1]} : vector<800x32xbf16> to vector<32x32xbf16>
    %c15 = arith.constant 15 : index
    %c0_51 = arith.constant 0 : index
    %c0_52 = arith.constant 0 : index
    %87 = vector.load %arg2[%c15, %c0_51, %c0_52] : memref<25x32x64xbf16, #tpu.memory_space<vmem>>, vector<1x32x64xbf16>
    %88 = vector.shape_cast %87 : vector<1x32x64xbf16> to vector<32x64xbf16>
    %cst_53 = arith.constant dense<0.000000e+00> : vector<32x64xf32>
    %89 = tpu.matmul %86, %88, %cst_53 {dimension_numbers = #tpu.dot_dimension_numbers<[1], [0], [0], [1], [0, 0, 1, 1], [], []>} : vector<32x32xbf16>, vector<32x64xbf16>, vector<32x64xf32> -> vector<32x64xf32>
    %90 = arith.addf %85, %89 : vector<32x64xf32>
    %91 = vector.extract_strided_slice %9 {offsets = [512, 0], sizes = [32, 32], strides = [1, 1]} : vector<800x32xbf16> to vector<32x32xbf16>
    %c16 = arith.constant 16 : index
    %c0_54 = arith.constant 0 : index
    %c0_55 = arith.constant 0 : index
    %92 = vector.load %arg2[%c16, %c0_54, %c0_55] : memref<25x32x64xbf16, #tpu.memory_space<vmem>>, vector<1x32x64xbf16>
    %93 = vector.shape_cast %92 : vector<1x32x64xbf16> to vector<32x64xbf16>
    %cst_56 = arith.constant dense<0.000000e+00> : vector<32x64xf32>
    %94 = tpu.matmul %91, %93, %cst_56 {dimension_numbers = #tpu.dot_dimension_numbers<[1], [0], [0], [1], [0, 0, 1, 1], [], []>} : vector<32x32xbf16>, vector<32x64xbf16>, vector<32x64xf32> -> vector<32x64xf32>
    %95 = arith.addf %90, %94 : vector<32x64xf32>
    %96 = vector.extract_strided_slice %9 {offsets = [544, 0], sizes = [32, 32], strides = [1, 1]} : vector<800x32xbf16> to vector<32x32xbf16>
    %c17 = arith.constant 17 : index
    %c0_57 = arith.constant 0 : index
    %c0_58 = arith.constant 0 : index
    %97 = vector.load %arg2[%c17, %c0_57, %c0_58] : memref<25x32x64xbf16, #tpu.memory_space<vmem>>, vector<1x32x64xbf16>
    %98 = vector.shape_cast %97 : vector<1x32x64xbf16> to vector<32x64xbf16>
    %cst_59 = arith.constant dense<0.000000e+00> : vector<32x64xf32>
    %99 = tpu.matmul %96, %98, %cst_59 {dimension_numbers = #tpu.dot_dimension_numbers<[1], [0], [0], [1], [0, 0, 1, 1], [], []>} : vector<32x32xbf16>, vector<32x64xbf16>, vector<32x64xf32> -> vector<32x64xf32>
    %100 = arith.addf %95, %99 : vector<32x64xf32>
    %101 = vector.extract_strided_slice %9 {offsets = [576, 0], sizes = [32, 32], strides = [1, 1]} : vector<800x32xbf16> to vector<32x32xbf16>
    %c18 = arith.constant 18 : index
    %c0_60 = arith.constant 0 : index
    %c0_61 = arith.constant 0 : index
    %102 = vector.load %arg2[%c18, %c0_60, %c0_61] : memref<25x32x64xbf16, #tpu.memory_space<vmem>>, vector<1x32x64xbf16>
    %103 = vector.shape_cast %102 : vector<1x32x64xbf16> to vector<32x64xbf16>
    %cst_62 = arith.constant dense<0.000000e+00> : vector<32x64xf32>
    %104 = tpu.matmul %101, %103, %cst_62 {dimension_numbers = #tpu.dot_dimension_numbers<[1], [0], [0], [1], [0, 0, 1, 1], [], []>} : vector<32x32xbf16>, vector<32x64xbf16>, vector<32x64xf32> -> vector<32x64xf32>
    %105 = arith.addf %100, %104 : vector<32x64xf32>
    %106 = vector.extract_strided_slice %9 {offsets = [608, 0], sizes = [32, 32], strides = [1, 1]} : vector<800x32xbf16> to vector<32x32xbf16>
    %c19 = arith.constant 19 : index
    %c0_63 = arith.constant 0 : index
    %c0_64 = arith.constant 0 : index
    %107 = vector.load %arg2[%c19, %c0_63, %c0_64] : memref<25x32x64xbf16, #tpu.memory_space<vmem>>, vector<1x32x64xbf16>
    %108 = vector.shape_cast %107 : vector<1x32x64xbf16> to vector<32x64xbf16>
    %cst_65 = arith.constant dense<0.000000e+00> : vector<32x64xf32>
    %109 = tpu.matmul %106, %108, %cst_65 {dimension_numbers = #tpu.dot_dimension_numbers<[1], [0], [0], [1], [0, 0, 1, 1], [], []>} : vector<32x32xbf16>, vector<32x64xbf16>, vector<32x64xf32> -> vector<32x64xf32>
    %110 = arith.addf %105, %109 : vector<32x64xf32>
    %111 = vector.extract_strided_slice %9 {offsets = [640, 0], sizes = [32, 32], strides = [1, 1]} : vector<800x32xbf16> to vector<32x32xbf16>
    %c20 = arith.constant 20 : index
    %c0_66 = arith.constant 0 : index
    %c0_67 = arith.constant 0 : index
    %112 = vector.load %arg2[%c20, %c0_66, %c0_67] : memref<25x32x64xbf16, #tpu.memory_space<vmem>>, vector<1x32x64xbf16>
    %113 = vector.shape_cast %112 : vector<1x32x64xbf16> to vector<32x64xbf16>
    %cst_68 = arith.constant dense<0.000000e+00> : vector<32x64xf32>
    %114 = tpu.matmul %111, %113, %cst_68 {dimension_numbers = #tpu.dot_dimension_numbers<[1], [0], [0], [1], [0, 0, 1, 1], [], []>} : vector<32x32xbf16>, vector<32x64xbf16>, vector<32x64xf32> -> vector<32x64xf32>
    %115 = arith.addf %110, %114 : vector<32x64xf32>
    %116 = vector.extract_strided_slice %9 {offsets = [672, 0], sizes = [32, 32], strides = [1, 1]} : vector<800x32xbf16> to vector<32x32xbf16>
    %c21 = arith.constant 21 : index
    %c0_69 = arith.constant 0 : index
    %c0_70 = arith.constant 0 : index
    %117 = vector.load %arg2[%c21, %c0_69, %c0_70] : memref<25x32x64xbf16, #tpu.memory_space<vmem>>, vector<1x32x64xbf16>
    %118 = vector.shape_cast %117 : vector<1x32x64xbf16> to vector<32x64xbf16>
    %cst_71 = arith.constant dense<0.000000e+00> : vector<32x64xf32>
    %119 = tpu.matmul %116, %118, %cst_71 {dimension_numbers = #tpu.dot_dimension_numbers<[1], [0], [0], [1], [0, 0, 1, 1], [], []>} : vector<32x32xbf16>, vector<32x64xbf16>, vector<32x64xf32> -> vector<32x64xf32>
    %120 = arith.addf %115, %119 : vector<32x64xf32>
    %121 = vector.extract_strided_slice %9 {offsets = [704, 0], sizes = [32, 32], strides = [1, 1]} : vector<800x32xbf16> to vector<32x32xbf16>
    %c22 = arith.constant 22 : index
    %c0_72 = arith.constant 0 : index
    %c0_73 = arith.constant 0 : index
    %122 = vector.load %arg2[%c22, %c0_72, %c0_73] : memref<25x32x64xbf16, #tpu.memory_space<vmem>>, vector<1x32x64xbf16>
    %123 = vector.shape_cast %122 : vector<1x32x64xbf16> to vector<32x64xbf16>
    %cst_74 = arith.constant dense<0.000000e+00> : vector<32x64xf32>
    %124 = tpu.matmul %121, %123, %cst_74 {dimension_numbers = #tpu.dot_dimension_numbers<[1], [0], [0], [1], [0, 0, 1, 1], [], []>} : vector<32x32xbf16>, vector<32x64xbf16>, vector<32x64xf32> -> vector<32x64xf32>
    %125 = arith.addf %120, %124 : vector<32x64xf32>
    %126 = vector.extract_strided_slice %9 {offsets = [736, 0], sizes = [32, 32], strides = [1, 1]} : vector<800x32xbf16> to vector<32x32xbf16>
    %c23 = arith.constant 23 : index
    %c0_75 = arith.constant 0 : index
    %c0_76 = arith.constant 0 : index
    %127 = vector.load %arg2[%c23, %c0_75, %c0_76] : memref<25x32x64xbf16, #tpu.memory_space<vmem>>, vector<1x32x64xbf16>
    %128 = vector.shape_cast %127 : vector<1x32x64xbf16> to vector<32x64xbf16>
    %cst_77 = arith.constant dense<0.000000e+00> : vector<32x64xf32>
    %129 = tpu.matmul %126, %128, %cst_77 {dimension_numbers = #tpu.dot_dimension_numbers<[1], [0], [0], [1], [0, 0, 1, 1], [], []>} : vector<32x32xbf16>, vector<32x64xbf16>, vector<32x64xf32> -> vector<32x64xf32>
    %130 = arith.addf %125, %129 : vector<32x64xf32>
    %131 = vector.extract_strided_slice %9 {offsets = [768, 0], sizes = [32, 32], strides = [1, 1]} : vector<800x32xbf16> to vector<32x32xbf16>
    %c24 = arith.constant 24 : index
    %c0_78 = arith.constant 0 : index
    %c0_79 = arith.constant 0 : index
    %132 = vector.load %arg2[%c24, %c0_78, %c0_79] : memref<25x32x64xbf16, #tpu.memory_space<vmem>>, vector<1x32x64xbf16>
    %133 = vector.shape_cast %132 : vector<1x32x64xbf16> to vector<32x64xbf16>
    %cst_80 = arith.constant dense<0.000000e+00> : vector<32x64xf32>
    %134 = tpu.matmul %131, %133, %cst_80 {dimension_numbers = #tpu.dot_dimension_numbers<[1], [0], [0], [1], [0, 0, 1, 1], [], []>} : vector<32x32xbf16>, vector<32x64xbf16>, vector<32x64xf32> -> vector<32x64xf32>
    %135 = arith.addf %130, %134 : vector<32x64xf32>
    %c0_81 = arith.constant 0 : index
    %c0_82 = arith.constant 0 : index
    %136 = vector.load %arg3[%c0_81, %c0_82] : memref<1x64xf32, #tpu.memory_space<vmem>>, vector<1x64xf32>
    %137 = vector.broadcast %136 : vector<1x64xf32> to vector<32x64xf32>
    %138 = arith.addf %135, %137 : vector<32x64xf32>
    %139 = vector.extract_strided_slice %138 {offsets = [0, 0], sizes = [8, 64], strides = [1, 1]} : vector<32x64xf32> to vector<8x64xf32>
    %140 = vector.extract_strided_slice %138 {offsets = [8, 0], sizes = [8, 64], strides = [1, 1]} : vector<32x64xf32> to vector<8x64xf32>
    %141 = tpu.concatenate %139, %140 in 1 : vector<8x64xf32>, vector<8x64xf32> -> vector<8x128xf32>
    %142 = vector.shape_cast %141 : vector<8x128xf32> to vector<1x8x128xf32>
    %143 = vector.extract_strided_slice %138 {offsets = [16, 0], sizes = [8, 64], strides = [1, 1]} : vector<32x64xf32> to vector<8x64xf32>
    %144 = vector.extract_strided_slice %138 {offsets = [24, 0], sizes = [8, 64], strides = [1, 1]} : vector<32x64xf32> to vector<8x64xf32>
    %145 = tpu.concatenate %143, %144 in 1 : vector<8x64xf32>, vector<8x64xf32> -> vector<8x128xf32>
    %146 = vector.shape_cast %145 : vector<8x128xf32> to vector<1x8x128xf32>
    %147 = tpu.concatenate %142, %146 in 0 : vector<1x8x128xf32>, vector<1x8x128xf32> -> vector<2x8x128xf32>
    %148 = arith.mulf %147, %147 : vector<2x8x128xf32>
    %cst_83 = arith.constant dense<0.000000e+00> : vector<2x128xf32>
    %149 = vector.multi_reduction <add>, %148, %cst_83 [1] : vector<2x8x128xf32> to vector<2x128xf32>
    %150 = vector.shape_cast %149 : vector<2x128xf32> to vector<2x1x128xf32>
    %151 = math.sqrt %150 : vector<2x1x128xf32>
    %cst_84 = arith.constant 1.000000e+00 : f32
    %152 = vector.broadcast %cst_84 : f32 to vector<2x1x128xf32>
    %153 = arith.addf %152, %150 : vector<2x1x128xf32>
    %154 = arith.divf %151, %153 : vector<2x1x128xf32>
    %155 = vector.broadcast %154 : vector<2x1x128xf32> to vector<2x8x128xf32>
    %156 = arith.mulf %147, %155 : vector<2x8x128xf32>
    %c0_i32_85 = arith.constant 0 : i32
    %157 = tpu.memref_slice %arg14[%c0_i32_85] : memref<2x!tpu.dma_semaphore, #tpu.memory_space<semaphore_mem>> -> memref<1x!tpu.dma_semaphore, #tpu.memory_space<semaphore_mem>>
    %158 = tpu.memref_squeeze %157 : memref<1x!tpu.dma_semaphore, #tpu.memory_space<semaphore_mem>> -> memref<!tpu.dma_semaphore, #tpu.memory_space<semaphore_mem>>
    tpu.wait_dma2 semaphore(%158 : memref<!tpu.dma_semaphore, #tpu.memory_space<semaphore_mem>>) src(%arg9 : memref<8x160x128xbf16, #tpu.memory_space<any>>) dst(%arg12 : memref<8x160x128xbf16, #tpu.memory_space<vmem>>)
    %159 = vector.extract_strided_slice %156 {offsets = [0, 0, 0], sizes = [2, 1, 128], strides = [1, 1, 1]} : vector<2x8x128xf32> to vector<2x1x128xf32>
    %c0_86 = arith.constant 0 : index
    %c0_87 = arith.constant 0 : index
    %c0_88 = arith.constant 0 : index
    %160 = vector.load %arg12[%c0_86, %c0_87, %c0_88] : memref<8x160x128xbf16, #tpu.memory_space<vmem>>, vector<1x160x128xbf16>
    %161 = vector.shape_cast %160 : vector<1x160x128xbf16> to vector<160x128xbf16>
    %162 = arith.extf %161 : vector<160x128xbf16> to vector<160x128xf32>
    %163 = vector.shape_cast %162 : vector<160x128xf32> to vector<1x160x128xf32>
    %164 = vector.broadcast %159 : vector<2x1x128xf32> to vector<2x160x128xf32>
    %165 = vector.broadcast %163 : vector<1x160x128xf32> to vector<2x160x128xf32>
    %166 = arith.mulf %164, %165 : vector<2x160x128xf32>
    %167 = vector.extract_strided_slice %156 {offsets = [0, 1, 0], sizes = [2, 1, 128], strides = [1, 1, 1]} : vector<2x8x128xf32> to vector<2x1x128xf32>
    %c1_89 = arith.constant 1 : index
    %c0_90 = arith.constant 0 : index
    %c0_91 = arith.constant 0 : index
    %168 = vector.load %arg12[%c1_89, %c0_90, %c0_91] : memref<8x160x128xbf16, #tpu.memory_space<vmem>>, vector<1x160x128xbf16>
    %169 = vector.shape_cast %168 : vector<1x160x128xbf16> to vector<160x128xbf16>
    %170 = arith.extf %169 : vector<160x128xbf16> to vector<160x128xf32>
    %171 = vector.shape_cast %170 : vector<160x128xf32> to vector<1x160x128xf32>
    %172 = vector.broadcast %167 : vector<2x1x128xf32> to vector<2x160x128xf32>
    %173 = vector.broadcast %171 : vector<1x160x128xf32> to vector<2x160x128xf32>
    %174 = arith.mulf %172, %173 : vector<2x160x128xf32>
    %175 = arith.addf %166, %174 : vector<2x160x128xf32>
    %176 = vector.extract_strided_slice %156 {offsets = [0, 2, 0], sizes = [2, 1, 128], strides = [1, 1, 1]} : vector<2x8x128xf32> to vector<2x1x128xf32>
    %c2_92 = arith.constant 2 : index
    %c0_93 = arith.constant 0 : index
    %c0_94 = arith.constant 0 : index
    %177 = vector.load %arg12[%c2_92, %c0_93, %c0_94] : memref<8x160x128xbf16, #tpu.memory_space<vmem>>, vector<1x160x128xbf16>
    %178 = vector.shape_cast %177 : vector<1x160x128xbf16> to vector<160x128xbf16>
    %179 = arith.extf %178 : vector<160x128xbf16> to vector<160x128xf32>
    %180 = vector.shape_cast %179 : vector<160x128xf32> to vector<1x160x128xf32>
    %181 = vector.broadcast %176 : vector<2x1x128xf32> to vector<2x160x128xf32>
    %182 = vector.broadcast %180 : vector<1x160x128xf32> to vector<2x160x128xf32>
    %183 = arith.mulf %181, %182 : vector<2x160x128xf32>
    %184 = arith.addf %175, %183 : vector<2x160x128xf32>
    %185 = vector.extract_strided_slice %156 {offsets = [0, 3, 0], sizes = [2, 1, 128], strides = [1, 1, 1]} : vector<2x8x128xf32> to vector<2x1x128xf32>
    %c3_95 = arith.constant 3 : index
    %c0_96 = arith.constant 0 : index
    %c0_97 = arith.constant 0 : index
    %186 = vector.load %arg12[%c3_95, %c0_96, %c0_97] : memref<8x160x128xbf16, #tpu.memory_space<vmem>>, vector<1x160x128xbf16>
    %187 = vector.shape_cast %186 : vector<1x160x128xbf16> to vector<160x128xbf16>
    %188 = arith.extf %187 : vector<160x128xbf16> to vector<160x128xf32>
    %189 = vector.shape_cast %188 : vector<160x128xf32> to vector<1x160x128xf32>
    %190 = vector.broadcast %185 : vector<2x1x128xf32> to vector<2x160x128xf32>
    %191 = vector.broadcast %189 : vector<1x160x128xf32> to vector<2x160x128xf32>
    %192 = arith.mulf %190, %191 : vector<2x160x128xf32>
    %193 = arith.addf %184, %192 : vector<2x160x128xf32>
    %194 = vector.extract_strided_slice %156 {offsets = [0, 4, 0], sizes = [2, 1, 128], strides = [1, 1, 1]} : vector<2x8x128xf32> to vector<2x1x128xf32>
    %c4_98 = arith.constant 4 : index
    %c0_99 = arith.constant 0 : index
    %c0_100 = arith.constant 0 : index
    %195 = vector.load %arg12[%c4_98, %c0_99, %c0_100] : memref<8x160x128xbf16, #tpu.memory_space<vmem>>, vector<1x160x128xbf16>
    %196 = vector.shape_cast %195 : vector<1x160x128xbf16> to vector<160x128xbf16>
    %197 = arith.extf %196 : vector<160x128xbf16> to vector<160x128xf32>
    %198 = vector.shape_cast %197 : vector<160x128xf32> to vector<1x160x128xf32>
    %199 = vector.broadcast %194 : vector<2x1x128xf32> to vector<2x160x128xf32>
    %200 = vector.broadcast %198 : vector<1x160x128xf32> to vector<2x160x128xf32>
    %201 = arith.mulf %199, %200 : vector<2x160x128xf32>
    %202 = arith.addf %193, %201 : vector<2x160x128xf32>
    %203 = vector.extract_strided_slice %156 {offsets = [0, 5, 0], sizes = [2, 1, 128], strides = [1, 1, 1]} : vector<2x8x128xf32> to vector<2x1x128xf32>
    %c5_101 = arith.constant 5 : index
    %c0_102 = arith.constant 0 : index
    %c0_103 = arith.constant 0 : index
    %204 = vector.load %arg12[%c5_101, %c0_102, %c0_103] : memref<8x160x128xbf16, #tpu.memory_space<vmem>>, vector<1x160x128xbf16>
    %205 = vector.shape_cast %204 : vector<1x160x128xbf16> to vector<160x128xbf16>
    %206 = arith.extf %205 : vector<160x128xbf16> to vector<160x128xf32>
    %207 = vector.shape_cast %206 : vector<160x128xf32> to vector<1x160x128xf32>
    %208 = vector.broadcast %203 : vector<2x1x128xf32> to vector<2x160x128xf32>
    %209 = vector.broadcast %207 : vector<1x160x128xf32> to vector<2x160x128xf32>
    %210 = arith.mulf %208, %209 : vector<2x160x128xf32>
    %211 = arith.addf %202, %210 : vector<2x160x128xf32>
    %212 = vector.extract_strided_slice %156 {offsets = [0, 6, 0], sizes = [2, 1, 128], strides = [1, 1, 1]} : vector<2x8x128xf32> to vector<2x1x128xf32>
    %c6_104 = arith.constant 6 : index
    %c0_105 = arith.constant 0 : index
    %c0_106 = arith.constant 0 : index
    %213 = vector.load %arg12[%c6_104, %c0_105, %c0_106] : memref<8x160x128xbf16, #tpu.memory_space<vmem>>, vector<1x160x128xbf16>
    %214 = vector.shape_cast %213 : vector<1x160x128xbf16> to vector<160x128xbf16>
    %215 = arith.extf %214 : vector<160x128xbf16> to vector<160x128xf32>
    %216 = vector.shape_cast %215 : vector<160x128xf32> to vector<1x160x128xf32>
    %217 = vector.broadcast %212 : vector<2x1x128xf32> to vector<2x160x128xf32>
    %218 = vector.broadcast %216 : vector<1x160x128xf32> to vector<2x160x128xf32>
    %219 = arith.mulf %217, %218 : vector<2x160x128xf32>
    %220 = arith.addf %211, %219 : vector<2x160x128xf32>
    %221 = vector.extract_strided_slice %156 {offsets = [0, 7, 0], sizes = [2, 1, 128], strides = [1, 1, 1]} : vector<2x8x128xf32> to vector<2x1x128xf32>
    %c7_107 = arith.constant 7 : index
    %c0_108 = arith.constant 0 : index
    %c0_109 = arith.constant 0 : index
    %222 = vector.load %arg12[%c7_107, %c0_108, %c0_109] : memref<8x160x128xbf16, #tpu.memory_space<vmem>>, vector<1x160x128xbf16>
    %223 = vector.shape_cast %222 : vector<1x160x128xbf16> to vector<160x128xbf16>
    %224 = arith.extf %223 : vector<160x128xbf16> to vector<160x128xf32>
    %225 = vector.shape_cast %224 : vector<160x128xf32> to vector<1x160x128xf32>
    %226 = vector.broadcast %221 : vector<2x1x128xf32> to vector<2x160x128xf32>
    %227 = vector.broadcast %225 : vector<1x160x128xf32> to vector<2x160x128xf32>
    %228 = arith.mulf %226, %227 : vector<2x160x128xf32>
    %229 = arith.addf %220, %228 : vector<2x160x128xf32>
    %c0_110 = arith.constant 0 : index
    %c0_111 = arith.constant 0 : index
    %230 = vector.load %arg4[%c0_110, %c0_111] : memref<160x16xf32, #tpu.memory_space<vmem>>, vector<160x16xf32>
    %c0_112 = arith.constant 0 : index
    %c0_113 = arith.constant 0 : index
    %231 = vector.load %arg5[%c0_112, %c0_113] : memref<16x160xf32, #tpu.memory_space<vmem>>, vector<16x160xf32>
    %cst_114 = arith.constant 0.000000e+00 : f32
    %232 = vector.broadcast %cst_114 : f32 to vector<16x128xf32>
    %cst_115 = arith.constant dense<0xFF800000> : vector<16xf32>
    %233 = vector.multi_reduction <maximumf>, %232, %cst_115 [1] : vector<16x128xf32> to vector<16xf32>
    %234 = vector.shape_cast %233 : vector<16xf32> to vector<16x1xf32>
    %235 = vector.broadcast %234 : vector<16x1xf32> to vector<16x128xf32>
    %236 = arith.subf %232, %235 : vector<16x128xf32>
    %237 = math.exp %236 : vector<16x128xf32>
    %cst_116 = arith.constant dense<0.000000e+00> : vector<16xf32>
    %238 = vector.multi_reduction <add>, %237, %cst_116 [1] : vector<16x128xf32> to vector<16xf32>
    %239 = vector.shape_cast %238 : vector<16xf32> to vector<16x1xf32>
    %240 = vector.broadcast %239 : vector<16x1xf32> to vector<16x128xf32>
    %241 = arith.divf %237, %240 : vector<16x128xf32>
    %cst_117 = arith.constant dense<0.000000e+00> : vector<160x128xf32>
    %242 = tpu.matmul %230, %241, %cst_117 {dimension_numbers = #tpu.dot_dimension_numbers<[1], [0], [0], [1], [0, 0, 1, 1], [], []>} : vector<160x16xf32>, vector<16x128xf32>, vector<160x128xf32> -> vector<160x128xf32>
    %243 = vector.shape_cast %242 : vector<160x128xf32> to vector<1x160x128xf32>
    %244 = vector.broadcast %243 : vector<1x160x128xf32> to vector<2x160x128xf32>
    %245 = arith.mulf %244, %229 : vector<2x160x128xf32>
    %cst_118 = arith.constant dense<0.000000e+00> : vector<2x160xf32>
    %246 = vector.multi_reduction <add>, %245, %cst_118 [2] : vector<2x160x128xf32> to vector<2x160xf32>
    %247 = vector.shape_cast %246 : vector<2x160xf32> to vector<2x160x1xf32>
    %248 = math.absf %247 : vector<2x160x1xf32>
    %249 = arith.mulf %247, %248 : vector<2x160x1xf32>
    %250 = arith.mulf %247, %247 : vector<2x160x1xf32>
    %cst_119 = arith.constant 1.000000e+00 : f32
    %251 = vector.broadcast %cst_119 : f32 to vector<2x160x1xf32>
    %252 = arith.addf %251, %250 : vector<2x160x1xf32>
    %253 = arith.divf %249, %252 : vector<2x160x1xf32>
    %254 = vector.broadcast %253 : vector<2x160x1xf32> to vector<2x160x128xf32>
    %255 = arith.mulf %229, %254 : vector<2x160x128xf32>
    %cst_120 = arith.constant dense<0.000000e+00> : vector<160x128xf32>
    %256 = vector.multi_reduction <add>, %255, %cst_120 [0] : vector<2x160x128xf32> to vector<160x128xf32>
    %cst_121 = arith.constant 2.000000e+00 : f32
    %257 = vector.broadcast %cst_121 : f32 to vector<160x128xf32>
    %258 = arith.divf %256, %257 : vector<160x128xf32>
    %cst_122 = arith.constant dense<0.000000e+00> : vector<16x128xf32>
    %259 = tpu.matmul %231, %258, %cst_122 {dimension_numbers = #tpu.dot_dimension_numbers<[1], [0], [0], [1], [0, 0, 1, 1], [], []>} : vector<16x160xf32>, vector<160x128xf32>, vector<16x128xf32> -> vector<16x128xf32>
    %260 = arith.addf %232, %259 : vector<16x128xf32>
    %cst_123 = arith.constant dense<0xFF800000> : vector<16xf32>
    %261 = vector.multi_reduction <maximumf>, %260, %cst_123 [1] : vector<16x128xf32> to vector<16xf32>
    %262 = vector.shape_cast %261 : vector<16xf32> to vector<16x1xf32>
    %263 = vector.broadcast %262 : vector<16x1xf32> to vector<16x128xf32>
    %264 = arith.subf %260, %263 : vector<16x128xf32>
    %265 = math.exp %264 : vector<16x128xf32>
    %cst_124 = arith.constant dense<0.000000e+00> : vector<16xf32>
    %266 = vector.multi_reduction <add>, %265, %cst_124 [1] : vector<16x128xf32> to vector<16xf32>
    %267 = vector.shape_cast %266 : vector<16xf32> to vector<16x1xf32>
    %268 = vector.broadcast %267 : vector<16x1xf32> to vector<16x128xf32>
    %269 = arith.divf %265, %268 : vector<16x128xf32>
    %cst_125 = arith.constant dense<0.000000e+00> : vector<160x128xf32>
    %270 = tpu.matmul %230, %269, %cst_125 {dimension_numbers = #tpu.dot_dimension_numbers<[1], [0], [0], [1], [0, 0, 1, 1], [], []>} : vector<160x16xf32>, vector<16x128xf32>, vector<160x128xf32> -> vector<160x128xf32>
    %271 = vector.shape_cast %270 : vector<160x128xf32> to vector<1x160x128xf32>
    %272 = vector.broadcast %271 : vector<1x160x128xf32> to vector<2x160x128xf32>
    %273 = arith.mulf %272, %229 : vector<2x160x128xf32>
    %cst_126 = arith.constant dense<0.000000e+00> : vector<2x160xf32>
    %274 = vector.multi_reduction <add>, %273, %cst_126 [2] : vector<2x160x128xf32> to vector<2x160xf32>
    %275 = vector.shape_cast %274 : vector<2x160xf32> to vector<2x160x1xf32>
    %276 = math.absf %275 : vector<2x160x1xf32>
    %277 = arith.mulf %275, %276 : vector<2x160x1xf32>
    %278 = arith.mulf %275, %275 : vector<2x160x1xf32>
    %cst_127 = arith.constant 1.000000e+00 : f32
    %279 = vector.broadcast %cst_127 : f32 to vector<2x160x1xf32>
    %280 = arith.addf %279, %278 : vector<2x160x1xf32>
    %281 = arith.divf %277, %280 : vector<2x160x1xf32>
    %282 = vector.broadcast %281 : vector<2x160x1xf32> to vector<2x160x128xf32>
    %283 = arith.mulf %229, %282 : vector<2x160x128xf32>
    %cst_128 = arith.constant dense<0.000000e+00> : vector<160x128xf32>
    %284 = vector.multi_reduction <add>, %283, %cst_128 [0] : vector<2x160x128xf32> to vector<160x128xf32>
    %cst_129 = arith.constant 2.000000e+00 : f32
    %285 = vector.broadcast %cst_129 : f32 to vector<160x128xf32>
    %286 = arith.divf %284, %285 : vector<160x128xf32>
    %cst_130 = arith.constant dense<0.000000e+00> : vector<16x128xf32>
    %287 = tpu.matmul %231, %286, %cst_130 {dimension_numbers = #tpu.dot_dimension_numbers<[1], [0], [0], [1], [0, 0, 1, 1], [], []>} : vector<16x160xf32>, vector<160x128xf32>, vector<16x128xf32> -> vector<16x128xf32>
    %288 = arith.addf %260, %287 : vector<16x128xf32>
    %cst_131 = arith.constant dense<0xFF800000> : vector<16xf32>
    %289 = vector.multi_reduction <maximumf>, %288, %cst_131 [1] : vector<16x128xf32> to vector<16xf32>
    %290 = vector.shape_cast %289 : vector<16xf32> to vector<16x1xf32>
    %291 = vector.broadcast %290 : vector<16x1xf32> to vector<16x128xf32>
    %292 = arith.subf %288, %291 : vector<16x128xf32>
    %293 = math.exp %292 : vector<16x128xf32>
    %cst_132 = arith.constant dense<0.000000e+00> : vector<16xf32>
    %294 = vector.multi_reduction <add>, %293, %cst_132 [1] : vector<16x128xf32> to vector<16xf32>
    %295 = vector.shape_cast %294 : vector<16xf32> to vector<16x1xf32>
    %296 = vector.broadcast %295 : vector<16x1xf32> to vector<16x128xf32>
    %297 = arith.divf %293, %296 : vector<16x128xf32>
    %cst_133 = arith.constant dense<0.000000e+00> : vector<160x128xf32>
    %298 = tpu.matmul %230, %297, %cst_133 {dimension_numbers = #tpu.dot_dimension_numbers<[1], [0], [0], [1], [0, 0, 1, 1], [], []>} : vector<160x16xf32>, vector<16x128xf32>, vector<160x128xf32> -> vector<160x128xf32>
    %299 = vector.shape_cast %298 : vector<160x128xf32> to vector<1x160x128xf32>
    %300 = vector.broadcast %299 : vector<1x160x128xf32> to vector<2x160x128xf32>
    %301 = arith.mulf %300, %229 : vector<2x160x128xf32>
    %cst_134 = arith.constant dense<0.000000e+00> : vector<2x160xf32>
    %302 = vector.multi_reduction <add>, %301, %cst_134 [2] : vector<2x160x128xf32> to vector<2x160xf32>
    %303 = math.absf %302 : vector<2x160xf32>
    %304 = arith.mulf %302, %303 : vector<2x160xf32>
    %305 = arith.mulf %302, %302 : vector<2x160xf32>
    %cst_135 = arith.constant 1.000000e+00 : f32
    %306 = vector.broadcast %cst_135 : f32 to vector<2x160xf32>
    %307 = arith.addf %306, %305 : vector<2x160xf32>
    %308 = arith.divf %304, %307 : vector<2x160xf32>
    %c1_i32_136 = arith.constant 1 : i32
    %309 = tpu.memref_slice %arg14[%c1_i32_136] : memref<2x!tpu.dma_semaphore, #tpu.memory_space<semaphore_mem>> -> memref<1x!tpu.dma_semaphore, #tpu.memory_space<semaphore_mem>>
    %310 = tpu.memref_squeeze %309 : memref<1x!tpu.dma_semaphore, #tpu.memory_space<semaphore_mem>> -> memref<!tpu.dma_semaphore, #tpu.memory_space<semaphore_mem>>
    tpu.wait_dma2 semaphore(%310 : memref<!tpu.dma_semaphore, #tpu.memory_space<semaphore_mem>>) src(%arg10 : memref<160x512xbf16, #tpu.memory_space<any>>) dst(%arg13 : memref<160x512xbf16, #tpu.memory_space<vmem>>)
    %311 = arith.truncf %308 : vector<2x160xf32> to vector<2x160xbf16>
    %c0_137 = arith.constant 0 : index
    %c0_138 = arith.constant 0 : index
    %312 = vector.load %arg13[%c0_137, %c0_138] : memref<160x512xbf16, #tpu.memory_space<vmem>>, vector<160x512xbf16>
    %cst_139 = arith.constant dense<0.000000e+00> : vector<2x512xf32>
    %313 = tpu.matmul %311, %312, %cst_139 {dimension_numbers = #tpu.dot_dimension_numbers<[1], [0], [0], [1], [0, 0, 1, 1], [], []>} : vector<2x160xbf16>, vector<160x512xbf16>, vector<2x512xf32> -> vector<2x512xf32>
    %c0_140 = arith.constant 0 : index
    %c0_141 = arith.constant 0 : index
    %314 = vector.load %arg6[%c0_140, %c0_141] : memref<1x512xf32, #tpu.memory_space<vmem>>, vector<1x512xf32>
    %315 = vector.broadcast %314 : vector<1x512xf32> to vector<2x512xf32>
    %316 = arith.addf %313, %315 : vector<2x512xf32>
    %cst_142 = arith.constant 0.000000e+00 : f32
    %317 = vector.broadcast %cst_142 : f32 to vector<2x512xf32>
    %318 = arith.maximumf %316, %317 : vector<2x512xf32>
    %319 = arith.truncf %318 : vector<2x512xf32> to vector<2x512xbf16>
    %c0_143 = arith.constant 0 : index
    %c0_144 = arith.constant 0 : index
    %320 = vector.load %arg7[%c0_143, %c0_144] : memref<512x9xbf16, #tpu.memory_space<vmem>>, vector<512x9xbf16>
    %cst_145 = arith.constant dense<0.000000e+00> : vector<2x9xf32>
    %321 = tpu.matmul %319, %320, %cst_145 {dimension_numbers = #tpu.dot_dimension_numbers<[1], [0], [0], [1], [0, 0, 1, 1], [], []>} : vector<2x512xbf16>, vector<512x9xbf16>, vector<2x9xf32> -> vector<2x9xf32>
    %c0_146 = arith.constant 0 : index
    %c0_147 = arith.constant 0 : index
    %322 = vector.load %arg8[%c0_146, %c0_147] : memref<1x9xf32, #tpu.memory_space<vmem>>, vector<1x9xf32>
    %323 = vector.broadcast %322 : vector<1x9xf32> to vector<2x9xf32>
    %324 = arith.addf %321, %323 : vector<2x9xf32>
    %cst_148 = arith.constant 0.000000e+00 : f32
    %325 = vector.broadcast %cst_148 : f32 to vector<2x9xf32>
    %326 = arith.subf %325, %324 : vector<2x9xf32>
    %327 = math.exp %326 : vector<2x9xf32>
    %cst_149 = arith.constant 1.000000e+00 : f32
    %328 = vector.broadcast %cst_149 : f32 to vector<2x9xf32>
    %329 = arith.addf %328, %327 : vector<2x9xf32>
    %cst_150 = arith.constant 1.000000e+00 : f32
    %330 = vector.broadcast %cst_150 : f32 to vector<2x9xf32>
    %331 = arith.divf %330, %329 : vector<2x9xf32>
    %c0_151 = arith.constant 0 : index
    %c0_152 = arith.constant 0 : index
    %332 = vector.load %arg11[%c0_151, %c0_152] : memref<2x9xf32, #tpu.memory_space<vmem>>, vector<2x9xf32>
    tpu.vector_store %arg11[%c0_151, %c0_152], %331 {strides = array<i32>} : memref<2x9xf32, #tpu.memory_space<vmem>>, vector<2x9xf32>,
    return
  }
}

</mosaic_0001>

<bundles_post_ra>
// kernel: capsnet_forward.1
= control target key start
LH: loop header
LB: loop body
LE: loop exit
PB: predicated region body
PF: predicated region fallthrough
CT: control target
= control target key end

     0   :  { %16 = vsyncpa [#allocation6], 0  ;;  %s16298_s0 = inlined_call_operand.vmem [shape: bf16[800,32], index: 0, kind: input, shape index: {}]   ;;  %s16299_s1 = inlined_call_operand.vmem [shape: bf16[32,32], index: 1, kind: input, shape index: {}]   ;;  %s16300_s2 = inlined_call_operand.vmem [shape: bf16[25,32,64], index: 2, kind: input, shape index: {}]   ;;  %s16301_s3 = inlined_call_operand.vmem [shape: f32[1,64], index: 3, kind: input, shape index: {}]   ;;  %s16302_s4 = inlined_call_operand.vmem [shape: f32[160,16], index: 4, kind: input, shape index: {}]   ;;  %s16303_s5 = inlined_call_operand.vmem [shape: f32[16,160], index: 5, kind: input, shape index: {}]   ;;  %s16304_s6 = inlined_call_operand.vmem [shape: f32[1,512], index: 6, kind: input, shape index: {}]   ;;  %s16305_s7 = inlined_call_operand.vmem [shape: bf16[512,9], index: 7, kind: input, shape index: {}]   ;;  %s16306_s8 = inlined_call_operand.vmem [shape: f32[1,9], index: 8, kind: input, shape index: {}]   ;;  %s16307_s9 = inlined_call_operand.vmem [shape: bf16[8,160,128], index: 9, kind: input, shape index: {}]   ;;  %s16308_s10 = inlined_call_operand.vmem [shape: bf16[160,512], index: 10, kind: input, shape index: {}]   ;;  %s16309_s11 = inlined_call_operand.hbm [shape: f32[2,9], index: 11, kind: output, shape index: {}]  }
   0x1   :  { %v9929_v0 = vld [vmem:[%s16307_s9] sm:$0xff]  ;;  %v9934_v1 = vld [vmem:[%s16307_s9 + $0x8] sm:$0xff]  ;;  %v9939_v2 = vld [vmem:[%s16307_s9 + $0x10] sm:$0xff] }
   0x2   :  { %16533 = vst [vmem:[#allocation12_spill] sm:$0xff] %v9929_v0  ;;  %v9944_v3 = vld [vmem:[%s16307_s9 + $0x18] sm:$0xff]  ;;  %v9949_v4 = vld [vmem:[%s16307_s9 + $0x20] sm:$0xff]  ;;  %v9954_v5 = vld [vmem:[%s16307_s9 + $0x28] sm:$0xff] }
   0x3   :  { %16534 = vst [vmem:[#allocation13_spill] sm:$0xff] %v9934_v1  ;;  %v9959_v6 = vld [vmem:[%s16307_s9 + $0x30] sm:$0xff]  ;;  %v9964_v7 = vld [vmem:[%s16307_s9 + $0x38] sm:$0xff]  ;;  %v9969_v8 = vld [vmem:[%s16307_s9 + $0x40] sm:$0xff] }
   0x4   :  { %16535 = vst [vmem:[#allocation14_spill] sm:$0xff] %v9939_v2  ;;  %v9974_v9 = vld [vmem:[%s16307_s9 + $0x48] sm:$0xff]  ;;  %v9979_v10 = vld [vmem:[%s16307_s9 + $0x50] sm:$0xff]  ;;  %v9984_v11 = vld [vmem:[%s16307_s9 + $0x58] sm:$0xff] }
   0x5   :  { %16536 = vst [vmem:[#allocation15_spill] sm:$0xff] %v9944_v3  ;;  %v9989_v12 = vld [vmem:[%s16307_s9 + $0x60] sm:$0xff]  ;;  %v9994_v13 = vld [vmem:[%s16307_s9 + $0x68] sm:$0xff]  ;;  %v9999_v14 = vld [vmem:[%s16307_s9 + $0x70] sm:$0xff] }
   0x6   :  { %16537 = vst [vmem:[#allocation16_spill] sm:$0xff] %v9949_v4  ;;  %v10004_v15 = vld [vmem:[%s16307_s9 + $0x78] sm:$0xff]  ;;  %v10009_v16 = vld [vmem:[%s16307_s9 + $0x80] sm:$0xff]  ;;  %v10014_v17 = vld [vmem:[%s16307_s9 + $0x88] sm:$0xff] }
   0x7   :  { %16538 = vst [vmem:[#allocation17_spill] sm:$0xff] %v9954_v5  ;;  %v10019_v18 = vld [vmem:[%s16307_s9 + $0x90] sm:$0xff]  ;;  %v10024_v19 = vld [vmem:[%s16307_s9 + $0x98] sm:$0xff]  ;;  %v10029_v20 = vld [vmem:[%s16307_s9 + $0xa0] sm:$0xff] }
   0x8   :  { %16539 = vst [vmem:[#allocation18_spill] sm:$0xff] %v9959_v6  ;;  %v10034_v21 = vld [vmem:[%s16307_s9 + $0xa8] sm:$0xff]  ;;  %v10039_v22 = vld [vmem:[%s16307_s9 + $0xb0] sm:$0xff]  ;;  %v10044_v23 = vld [vmem:[%s16307_s9 + $0xb8] sm:$0xff] }
   0x9   :  { %16540 = vst [vmem:[#allocation19_spill] sm:$0xff] %v9964_v7  ;;  %v10049_v24 = vld [vmem:[%s16307_s9 + $0xc0] sm:$0xff]  ;;  %v10054_v25 = vld [vmem:[%s16307_s9 + $0xc8] sm:$0xff]  ;;  %v10059_v26 = vld [vmem:[%s16307_s9 + $0xd0] sm:$0xff] }
   0xa   :  { %16541 = vst [vmem:[#allocation20_spill] sm:$0xff] %v9969_v8  ;;  %v10064_v27 = vld [vmem:[%s16307_s9 + $0xd8] sm:$0xff]  ;;  %v10069_v28 = vld [vmem:[%s16307_s9 + $0xe0] sm:$0xff]  ;;  %v10074_v29 = vld [vmem:[%s16307_s9 + $0xe8] sm:$0xff] }
   0xb   :  { %16542 = vst [vmem:[#allocation21_spill] sm:$0xff] %v9974_v9  ;;  %v10079_v30 = vld [vmem:[%s16307_s9 + $0xf0] sm:$0xff]  ;;  %v10084_v31 = vld [vmem:[%s16307_s9 + $0xf8] sm:$0xff]  ;;  %v10089_v32 = vld [vmem:[%s16307_s9 + $0x100] sm:$0xff] }
   0xc   :  { %16543 = vst [vmem:[#allocation22_spill] sm:$0xff] %v9979_v10  ;;  %v10094_v33 = vld [vmem:[%s16307_s9 + $0x108] sm:$0xff]  ;;  %v10099_v34 = vld [vmem:[%s16307_s9 + $0x110] sm:$0xff]  ;;  %v10104_v35 = vld [vmem:[%s16307_s9 + $0x118] sm:$0xff] }
   0xd   :  { %16544 = vst [vmem:[#allocation23_spill] sm:$0xff] %v9984_v11  ;;  %v10109_v36 = vld [vmem:[%s16307_s9 + $0x120] sm:$0xff]  ;;  %v10114_v37 = vld [vmem:[%s16307_s9 + $0x128] sm:$0xff]  ;;  %v10119_v38 = vld [vmem:[%s16307_s9 + $0x130] sm:$0xff] }
   0xe   :  { %16545 = vst [vmem:[#allocation24_spill] sm:$0xff] %v9989_v12  ;;  %v10124_v39 = vld [vmem:[%s16307_s9 + $0x138] sm:$0xff]  ;;  %v10129_v40 = vld [vmem:[%s16307_s9 + $0x140] sm:$0xff]  ;;  %v10134_v41 = vld [vmem:[%s16307_s9 + $0x148] sm:$0xff] }
   0xf   :  { %16546 = vst [vmem:[#allocation25_spill] sm:$0xff] %v9994_v13  ;;  %v10139_v42 = vld [vmem:[%s16307_s9 + $0x150] sm:$0xff]  ;;  %v10144_v43 = vld [vmem:[%s16307_s9 + $0x158] sm:$0xff]  ;;  %v10149_v44 = vld [vmem:[%s16307_s9 + $0x160] sm:$0xff] }
  0x10   :  { %16547 = vst [vmem:[#allocation26_spill] sm:$0xff] %v9999_v14  ;;  %v10154_v45 = vld [vmem:[%s16307_s9 + $0x168] sm:$0xff]  ;;  %v10159_v46 = vld [vmem:[%s16307_s9 + $0x170] sm:$0xff]  ;;  %v10164_v47 = vld [vmem:[%s16307_s9 + $0x178] sm:$0xff] }
  0x11   :  { %16548 = vst [vmem:[#allocation27_spill] sm:$0xff] %v10004_v15  ;;  %v10169_v48 = vld [vmem:[%s16307_s9 + $0x180] sm:$0xff]  ;;  %v10174_v49 = vld [vmem:[%s16307_s9 + $0x188] sm:$0xff]  ;;  %v10179_v50 = vld [vmem:[%s16307_s9 + $0x190] sm:$0xff] }
  0x12   :  { %16549 = vst [vmem:[#allocation28_spill] sm:$0xff] %v10009_v16  ;;  %v10184_v51 = vld [vmem:[%s16307_s9 + $0x198] sm:$0xff]  ;;  %v10189_v52 = vld [vmem:[%s16307_s9 + $0x1a0] sm:$0xff]  ;;  %v10194_v53 = vld [vmem:[%s16307_s9 + $0x1a8] sm:$0xff] }
  0x13   :  { %16550 = vst [vmem:[#allocation29_spill] sm:$0xff] %v10014_v17  ;;  %v10199_v54 = vld [vmem:[%s16307_s9 + $0x1b0] sm:$0xff]  ;;  %v10204_v55 = vld [vmem:[%s16307_s9 + $0x1b8] sm:$0xff]  ;;  %v10209_v56 = vld [vmem:[%s16307_s9 + $0x1c0] sm:$0xff] }
  0x14   :  { %16551 = vst [vmem:[#allocation30_spill] sm:$0xff] %v10019_v18  ;;  %v10214_v57 = vld [vmem:[%s16307_s9 + $0x1c8] sm:$0xff]  ;;  %v10219_v58 = vld [vmem:[%s16307_s9 + $0x1d0] sm:$0xff]  ;;  %v10224_v59 = vld [vmem:[%s16307_s9 + $0x1d8] sm:$0xff] }
  0x15   :  { %16552 = vst [vmem:[#allocation31_spill] sm:$0xff] %v10024_v19  ;;  %v10229_v60 = vld [vmem:[%s16307_s9 + $0x1e0] sm:$0xff]  ;;  %v10234_v61 = vld [vmem:[%s16307_s9 + $0x1e8] sm:$0xff]  ;;  %v10239_v62 = vld [vmem:[%s16307_s9 + $0x1f0] sm:$0xff] }
  0x16   :  { %16553 = vst [vmem:[#allocation32_spill] sm:$0xff] %v10029_v20  ;;  %v10244_v63 = vld [vmem:[%s16307_s9 + $0x1f8] sm:$0xff]  ;;  %v10269_v19 = vld [vmem:[%s16307_s9 + $0x220] sm:$0xff]  ;;  %v10274_v9 = vld [vmem:[%s16307_s9 + $0x228] sm:$0xff] }
  0x17   :  { %16554 = vst [vmem:[#allocation33_spill] sm:$0xff] %v10034_v21  ;;  %v10309_v18 = vld [vmem:[%s16307_s9 + $0x260] sm:$0xff]  ;;  %v10314_v8 = vld [vmem:[%s16307_s9 + $0x268] sm:$0xff] }
  0x18   :  { %16555 = vst [vmem:[#allocation34_spill] sm:$0xff] %v10039_v22 }
  0x19   :  { %16556 = vst [vmem:[#allocation35_spill] sm:$0xff] %v10044_v23 }
  0x1a   :  { %16557 = vst [vmem:[#allocation36_spill] sm:$0xff] %v10049_v24 }
  0x1b   :  { %16558 = vst [vmem:[#allocation37_spill] sm:$0xff] %v10054_v25 }
  0x1c   :  { %16559 = vst [vmem:[#allocation38_spill] sm:$0xff] %v10059_v26 }
  0x1d   :  { %16560 = vst [vmem:[#allocation39_spill] sm:$0xff] %v10064_v27 }
  0x1e   :  { %16561 = vst [vmem:[#allocation40_spill] sm:$0xff] %v10069_v28  ;;  %v10304_v28 = vld [vmem:[%s16307_s9 + $0x258] sm:$0xff] }
  0x1f   :  { %16562 = vst [vmem:[#allocation41_spill] sm:$0xff] %v10074_v29  ;;  %v10264_v29 = vld [vmem:[%s16307_s9 + $0x218] sm:$0xff] }
  0x20   :  { %16563 = vst [vmem:[#allocation42_spill] sm:$0xff] %v10079_v30 }
  0x21   :  { %16564 = vst [vmem:[#allocation43_spill] sm:$0xff] %v10084_v31 }
  0x22   :  { %16565 = vst [vmem:[#allocation44_spill] sm:$0xff] %v10089_v32 }
  0x23   :  { %16566 = vst [vmem:[#allocation45_spill] sm:$0xff] %v10094_v33 }
  0x24   :  { %16567 = vst [vmem:[#allocation46_spill] sm:$0xff] %v10099_v34 }
  0x25   :  { %16568 = vst [vmem:[#allocation47_spill] sm:$0xff] %v10104_v35 }
  0x26   :  { %16569 = vst [vmem:[#allocation48_spill] sm:$0xff] %v10109_v36 }
  0x27   :  { %16570 = vst [vmem:[#allocation49_spill] sm:$0xff] %v10114_v37 }
  0x28   :  { %16571 = vst [vmem:[#allocation50_spill] sm:$0xff] %v10119_v38  ;;  %v10289_v38 = vld [vmem:[%s16307_s9 + $0x240] sm:$0xff] }
  0x29   :  { %16572 = vst [vmem:[#allocation51_spill] sm:$0xff] %v10124_v39  ;;  %v10259_v39 = vld [vmem:[%s16307_s9 + $0x210] sm:$0xff] }
  0x2a   :  { %16573 = vst [vmem:[#allocation52_spill] sm:$0xff] %v10129_v40 }
  0x2b   :  { %16574 = vst [vmem:[#allocation53_spill] sm:$0xff] %v10134_v41 }
  0x2c   :  { %16575 = vst [vmem:[#allocation54_spill] sm:$0xff] %v10139_v42 }
  0x2d   :  { %16576 = vst [vmem:[#allocation55_spill] sm:$0xff] %v10144_v43 }
  0x2e   :  { %16577 = vst [vmem:[#allocation56_spill] sm:$0xff] %v10149_v44 }
  0x2f   :  { %16578 = vst [vmem:[#allocation57_spill] sm:$0xff] %v10154_v45 }
  0x30   :  { %16579 = vst [vmem:[#allocation58_spill] sm:$0xff] %v10159_v46 }
  0x31   :  { %16580 = vst [vmem:[#allocation59_spill] sm:$0xff] %v10164_v47 }
  0x32   :  { %16581 = vst [vmem:[#allocation60_spill] sm:$0xff] %v10169_v48  ;;  %v10284_v48 = vld [vmem:[%s16307_s9 + $0x238] sm:$0xff] }
  0x33   :  { %16582 = vst [vmem:[#allocation61_spill] sm:$0xff] %v10174_v49  ;;  %v10254_v49 = vld [vmem:[%s16307_s9 + $0x208] sm:$0xff] }
  0x34   :  { %16583 = vst [vmem:[#allocation62_spill] sm:$0xff] %v10179_v50 }
  0x35   :  { %16584 = vst [vmem:[#allocation63_spill] sm:$0xff] %v10184_v51 }
  0x36   :  { %16585 = vst [vmem:[#allocation64_spill] sm:$0xff] %v10189_v52 }
  0x37   :  { %16586 = vst [vmem:[#allocation65_spill] sm:$0xff] %v10194_v53 }
  0x38   :  { %16587 = vst [vmem:[#allocation66_spill] sm:$0xff] %v10199_v54 }
  0x39   :  { %16588 = vst [vmem:[#allocation67_spill] sm:$0xff] %v10204_v55 }
  0x3a   :  { %16589 = vst [vmem:[#allocation68_spill] sm:$0xff] %v10209_v56 }
  0x3b   :  { %16590 = vst [vmem:[#allocation69_spill] sm:$0xff] %v10214_v57 }
  0x3c   :  { %16591 = vst [vmem:[#allocation70_spill] sm:$0xff] %v10219_v58  ;;  %v10279_v58 = vld [vmem:[%s16307_s9 + $0x230] sm:$0xff] }
  0x3d   :  { %16592 = vst [vmem:[#allocation71_spill] sm:$0xff] %v10224_v59  ;;  %v10249_v59 = vld [vmem:[%s16307_s9 + $0x200] sm:$0xff] }
  0x3e   :  { %16593 = vst [vmem:[#allocation72_spill] sm:$0xff] %v10229_v60  ;;  %v10324_v60 = vld [vmem:[%s16307_s9 + $0x278] sm:$0xff] }
  0x3f   :  { %16594 = vst [vmem:[#allocation73_spill] sm:$0xff] %v10234_v61 }
  0x40   :  { %16595 = vst [vmem:[#allocation74_spill] sm:$0xff] %v10239_v62 }
  0x41   :  { %16596 = vst [vmem:[#allocation75_spill] sm:$0xff] %v10244_v63 }
  0x42   :  { %16597 = vst [vmem:[#allocation76_spill] sm:$0xff] %v10249_v59 }
  0x43   :  { %16598 = vst [vmem:[#allocation77_spill] sm:$0xff] %v10254_v49 }
  0x44   :  { %16599 = vst [vmem:[#allocation78_spill] sm:$0xff] %v10259_v39 }
  0x45   :  { %16600 = vst [vmem:[#allocation79_spill] sm:$0xff] %v10264_v29 }
  0x46   :  { %16601 = vst [vmem:[#allocation80_spill] sm:$0xff] %v10269_v19  ;;  %v10294_v19 = vld [vmem:[%s16307_s9 + $0x248] sm:$0xff] }
  0x47   :  { %16602 = vst [vmem:[#allocation81_spill] sm:$0xff] %v10274_v9  ;;  %v10299_v9 = vld [vmem:[%s16307_s9 + $0x250] sm:$0xff] }
  0x48   :  { %16603 = vst [vmem:[#allocation82_spill] sm:$0xff] %v10279_v58  ;;  %v10319_v58 = vld [vmem:[%s16307_s9 + $0x270] sm:$0xff] }
  0x49   :  { %16604 = vst [vmem:[#allocation83_spill] sm:$0xff] %v10284_v48 }
  0x4a   :  { %16605 = vst [vmem:[#allocation84_spill] sm:$0xff] %v10289_v38 }
  0x4b   :  { %16606 = vst [vmem:[#allocation85_spill] sm:$0xff] %v10294_v19 }
  0x4c   :  { %16607 = vst [vmem:[#allocation86_spill] sm:$0xff] %v10299_v9 }
  0x4d   :  { %16608 = vst [vmem:[#allocation87_spill] sm:$0xff] %v10304_v28 }
  0x4e   :  { %16609 = vst [vmem:[#allocation88_spill] sm:$0xff] %v10309_v18 }
  0x4f   :  { %16610 = vst [vmem:[#allocation89_spill] sm:$0xff] %v10314_v8 }
  0x50   :  { %16611 = vst [vmem:[#allocation90_spill] sm:$0xff] %v10319_v58 }
  0x51   :  { %16612 = vst [vmem:[#allocation91_spill] sm:$0xff] %v10324_v60 }
  0x52   :  { %211 = vsyncadd [#allocation4], 10240  ;;  %v223_v50 = vld [vmem:[%s16308_s10] sm:$0xff]  ;;  %v225_v40 = vld [vmem:[%s16308_s10 + $0x8] sm:$0xff] }
  0x53   :  { %224 = vst [vmem:[#allocation3] sm:$0xff] %v223_v50  ;;  %v227_v30 = vld [vmem:[%s16308_s10 + $0x10] sm:$0xff]  ;;  %v229_v58 = vld [vmem:[%s16308_s10 + $0x18] sm:$0xff]  ;;  %v231_v60 = vld [vmem:[%s16308_s10 + $0x20] sm:$0xff] }
  0x54   :  { %226 = vst [vmem:[#allocation3 + $0x8] sm:$0xff] %v225_v40  ;;  %v233_v20 = vld [vmem:[%s16308_s10 + $0x28] sm:$0xff]  ;;  %v235_v50 = vld [vmem:[%s16308_s10 + $0x30] sm:$0xff]  ;;  %v237_v10 = vld [vmem:[%s16308_s10 + $0x38] sm:$0xff] }
  0x55   :  { %228 = vst [vmem:[#allocation3 + $0x10] sm:$0xff] %v227_v30  ;;  %v239_v40 = vld [vmem:[%s16308_s10 + $0x40] sm:$0xff]  ;;  %v241_v30 = vld [vmem:[%s16308_s10 + $0x48] sm:$0xff] }
  0x56   :  { %230 = vst [vmem:[#allocation3 + $0x18] sm:$0xff] %v229_v58  ;;  %v243_v58 = vld [vmem:[%s16308_s10 + $0x50] sm:$0xff] }
  0x57   :  { %232 = vst [vmem:[#allocation3 + $0x20] sm:$0xff] %v231_v60  ;;  %v245_v60 = vld [vmem:[%s16308_s10 + $0x58] sm:$0xff] }
  0x58   :  { %234 = vst [vmem:[#allocation3 + $0x28] sm:$0xff] %v233_v20  ;;  %v247_v20 = vld [vmem:[%s16308_s10 + $0x60] sm:$0xff] }
  0x59   :  { %236 = vst [vmem:[#allocation3 + $0x30] sm:$0xff] %v235_v50  ;;  %v249_v50 = vld [vmem:[%s16308_s10 + $0x68] sm:$0xff] }
  0x5a   :  { %238 = vst [vmem:[#allocation3 + $0x38] sm:$0xff] %v237_v10  ;;  %v251_v10 = vld [vmem:[%s16308_s10 + $0x70] sm:$0xff] }
  0x5b   :  { %240 = vst [vmem:[#allocation3 + $0x40] sm:$0xff] %v239_v40  ;;  %v253_v40 = vld [vmem:[%s16308_s10 + $0x78] sm:$0xff] }
  0x5c   :  { %242 = vst [vmem:[#allocation3 + $0x48] sm:$0xff] %v241_v30  ;;  %v255_v30 = vld [vmem:[%s16308_s10 + $0x80] sm:$0xff] }
  0x5d   :  { %244 = vst [vmem:[#allocation3 + $0x50] sm:$0xff] %v243_v58  ;;  %v257_v58 = vld [vmem:[%s16308_s10 + $0x88] sm:$0xff] }
  0x5e   :  { %246 = vst [vmem:[#allocation3 + $0x58] sm:$0xff] %v245_v60  ;;  %v259_v60 = vld [vmem:[%s16308_s10 + $0x90] sm:$0xff] }
  0x5f   :  { %248 = vst [vmem:[#allocation3 + $0x60] sm:$0xff] %v247_v20  ;;  %v261_v20 = vld [vmem:[%s16308_s10 + $0x98] sm:$0xff] }
  0x60   :  { %250 = vst [vmem:[#allocation3 + $0x68] sm:$0xff] %v249_v50  ;;  %v263_v50 = vld [vmem:[%s16308_s10 + $0xa0] sm:$0xff] }
  0x61   :  { %252 = vst [vmem:[#allocation3 + $0x70] sm:$0xff] %v251_v10  ;;  %v265_v10 = vld [vmem:[%s16308_s10 + $0xa8] sm:$0xff] }
  0x62   :  { %254 = vst [vmem:[#allocation3 + $0x78] sm:$0xff] %v253_v40  ;;  %v267_v40 = vld [vmem:[%s16308_s10 + $0xb0] sm:$0xff] }
  0x63   :  { %256 = vst [vmem:[#allocation3 + $0x80] sm:$0xff] %v255_v30  ;;  %v269_v30 = vld [vmem:[%s16308_s10 + $0xb8] sm:$0xff] }
  0x64   :  { %258 = vst [vmem:[#allocation3 + $0x88] sm:$0xff] %v257_v58  ;;  %v271_v58 = vld [vmem:[%s16308_s10 + $0xc0] sm:$0xff] }
  0x65   :  { %260 = vst [vmem:[#allocation3 + $0x90] sm:$0xff] %v259_v60  ;;  %v273_v60 = vld [vmem:[%s16308_s10 + $0xc8] sm:$0xff] }
  0x66   :  { %262 = vst [vmem:[#allocation3 + $0x98] sm:$0xff] %v261_v20  ;;  %v275_v20 = vld [vmem:[%s16308_s10 + $0xd0] sm:$0xff] }
  0x67   :  { %264 = vst [vmem:[#allocation3 + $0xa0] sm:$0xff] %v263_v50  ;;  %v277_v50 = vld [vmem:[%s16308_s10 + $0xd8] sm:$0xff] }
  0x68   :  { %266 = vst [vmem:[#allocation3 + $0xa8] sm:$0xff] %v265_v10  ;;  %v279_v10 = vld [vmem:[%s16308_s10 + $0xe0] sm:$0xff] }
  0x69   :  { %268 = vst [vmem:[#allocation3 + $0xb0] sm:$0xff] %v267_v40  ;;  %v281_v40 = vld [vmem:[%s16308_s10 + $0xe8] sm:$0xff] }
  0x6a   :  { %270 = vst [vmem:[#allocation3 + $0xb8] sm:$0xff] %v269_v30  ;;  %v283_v30 = vld [vmem:[%s16308_s10 + $0xf0] sm:$0xff] }
  0x6b   :  { %272 = vst [vmem:[#allocation3 + $0xc0] sm:$0xff] %v271_v58  ;;  %v285_v58 = vld [vmem:[%s16308_s10 + $0xf8] sm:$0xff] }
  0x6c   :  { %274 = vst [vmem:[#allocation3 + $0xc8] sm:$0xff] %v273_v60  ;;  %v287_v60 = vld [vmem:[%s16308_s10 + $0x100] sm:$0xff] }
  0x6d   :  { %276 = vst [vmem:[#allocation3 + $0xd0] sm:$0xff] %v275_v20  ;;  %v289_v20 = vld [vmem:[%s16308_s10 + $0x108] sm:$0xff] }
  0x6e   :  { %278 = vst [vmem:[#allocation3 + $0xd8] sm:$0xff] %v277_v50  ;;  %v291_v50 = vld [vmem:[%s16308_s10 + $0x110] sm:$0xff] }
  0x6f   :  { %280 = vst [vmem:[#allocation3 + $0xe0] sm:$0xff] %v279_v10  ;;  %v293_v10 = vld [vmem:[%s16308_s10 + $0x118] sm:$0xff] }
  0x70   :  { %282 = vst [vmem:[#allocation3 + $0xe8] sm:$0xff] %v281_v40  ;;  %v295_v40 = vld [vmem:[%s16308_s10 + $0x120] sm:$0xff] }
  0x71   :  { %284 = vst [vmem:[#allocation3 + $0xf0] sm:$0xff] %v283_v30  ;;  %v297_v30 = vld [vmem:[%s16308_s10 + $0x128] sm:$0xff] }
  0x72   :  { %286 = vst [vmem:[#allocation3 + $0xf8] sm:$0xff] %v285_v58  ;;  %v299_v58 = vld [vmem:[%s16308_s10 + $0x130] sm:$0xff] }
  0x73   :  { %288 = vst [vmem:[#allocation3 + $0x100] sm:$0xff] %v287_v60  ;;  %v301_v60 = vld [vmem:[%s16308_s10 + $0x138] sm:$0xff] }
  0x74   :  { %290 = vst [vmem:[#allocation3 + $0x108] sm:$0xff] %v289_v20 }
  0x75   :  { %292 = vst [vmem:[#allocation3 + $0x110] sm:$0xff] %v291_v50 }
  0x76   :  { %294 = vst [vmem:[#allocation3 + $0x118] sm:$0xff] %v293_v10 }
  0x77   :  { %296 = vst [vmem:[#allocation3 + $0x120] sm:$0xff] %v295_v40 }
  0x78   :  { %298 = vst [vmem:[#allocation3 + $0x128] sm:$0xff] %v297_v30 }
  0x79   :  { %300 = vst [vmem:[#allocation3 + $0x130] sm:$0xff] %v299_v58 }
  0x7a   :  { %302 = vst [vmem:[#allocation3 + $0x138] sm:$0xff] %v301_v60 }
  0x7b   :  { %308 = vsyncadd [#allocation4 + $0x1], 5120  ;;  %v8989_v20 = vld [vmem:[%s16299_s1 + $0x8] sm:$0xff]  ;;  %v8988_v50 = vld [vmem:[%s16299_s1] sm:$0xff]  ;;  %vm675_vm0 = vcmask 261120   ;;  %s9862_s30 = smov 64  }
  0x7c   :  { %832 = vmatpush.bf16.msra.mxu0 %v8989_v20  ;;  %9505 = vmatpush.bf16.msra.mxu2 %v8989_v20  ;;  %v8938_v10 = vld [vmem:[%s16298_s0] sm:$0xff]  ;;  %v8939_v40 = vld [vmem:[%s16298_s0 + $0x8] sm:$0xff]  ;;  %v8940_v30 = vld [vmem:[%s16298_s0 + $0x10] sm:$0xff]  ;;  %vm2688_vm1 = vcmask 523264  }
  0x7d   :  { %9504 = vmatpush.bf16.msra.mxu1 %v8989_v20  ;;  %9506 = vmatpush.bf16.msra.mxu3 %v8989_v20  ;;  %v8980_v58 = vld [vmem:[%s16298_s0 + $0x150] sm:$0xff]  ;;  %v8941_v60 = vld [vmem:[%s16298_s0 + $0x18] sm:$0xff]  ;;  %v8955_v7 = vld [vmem:[%s16298_s0 + $0x88] sm:$0xff] }
  0x7e   :  { %v8981_v20 = vld [vmem:[%s16298_s0 + $0x158] sm:$0xff]  ;;  %v8992_v51 = vld [vmem:[%s16300_s2 + $0x10] sm:$0xff] }
  0x7f   :  { %v8948_v31 = vld [vmem:[%s16298_s0 + $0x50] sm:$0xff]  ;;  %v8953_v1 = vld [vmem:[%s16298_s0 + $0x78] sm:$0xff] }
  0x80   :  { %833 = vmatpush.bf16.msra.mxu0 %v8988_v50  ;;  %9508 = vmatpush.bf16.msra.mxu2 %v8988_v50 }
  0x81   :  { %9507 = vmatpush.bf16.msra.mxu1 %v8988_v50  ;;  %9509 = vmatpush.bf16.msra.mxu3 %v8988_v50  ;;  %v8942_v50 = vld [vmem:[%s16298_s0 + $0x20] sm:$0xff] }
  0x83   :  { %8184 = vmatmul.msk.bf16.vlgmr.msra.gmra.mxu0 %vm675_vm0, %v8938_v10  ;;  %8226 = vmatmul.msk.bf16.vlgmr.msra.gmra.mxu2 %vm675_vm0, %v8980_v58  ;;  %v8976_v10 = vld [vmem:[%s16298_s0 + $0x130] sm:$0xff] }
  0x84   :  { %8222 = vmatmul.msk.bf16.vlgmr.msra.gmra.mxu1 %vm675_vm0, %v8976_v10  ;;  %v8944_v58 = vld [vmem:[%s16298_s0 + $0x30] sm:$0xff]  ;;  %v8990_v10 = vld [vmem:[%s16300_s2] sm:$0xff] }
  0x93   :  { %8185 = vmatmul.msk.bf16.gmra.mxu0 %vm675_vm0, %v8939_v40  ;;  %8227 = vmatmul.msk.bf16.gmra.mxu2 %vm675_vm0, %v8981_v20  ;;  %v8982_v40 = vld [vmem:[%s16298_s0 + $0x160] sm:$0xff]  ;;  %v8983_v20 = vld [vmem:[%s16298_s0 + $0x168] sm:$0xff] }
  0xa3   :  { %8186 = vmatmul.msk.bf16.gmra.mxu0 %vm675_vm0, %v8940_v30  ;;  %8228 = vmatmul.msk.bf16.gmra.mxu2 %vm675_vm0, %v8982_v40  ;;  %v8943_v30 = vld [vmem:[%s16298_s0 + $0x28] sm:$0xff]  ;;  %v8945_v40 = vld [vmem:[%s16298_s0 + $0x38] sm:$0xff] }
  0xb3   :  { %8187 = vmatmul.msk.bf16.gmra.mxu0 %vm675_vm0, %v8941_v60  ;;  %v8977_v60 = vld [vmem:[%s16298_s0 + $0x138] sm:$0xff]  ;;  %8229 = vmatmul.msk.bf16.gmra.mxu2 %vm675_vm0, %v8983_v20  ;;  %v8979_v20 = vld [vmem:[%s16298_s0 + $0x148] sm:$0xff] }
  0xb4   :  { %8223 = vmatmul.msk.bf16.gmra.mxu1 %vm675_vm0, %v8977_v60  ;;  %v8946_v60 = vld [vmem:[%s16298_s0 + $0x40] sm:$0xff] }
  0xc3   :  { %8188 = vmatmul.msk.bf16.gmra.mxu0 %vm675_vm0, %v8942_v50  ;;  %v8991_v50 = vld [vmem:[%s16300_s2 + $0x8] sm:$0xff] }
  0xc4   :  { %1375 = vmatpush.bf16.msrb.mxu2 %v8991_v50  ;;  %v8985_v50 = vld [vmem:[%s16298_s0 + $0x178] sm:$0xff] }
  0xc8   :  { %1376 = vmatpush.bf16.msrb.mxu2 %v8990_v10 }
  0xd3   :  { %8189 = vmatmul.msk.bf16.gmra.mxu0 %vm675_vm0, %v8943_v30  ;;  %v8978_v30 = vld [vmem:[%s16298_s0 + $0x140] sm:$0xff] }
  0xd4   :  { %8224 = vmatmul.msk.bf16.gmra.mxu1 %vm675_vm0, %v8978_v30 }
  0xe3   :  { %8190 = vmatmul.msk.bf16.gmra.mxu0 %vm675_vm0, %v8944_v58  ;;  %v8984_v58 = vld [vmem:[%s16298_s0 + $0x170] sm:$0xff] }
  0xe4   :  { %8230 = vmatmul.msk.bf16.vlgmr.msra.gmra.mxu3 %vm675_vm0, %v8984_v58  ;;  %8225 = vmatmul.msk.bf16.gmra.mxu1 %vm675_vm0, %v8979_v20  ;;  %v8993_v58 = vld [vmem:[%s16300_s2 + $0x18] sm:$0xff] }
  0xe5   :  { %1328 = vmatpush.bf16.msrb.mxu1 %v8993_v58 }
  0xe9   :  { %1329 = vmatpush.bf16.msrb.mxu1 %v8992_v51 }
  0xf3   :  { %8191 = vmatmul.msk.bf16.gmra.mxu0 %vm675_vm0, %v8945_v40 }
  0xf4   :  { %8231 = vmatmul.msk.bf16.gmra.mxu3 %vm675_vm0, %v8985_v50 }
 0x100   :  { %v835_v10 = vpop.f32.mrf.mxu0 }
 0x101   :  { %v1085_v40 = vmax.f32 %v835_v10, 0.0  ;;  %v8986_v10 = vld [vmem:[%s16298_s0 + $0x180] sm:$0xff] }
 0x103   :  { %8192 = vmatmul.msk.bf16.gmra.mxu0 %vm675_vm0, %v8946_v60  ;;  %v1185_v0 = vpack.c.bf16 %v1085_v40, %v1085_v40  ;;  %v8947_v60 = vld [vmem:[%s16298_s0 + $0x48] sm:$0xff] }
 0x104   :  { %8232 = vmatmul.msk.bf16.gmra.mxu3 %vm675_vm0, %v8986_v10 }
 0x105   :  { %v1345_v41 = vunpack.c.l.b16 %v1185_v0 }
 0x108   :  { %v837_v30 = vpop.f32.mrf.mxu0 }
 0x109   :  { %v1086_v48 = vmax.f32 %v837_v30, 0.0 }
 0x10b   :  { %v1186_v61 = vpack.c.bf16 %v1086_v48, %v1086_v48 }
 0x10d   :  { %v1346_v20 = vunpack.c.l.b16 %v1186_v61 }
 0x10f   :  { %v1349_v50 = vpack.c.b16 %v1346_v20, %v1345_v41 }
 0x110   :  { %v840_v40 = vpop.f32.mrf.mxu0 }
 0x111   :  { %8256 = vmatmul.msk.bf16.vlgmr.msrb.gmra.mxu2 %vm675_vm0, %v1349_v50  ;;  %v1087_v48 = vmax.f32 %v840_v40, 0.0  ;;  %v8987_v50 = vld [vmem:[%s16298_s0 + $0x188] sm:$0xff] }
 0x112   :  { %v8995_v40 = vld [vmem:[%s16300_s2 + $0x28] sm:$0xff] }
 0x113   :  { %8193 = vmatmul.msk.bf16.gmra.mxu0 %vm675_vm0, %v8947_v60  ;;  %v1187_v61 = vpack.c.bf16 %v1087_v48, %v1087_v48  ;;  %1427 = vmatpush.bf16.msrb.mxu3 %v8995_v40 }
 0x114   :  { %8233 = vmatmul.msk.bf16.gmra.mxu3 %vm675_vm0, %v8987_v50 }
 0x115   :  { %v1347_v30 = vunpack.c.l.b16 %v1187_v61 }
 0x118   :  { %v842_v0 = vpop.f32.mrf.mxu0 }
 0x119   :  { %v1088_v51 = vmax.f32 %v842_v0, 0.0 }
 0x11b   :  { %v1188_v41 = vpack.c.bf16 %v1088_v51, %v1088_v51  ;;  %v8994_v51 = vld [vmem:[%s16300_s2 + $0x20] sm:$0xff] }
 0x11c   :  { %1428 = vmatpush.bf16.msrb.mxu3 %v8994_v51 }
 0x11d   :  { %v1348_v58 = vunpack.c.l.b16 %v1188_v41 }
 0x11f   :  { %v1350_v20 = vpack.c.b16 %v1348_v58, %v1347_v30 }
 0x120   :  { %v845_v21 = vpop.f32.mrf.mxu0 }
 0x121   :  { %8257 = vmatmul.msk.bf16.gmra.mxu2 %vm675_vm0, %v1350_v20  ;;  %v1089_v60 = vmax.f32 %v845_v21, 0.0  ;;  %v8949_v21 = vld [vmem:[%s16298_s0 + $0x58] sm:$0xff] }
 0x123   :  { %8194 = vmatmul.msk.bf16.gmra.mxu0 %vm675_vm0, %v8948_v31  ;;  %v1189_v48 = vpack.c.bf16 %v1089_v60, %v1089_v60 }
 0x125   :  { %v1298_v41 = vunpack.c.l.b16 %v1189_v48 }
 0x128   :  { %v847_v10 = vpop.f32.mrf.mxu0 }
 0x129   :  { %v1090_v0 = vmax.f32 %v847_v10, 0.0 }
 0x12b   :  { %v1190_v61 = vpack.c.bf16 %v1090_v0, %v1090_v0 }
 0x12d   :  { %v1299_v30 = vunpack.c.l.b16 %v1190_v61  ;;  %v8950_v61 = vld [vmem:[%s16298_s0 + $0x60] sm:$0xff] }
 0x12f   :  { %v1302_v58 = vpack.c.b16 %v1299_v30, %v1298_v41 }
 0x130   :  { %v850_v31 = vpop.f32.mrf.mxu0 }
 0x131   :  { %8246 = vmatmul.msk.bf16.vlgmr.msrb.gmra.mxu1 %vm675_vm0, %v1302_v58  ;;  %v1091_v20 = vmax.f32 %v850_v31, 0.0  ;;  %v8997_v58 = vld [vmem:[%s16300_s2 + $0x38] sm:$0xff] }
 0x132   :  { %1483 = vmatpush.bf16.msra.mxu1 %v8997_v58 }
 0x133   :  { %8195 = vmatmul.msk.bf16.gmra.mxu0 %vm675_vm0, %v8949_v21  ;;  %v1191_v60 = vpack.c.bf16 %v1091_v20, %v1091_v20 }
 0x135   :  { %v1300_v0 = vunpack.c.l.b16 %v1191_v60 }
 0x138   :  { %v852_v50 = vpop.f32.mrf.mxu0 }
 0x139   :  { %v1092_v10 = vmax.f32 %v852_v50, 0.0 }
 0x13b   :  { %v1192_v40 = vpack.c.bf16 %v1092_v10, %v1092_v10 }
 0x13d   :  { %v1301_v11 = vunpack.c.l.b16 %v1192_v40  ;;  %v8951_v40 = vld [vmem:[%s16298_s0 + $0x68] sm:$0xff] }
 0x13f   :  { %v1303_v48 = vpack.c.b16 %v1301_v11, %v1300_v0  ;;  %v8996_v11 = vld [vmem:[%s16300_s2 + $0x30] sm:$0xff] }
 0x140   :  { %v855_v51 = vpop.f32.mrf.mxu0  ;;  %1484 = vmatpush.bf16.msra.mxu1 %v8996_v11 }
 0x141   :  { %8247 = vmatmul.msk.bf16.gmra.mxu1 %vm675_vm0, %v1303_v48  ;;  %v1093_v41 = vmax.f32 %v855_v51, 0.0 }
 0x143   :  { %8196 = vmatmul.msk.bf16.gmra.mxu0 %vm675_vm0, %v8950_v61  ;;  %v1193_v21 = vpack.c.bf16 %v1093_v41, %v1093_v41 }
 0x145   :  { %v1397_v50 = vunpack.c.l.b16 %v1193_v21 }
 0x148   :  { %v857_v30 = vpop.f32.mrf.mxu0 }
 0x149   :  { %v1094_v31 = vmax.f32 %v857_v30, 0.0  ;;  %v10585_v30 = vpop.f32.mrf.mxu2 }
 0x14b   :  { %v1194_v20 = vpack.c.bf16 %v1094_v31, %v1094_v31 }
 0x14d   :  { %v1398_v60 = vunpack.c.l.b16 %v1194_v20  ;;  %v10587_v20 = vpop.f32.mrf.mxu1 }
 0x14f   :  { %v1401_v10 = vpack.c.b16 %v1398_v60, %v1397_v50  ;;  %v8952_v50 = vld [vmem:[%s16298_s0 + $0x70] sm:$0xff] }
 0x150   :  { %v860_v0 = vpop.f32.mrf.mxu0 }
 0x151   :  { %8270 = vmatmul.msk.bf16.vlgmr.msrb.gmra.mxu3 %vm675_vm0, %v1401_v10  ;;  %v1095_v48 = vmax.f32 %v860_v0, 0.0  ;;  %v10594_v10 = vpop.f32.mrf.mxu2 }
 0x153   :  { %8197 = vmatmul.msk.bf16.gmra.mxu0 %vm675_vm0, %v8951_v40  ;;  %v1195_v51 = vpack.c.bf16 %v1095_v48, %v1095_v48 }
 0x155   :  { %v1399_v21 = vunpack.c.l.b16 %v1195_v51  ;;  %v10596_v48 = vpop.f32.mrf.mxu1 }
 0x158   :  { %v862_v61 = vpop.f32.mrf.mxu0 }
 0x159   :  { %v1096_v41 = vmax.f32 %v862_v61, 0.0  ;;  %v8999_v61 = vld [vmem:[%s16300_s2 + $0x48] sm:$0xff] }
 0x15a   :  { %1539 = vmatpush.bf16.msra.mxu2 %v8999_v61 }
 0x15b   :  { %v1196_v58 = vpack.c.bf16 %v1096_v41, %v1096_v41 }
 0x15d   :  { %v1400_v31 = vunpack.c.l.b16 %v1196_v58 }
 0x15f   :  { %v1402_v11 = vpack.c.b16 %v1400_v31, %v1399_v21  ;;  %v8998_v21 = vld [vmem:[%s16300_s2 + $0x40] sm:$0xff] }
 0x160   :  { %v865_v60 = vpop.f32.mrf.mxu0  ;;  %1540 = vmatpush.bf16.msra.mxu2 %v8998_v21 }
 0x161   :  { %8271 = vmatmul.msk.bf16.gmra.mxu3 %vm675_vm0, %v1402_v11  ;;  %v1097_v40 = vmax.f32 %v865_v60, 0.0 }
 0x163   :  { %8198 = vmatmul.msk.bf16.gmra.mxu0 %vm675_vm0, %v8952_v50  ;;  %v1197_v51 = vpack.c.bf16 %v1097_v40, %v1097_v40  ;;  %v10604_v50 = vpop.f32.mrf.mxu2  ;;  %v10610_v40 = vpop.f32.mrf.mxu1 }
 0x165   :  { %v1453_v31 = vunpack.c.l.b16 %v1197_v51 }
 0x168   :  { %v867_v0 = vpop.f32.mrf.mxu0 }
 0x169   :  { %v1098_v41 = vmax.f32 %v867_v0, 0.0 }
 0x16b   :  { %v1198_v58 = vpack.c.bf16 %v1098_v41, %v1098_v41  ;;  %v10613_v61 = vpop.f32.mrf.mxu2  ;;  %v10615_v21 = vpop.f32.mrf.mxu1 }
 0x16d   :  { %v1454_v11 = vunpack.c.l.b16 %v1198_v58 }
 0x16f   :  { %v1457_v60 = vpack.c.b16 %v1454_v11, %v1453_v31 }
 0x170   :  { %v870_v8 = vpop.f32.mrf.mxu0 }
 0x171   :  { %8284 = vmatmul.msk.bf16.vlgmr.msra.gmra.mxu1 %vm675_vm0, %v1457_v60  ;;  %v1099_v0 = vmax.f32 %v870_v8, 0.0  ;;  %v8954_v60 = vld [vmem:[%s16298_s0 + $0x80] sm:$0xff]  ;;  %v10624_v8 = vpop.f32.mrf.mxu3 }
 0x173   :  { %8199 = vmatmul.msk.bf16.gmra.mxu0 %vm675_vm0, %v8953_v1  ;;  %v1199_v41 = vpack.c.bf16 %v1099_v0, %v1099_v0  ;;  %v10621_v1 = vpop.f32.mrf.mxu2 }
 0x175   :  { %v1455_v31 = vunpack.c.l.b16 %v1199_v41 }
 0x178   :  { %v872_v51 = vpop.f32.mrf.mxu0 }
 0x179   :  { %v1100_v58 = vmax.f32 %v872_v51, 0.0  ;;  %v10626_v51 = vpop.f32.mrf.mxu1 }
 0x17b   :  { %v1200_v29 = vpack.c.bf16 %v1100_v58, %v1100_v58  ;;  %v10631_v37 = vpop.f32.mrf.mxu2 }
 0x17d   :  { %v1456_v11 = vunpack.c.l.b16 %v1200_v29  ;;  %v9001_v29 = vld [vmem:[%s16300_s2 + $0x58] sm:$0xff] }
 0x17e   :  { %1595 = vmatpush.bf16.msra.mxu3 %v9001_v29 }
 0x17f   :  { %v1458_v57 = vpack.c.b16 %v1456_v11, %v1455_v31 }
 0x180   :  { %v875_v47 = vpop.f32.mrf.mxu0 }
 0x181   :  { %8285 = vmatmul.msk.bf16.gmra.mxu1 %vm675_vm0, %v1458_v57  ;;  %v1101_v0 = vmax.f32 %v875_v47, 0.0  ;;  %v9000_v57 = vld [vmem:[%s16300_s2 + $0x50] sm:$0xff]  ;;  %v10636_v47 = vpop.f32.mrf.mxu3 }
 0x182   :  { %1596 = vmatpush.bf16.msra.mxu3 %v9000_v57 }
 0x183   :  { %8200 = vmatmul.msk.bf16.gmra.mxu0 %vm675_vm0, %v8954_v60  ;;  %v1201_v41 = vpack.c.bf16 %v1101_v0, %v1101_v0 }
 0x185   :  { %v1509_v60 = vunpack.c.l.b16 %v1201_v41 }
 0x188   :  { %v877_v58 = vpop.f32.mrf.mxu0 }
 0x189   :  { %v1102_v31 = vmax.f32 %v877_v58, 0.0  ;;  %v10641_v58 = vpop.f32.mrf.mxu1 }
 0x18b   :  { %v1202_v11 = vpack.c.bf16 %v1102_v31, %v1102_v31  ;;  %v10645_v31 = vpop.f32.mrf.mxu2 }
 0x18d   :  { %v1510_v27 = vunpack.c.l.b16 %v1202_v11  ;;  %v10647_v11 = vpop.f32.mrf.mxu3 }
 0x18f   :  { %v1513_v17 = vpack.c.b16 %v1510_v27, %v1509_v60 }
 0x190   :  { %v880_v0 = vpop.f32.mrf.mxu0 }
 0x191   :  { %8298 = vmatmul.msk.bf16.vlgmr.msra.gmra.mxu2 %vm675_vm0, %v1513_v17  ;;  %v1103_v29 = vmax.f32 %v880_v0, 0.0  ;;  %v10649_v27 = vpop.f32.mrf.mxu1  ;;  %v8956_v17 = vld [vmem:[%s16298_s0 + $0x90] sm:$0xff] }
 0x193   :  { %8201 = vmatmul.msk.bf16.gmra.mxu0 %vm675_vm0, %v8955_v7  ;;  %v1203_v18 = vpack.c.bf16 %v1103_v29, %v1103_v29  ;;  %v10654_v36 = vpop.f32.mrf.mxu2 }
 0x195   :  { %v1511_v39 = vunpack.c.l.b16 %v1203_v18  ;;  %v10657_v0 = vpop.f32.mrf.mxu3  ;;  %v9003_v18 = vld [vmem:[%s16300_s2 + $0x68] sm:$0xff] }
 0x196   :  { %1651 = vmatpush.bf16.msrb.mxu1 %v9003_v18 }
 0x198   :  { %v882_v41 = vpop.f32.mrf.mxu0 }
 0x199   :  { %v1104_v57 = vmax.f32 %v882_v41, 0.0  ;;  %v10660_v29 = vpop.f32.mrf.mxu1 }
 0x19b   :  { %v1204_v60 = vpack.c.bf16 %v1104_v57, %v1104_v57 }
 0x19d   :  { %v1512_v56 = vunpack.c.l.b16 %v1204_v60  ;;  %v1378_v60 = vpop.f32.mrf.mxu2  ;;  %v10665_v16 = vpop.f32.mrf.mxu3 }
 0x19f   :  { %v1514_v46 = vpack.c.b16 %v1512_v56, %v1511_v39 }
 0x1a0   :  { %v885_v7 = vpop.f32.mrf.mxu0 }
 0x1a1   :  { %8299 = vmatmul.msk.bf16.gmra.mxu2 %vm675_vm0, %v1514_v46  ;;  %v1105_v41 = vmax.f32 %v885_v7, 0.0  ;;  %v9002_v46 = vld [vmem:[%s16300_s2 + $0x60] sm:$0xff] }
 0x1a2   :  { %1652 = vmatpush.bf16.msrb.mxu1 %v9002_v46 }
 0x1a3   :  { %8202 = vmatmul.msk.bf16.gmra.mxu0 %vm675_vm0, %v8956_v17  ;;  %v1205_v39 = vpack.c.bf16 %v1105_v41, %v1105_v41  ;;  %v8957_v41 = vld [vmem:[%s16298_s0 + $0x98] sm:$0xff] }
 0x1a5   :  { %v1565_v17 = vunpack.c.l.b16 %v1205_v39  ;;  %v10675_v18 = vpop.f32.mrf.mxu2  ;;  %v10679_v39 = vpop.f32.mrf.mxu3 }
 0x1a8   :  { %v887_v57 = vpop.f32.mrf.mxu0 }
 0x1a9   :  { %v1106_v56 = vmax.f32 %v887_v57, 0.0 }
 0x1ab   :  { %v1206_v26 = vpack.c.bf16 %v1106_v56, %v1106_v56 }
 0x1ad   :  { %v1566_v6 = vunpack.c.l.b16 %v1206_v26  ;;  %v1383_v45 = vpop.f32.mrf.mxu2 }
 0x1ae   :  { %v1331_v28 = vpop.f32.mrf.mxu1 }
 0x1af   :  { %v1569_v7 = vpack.c.b16 %v1566_v6, %v1565_v17  ;;  %v1379_v49 = vadd.f32 %v1378_v60, %v1331_v28 }
 0x1b0   :  { %v890_v57 = vpop.f32.mrf.mxu0 }
 0x1b1   :  { %8312 = vmatmul.msk.bf16.vlgmr.msra.gmra.mxu3 %vm675_vm0, %v1569_v7  ;;  %v1107_v56 = vmax.f32 %v890_v57, 0.0  ;;  %v8958_v7 = vld [vmem:[%s16298_s0 + $0xa0] sm:$0xff]  ;;  %v10684_v57 = vpop.f32.mrf.mxu3 }
 0x1b3   :  { %8203 = vmatmul.msk.bf16.gmra.mxu0 %vm675_vm0, %v8957_v41  ;;  %v1207_v46 = vpack.c.bf16 %v1107_v56, %v1107_v56 }
 0x1b5   :  { %v1567_v60 = vunpack.c.l.b16 %v1207_v46  ;;  %v9005_v46 = vld [vmem:[%s16300_s2 + $0x78] sm:$0xff] }
 0x1b6   :  { %v10677_v55 = vpop.f32.mrf.mxu1  ;;  %1707 = vmatpush.bf16.msrb.mxu2 %v9005_v46 }
 0x1b8   :  { %v892_v26 = vpop.f32.mrf.mxu0 }
 0x1b9   :  { %v1108_v6 = vmax.f32 %v892_v26, 0.0 }
 0x1bb   :  { %v1208_v28 = vpack.c.bf16 %v1108_v6, %v1108_v6 }
 0x1bd   :  { %v1568_v17 = vunpack.c.l.b16 %v1208_v28 }
 0x1be   :  { %v1336_v35 = vpop.f32.mrf.mxu1 }
 0x1bf   :  { %v1384_v25 = vadd.f32 %v1383_v45, %v1336_v35  ;;  %v1570_v15 = vpack.c.b16 %v1568_v17, %v1567_v60  ;;  %v10691_v45 = vpop.f32.mrf.mxu3  ;;  %v9004_v60 = vld [vmem:[%s16300_s2 + $0x70] sm:$0xff] }
 0x1c0   :  { %v895_v41 = vpop.f32.mrf.mxu0  ;;  %1708 = vmatpush.bf16.msrb.mxu2 %v9004_v60 }
 0x1c1   :  { %8313 = vmatmul.msk.bf16.gmra.mxu3 %vm675_vm0, %v1570_v15  ;;  %v1109_v56 = vmax.f32 %v895_v41, 0.0  ;;  %v8959_v41 = vld [vmem:[%s16298_s0 + $0xa8] sm:$0xff] }
 0x1c3   :  { %8204 = vmatmul.msk.bf16.gmra.mxu0 %vm675_vm0, %v8958_v7  ;;  %v1209_v6 = vpack.c.bf16 %v1109_v56, %v1109_v56 }
 0x1c5   :  { %v1621_v17 = vunpack.c.l.b16 %v1209_v6 }
 0x1c8   :  { %v897_v26 = vpop.f32.mrf.mxu0 }
 0x1c9   :  { %v1110_v35 = vmax.f32 %v897_v26, 0.0 }
 0x1cb   :  { %v1210_v28 = vpack.c.bf16 %v1110_v35, %v1110_v35 }
 0x1cd   :  { %v1622_v15 = vunpack.c.l.b16 %v1210_v28 }
 0x1cf   :  { %v1625_v7 = vpack.c.b16 %v1622_v15, %v1621_v17  ;;  %v8960_v15 = vld [vmem:[%s16298_s0 + $0xb0] sm:$0xff] }
 0x1d0   :  { %v900_v5 = vpop.f32.mrf.mxu0 }
 0x1d1   :  { %8326 = vmatmul.msk.bf16.vlgmr.msrb.gmra.mxu1 %vm675_vm0, %v1625_v7  ;;  %v1111_v26 = vmax.f32 %v900_v5, 0.0 }
 0x1d3   :  { %8205 = vmatmul.msk.bf16.gmra.mxu0 %vm675_vm0, %v8959_v41  ;;  %v1211_v9 = vpack.c.bf16 %v1111_v26, %v1111_v26  ;;  %v10708_v41 = vpop.f32.mrf.mxu1 }
 0x1d4   :  { %v1430_v56 = vpop.f32.mrf.mxu3 }
 0x1d5   :  { %v1440_v46 = vadd.f32 %v1430_v56, %v1379_v49  ;;  %v1623_v28 = vunpack.c.l.b16 %v1211_v9  ;;  %v9007_v9 = vld [vmem:[%s16300_s2 + $0x88] sm:$0xff] }
 0x1d6   :  { %1763 = vmatpush.bf16.msrb.mxu3 %v9007_v9 }
 0x1d8   :  { %v902_v35 = vpop.f32.mrf.mxu0 }
 0x1d9   :  { %v1112_v59 = vmax.f32 %v902_v35, 0.0  ;;  %v9006_v35 = vld [vmem:[%s16300_s2 + $0x80] sm:$0xff] }
 0x1da   :  { %1764 = vmatpush.bf16.msrb.mxu3 %v9006_v35 }
 0x1db   :  { %v1212_v54 = vpack.c.bf16 %v1112_v59, %v1112_v59 }
 0x1dc   :  { %v10701_v6 = vpop.f32.mrf.mxu3 }
 0x1dd   :  { %v1624_v60 = vunpack.c.l.b16 %v1212_v54 }
 0x1df   :  { %v1626_v17 = vpack.c.b16 %v1624_v60, %v1623_v28 }
 0x1e0   :  { %v905_v44 = vpop.f32.mrf.mxu0 }
 0x1e1   :  { %8327 = vmatmul.msk.bf16.gmra.mxu1 %vm675_vm0, %v1626_v17  ;;  %v1113_v49 = vmax.f32 %v905_v44, 0.0 }
 0x1e3   :  { %8206 = vmatmul.msk.bf16.gmra.mxu0 %vm675_vm0, %v8960_v15  ;;  %v1213_v54 = vpack.c.bf16 %v1113_v49, %v1113_v49  ;;  %v8961_v15 = vld [vmem:[%s16298_s0 + $0xb8] sm:$0xff] }
 0x1e4   :  { %v1435_v5 = vpop.f32.mrf.mxu3 }
 0x1e5   :  { %v1442_v7 = vadd.f32 %v1435_v5, %v1384_v25  ;;  %v1677_v28 = vunpack.c.l.b16 %v1213_v54 }
 0x1e8   :  { %v907_v59 = vpop.f32.mrf.mxu0 }
 0x1e9   :  { %v1114_v56 = vmax.f32 %v907_v59, 0.0 }
 0x1eb   :  { %v1214_v26 = vpack.c.bf16 %v1114_v56, %v1114_v56 }
 0x1ed   :  { %v1678_v60 = vunpack.c.l.b16 %v1214_v26 }
 0x1ee   :  { %v1486_v17 = vpop.f32.mrf.mxu1 }
 0x1ef   :  { %v1681_v25 = vpack.c.b16 %v1678_v60, %v1677_v28  ;;  %v1496_v44 = vadd.f32 %v1486_v17, %v1440_v46  ;;  %v8962_v17 = vld [vmem:[%s16298_s0 + $0xc0] sm:$0xff] }
 0x1f0   :  { %v910_v5 = vpop.f32.mrf.mxu0 }
 0x1f1   :  { %8340 = vmatmul.msk.bf16.vlgmr.msrb.gmra.mxu2 %vm675_vm0, %v1681_v25  ;;  %v1115_v49 = vmax.f32 %v910_v5, 0.0  ;;  %v9009_v5 = vld [vmem:[%s16300_s2 + $0x98] sm:$0xff] }
 0x1f2   :  { %1819 = vmatpush.bf16.msra.mxu1 %v9009_v5 }
 0x1f3   :  { %8207 = vmatmul.msk.bf16.gmra.mxu0 %vm675_vm0, %v8961_v15  ;;  %v1215_v56 = vpack.c.bf16 %v1115_v49, %v1115_v49 }
 0x1f5   :  { %v1679_v34 = vunpack.c.l.b16 %v1215_v56  ;;  %v9008_v56 = vld [vmem:[%s16300_s2 + $0x90] sm:$0xff] }
 0x1f6   :  { %v10721_v59 = vpop.f32.mrf.mxu1  ;;  %1820 = vmatpush.bf16.msra.mxu1 %v9008_v56 }
 0x1f8   :  { %v912_v9 = vpop.f32.mrf.mxu0 }
 0x1f9   :  { %v1116_v54 = vmax.f32 %v912_v9, 0.0 }
 0x1fb   :  { %v1216_v26 = vpack.c.bf16 %v1116_v54, %v1116_v54 }
 0x1fd   :  { %v1680_v35 = vunpack.c.l.b16 %v1216_v26 }
 0x1fe   :  { %v1491_v28 = vpop.f32.mrf.mxu1 }
 0x1ff   :  { %v1498_v46 = vadd.f32 %v1491_v28, %v1442_v7  ;;  %v1682_v60 = vpack.c.b16 %v1680_v35, %v1679_v34  ;;  %v10731_v34 = vpop.f32.mrf.mxu2 }
 0x200   :  { %v915_v24 = vpop.f32.mrf.mxu0 }
 0x201   :  { %8341 = vmatmul.msk.bf16.gmra.mxu2 %vm675_vm0, %v1682_v60  ;;  %v1117_v25 = vmax.f32 %v915_v24, 0.0  ;;  %v8963_v24 = vld [vmem:[%s16298_s0 + $0xc8] sm:$0xff] }
 0x203   :  { %8208 = vmatmul.msk.bf16.gmra.mxu0 %vm675_vm0, %v8962_v17  ;;  %v1217_v49 = vpack.c.bf16 %v1117_v25, %v1117_v25 }
 0x205   :  { %v1733_v54 = vunpack.c.l.b16 %v1217_v49 }
 0x208   :  { %v917_v15 = vpop.f32.mrf.mxu0 }
 0x209   :  { %v1118_v9 = vmax.f32 %v917_v15, 0.0 }
 0x20b   :  { %v1218_v7 = vpack.c.bf16 %v1118_v9, %v1118_v9 }
 0x20d   :  { %v1734_v26 = vunpack.c.l.b16 %v1218_v7 }
 0x20f   :  { %v1737_v35 = vpack.c.b16 %v1734_v26, %v1733_v54  ;;  %v8964_v26 = vld [vmem:[%s16298_s0 + $0xd0] sm:$0xff] }
 0x210   :  { %v920_v28 = vpop.f32.mrf.mxu0 }
 0x211   :  { %8354 = vmatmul.msk.bf16.vlgmr.msrb.gmra.mxu3 %vm675_vm0, %v1737_v35  ;;  %v1119_v17 = vmax.f32 %v920_v28, 0.0 }
 0x213   :  { %8209 = vmatmul.msk.bf16.gmra.mxu0 %vm675_vm0, %v8963_v24  ;;  %v1219_v5 = vpack.c.bf16 %v1119_v17, %v1119_v17 }
 0x214   :  { %v1542_v60 = vpop.f32.mrf.mxu2 }
 0x215   :  { %v1552_v25 = vadd.f32 %v1542_v60, %v1496_v44  ;;  %v1735_v7 = vunpack.c.l.b16 %v1219_v5  ;;  %v9011_v60 = vld [vmem:[%s16300_s2 + $0xa8] sm:$0xff]  ;;  %v10751_v5 = vpop.f32.mrf.mxu3 }
 0x216   :  { %1875 = vmatpush.bf16.msra.mxu2 %v9011_v60 }
 0x218   :  { %v922_v15 = vpop.f32.mrf.mxu0 }
 0x219   :  { %v1120_v9 = vmax.f32 %v922_v15, 0.0 }
 0x21b   :  { %v1220_v14 = vpack.c.bf16 %v1120_v9, %v1120_v9  ;;  %v9010_v9 = vld [vmem:[%s16300_s2 + $0xa0] sm:$0xff] }
 0x21c   :  { %v10741_v49 = vpop.f32.mrf.mxu2  ;;  %1876 = vmatpush.bf16.msra.mxu2 %v9010_v9 }
 0x21d   :  { %v1736_v56 = vunpack.c.l.b16 %v1220_v14 }
 0x21f   :  { %v1738_v54 = vpack.c.b16 %v1736_v56, %v1735_v7 }
 0x220   :  { %v925_v4 = vpop.f32.mrf.mxu0 }
 0x221   :  { %8355 = vmatmul.msk.bf16.gmra.mxu3 %vm675_vm0, %v1738_v54  ;;  %v1121_v44 = vmax.f32 %v925_v4, 0.0 }
 0x223   :  { %8210 = vmatmul.msk.bf16.gmra.mxu0 %vm675_vm0, %v8964_v26  ;;  %v1221_v17 = vpack.c.bf16 %v1121_v44, %v1121_v44 }
 0x224   :  { %v1547_v35 = vpop.f32.mrf.mxu2 }
 0x225   :  { %v1554_v24 = vadd.f32 %v1547_v35, %v1498_v46  ;;  %v1789_v7 = vunpack.c.l.b16 %v1221_v17  ;;  %v8965_v46 = vld [vmem:[%s16298_s0 + $0xd8] sm:$0xff] }
 0x228   :  { %v927_v28 = vpop.f32.mrf.mxu0 }
 0x229   :  { %v1122_v14 = vmax.f32 %v927_v28, 0.0 }
 0x22b   :  { %v1222_v15 = vpack.c.bf16 %v1122_v14, %v1122_v14 }
 0x22d   :  { %v1790_v56 = vunpack.c.l.b16 %v1222_v15 }
 0x22f   :  { %v1793_v4 = vpack.c.b16 %v1790_v56, %v1789_v7  ;;  %v8966_v56 = vld [vmem:[%s16298_s0 + $0xe0] sm:$0xff] }
 0x230   :  { %v930_v54 = vpop.f32.mrf.mxu0 }
 0x231   :  { %8368 = vmatmul.msk.bf16.vlgmr.msra.gmra.mxu1 %vm675_vm0, %v1793_v4  ;;  %v1123_v35 = vmax.f32 %v930_v54, 0.0  ;;  %v10768_v54 = vpop.f32.mrf.mxu1 }
 0x233   :  { %8211 = vmatmul.msk.bf16.gmra.mxu0 %vm675_vm0, %v8965_v46  ;;  %v1223_v60 = vpack.c.bf16 %v1123_v35, %v1123_v35 }
 0x234   :  { %v1598_v26 = vpop.f32.mrf.mxu3 }
 0x235   :  { %v1608_v44 = vadd.f32 %v1598_v26, %v1552_v25  ;;  %v1791_v15 = vunpack.c.l.b16 %v1223_v60 }
 0x238   :  { %v932_v28 = vpop.f32.mrf.mxu0 }
 0x239   :  { %v1124_v14 = vmax.f32 %v932_v28, 0.0 }
 0x23b   :  { %v1224_v19 = vpack.c.bf16 %v1124_v14, %v1124_v14  ;;  %v9012_v14 = vld [vmem:[%s16300_s2 + $0xb0] sm:$0xff] }
 0x23c   :  { %v10761_v17 = vpop.f32.mrf.mxu3 }
 0x23d   :  { %v1792_v9 = vunpack.c.l.b16 %v1224_v19  ;;  %v9013_v19 = vld [vmem:[%s16300_s2 + $0xb8] sm:$0xff] }
 0x23e   :  { %1931 = vmatpush.bf16.msra.mxu3 %v9013_v19 }
 0x23f   :  { %v1794_v7 = vpack.c.b16 %v1792_v9, %v1791_v15 }
 0x240   :  { %v935_v63 = vpop.f32.mrf.mxu0 }
 0x241   :  { %8369 = vmatmul.msk.bf16.gmra.mxu1 %vm675_vm0, %v1794_v7  ;;  %v1125_v25 = vmax.f32 %v935_v63, 0.0 }
 0x242   :  { %1932 = vmatpush.bf16.msra.mxu3 %v9012_v14 }
 0x243   :  { %8212 = vmatmul.msk.bf16.gmra.mxu0 %vm675_vm0, %v8966_v56  ;;  %v1225_v35 = vpack.c.bf16 %v1125_v25, %v1125_v25  ;;  %v8967_v56 = vld [vmem:[%s16298_s0 + $0xe8] sm:$0xff] }
 0x244   :  { %v1603_v4 = vpop.f32.mrf.mxu3 }
 0x245   :  { %v1610_v46 = vadd.f32 %v1603_v4, %v1554_v24  ;;  %v1845_v15 = vunpack.c.l.b16 %v1225_v35 }
 0x248   :  { %v937_v26 = vpop.f32.mrf.mxu0 }
 0x249   :  { %v1126_v28 = vmax.f32 %v937_v26, 0.0 }
 0x24b   :  { %v1226_v60 = vpack.c.bf16 %v1126_v28, %v1126_v28 }
 0x24d   :  { %v1846_v9 = vunpack.c.l.b16 %v1226_v60 }
 0x24e   :  { %v1654_v7 = vpop.f32.mrf.mxu1 }
 0x24f   :  { %v1849_v63 = vpack.c.b16 %v1846_v9, %v1845_v15  ;;  %v1664_v24 = vadd.f32 %v1654_v7, %v1608_v44  ;;  %v8968_v7 = vld [vmem:[%s16298_s0 + $0xf0] sm:$0xff] }
 0x250   :  { %v940_v4 = vpop.f32.mrf.mxu0 }
 0x251   :  { %8382 = vmatmul.msk.bf16.vlgmr.msra.gmra.mxu2 %vm675_vm0, %v1849_v63  ;;  %v1127_v25 = vmax.f32 %v940_v4, 0.0  ;;  %v9015_v4 = vld [vmem:[%s16300_s2 + $0xc8] sm:$0xff] }
 0x252   :  { %1987 = vmatpush.bf16.msrb.mxu1 %v9015_v4 }
 0x253   :  { %8213 = vmatmul.msk.bf16.gmra.mxu0 %vm675_vm0, %v8967_v56  ;;  %v1227_v28 = vpack.c.bf16 %v1127_v25, %v1127_v25 }
 0x255   :  { %v1847_v53 = vunpack.c.l.b16 %v1227_v28  ;;  %v9014_v28 = vld [vmem:[%s16300_s2 + $0xc0] sm:$0xff] }
 0x256   :  { %v10781_v26 = vpop.f32.mrf.mxu1  ;;  %1988 = vmatpush.bf16.msrb.mxu1 %v9014_v28 }
 0x258   :  { %v942_v19 = vpop.f32.mrf.mxu0 }
 0x259   :  { %v1128_v35 = vmax.f32 %v942_v19, 0.0 }
 0x25b   :  { %v1228_v60 = vpack.c.bf16 %v1128_v35, %v1128_v35 }
 0x25d   :  { %v1848_v14 = vunpack.c.l.b16 %v1228_v60 }
 0x25e   :  { %v1659_v15 = vpop.f32.mrf.mxu1 }
 0x25f   :  { %v1666_v44 = vadd.f32 %v1659_v15, %v1610_v46  ;;  %v1850_v9 = vpack.c.b16 %v1848_v14, %v1847_v53  ;;  %v10791_v53 = vpop.f32.mrf.mxu2 }
 0x260   :  { %v945_v43 = vpop.f32.mrf.mxu0 }
 0x261   :  { %8383 = vmatmul.msk.bf16.gmra.mxu2 %vm675_vm0, %v1850_v9  ;;  %v1129_v63 = vmax.f32 %v945_v43, 0.0  ;;  %v8969_v43 = vld [vmem:[%s16298_s0 + $0xf8] sm:$0xff] }
 0x263   :  { %8214 = vmatmul.msk.bf16.gmra.mxu0 %vm675_vm0, %v8968_v7  ;;  %v1229_v25 = vpack.c.bf16 %v1129_v63, %v1129_v63 }
 0x265   :  { %v1901_v35 = vunpack.c.l.b16 %v1229_v25 }
 0x268   :  { %v947_v56 = vpop.f32.mrf.mxu0 }
 0x269   :  { %v1130_v19 = vmax.f32 %v947_v56, 0.0 }
 0x26b   :  { %v1230_v46 = vpack.c.bf16 %v1130_v19, %v1130_v19 }
 0x26d   :  { %v1902_v60 = vunpack.c.l.b16 %v1230_v46 }
 0x26f   :  { %v1905_v14 = vpack.c.b16 %v1902_v60, %v1901_v35  ;;  %v8970_v60 = vld [vmem:[%s16298_s0 + $0x100] sm:$0xff] }
 0x270   :  { %v950_v15 = vpop.f32.mrf.mxu0 }
 0x271   :  { %8396 = vmatmul.msk.bf16.vlgmr.msra.gmra.mxu3 %vm675_vm0, %v1905_v14  ;;  %v1131_v7 = vmax.f32 %v950_v15, 0.0 }
 0x273   :  { %8215 = vmatmul.msk.bf16.gmra.mxu0 %vm675_vm0, %v8969_v43  ;;  %v1231_v4 = vpack.c.bf16 %v1131_v7, %v1131_v7 }
 0x274   :  { %v1710_v9 = vpop.f32.mrf.mxu2 }
 0x275   :  { %v1720_v63 = vadd.f32 %v1710_v9, %v1664_v24  ;;  %v1903_v46 = vunpack.c.l.b16 %v1231_v4  ;;  %v9017_v9 = vld [vmem:[%s16300_s2 + $0xd8] sm:$0xff]  ;;  %v10809_v4 = vpop.f32.mrf.mxu3 }
 0x276   :  { %2043 = vmatpush.bf16.msrb.mxu2 %v9017_v9 }
 0x278   :  { %v952_v56 = vpop.f32.mrf.mxu0 }
 0x279   :  { %v1132_v19 = vmax.f32 %v952_v56, 0.0 }
 0x27b   :  { %v1232_v33 = vpack.c.bf16 %v1132_v19, %v1132_v19  ;;  %v9016_v19 = vld [vmem:[%s16300_s2 + $0xd0] sm:$0xff] }
 0x27c   :  { %v1712_v25 = vpop.f32.mrf.mxu2  ;;  %2044 = vmatpush.bf16.msrb.mxu2 %v9016_v19 }
 0x27d   :  { %v1904_v28 = vunpack.c.l.b16 %v1232_v33 }
 0x27f   :  { %v1906_v35 = vpack.c.b16 %v1904_v28, %v1903_v46 }
 0x280   :  { %v955_v23 = vpop.f32.mrf.mxu0 }
 0x281   :  { %8397 = vmatmul.msk.bf16.gmra.mxu3 %vm675_vm0, %v1906_v35  ;;  %v1133_v43 = vmax.f32 %v955_v23, 0.0  ;;  %v1381_v23 = vadd.f32 %v10675_v18, %v10677_v55  ;;  %v8971_v35 = vld [vmem:[%s16298_s0 + $0x108] sm:$0xff] }
 0x283   :  { %8216 = vmatmul.msk.bf16.gmra.mxu0 %vm675_vm0, %v8970_v60  ;;  %v1233_v7 = vpack.c.bf16 %v1133_v43, %v1133_v43 }
 0x284   :  { %v1715_v14 = vpop.f32.mrf.mxu2 }
 0x285   :  { %v1722_v24 = vadd.f32 %v1715_v14, %v1666_v44  ;;  %v1957_v46 = vunpack.c.l.b16 %v1233_v7  ;;  %v1441_v14 = vadd.f32 %v10701_v6, %v1381_v23 }
 0x287   :  { %v1497_v43 = vadd.f32 %v10721_v59, %v1441_v14 }
 0x288   :  { %v957_v15 = vpop.f32.mrf.mxu0 }
 0x289   :  { %v1134_v33 = vmax.f32 %v957_v15, 0.0  ;;  %v1553_v9 = vadd.f32 %v10741_v49, %v1497_v43  ;;  %v8972_v49 = vld [vmem:[%s16298_s0 + $0x110] sm:$0xff]  ;;  %v9019_v43 = vld [vmem:[%s16300_s2 + $0xe8] sm:$0xff] }
 0x28a   :  { %2099 = vmatpush.bf16.msrb.mxu3 %v9019_v43 }
 0x28b   :  { %v1234_v56 = vpack.c.bf16 %v1134_v33, %v1134_v33  ;;  %v1609_v55 = vadd.f32 %v10761_v17, %v1553_v9 }
 0x28d   :  { %v1958_v28 = vunpack.c.l.b16 %v1234_v56  ;;  %v1665_v56 = vadd.f32 %v10781_v26, %v1609_v55 }
 0x28f   :  { %v1961_v44 = vpack.c.b16 %v1958_v28, %v1957_v46  ;;  %v1721_v28 = vadd.f32 %v1712_v25, %v1665_v56 }
 0x290   :  { %v960_v60 = vpop.f32.mrf.mxu0 }
 0x291   :  { %8410 = vmatmul.msk.bf16.vlgmr.msrb.gmra.mxu1 %vm675_vm0, %v1961_v44  ;;  %v1135_v7 = vmax.f32 %v960_v60, 0.0  ;;  %v10831_v60 = vpop.f32.mrf.mxu1 }
 0x293   :  { %8217 = vmatmul.msk.bf16.gmra.mxu0 %vm675_vm0, %v8971_v35  ;;  %v1235_v19 = vpack.c.bf16 %v1135_v7, %v1135_v7  ;;  %v9018_v7 = vld [vmem:[%s16300_s2 + $0xe0] sm:$0xff] }
 0x294   :  { %v1766_v15 = vpop.f32.mrf.mxu3  ;;  %2100 = vmatpush.bf16.msrb.mxu3 %v9018_v7 }
 0x295   :  { %v1776_v33 = vadd.f32 %v1766_v15, %v1720_v63  ;;  %v1959_v44 = vunpack.c.l.b16 %v1235_v19 }
 0x298   :  { %v962_v18 = vpop.f32.mrf.mxu0 }
 0x299   :  { %v1136_v46 = vmax.f32 %v962_v18, 0.0 }
 0x29b   :  { %v1236_v6 = vpack.c.bf16 %v1136_v46, %v1136_v46  ;;  %v8973_v46 = vld [vmem:[%s16298_s0 + $0x118] sm:$0xff] }
 0x29c   :  { %v1768_v23 = vpop.f32.mrf.mxu3 }
 0x29d   :  { %v1960_v13 = vunpack.c.l.b16 %v1236_v6  ;;  %v1777_v59 = vadd.f32 %v1768_v23, %v1721_v28 }
 0x29f   :  { %v1962_v14 = vpack.c.b16 %v1960_v13, %v1959_v44 }
 0x2a0   :  { %v965_v35 = vpop.f32.mrf.mxu0 }
 0x2a1   :  { %8411 = vmatmul.msk.bf16.gmra.mxu1 %vm675_vm0, %v1962_v14  ;;  %v1137_v26 = vmax.f32 %v965_v35, 0.0 }
 0x2a3   :  { %8218 = vmatmul.msk.bf16.gmra.mxu0 %vm675_vm0, %v8972_v49  ;;  %v1237_v13 = vpack.c.bf16 %v1137_v26, %v1137_v26 }
 0x2a4   :  { %v1771_v17 = vpop.f32.mrf.mxu3 }
 0x2a5   :  { %v1778_v63 = vadd.f32 %v1771_v17, %v1722_v24  ;;  %v2013_v55 = vunpack.c.l.b16 %v1237_v13 }
 0x2a8   :  { %v967_v25 = vpop.f32.mrf.mxu0 }
 0x2a9   :  { %v1138_v15 = vmax.f32 %v967_v25, 0.0 }
 0x2ab   :  { %v1238_v9 = vpack.c.bf16 %v1138_v15, %v1138_v15  ;;  %v8974_v15 = vld [vmem:[%s16298_s0 + $0x120] sm:$0xff] }
 0x2ad   :  { %v2014_v18 = vunpack.c.l.b16 %v1238_v9 }
 0x2ae   :  { %v1822_v56 = vpop.f32.mrf.mxu1 }
 0x2af   :  { %v2017_v24 = vpack.c.b16 %v2014_v18, %v2013_v55  ;;  %v1832_v19 = vadd.f32 %v1822_v56, %v1776_v33  ;;  %v9021_v55 = vld [vmem:[%s16300_s2 + $0xf8] sm:$0xff] }
 0x2b0   :  { %v970_v28 = vpop.f32.mrf.mxu0  ;;  %2155 = vmatpush.bf16.msra.mxu1 %v9021_v55 }
 0x2b1   :  { %8424 = vmatmul.msk.bf16.vlgmr.msrb.gmra.mxu2 %vm675_vm0, %v2017_v24  ;;  %v1139_v6 = vmax.f32 %v970_v28, 0.0 }
 0x2b3   :  { %8219 = vmatmul.msk.bf16.gmra.mxu0 %vm675_vm0, %v8973_v46  ;;  %v1239_v49 = vpack.c.bf16 %v1139_v6, %v1139_v6  ;;  %v9020_v46 = vld [vmem:[%s16300_s2 + $0xf0] sm:$0xff] }
 0x2b4   :  { %2156 = vmatpush.bf16.msra.mxu1 %v9020_v46 }
 0x2b5   :  { %v2015_v26 = vunpack.c.l.b16 %v1239_v49 }
 0x2b6   :  { %v1824_v23 = vpop.f32.mrf.mxu1 }
 0x2b7   :  { %v1833_v44 = vadd.f32 %v1824_v23, %v1777_v59 }
 0x2b8   :  { %v972_v14 = vpop.f32.mrf.mxu0 }
 0x2b9   :  { %v1140_v35 = vmax.f32 %v972_v14, 0.0  ;;  %v8975_v14 = vld [vmem:[%s16298_s0 + $0x128] sm:$0xff] }
 0x2bb   :  { %v1240_v17 = vpack.c.bf16 %v1140_v35, %v1140_v35 }
 0x2bd   :  { %v2016_v25 = vunpack.c.l.b16 %v1240_v17 }
 0x2be   :  { %v1827_v43 = vpop.f32.mrf.mxu1 }
 0x2bf   :  { %v2018_v33 = vpack.c.b16 %v2016_v25, %v2015_v26  ;;  %v1834_v13 = vadd.f32 %v1827_v43, %v1778_v63  ;;  %v10852_v63 = vpop.f32.mrf.mxu2 }
 0x2c0   :  { %v975_v9 = vpop.f32.mrf.mxu0 }
 0x2c1   :  { %8425 = vmatmul.msk.bf16.gmra.mxu2 %vm675_vm0, %v2018_v33  ;;  %v1141_v7 = vmax.f32 %v975_v9, 0.0 }
 0x2c3   :  { %8220 = vmatmul.msk.bf16.gmra.mxu0 %vm675_vm0, %v8974_v15  ;;  %v1241_v18 = vpack.c.bf16 %v1141_v7, %v1141_v7 }
 0x2c5   :  { %v2069_v28 = vunpack.c.l.b16 %v1241_v18 }
 0x2c8   :  { %v977_v59 = vpop.f32.mrf.mxu0 }
 0x2c9   :  { %v1142_v56 = vmax.f32 %v977_v59, 0.0 }
 0x2cb   :  { %v1242_v24 = vpack.c.bf16 %v1142_v56, %v1142_v56 }
 0x2cd   :  { %v2070_v6 = vunpack.c.l.b16 %v1242_v24 }
 0x2cf   :  { %v2073_v23 = vpack.c.b16 %v2070_v6, %v2069_v28 }
 0x2d0   :  { %v980_v49 = vpop.f32.mrf.mxu0 }
 0x2d1   :  { %8438 = vmatmul.msk.bf16.vlgmr.msrb.gmra.mxu3 %vm675_vm0, %v2073_v23  ;;  %v1143_v17 = vmax.f32 %v980_v49, 0.0 }
 0x2d3   :  { %8221 = vmatmul.msk.bf16.gmra.mxu0 %vm675_vm0, %v8975_v14  ;;  %v1243_v43 = vpack.c.bf16 %v1143_v17, %v1143_v17 }
 0x2d4   :  { %v1878_v35 = vpop.f32.mrf.mxu2 }
 0x2d5   :  { %v1888_v26 = vadd.f32 %v1878_v35, %v1832_v19  ;;  %v2071_v7 = vunpack.c.l.b16 %v1243_v43  ;;  %v9023_v19 = vld [vmem:[%s16300_s2 + $0x108] sm:$0xff]  ;;  %v10866_v35 = vpop.f32.mrf.mxu3 }
 0x2d6   :  { %2211 = vmatpush.bf16.msra.mxu2 %v9023_v19 }
 0x2d8   :  { %v982_v25 = vpop.f32.mrf.mxu0 }
 0x2d9   :  { %v1144_v33 = vmax.f32 %v982_v25, 0.0 }
 0x2db   :  { %v1244_v15 = vpack.c.bf16 %v1144_v33, %v1144_v33 }
 0x2dc   :  { %v1880_v9 = vpop.f32.mrf.mxu2 }
 0x2dd   :  { %v2072_v59 = vunpack.c.l.b16 %v1244_v15  ;;  %v1889_v55 = vadd.f32 %v1880_v9, %v1833_v44  ;;  %v9022_v44 = vld [vmem:[%s16300_s2 + $0x100] sm:$0xff] }
 0x2de   :  { %2212 = vmatpush.bf16.msra.mxu2 %v9022_v44 }
 0x2df   :  { %v2074_v18 = vpack.c.b16 %v2072_v59, %v2071_v7 }
 0x2e0   :  { %v985_v56 = vpop.f32.mrf.mxu0 }
 0x2e1   :  { %8439 = vmatmul.msk.bf16.gmra.mxu3 %vm675_vm0, %v2074_v18  ;;  %v1145_v46 = vmax.f32 %v985_v56, 0.0 }
 0x2e3   :  { %v1245_v23 = vpack.c.bf16 %v1145_v46, %v1145_v46 }
 0x2e4   :  { %v1883_v24 = vpop.f32.mrf.mxu2 }
 0x2e5   :  { %v1890_v28 = vadd.f32 %v1883_v24, %v1834_v13  ;;  %v2125_v17 = vunpack.c.l.b16 %v1245_v23 }
 0x2e8   :  { %v987_v6 = vpop.f32.mrf.mxu0 }
 0x2e9   :  { %v1146_v14 = vmax.f32 %v987_v6, 0.0 }
 0x2eb   :  { %v1246_v49 = vpack.c.bf16 %v1146_v14, %v1146_v14 }
 0x2ed   :  { %v2126_v25 = vunpack.c.l.b16 %v1246_v49 }
 0x2ef   :  { %v2129_v43 = vpack.c.b16 %v2126_v25, %v2125_v17  ;;  %v10873_v17 = vpop.f32.mrf.mxu1 }
 0x2f0   :  { %v990_v13 = vpop.f32.mrf.mxu0 }
 0x2f1   :  { %8452 = vmatmul.msk.bf16.vlgmr.msra.gmra.mxu1 %vm675_vm0, %v2129_v43  ;;  %v1147_v15 = vmax.f32 %v990_v13, 0.0  ;;  %v9029_v43 = vld [vmem:[%s16300_s2 + $0x138] sm:$0xff] }
 0x2f2   :  { %2379 = vmatpush.bf16.msrb.mxu2 %v9029_v43 }
 0x2f3   :  { %v1247_v59 = vpack.c.bf16 %v1147_v15, %v1147_v15 }
 0x2f4   :  { %v1934_v33 = vpop.f32.mrf.mxu3 }
 0x2f5   :  { %v1944_v9 = vadd.f32 %v1934_v33, %v1888_v26  ;;  %v2127_v46 = vunpack.c.l.b16 %v1247_v59  ;;  %v9025_v26 = vld [vmem:[%s16300_s2 + $0x118] sm:$0xff] }
 0x2f6   :  { %2267 = vmatpush.bf16.msra.mxu3 %v9025_v26 }
 0x2f8   :  { %v992_v7 = vpop.f32.mrf.mxu0 }
 0x2f9   :  { %v1148_v18 = vmax.f32 %v992_v7, 0.0 }
 0x2fb   :  { %v1248_v56 = vpack.c.bf16 %v1148_v18, %v1148_v18 }
 0x2fc   :  { %v1936_v24 = vpop.f32.mrf.mxu3 }
 0x2fd   :  { %v2128_v6 = vunpack.c.l.b16 %v1248_v56  ;;  %v1945_v19 = vadd.f32 %v1936_v24, %v1889_v55 }
 0x2ff   :  { %v2130_v14 = vpack.c.b16 %v2128_v6, %v2127_v46  ;;  %v9027_v6 = vld [vmem:[%s16300_s2 + $0x128] sm:$0xff] }
 0x300   :  { %v995_v3 = vpop.f32.mrf.mxu0  ;;  %2323 = vmatpush.bf16.msrb.mxu1 %v9027_v6  ;;  %v9035_v6 = vld [vmem:[%s16300_s2 + $0x168] sm:$0xff] }
 0x301   :  { %8453 = vmatmul.msk.bf16.gmra.mxu1 %vm675_vm0, %v2130_v14  ;;  %v1149_v49 = vmax.f32 %v995_v3, 0.0  ;;  %v9024_v3 = vld [vmem:[%s16300_s2 + $0x110] sm:$0xff] }
 0x302   :  { %2268 = vmatpush.bf16.msra.mxu3 %v9024_v3 }
 0x303   :  { %v1249_v13 = vpack.c.bf16 %v1149_v49, %v1149_v49 }
 0x304   :  { %v1939_v23 = vpop.f32.mrf.mxu3 }
 0x305   :  { %v1946_v44 = vadd.f32 %v1939_v23, %v1890_v28  ;;  %v9028_v28 = vld [vmem:[%s16300_s2 + $0x130] sm:$0xff]  ;;  %v2181_v15 = vunpack.c.l.b16 %v1249_v13 }
 0x306   :  { %2380 = vmatpush.bf16.msrb.mxu2 %v9028_v28 }
 0x308   :  { %v997_v25 = vpop.f32.mrf.mxu0 }
 0x309   :  { %v1150_v55 = vmax.f32 %v997_v25, 0.0 }
 0x30b   :  { %v1250_v33 = vpack.c.bf16 %v1150_v55, %v1150_v55 }
 0x30d   :  { %v2182_v7 = vunpack.c.l.b16 %v1250_v33 }
 0x30e   :  { %v1990_v59 = vpop.f32.mrf.mxu1 }
 0x30f   :  { %v2185_v18 = vpack.c.b16 %v2182_v7, %v2181_v15  ;;  %v2000_v56 = vadd.f32 %v1990_v59, %v1944_v9  ;;  %v1161_v15 = vmax.f32 %v10587_v20, 0.0  ;;  %v1162_v7 = vmax.f32 %v10596_v48, 0.0 }
 0x310   :  { %v1000_v24 = vpop.f32.mrf.mxu0 }
 0x311   :  { %8466 = vmatmul.msk.bf16.vlgmr.msra.gmra.mxu2 %vm675_vm0, %v2185_v18  ;;  %v1151_v46 = vmax.f32 %v1000_v24, 0.0  ;;  %v1261_v18 = vpack.c.bf16 %v1161_v15, %v1161_v15  ;;  %v1262_v24 = vpack.c.bf16 %v1162_v7, %v1162_v7  ;;  %v1163_v7 = vmax.f32 %v10610_v40, 0.0 }
 0x312   :  { %2547 = vmatpush.bf16.msra.mxu2 %v9035_v6 }
 0x313   :  { %v1251_v25 = vpack.c.bf16 %v1151_v46, %v1151_v46  ;;  %v2349_v48 = vunpack.c.l.b16 %v1261_v18 }
 0x315   :  { %v2183_v13 = vunpack.c.l.b16 %v1251_v25 }
 0x316   :  { %v1992_v14 = vpop.f32.mrf.mxu1 }
 0x317   :  { %v2001_v23 = vadd.f32 %v1992_v14, %v1945_v19  ;;  %v9026_v19 = vld [vmem:[%s16300_s2 + $0x120] sm:$0xff] }
 0x318   :  { %v1002_v49 = vpop.f32.mrf.mxu0  ;;  %2324 = vmatpush.bf16.msrb.mxu1 %v9026_v19 }
 0x319   :  { %v1152_v26 = vmax.f32 %v1002_v49, 0.0  ;;  %v2350_v49 = vunpack.c.l.b16 %v1262_v24 }
 0x31b   :  { %v1252_v43 = vpack.c.bf16 %v1152_v26, %v1152_v26  ;;  %v10905_v26 = vpop.f32.mrf.mxu2 }
 0x31d   :  { %v2184_v55 = vunpack.c.l.b16 %v1252_v43  ;;  %v9030_v43 = vld [vmem:[%s16300_s2 + $0x140] sm:$0xff] }
 0x31e   :  { %v1995_v33 = vpop.f32.mrf.mxu1 }
 0x31f   :  { %v2186_v3 = vpack.c.b16 %v2184_v55, %v2183_v13  ;;  %v10891_v9 = vadd.f32 %v1995_v33, %v1946_v44  ;;  %v9031_v44 = vld [vmem:[%s16300_s2 + $0x148] sm:$0xff]  ;;  %v9034_v13 = vld [vmem:[%s16300_s2 + $0x160] sm:$0xff] }
 0x320   :  { %v1005_v28 = vpop.f32.mrf.mxu0  ;;  %2435 = vmatpush.bf16.msrb.mxu3 %v9031_v44  ;;  %2548 = vmatpush.bf16.msra.mxu2 %v9034_v13  ;;  %v1263_v44 = vpack.c.bf16 %v1163_v7, %v1163_v7  ;;  %v1166_v7 = vmax.f32 %v10641_v58, 0.0 }
 0x321   :  { %8467 = vmatmul.msk.bf16.gmra.mxu2 %vm675_vm0, %v2186_v3  ;;  %v1153_v59 = vmax.f32 %v1005_v28, 0.0  ;;  %v2353_v3 = vpack.c.b16 %v2350_v49, %v2349_v48 }
 0x322   :  { %v2351_v49 = vunpack.c.l.b16 %v1263_v44  ;;  %v9037_v44 = vld [vmem:[%s16300_s2 + $0x178] sm:$0xff] }
 0x323   :  { %v1253_v20 = vpack.c.bf16 %v1153_v59, %v1153_v59  ;;  %v1164_v59 = vmax.f32 %v10615_v21, 0.0 }
 0x324   :  { %2436 = vmatpush.bf16.msrb.mxu3 %v9030_v43 }
 0x325   :  { %v2237_v55 = vunpack.c.l.b16 %v1253_v20  ;;  %v1264_v6 = vpack.c.bf16 %v1164_v59, %v1164_v59  ;;  %v1173_v59 = vmax.f32 %v10621_v1, 0.0 }
 0x328   :  { %v1007_v46 = vpop.f32.mrf.mxu0 }
 0x329   :  { %v1154_v14 = vmax.f32 %v1007_v46, 0.0  ;;  %v9033_v46 = vld [vmem:[%s16300_s2 + $0x158] sm:$0xff] }
 0x32a   :  { %2491 = vmatpush.bf16.msra.mxu1 %v9033_v46 }
 0x32b   :  { %v1254_v25 = vpack.c.bf16 %v1154_v14, %v1154_v14 }
 0x32d   :  { %v2238_v33 = vunpack.c.l.b16 %v1254_v25  ;;  %v2352_v25 = vunpack.c.l.b16 %v1264_v6 }
 0x32f   :  { %v2241_v28 = vpack.c.b16 %v2238_v33, %v2237_v55 }
 0x330   :  { %v1010_v15 = vpop.f32.mrf.mxu0 }
 0x331   :  { %8480 = vmatmul.msk.bf16.vlgmr.msra.gmra.mxu3 %vm675_vm0, %v2241_v28  ;;  %8508 = vmatmul.msk.bf16.vlgmr.msrb.gmra.mxu2 %vm675_vm0, %v2353_v3  ;;  %v1155_v18 = vmax.f32 %v1010_v15, 0.0  ;;  %v9032_v28 = vld [vmem:[%s16300_s2 + $0x150] sm:$0xff]  ;;  %v1165_v15 = vmax.f32 %v10626_v51, 0.0  ;;  %v1273_v51 = vpack.c.bf16 %v1173_v59, %v1173_v59  ;;  %v1167_v59 = vmax.f32 %v10649_v27, 0.0 }
 0x332   :  { %2492 = vmatpush.bf16.msra.mxu1 %v9032_v28  ;;  %2603 = vmatpush.bf16.msra.mxu3 %v9037_v44 }
 0x333   :  { %v1255_v14 = vpack.c.bf16 %v1155_v18, %v1155_v18  ;;  %v1265_v6 = vpack.c.bf16 %v1165_v15, %v1165_v15 }
 0x334   :  { %v2046_v19 = vpop.f32.mrf.mxu2 }
 0x335   :  { %v10917_v24 = vadd.f32 %v2046_v19, %v2000_v56  ;;  %v2239_v13 = vunpack.c.l.b16 %v1255_v14  ;;  %v2354_v56 = vpack.c.b16 %v2352_v25, %v2351_v49  ;;  %v2405_v1 = vunpack.c.l.b16 %v1265_v6 }
 0x338   :  { %v1012_v20 = vpop.f32.mrf.mxu0 }
 0x339   :  { %v1156_v48 = vmax.f32 %v1012_v20, 0.0  ;;  %v1266_v20 = vpack.c.bf16 %v1166_v7, %v1166_v7  ;;  %v9039_v7 = vld [vmem:[%s16300_s2 + $0x188] sm:$0xff] }
 0x33b   :  { %v1256_v43 = vpack.c.bf16 %v1156_v48, %v1156_v48  ;;  %v2406_v25 = vunpack.c.l.b16 %v1266_v20 }
 0x33c   :  { %v2048_v40 = vpop.f32.mrf.mxu2 }
 0x33d   :  { %v2240_v21 = vunpack.c.l.b16 %v1256_v43  ;;  %v10922_v55 = vadd.f32 %v2048_v40, %v2001_v23  ;;  %v1174_v23 = vmax.f32 %v10631_v37, 0.0  ;;  %v2517_v43 = vunpack.c.l.b16 %v1273_v51 }
 0x33e   :  { %v1267_v51 = vpack.c.bf16 %v1167_v59, %v1167_v59 }
 0x33f   :  { %v2242_v33 = vpack.c.b16 %v2240_v21, %v2239_v13  ;;  %v1274_v14 = vpack.c.bf16 %v1174_v23, %v1174_v23  ;;  %v10939_v13 = vpop.f32.mrf.mxu3  ;;  %v1168_v23 = vmax.f32 %v10660_v29, 0.0 }
 0x340   :  { %v1015_v3 = vpop.f32.mrf.mxu0 }
 0x341   :  { %8481 = vmatmul.msk.bf16.gmra.mxu3 %vm675_vm0, %v2242_v33  ;;  %8509 = vmatmul.msk.bf16.gmra.mxu2 %vm675_vm0, %v2354_v56  ;;  %v1157_v18 = vmax.f32 %v1015_v3, 0.0  ;;  %v2518_v40 = vunpack.c.l.b16 %v1274_v14  ;;  %v9036_v56 = vld [vmem:[%s16300_s2 + $0x170] sm:$0xff]  ;;  %v2409_v33 = vpack.c.b16 %v2406_v25, %v2405_v1  ;;  %v1268_v14 = vpack.c.bf16 %v1168_v23, %v1168_v23 }
 0x342   :  { %2604 = vmatpush.bf16.msra.mxu3 %v9036_v56 }
 0x343   :  { %v1257_v48 = vpack.c.bf16 %v1157_v18, %v1157_v18  ;;  %v2521_v28 = vpack.c.b16 %v2518_v40, %v2517_v43  ;;  %v1176_v18 = vmax.f32 %v10654_v36, 0.0  ;;  %v2408_v27 = vunpack.c.l.b16 %v1268_v14 }
 0x344   :  { %v2051_v19 = vpop.f32.mrf.mxu2 }
 0x345   :  { %v10934_v46 = vadd.f32 %v2051_v19, %v10891_v9  ;;  %v2293_v9 = vunpack.c.l.b16 %v1257_v48  ;;  %v1175_v19 = vmax.f32 %v10645_v31, 0.0  ;;  %v1276_v48 = vpack.c.bf16 %v1176_v18, %v1176_v18 }
 0x347   :  { %v2520_v40 = vunpack.c.l.b16 %v1276_v48 }
 0x348   :  { %v1017_v58 = vpop.f32.mrf.mxu0 }
 0x349   :  { %v1158_v49 = vmax.f32 %v1017_v58, 0.0  ;;  %v1275_v58 = vpack.c.bf16 %v1175_v19, %v1175_v19  ;;  %v10967_v19 = vpop.f32.mrf.mxu1 }
 0x34b   :  { %v1258_v37 = vpack.c.bf16 %v1158_v49, %v1158_v49  ;;  %v2519_v29 = vunpack.c.l.b16 %v1275_v58 }
 0x34d   :  { %v2294_v21 = vunpack.c.l.b16 %v1258_v37  ;;  %v2407_v37 = vunpack.c.l.b16 %v1267_v51 }
 0x34f   :  { %v2297_v3 = vpack.c.b16 %v2294_v21, %v2293_v9  ;;  %v2410_v56 = vpack.c.b16 %v2408_v27, %v2407_v37  ;;  %v1180_v37 = vmax.f32 %v10657_v0, 0.0 }
 0x350   :  { %v1020_v15 = vpop.f32.mrf.mxu0 }
 0x351   :  { %8494 = vmatmul.msk.bf16.vlgmr.msrb.gmra.mxu1 %vm675_vm0, %v2297_v3  ;;  %8522 = vmatmul.msk.bf16.vlgmr.msrb.gmra.mxu3 %vm675_vm0, %v2409_v33  ;;  %v1159_v6 = vmax.f32 %v1020_v15, 0.0  ;;  %v9038_v3 = vld [vmem:[%s16300_s2 + $0x180] sm:$0xff]  ;;  %v1170_v15 = vmax.f32 %v10594_v10, 0.0 }
 0x352   :  { %8550 = vmatmul.msk.bf16.vlgmr.msra.gmra.mxu2 %vm675_vm0, %v2521_v28  ;;  %2659 = vmatpush.bf16.msrb.mxu1 %v9039_v7  ;;  %v1169_v28 = vmax.f32 %v10585_v30, 0.0  ;;  %v1177_v7 = vmax.f32 %v10624_v8, 0.0 }
 0x353   :  { %v1259_v1 = vpack.c.bf16 %v1159_v6, %v1159_v6 }
 0x354   :  { %v2102_v44 = vpop.f32.mrf.mxu3  ;;  %v1269_v18 = vpack.c.bf16 %v1169_v28, %v1169_v28  ;;  %v1277_v6 = vpack.c.bf16 %v1177_v7, %v1177_v7 }
 0x355   :  { %v2112_v20 = vadd.f32 %v2102_v44, %v10917_v24  ;;  %v2295_v31 = vunpack.c.l.b16 %v1259_v1  ;;  %v2522_v24 = vpack.c.b16 %v2520_v40, %v2519_v29  ;;  %v1270_v44 = vpack.c.bf16 %v1170_v15, %v1170_v15 }
 0x356   :  { %2660 = vmatpush.bf16.msrb.mxu1 %v9038_v3  ;;  %v2461_v14 = vunpack.c.l.b16 %v1269_v18  ;;  %v2573_v48 = vunpack.c.l.b16 %v1277_v6  ;;  %v1183_v18 = vmax.f32 %v10684_v57, 0.0 }
 0x357   :  { %v2462_v58 = vunpack.c.l.b16 %v1270_v44 }
 0x358   :  { %v1022_v49 = vpop.f32.mrf.mxu0 }
 0x359   :  { %v1160_v25 = vmax.f32 %v1022_v49, 0.0  ;;  %v2465_v10 = vpack.c.b16 %v2462_v58, %v2461_v14 }
 0x35b   :  { %v1260_v43 = vpack.c.bf16 %v1160_v25, %v1160_v25  ;;  %v1179_v25 = vmax.f32 %v10647_v11, 0.0  ;;  %v1182_v11 = vmax.f32 %v10679_v39, 0.0 }
 0x35c   :  { %v2104_v9 = vpop.f32.mrf.mxu3 }
 0x35d   :  { %v2296_v21 = vunpack.c.l.b16 %v1260_v43  ;;  %v2113_v36 = vadd.f32 %v2104_v9, %v10922_v55  ;;  %v1178_v55 = vmax.f32 %v10636_v47, 0.0  ;;  %v1171_v47 = vmax.f32 %v10604_v50, 0.0 }
 0x35e   :  { %v1279_v40 = vpack.c.bf16 %v1179_v25, %v1179_v25  ;;  %v1280_v9 = vpack.c.bf16 %v1180_v37, %v1180_v37  ;;  %v1282_v15 = vpack.c.bf16 %v1182_v11, %v1182_v11 }
 0x35f   :  { %v2298_v33 = vpack.c.b16 %v2296_v21, %v2295_v31  ;;  %v1278_v51 = vpack.c.bf16 %v1178_v55, %v1178_v55  ;;  %v1271_v27 = vpack.c.bf16 %v1171_v47, %v1171_v47  ;;  %v10981_v55 = vpop.f32.mrf.mxu2 }
 0x360   :  { %v2630_v7 = vunpack.c.l.b16 %v1282_v15 }
 0x361   :  { %8495 = vmatmul.msk.bf16.gmra.mxu1 %vm675_vm0, %v2298_v33  ;;  %8523 = vmatmul.msk.bf16.gmra.mxu3 %vm675_vm0, %v2410_v56  ;;  %v2574_v30 = vunpack.c.l.b16 %v1278_v51  ;;  %v2575_v56 = vunpack.c.l.b16 %v1279_v40  ;;  %v2576_v33 = vunpack.c.l.b16 %v1280_v9  ;;  %v1283_v51 = vpack.c.bf16 %v1183_v18, %v1183_v18 }
 0x362   :  { %8551 = vmatmul.msk.bf16.gmra.mxu2 %vm675_vm0, %v2522_v24 }
 0x363   :  { %v2577_v1 = vpack.c.b16 %v2574_v30, %v2573_v48  ;;  %v2578_v50 = vpack.c.b16 %v2576_v33, %v2575_v56 }
 0x364   :  { %v2107_v59 = vpop.f32.mrf.mxu3 }
 0x365   :  { %v2114_v23 = vadd.f32 %v2107_v59, %v10934_v46  ;;  %v1172_v46 = vmax.f32 %v10613_v61, 0.0  ;;  %v1181_v61 = vmax.f32 %v10665_v16, 0.0  ;;  %v2631_v16 = vunpack.c.l.b16 %v1283_v51 }
 0x367   :  { %v1272_v29 = vpack.c.bf16 %v1172_v46, %v1172_v46  ;;  %v1281_v0 = vpack.c.bf16 %v1181_v61, %v1181_v61 }
 0x369   :  { %v2464_v21 = vunpack.c.l.b16 %v1272_v29 }
 0x36e   :  { %v2158_v49 = vpop.f32.mrf.mxu1 }
 0x36f   :  { %v2168_v8 = vadd.f32 %v2158_v49, %v2112_v20  ;;  %v2463_v20 = vunpack.c.l.b16 %v1271_v27 }
 0x371   :  { %8536 = vmatmul.msk.bf16.vlgmr.msra.gmra.mxu1 %vm675_vm0, %v2465_v10  ;;  %8564 = vmatmul.msk.bf16.vlgmr.msra.gmra.mxu3 %vm675_vm0, %v2577_v1  ;;  %v2466_v3 = vpack.c.b16 %v2464_v21, %v2463_v20  ;;  %v10987_v10 = vpop.f32.mrf.mxu3 }
 0x376   :  { %v2160_v43 = vpop.f32.mrf.mxu1 }
 0x377   :  { %v10975_v31 = vadd.f32 %v2160_v43, %v2113_v36  ;;  %v2629_v36 = vunpack.c.l.b16 %v1281_v0 }
 0x379   :  { %v2633_v59 = vpack.c.b16 %v2630_v7, %v2629_v36 }
 0x37e   :  { %v2163_v24 = vpop.f32.mrf.mxu1 }
 0x37f   :  { %v2170_v28 = vadd.f32 %v2163_v24, %v2114_v23  ;;  %v1184_v23 = vmax.f32 %v10691_v45, 0.0 }
 0x381   :  { %8537 = vmatmul.msk.bf16.gmra.mxu1 %vm675_vm0, %v2466_v3  ;;  %8565 = vmatmul.msk.bf16.gmra.mxu3 %vm675_vm0, %v2578_v50  ;;  %v1284_v14 = vpack.c.bf16 %v1184_v23, %v1184_v23 }
 0x383   :  { %v2632_v58 = vunpack.c.l.b16 %v1284_v14 }
 0x385   :  { %v2634_v48 = vpack.c.b16 %v2632_v58, %v2631_v16 }
 0x386   :  { %v2165_v37 = vpop.f32.mrf.mxu1 }
 0x391   :  { %8578 = vmatmul.msk.bf16.vlgmr.msrb.gmra.mxu1 %vm675_vm0, %v2633_v59 }
 0x394   :  { %v2214_v44 = vpop.f32.mrf.mxu2 }
 0x395   :  { %v2224_v6 = vadd.f32 %v2214_v44, %v2168_v8 }
 0x39c   :  { %v2216_v39 = vpop.f32.mrf.mxu2 }
 0x3a1   :  { %8579 = vmatmul.msk.bf16.gmra.mxu1 %vm675_vm0, %v2634_v48 }
 0x3a4   :  { %v2219_v30 = vpop.f32.mrf.mxu2 }
 0x3a5   :  { %v2226_v49 = vadd.f32 %v2219_v30, %v2170_v28 }
 0x3ac   :  { %v10989_v46 = vpop.f32.mrf.mxu2 }
 0x3b4   :  { %v2270_v1 = vpop.f32.mrf.mxu3  ;;  %v2382_v45 = vpop.f32.mrf.mxu2 }
 0x3b5   :  { %v2280_v47 = vadd.f32 %v2270_v1, %v2224_v6  ;;  %v1386_v6 = vadd.f32 %v10731_v34, %v10708_v41 }
 0x3b7   :  { %v1443_v58 = vadd.f32 %v10751_v5, %v1386_v6 }
 0x3b9   :  { %v1499_v48 = vadd.f32 %v10768_v54, %v1443_v58 }
 0x3bb   :  { %v1555_v30 = vadd.f32 %v10791_v53, %v1499_v48 }
 0x3bc   :  { %v2272_v57 = vpop.f32.mrf.mxu3  ;;  %v2384_v43 = vpop.f32.mrf.mxu2 }
 0x3bd   :  { %v1611_v1 = vadd.f32 %v10809_v4, %v1555_v30 }
 0x3c4   :  { %v2275_v25 = vpop.f32.mrf.mxu3  ;;  %v2387_v33 = vpop.f32.mrf.mxu2 }
 0x3c5   :  { %v2282_v8 = vadd.f32 %v2275_v25, %v2226_v49 }
 0x3cc   :  { %v2277_v27 = vpop.f32.mrf.mxu3  ;;  %v2389_v61 = vpop.f32.mrf.mxu2 }
 0x3ce   :  { %v2326_v29 = vpop.f32.mrf.mxu1 }
 0x3cf   :  { %v2336_v40 = vadd.f32 %v2326_v29, %v2280_v47 }
 0x3d1   :  { %v2392_v9 = vadd.f32 %v2382_v45, %v2336_v40  ;;  %v1667_v45 = vadd.f32 %v10831_v60, %v1611_v1  ;;  %v2225_v40 = vadd.f32 %v2216_v39, %v10975_v31 }
 0x3d3   :  { %v1723_v29 = vadd.f32 %v10852_v63, %v1667_v45 }
 0x3d4   :  { %v2438_v20 = vpop.f32.mrf.mxu3 }
 0x3d5   :  { %v2448_v21 = vadd.f32 %v2438_v20, %v2392_v9  ;;  %v2550_v36 = vpop.f32.mrf.mxu2  ;;  %v1779_v34 = vadd.f32 %v10866_v35, %v1723_v29  ;;  %v2281_v9 = vadd.f32 %v2272_v57, %v2225_v40  ;;  %v9514_v35 = vld [vmem:[%s16301_s3] ss:$0 sm:$0xff] }
 0x3d6   :  { %v2328_v56 = vpop.f32.mrf.mxu1 }
 0x3d7   :  { %v1835_v54 = vadd.f32 %v10873_v17, %v1779_v34 }
 0x3d9   :  { %v1891_v4 = vadd.f32 %v10905_v26, %v1835_v54 }
 0x3db   :  { %v1947_v60 = vadd.f32 %v10939_v13, %v1891_v4 }
 0x3dc   :  { %v2440_v24 = vpop.f32.mrf.mxu3 }
 0x3dd   :  { %v2552_v14 = vpop.f32.mrf.mxu2 }
 0x3de   :  { %v2331_v3 = vpop.f32.mrf.mxu1 }
 0x3df   :  { %v2338_v50 = vadd.f32 %v2331_v3, %v2282_v8 }
 0x3e1   :  { %v2394_v28 = vadd.f32 %v2387_v33, %v2338_v50  ;;  %v2003_v33 = vadd.f32 %v10967_v19, %v1947_v60 }
 0x3e3   :  { %v2059_v63 = vadd.f32 %v10981_v55, %v2003_v33 }
 0x3e4   :  { %v2443_v11 = vpop.f32.mrf.mxu3 }
 0x3e5   :  { %v2450_v0 = vadd.f32 %v2443_v11, %v2394_v28  ;;  %v2555_v8 = vpop.f32.mrf.mxu2  ;;  %v2115_v17 = vadd.f32 %v10987_v10, %v2059_v63 }
 0x3e6   :  { %v2333_v15 = vpop.f32.mrf.mxu1 }
 0x3e7   :  { %v2171_v28 = vadd.f32 %v2165_v37, %v2115_v17 }
 0x3ec   :  { %v2445_v7 = vpop.f32.mrf.mxu3 }
 0x3ed   :  { %v2557_v6 = vpop.f32.mrf.mxu2 }
 0x3ee   :  { %v2494_v59 = vpop.f32.mrf.mxu1 }
 0x3ef   :  { %v2504_v18 = vadd.f32 %v2494_v59, %v2448_v21  ;;  %v2337_v21 = vadd.f32 %v2328_v56, %v2281_v9  ;;  %v2227_v56 = vadd.f32 %v10989_v46, %v2171_v28 }
 0x3f1   :  { %v2560_v23 = vadd.f32 %v2550_v36, %v2504_v18  ;;  %v2393_v3 = vadd.f32 %v2384_v43, %v2337_v21  ;;  %v2283_v11 = vadd.f32 %v2277_v27, %v2227_v56 }
 0x3f3   :  { %v2449_v50 = vadd.f32 %v2440_v24, %v2393_v3 }
 0x3f4   :  { %v2606_v44 = vpop.f32.mrf.mxu3 }
 0x3f5   :  { %v2616_v51 = vadd.f32 %v2606_v44, %v2560_v23 }
 0x3f6   :  { %v2496_v16 = vpop.f32.mrf.mxu1 }
 0x3f7   :  { %v2505_v39 = vadd.f32 %v2496_v16, %v2449_v50 }
 0x3f9   :  { %v2561_v13 = vadd.f32 %v2552_v14, %v2505_v39 }
 0x3fc   :  { %v2608_v49 = vpop.f32.mrf.mxu3 }
 0x3fd   :  { %v2617_v19 = vadd.f32 %v2608_v49, %v2561_v13 }
 0x3fe   :  { %v2499_v47 = vpop.f32.mrf.mxu1 }
 0x3ff   :  { %v2506_v25 = vadd.f32 %v2499_v47, %v2450_v0  ;;  %v2339_v0 = vadd.f32 %v2333_v15, %v2283_v11 }
 0x401   :  { %v2562_v41 = vadd.f32 %v2555_v8, %v2506_v25  ;;  %v2395_v36 = vadd.f32 %v2389_v61, %v2339_v0 }
 0x403   :  { %v2451_v59 = vadd.f32 %v2445_v7, %v2395_v36 }
 0x404   :  { %v2611_v5 = vpop.f32.mrf.mxu3 }
 0x405   :  { %v2618_v53 = vadd.f32 %v2611_v5, %v2562_v41 }
 0x406   :  { %v2501_v20 = vpop.f32.mrf.mxu1 }
 0x407   :  { %v2507_v23 = vadd.f32 %v2501_v20, %v2451_v59 }
 0x40c   :  { %v2613_v37 = vpop.f32.mrf.mxu3 }
 0x40e   :  { %v2662_v31 = vpop.f32.mrf.mxu1 }
 0x40f   :  { %v2672_v57 = vadd.f32 %v2662_v31, %v2616_v51  ;;  %v2563_v51 = vadd.f32 %v2557_v6, %v2507_v23 }
 0x411   :  { %v2680_v26 = vadd.f32 %v9514_v35, %v2672_v57  ;;  %v2619_v16 = vadd.f32 %v2613_v37, %v2563_v51 }
 0x416   :  { %v2664_v43 = vpop.f32.mrf.mxu1 }
 0x417   :  { %v2673_v55 = vadd.f32 %v2664_v43, %v2617_v19 }
 0x419   :  { %v2681_v24 = vadd.f32 %v9514_v35, %v2673_v55 }
 0x41b   :  { %2685 = vrot.lane.b32.xlu0 %v2681_v24, %s9862_s30 }
 0x41e   :  { %v2667_v18 = vpop.f32.mrf.mxu1 }
 0x41f   :  { %v2674_v10 = vadd.f32 %v2667_v18, %v2618_v53 }
 0x421   :  { %v2682_v44 = vadd.f32 %v9514_v35, %v2674_v10 }
 0x426   :  { %v2669_v46 = vpop.f32.mrf.mxu1 }
 0x427   :  { %v2675_v14 = vadd.f32 %v2669_v46, %v2619_v16 }
 0x429   :  { %v2683_v27 = vadd.f32 %v9514_v35, %v2675_v14 }
 0x42b   :  { %2691 = vrot.lane.b32.xlu0 %v2683_v27, %s9862_s30 }
 0x48d   :  { %v2686_v15 = vpop.permute.xlu0 %2685 }
 0x48e   :  { %v2689_v58 = vsel %vm2688_vm1, %v2680_v26, %v2686_v15 }
 0x48f   :  { %v2695_v48 = vmul.f32 %v2689_v58, %v2689_v58 }
 0x491   :  { %v2697_v61 = vrot.slane %v2695_v48, 4 }
 0x493   :  { %v2698_v30 = vadd.f32 %v2697_v61, %v2695_v48 }
 0x495   :  { %v2699_v49 = vrot.slane %v2698_v30, 2 }
 0x497   :  { %v2700_v7 = vadd.f32 %v2699_v49, %v2698_v30 }
 0x499   :  { %v2701_v1 = vrot.slane %v2700_v7, 1 }
 0x49b   :  { %v2702_v47 = vadd.f32 %v2701_v1, %v2700_v7 }
 0x49d   :  { %9515 = vrsqrt.f32 %v2702_v47  ;;  %v2692_v45 = vpop.permute.xlu0 %2691  ;;  %v2733_v25 = vadd.f32 1.0, %v2702_v47  ;;  %vm2716_vm5 = vcmp.eq.f32.partialorder %v2702_v47, inf  ;;  %v2719_v26 = vand.u32 2147483648, %v2702_v47 }
 0x49e   :  { %v11011_v8 = vsel %vm2688_vm1, %v2682_v44, %v2692_v45  ;;  %vm2718_vm6 = vcmp.eq.f32.partialorder %v2702_v47, 0.0 }
 0x49f   :  { %v2696_v29 = vmul.f32 %v11011_v8, %v11011_v8  ;;  %9517 = vrcp.f32 %v2733_v25  ;;  %v2746_v50 = vand.u32 2147483648, %v2733_v25  ;;  %v2744_v17 = vand.u32 2147483647, %v2733_v25 }
 0x4a0   :  { %vm2740_vm3 = vweird.f32 %v2733_v25 }
 0x4a1   :  { %v2703_v41 = vrot.slane %v2696_v29, 4  ;;  %v2747_v13 = vor.u32 1.1754944e-38, %v2746_v50  ;;  %vm2745_vm7 = vcmp.eq.f32.partialorder %v2744_v17, 8.507059e+37 }
 0x4a3   :  { %v9516_v34 = vpop.eup %9515  ;;  %v2704_v40 = vadd.f32 %v2703_v41, %v2696_v29 }
 0x4a4   :  { %v2710_v5 = vmul.f32 %v9516_v34, %v2702_v47 }
 0x4a5   :  { %v2705_v54 = vrot.slane %v2704_v40, 2  ;;  %v9518_v9 = vpop.eup %9517 }
 0x4a6   :  { %v2711_v53 = vmul.f32 %v9516_v34, %v2710_v5  ;;  %v2736_v20 = vmul.f32 %v9518_v9, %v2733_v25  ;;  %vm2741_vm2 = vweird.f32 %v9518_v9 }
 0x4a7   :  { %v2706_v4 = vadd.f32 %v2705_v54, %v2704_v40  ;;  %vm2742_vm4 = vmor %vm2740_vm3, %vm2741_vm2 }
 0x4a8   :  { %v2712_v21 = vmul.f32 0.5, %v2711_v53  ;;  %v2737_v60 = vsub.f32 1.0, %v2736_v20 }
 0x4a9   :  { %v2707_v33 = vrot.slane %v2706_v4, 1 }
 0x4aa   :  { %v2713_v3 = vsub.f32 1.5, %v2712_v21  ;;  %v2738_v63 = vmul.f32 %v9518_v9, %v2737_v60 }
 0x4ab   :  { %v2708_v35 = vadd.f32 %v2707_v33, %v2706_v4 }
 0x4ac   :  { %v2714_v31 = vmul.f32 %v9516_v34, %v2713_v3  ;;  %v2739_v39 = vadd.f32 %v9518_v9, %v2738_v63 }
 0x4ad   :  { %9519 = vrsqrt.f32 %v2708_v35  ;;  %v2734_v28 = vadd.f32 1.0, %v2708_v35  ;;  %vm2728_vm11 = vcmp.eq.f32.partialorder %v2708_v35, inf  ;;  %v2731_v15 = vand.u32 2147483648, %v2708_v35 }
 0x4ae   :  { %v2715_v57 = vmul.f32 %v2714_v31, %v2702_v47  ;;  %v2743_v56 = vsel %vm2742_vm4, %v9518_v9, %v2739_v39  ;;  %vm2730_vm12 = vcmp.eq.f32.partialorder %v2708_v35, 0.0 }
 0x4af   :  { %9521 = vrcp.f32 %v2734_v28  ;;  %v2748_v43 = vsel %vm2745_vm7, %v2747_v13, %v2743_v56  ;;  %v2761_v51 = vand.u32 2147483648, %v2734_v28  ;;  %v2759_v46 = vand.u32 2147483647, %v2734_v28 }
 0x4b0   :  { %v2717_v11 = vsel %vm2716_vm5, %v2702_v47, %v2715_v57  ;;  %vm2755_vm9 = vweird.f32 %v2734_v28 }
 0x4b1   :  { %v2720_v19 = vsel %vm2718_vm6, %v2719_v26, %v2717_v11  ;;  %v2762_v48 = vor.u32 1.1754944e-38, %v2761_v51  ;;  %vm2760_vm13 = vcmp.eq.f32.partialorder %v2759_v46, 8.507059e+37 }
 0x4b2   :  { %v2749_v0 = vmul.f32 %v2748_v43, %v2720_v19 }
 0x4b3   :  { %v9520_v55 = vpop.eup %9519 }
 0x4b4   :  { %v11015_v24 = vmul.f32 %v2749_v0, %v2689_v58  ;;  %v2722_v36 = vmul.f32 %v9520_v55, %v2708_v35 }
 0x4b5   :  { %v9522_v59 = vpop.eup %9521 }
 0x4b6   :  { %v2723_v18 = vmul.f32 %v9520_v55, %v2722_v36  ;;  %v2751_v23 = vmul.f32 %v9522_v59, %v2734_v28  ;;  %vm2756_vm8 = vweird.f32 %v9522_v59 }
 0x4b7   :  { %vm2757_vm10 = vmor %vm2755_vm9, %vm2756_vm8 }
 0x4b8   :  { %v2724_v10 = vmul.f32 0.5, %v2723_v18  ;;  %v2752_v44 = vsub.f32 1.0, %v2751_v23 }
 0x4ba   :  { %v2725_v6 = vsub.f32 1.5, %v2724_v10  ;;  %v2753_v37 = vmul.f32 %v9522_v59, %v2752_v44 }
 0x4bc   :  { %v2726_v16 = vmul.f32 %v9520_v55, %v2725_v6  ;;  %v2754_v14 = vadd.f32 %v9522_v59, %v2753_v37 }
 0x4be   :  { %v2727_v27 = vmul.f32 %v2726_v16, %v2708_v35  ;;  %v2758_v58 = vsel %vm2757_vm10, %v9522_v59, %v2754_v14 }
 0x4bf   :  { %v2763_v49 = vsel %vm2760_vm13, %v2762_v48, %v2758_v58 }
 0x4c0   :  { %v2729_v61 = vsel %vm2728_vm11, %v2708_v35, %v2727_v27 }
 0x4c1   :  { %v2732_v30 = vsel %vm2730_vm12, %v2731_v15, %v2729_v61 }
 0x4c2   :  { %v2764_v7 = vmul.f32 %v2763_v49, %v2732_v30 }
 0x4c4   :  { %v11018_v1 = vmul.f32 %v2764_v7, %v11011_v8 }
 0x4c5   :  { %9856 = dma.done.wait [#allocation4], 10240 }
 0x4c6   :  { %9857 = vsyncadd [#allocation4], 4294957056  ;;  %v9863_v47 = vmov 1.0   ;;  %v3715_v20 = vld [vmem:[%s16302_s4] sm:$0xff]  ;;  %vm3756_vm3 = vcmask 130048   ;;  %v3716_v4 = vld [vmem:[%s16302_s4 + $0x8] sm:$0xff]  ;;  %v16389_v11 = vunpack.c.l.bf16 %v9939_v2  ;;  %v16388_v19 = vunpack.c.l.bf16 %v9989_v12 }
 0x4c7   :  { %3739 = vadd.xlane.f32.xlu0 %v9863_v47  ;;  %v3717_v21 = vld [vmem:[%s16302_s4 + $0x10] sm:$0xff]  ;;  %v3718_v60 = vld [vmem:[%s16302_s4 + $0x18] sm:$0xff]  ;;  %v3719_v33 = vld [vmem:[%s16302_s4 + $0x20] sm:$0xff]  ;;  %v11081_v56 = vperm.slane %v11015_v24, 0  ;;  %v11084_v13 = vperm.slane %v11015_v24, 1  ;;  %v11089_v43 = vperm.slane %v11015_v24, 2  ;;  %v16387_v36 = vunpack.c.l.bf16 %v10039_v22 }
 0x4c8   :  { %v3720_v3 = vld [vmem:[%s16302_s4 + $0x28] sm:$0xff]  ;;  %v3721_v63 = vld [vmem:[%s16302_s4 + $0x30] sm:$0xff]  ;;  %v3722_v50 = vld [vmem:[%s16302_s4 + $0x38] sm:$0xff]  ;;  %v11102_v18 = vperm.slane %v11015_v24, 3  ;;  %v16386_v44 = vunpack.c.l.bf16 %v10089_v32  ;;  %v11109_v6 = vperm.slane %v11018_v1, 0  ;;  %v11112_v37 = vperm.slane %v11018_v1, 1 }
 0x4c9   :  { %v3723_v35 = vld [vmem:[%s16302_s4 + $0x40] sm:$0xff]  ;;  %v3724_v31 = vld [vmem:[%s16302_s4 + $0x48] sm:$0xff]  ;;  %v3725_v17 = vld [vmem:[%s16302_s4 + $0x50] sm:$0xff]  ;;  %v2818_v0 = vmul.f32 %v16389_v11, %v11081_v56  ;;  %v2901_v55 = vmul.f32 %v16388_v19, %v11084_v13  ;;  %v3024_v10 = vmul.f32 %v16387_v36, %v11089_v43  ;;  %v11116_v51 = vperm.slane %v11015_v24, 4 }
 0x4ca   :  { %v3726_v39 = vld [vmem:[%s16302_s4 + $0x58] sm:$0xff]  ;;  %v3727_v57 = vld [vmem:[%s16302_s4 + $0x60] sm:$0xff]  ;;  %v3728_v28 = vld [vmem:[%s16302_s4 + $0x68] sm:$0xff]  ;;  %v3147_v46 = vmul.f32 %v16386_v44, %v11102_v18  ;;  %v16385_v14 = vunpack.c.l.bf16 %v10139_v42  ;;  %v11123_v27 = vperm.slane %v11018_v1, 2  ;;  %v11126_v15 = vperm.slane %v11018_v1, 3 }
 0x4cb   :  { %v3729_v26 = vld [vmem:[%s16302_s4 + $0x70] sm:$0xff]  ;;  %v3730_v59 = vld [vmem:[%s16302_s4 + $0x78] sm:$0xff]  ;;  %v2941_v23 = vadd.f32 %v2901_v55, %v2818_v0  ;;  %v11129_v58 = vperm.slane %v11018_v1, 4  ;;  %v11132_v48 = vperm.slane %v11018_v1, 5  ;;  %v9123_v61 = vunpack.c.h.bf16 %v9939_v2 }
 0x4cc   :  { %v9163_v30 = vunpack.c.h.bf16 %v9989_v12  ;;  %v3270_v7 = vmul.f32 %v16385_v14, %v11116_v51  ;;  %v11140_v47 = vperm.slane %v11018_v1, 6  ;;  %v11176_v0 = vperm.slane %v11015_v24, 7 }
 0x4cd   :  { %v3064_v16 = vadd.f32 %v3024_v10, %v2941_v23  ;;  %v9323_v10 = vunpack.c.h.bf16 %v10189_v52 }
 0x4cf   :  { %v3187_v49 = vadd.f32 %v3147_v46, %v3064_v16 }
 0x53a   :  { %v3740_v45 = vpop.xlane.xlu0 %3739 }
 0x53b   :  { %9523 = vrcp.f32 %v3740_v45  ;;  %v3752_v34 = vand.u32 2147483648, %v3740_v45  ;;  %v3750_v5 = vand.u32 2147483647, %v3740_v45  ;;  %vm3746_vm15 = vweird.f32 %v3740_v45 }
 0x53d   :  { %v3753_v9 = vor.u32 1.1754944e-38, %v3752_v34  ;;  %vm3751_vm2 = vcmp.eq.f32.partialorder %v3750_v5, 8.507059e+37  ;;  %v2922_v34 = vmul.f32 %v9163_v30, %v11112_v37  ;;  %v2819_v5 = vmul.f32 %v9123_v61, %v11081_v56 }
 0x541   :  { %v9524_v25 = vpop.eup %9523 }
 0x542   :  { %v3742_v29 = vmul.f32 %v9524_v25, %v3740_v45  ;;  %vm3747_vm14 = vweird.f32 %v9524_v25  ;;  %v11143_v45 = vperm.slane %v11015_v24, 5 }
 0x543   :  { %vm3748_vm1 = vmor %vm3746_vm15, %vm3747_vm14 }
 0x544   :  { %v3743_v41 = vsub.f32 1.0, %v3742_v29  ;;  %v16384_v29 = vunpack.c.l.bf16 %v10189_v52 }
 0x546   :  { %v3744_v40 = vmul.f32 %v9524_v25, %v3743_v41  ;;  %v2839_v41 = vmul.f32 %v9123_v61, %v11109_v6 }
 0x548   :  { %v3745_v54 = vadd.f32 %v9524_v25, %v3744_v40  ;;  %v9203_v40 = vunpack.c.h.bf16 %v10039_v22 }
 0x54a   :  { %v3749_v53 = vsel %vm3748_vm1, %v9524_v25, %v3745_v54  ;;  %v11146_v25 = vperm.slane %v11015_v24, 6  ;;  %v3731_v54 = vld [vmem:[%s16302_s4 + $0x80] sm:$0xff] }
 0x54b   :  { %v3754_v8 = vsel %vm3751_vm2, %v3753_v9, %v3749_v53  ;;  %v2902_v9 = vmul.f32 %v9163_v30, %v11084_v13  ;;  %v3310_v53 = vadd.f32 %v3270_v7, %v3187_v49  ;;  %v16614_v30 = vld [vmem:[#allocation15_spill] sm:$0xff]  ;;  %v16615_v7 = vld [vmem:[#allocation25_spill] sm:$0xff] }
 0x54c   :  { %3831 = vmatpush.msrb.mxu2 %v3754_v8  ;;  %v9126_v49 = vunpack.c.l.bf16 %v16614_v30 }
 0x54e   :  { %3832 = vmatpush.msrb.mxu2 %v3754_v8  ;;  %v3393_v8 = vmul.f32 %v16384_v29, %v11143_v45 }
 0x54f   :  { %8580 = vmatmul.msk.f32.vlgmr.msrb.gmra.mxu2 %vm3756_vm3, %v3715_v20  ;;  %v16383_v20 = vunpack.c.l.bf16 %v10239_v62 }
 0x557   :  { %8581 = vmatmul.msk.f32.gmra.mxu2 %vm3756_vm3, %v3716_v4  ;;  %v2962_v4 = vadd.f32 %v2922_v34, %v2839_v41  ;;  %v3414_v34 = vmul.f32 %v9323_v10, %v11132_v48 }
 0x55f   :  { %8582 = vmatmul.msk.f32.gmra.mxu2 %vm3756_vm3, %v3717_v21  ;;  %v3045_v21 = vmul.f32 %v9203_v40, %v11123_v27 }
 0x567   :  { %8583 = vmatmul.msk.f32.gmra.mxu2 %vm3756_vm3, %v3718_v60  ;;  %v9243_v60 = vunpack.c.h.bf16 %v10089_v32 }
 0x56f   :  { %8584 = vmatmul.msk.f32.gmra.mxu2 %vm3756_vm3, %v3719_v33  ;;  %v3025_v33 = vmul.f32 %v9203_v40, %v11089_v43  ;;  %v9363_v40 = vunpack.c.h.bf16 %v10239_v62 }
 0x577   :  { %8585 = vmatmul.msk.f32.gmra.mxu2 %vm3756_vm3, %v3720_v3  ;;  %v2942_v3 = vadd.f32 %v2902_v9, %v2819_v5  ;;  %v3394_v5 = vmul.f32 %v9323_v10, %v11143_v45 }
 0x57f   :  { %8586 = vmatmul.msk.f32.gmra.mxu2 %vm3756_vm3, %v3721_v63  ;;  %v3433_v63 = vadd.f32 %v3393_v8, %v3310_v53  ;;  %v2840_v53 = vmul.f32 %v9126_v49, %v11109_v6 }
 0x587   :  { %8587 = vmatmul.msk.f32.gmra.mxu2 %vm3756_vm3, %v3722_v50  ;;  %v3516_v50 = vmul.f32 %v16383_v20, %v11146_v25  ;;  %v3733_v20 = vld [vmem:[%s16302_s4 + $0x90] sm:$0xff] }
 0x589   :  { %v3556_v55 = vadd.f32 %v3516_v50, %v3433_v63  ;;  %v3517_v63 = vmul.f32 %v9363_v40, %v11146_v25 }
 0x58f   :  { %8588 = vmatmul.msk.f32.gmra.mxu2 %vm3756_vm3, %v3723_v35  ;;  %v16382_v35 = vunpack.c.l.bf16 %v10289_v38 }
 0x591   :  { %v3639_v24 = vmul.f32 %v16382_v35, %v11176_v0 }
 0x597   :  { %8589 = vmatmul.msk.f32.gmra.mxu2 %vm3756_vm3, %v3724_v31  ;;  %v3085_v31 = vadd.f32 %v3045_v21, %v2962_v4  ;;  %v16616_v4 = vld [vmem:[#allocation35_spill] sm:$0xff] }
 0x598   :  { %v9206_v21 = vunpack.c.l.bf16 %v16616_v4 }
 0x59f   :  { %8590 = vmatmul.msk.f32.gmra.mxu2 %vm3756_vm3, %v3725_v17  ;;  %v3168_v17 = vmul.f32 %v9243_v60, %v11126_v15 }
 0x5a7   :  { %8591 = vmatmul.msk.f32.gmra.mxu2 %vm3756_vm3, %v3726_v39  ;;  %v9283_v39 = vunpack.c.h.bf16 %v10139_v42 }
 0x5a9   :  { %v3291_v23 = vmul.f32 %v9283_v39, %v11129_v58  ;;  %v3271_v16 = vmul.f32 %v9283_v39, %v11116_v51  ;;  %v16617_v39 = vld [vmem:[#allocation45_spill] sm:$0xff] }
 0x5af   :  { %8592 = vmatmul.msk.f32.gmra.mxu2 %vm3756_vm3, %v3727_v57  ;;  %v3148_v57 = vmul.f32 %v9243_v60, %v11102_v18 }
 0x5b7   :  { %8593 = vmatmul.msk.f32.gmra.mxu2 %vm3756_vm3, %v3728_v28  ;;  %v11173_v28 = vperm.slane %v11018_v1, 7  ;;  %v9166_v1 = vunpack.c.l.bf16 %v16615_v7 }
 0x5b9   :  { %v2923_v8 = vmul.f32 %v9166_v1, %v11112_v37 }
 0x5bf   :  { %8594 = vmatmul.msk.f32.gmra.mxu2 %vm3756_vm3, %v3729_v26  ;;  %v3065_v26 = vadd.f32 %v3025_v33, %v2942_v3  ;;  %v3537_v33 = vmul.f32 %v9363_v40, %v11140_v47  ;;  %v9403_v3 = vunpack.c.h.bf16 %v10289_v38 }
 0x5c1   :  { %v3188_v61 = vadd.f32 %v3148_v57, %v3065_v26  ;;  %v9246_v57 = vunpack.c.l.bf16 %v16617_v39  ;;  %v3640_v40 = vmul.f32 %v9403_v3, %v11176_v0 }
 0x5c3   :  { %v3311_v9 = vadd.f32 %v3271_v16, %v3188_v61  ;;  %v3169_v61 = vmul.f32 %v9246_v57, %v11126_v15 }
 0x5c5   :  { %v3434_v50 = vadd.f32 %v3394_v5, %v3311_v9  ;;  %v16620_v9 = vld [vmem:[#allocation65_spill] sm:$0xff] }
 0x5c7   :  { %8595 = vmatmul.msk.f32.gmra.mxu2 %vm3756_vm3, %v3730_v59  ;;  %v3208_v59 = vadd.f32 %v3168_v17, %v3085_v31  ;;  %v2963_v31 = vadd.f32 %v2923_v8, %v2840_v53  ;;  %v3046_v17 = vmul.f32 %v9206_v21, %v11123_v27  ;;  %v9326_v53 = vunpack.c.l.bf16 %v16620_v9 }
 0x5c9   :  { %v3331_v41 = vadd.f32 %v3291_v23, %v3208_v59  ;;  %v3660_v59 = vmul.f32 %v9403_v3, %v11173_v28  ;;  %v16618_v23 = vld [vmem:[#allocation55_spill] sm:$0xff]  ;;  %v3086_v16 = vadd.f32 %v3046_v17, %v2963_v31  ;;  %v3026_v17 = vmul.f32 %v9206_v21, %v11089_v43 }
 0x5ca   :  { %v9286_v10 = vunpack.c.l.bf16 %v16618_v23  ;;  %v3149_v3 = vmul.f32 %v9246_v57, %v11102_v18 }
 0x5cb   :  { %v3454_v60 = vadd.f32 %v3414_v34, %v3331_v41  ;;  %v2820_v41 = vmul.f32 %v9126_v49, %v11081_v56  ;;  %v11207_v34 = vadd.f32 %v3639_v24, %v3556_v55  ;;  %v3209_v31 = vadd.f32 %v3169_v61, %v3086_v16  ;;  %v16623_v55 = vld [vmem:[#allocation75_spill] sm:$0xff] }
 0x5cc   :  { %v3292_v5 = vmul.f32 %v9286_v10, %v11129_v58  ;;  %v3415_v49 = vmul.f32 %v9326_v53, %v11132_v48  ;;  %v9366_v24 = vunpack.c.l.bf16 %v16623_v55  ;;  %v3272_v29 = vmul.f32 %v9286_v10, %v11116_v51 }
 0x5cd   :  { %v3577_v26 = vadd.f32 %v3537_v33, %v3454_v60  ;;  %16619 = vst [vmem:[#allocation15_spill] sm:$0xff] %v11207_v34  ;;  %v3557_v33 = vadd.f32 %v3517_v63, %v3434_v50  ;;  %v9167_v63 = vunpack.c.h.bf16 %v16615_v7  ;;  %v16624_v50 = vld [vmem:[#allocation85_spill] sm:$0xff]  ;;  %v3395_v61 = vmul.f32 %v9326_v53, %v11143_v45 }
 0x5ce   :  { %v3538_v21 = vmul.f32 %v9366_v24, %v11140_v47  ;;  %v3518_v7 = vmul.f32 %v9366_v24, %v11146_v25 }
 0x5cf   :  { %8596 = vmatmul.msk.f32.gmra.mxu2 %vm3756_vm3, %v3731_v54  ;;  %v3732_v54 = vld [vmem:[%s16302_s4 + $0x88] sm:$0xff]  ;;  %v11215_v60 = vadd.f32 %v3660_v59, %v3577_v26  ;;  %v9127_v26 = vunpack.c.h.bf16 %v16614_v30  ;;  %v9406_v59 = vunpack.c.l.bf16 %v16624_v50 }
 0x5d1   :  { %16622 = vst [vmem:[#allocation35_spill] sm:$0xff] %v11215_v60  ;;  %v2841_v57 = vmul.f32 %v9127_v26, %v11109_v6  ;;  %v3661_v30 = vmul.f32 %v9406_v59, %v11173_v28 }
 0x5d2   :  { %v11181_v46 = vpop.f32.mrf.mxu2 }
 0x5d3   :  { %16613 = vst [vmem:[#allocation92_spill] sm:$0xff] %v11181_v46 }
 0x5d7   :  { %8597 = vmatmul.msk.f32.gmra.mxu2 %vm3756_vm3, %v3732_v54  ;;  %v2903_v54 = vmul.f32 %v9166_v1, %v11084_v13  ;;  %v3332_v1 = vadd.f32 %v3292_v5, %v3209_v31  ;;  %v9207_v5 = vunpack.c.h.bf16 %v16616_v4  ;;  %v9247_v31 = vunpack.c.h.bf16 %v16617_v39 }
 0x5d8   :  { %v9327_v4 = vunpack.c.h.bf16 %v16620_v9  ;;  %v3734_v9 = vld [vmem:[%s16302_s4 + $0x98] sm:$0xff] }
 0x5d9   :  { %v2943_v35 = vadd.f32 %v2903_v54, %v2820_v41  ;;  %v3455_v41 = vadd.f32 %v3415_v49, %v3332_v1  ;;  %v2924_v54 = vmul.f32 %v9167_v63, %v11112_v37  ;;  %v3047_v53 = vmul.f32 %v9207_v5, %v11123_v27 }
 0x5da   :  { %v11213_v8 = vpop.f32.mrf.mxu2  ;;  %v3170_v1 = vmul.f32 %v9247_v31, %v11126_v15 }
 0x5db   :  { %16621 = vst [vmem:[#allocation25_spill] sm:$0xff] %v11213_v8  ;;  %v3066_v16 = vadd.f32 %v3026_v17, %v2943_v35  ;;  %v3578_v14 = vadd.f32 %v3538_v21, %v3455_v41  ;;  %v2964_v35 = vadd.f32 %v2924_v54, %v2841_v57  ;;  %v9287_v17 = vunpack.c.h.bf16 %v16618_v23  ;;  %v16636_v8 = vld [vmem:[#allocation76_spill] sm:$0xff] }
 0x5dc   :  { %v2904_v21 = vmul.f32 %v9167_v63, %v11084_v13  ;;  %v3641_v41 = vmul.f32 %v9406_v59, %v11176_v0  ;;  %v3027_v23 = vmul.f32 %v9207_v5, %v11089_v43  ;;  %v3150_v57 = vmul.f32 %v9247_v31, %v11102_v18 }
 0x5dd   :  { %v3189_v10 = vadd.f32 %v3149_v3, %v3066_v16  ;;  %v11244_v3 = vadd.f32 %v3640_v40, %v3557_v33  ;;  %v3087_v24 = vadd.f32 %v3047_v53, %v2964_v35  ;;  %v3293_v39 = vmul.f32 %v9287_v17, %v11129_v58  ;;  %v16628_v35 = vld [vmem:[#allocation16_spill] sm:$0xff] }
 0x5de   :  { %v3416_v40 = vmul.f32 %v9327_v4, %v11132_v48  ;;  %v11256_v54 = vadd.f32 %v3661_v30, %v3578_v14  ;;  %v3273_v59 = vmul.f32 %v9287_v17, %v11116_v51  ;;  %v9130_v53 = vunpack.c.l.bf16 %v16628_v35  ;;  %v16629_v30 = vld [vmem:[#allocation26_spill] sm:$0xff] }
 0x5df   :  { %8598 = vmatmul.msk.f32.gmra.mxu2 %vm3756_vm3, %v3733_v20  ;;  %v3312_v49 = vadd.f32 %v3272_v29, %v3189_v10  ;;  %v2821_v20 = vmul.f32 %v9127_v26, %v11081_v56  ;;  %16626 = vst [vmem:[#allocation55_spill] sm:$0xff] %v11244_v3  ;;  %v9367_v29 = vunpack.c.h.bf16 %v16623_v55  ;;  %v3210_v26 = vadd.f32 %v3170_v1, %v3087_v24 }
 0x5e0   :  { %16627 = vst [vmem:[#allocation65_spill] sm:$0xff] %v11256_v54  ;;  %v3396_v1 = vmul.f32 %v9327_v4, %v11143_v45  ;;  %v2842_v17 = vmul.f32 %v9130_v53, %v11109_v6  ;;  %v9370_v38 = vunpack.c.l.bf16 %v16636_v8 }
 0x5e1   :  { %v3435_v16 = vadd.f32 %v3395_v61, %v3312_v49  ;;  %v2944_v33 = vadd.f32 %v2904_v21, %v2821_v20  ;;  %v9407_v61 = vunpack.c.h.bf16 %v16624_v50  ;;  %v3333_v55 = vadd.f32 %v3293_v39, %v3210_v26  ;;  %v16630_v20 = vld [vmem:[#allocation36_spill] sm:$0xff]  ;;  %v16631_v21 = vld [vmem:[#allocation46_spill] sm:$0xff] }
 0x5e2   :  { %v11242_v44 = vpop.f32.mrf.mxu2  ;;  %v3539_v5 = vmul.f32 %v9367_v29, %v11140_v47  ;;  %v3519_v14 = vmul.f32 %v9367_v29, %v11146_v25  ;;  %v9210_v24 = vunpack.c.l.bf16 %v16630_v20  ;;  %v16633_v26 = vld [vmem:[#allocation66_spill] sm:$0xff]  ;;  %v3520_v62 = vmul.f32 %v9370_v38, %v11146_v25 }
 0x5e3   :  { %16625 = vst [vmem:[#allocation45_spill] sm:$0xff] %v11242_v44  ;;  %v3558_v63 = vadd.f32 %v3518_v7, %v3435_v16  ;;  %v3067_v10 = vadd.f32 %v3027_v23, %v2944_v33  ;;  %v3662_v49 = vmul.f32 %v9407_v61, %v11173_v28  ;;  %v9170_v7 = vunpack.c.l.bf16 %v16629_v30  ;;  %v16632_v23 = vld [vmem:[#allocation56_spill] sm:$0xff] }
 0x5e4   :  { %v3456_v31 = vadd.f32 %v3416_v40, %v3333_v55  ;;  %v9250_v16 = vunpack.c.l.bf16 %v16631_v21  ;;  %v9330_v33 = vunpack.c.l.bf16 %v16633_v26  ;;  %v3048_v19 = vmul.f32 %v9210_v24, %v11123_v27 }
 0x5e5   :  { %v3190_v50 = vadd.f32 %v3150_v57, %v3067_v10  ;;  %v2925_v39 = vmul.f32 %v9170_v7, %v11112_v37  ;;  %v2822_v40 = vmul.f32 %v9130_v53, %v11081_v56  ;;  %v11277_v57 = vadd.f32 %v3641_v41, %v3558_v63 }
 0x5e6   :  { %v3579_v4 = vadd.f32 %v3539_v5, %v3456_v31  ;;  %v3642_v55 = vmul.f32 %v9407_v61, %v11176_v0  ;;  %v3171_v11 = vmul.f32 %v9250_v16, %v11126_v15  ;;  %v16637_v31 = vld [vmem:[#allocation86_spill] sm:$0xff]  ;;  %v3028_v41 = vmul.f32 %v9210_v24, %v11089_v43 }
 0x5e7   :  { %8599 = vmatmul.msk.f32.gmra.mxu2 %vm3756_vm3, %v3734_v9  ;;  %v9290_v9 = vunpack.c.l.bf16 %v16632_v23  ;;  %v3313_v29 = vadd.f32 %v3273_v59, %v3190_v50  ;;  %16635 = vst [vmem:[#allocation85_spill] sm:$0xff] %v11277_v57  ;;  %v2965_v10 = vadd.f32 %v2925_v39, %v2842_v17  ;;  %v3417_v59 = vmul.f32 %v9330_v33, %v11132_v48 }
 0x5e8   :  { %v9410_v50 = vunpack.c.l.bf16 %v16637_v31  ;;  %v11287_v63 = vadd.f32 %v3662_v49, %v3579_v4  ;;  %v3151_v17 = vmul.f32 %v9250_v16, %v11102_v18  ;;  %v3540_v39 = vmul.f32 %v9370_v38, %v11140_v47 }
 0x5e9   :  { %v3436_v46 = vadd.f32 %v3396_v1, %v3313_v29  ;;  %v3294_v44 = vmul.f32 %v9290_v9, %v11129_v58  ;;  %v3088_v5 = vadd.f32 %v3048_v19, %v2965_v10  ;;  %v3397_v10 = vmul.f32 %v9330_v33, %v11143_v45 }
 0x5ea   :  { %v11273_v36 = vpop.f32.mrf.mxu2  ;;  %16638 = vst [vmem:[#allocation16_spill] sm:$0xff] %v11287_v63  ;;  %v3663_v29 = vmul.f32 %v9410_v50, %v11173_v28  ;;  %v9131_v24 = vunpack.c.h.bf16 %v16628_v35  ;;  %v9291_v33 = vunpack.c.h.bf16 %v16632_v23  ;;  %v9331_v35 = vunpack.c.h.bf16 %v16633_v26 }
 0x5eb   :  { %16634 = vst [vmem:[#allocation75_spill] sm:$0xff] %v11273_v36  ;;  %v2905_v36 = vmul.f32 %v9170_v7, %v11084_v13  ;;  %v3559_v61 = vadd.f32 %v3519_v14, %v3436_v46  ;;  %v3211_v1 = vadd.f32 %v3171_v11, %v3088_v5  ;;  %v3274_v7 = vmul.f32 %v9290_v9, %v11116_v51 }
 0x5ec   :  { %v9171_v46 = vunpack.c.h.bf16 %v16629_v30  ;;  %v9251_v11 = vunpack.c.h.bf16 %v16631_v21  ;;  %v2843_v9 = vmul.f32 %v9131_v24, %v11109_v6  ;;  %v2823_v23 = vmul.f32 %v9131_v24, %v11081_v56 }
 0x5ed   :  { %v2945_v53 = vadd.f32 %v2905_v36, %v2822_v40  ;;  %v3334_v49 = vadd.f32 %v3294_v44, %v3211_v1  ;;  %v9211_v36 = vunpack.c.h.bf16 %v16630_v20  ;;  %v11301_v16 = vadd.f32 %v3642_v55, %v3559_v61 }
 0x5ee   :  { %v2926_v38 = vmul.f32 %v9171_v46, %v11112_v37  ;;  %v3643_v20 = vmul.f32 %v9410_v50, %v11176_v0  ;;  %v3172_v21 = vmul.f32 %v9251_v11, %v11126_v15  ;;  %v9371_v55 = vunpack.c.h.bf16 %v16636_v8 }
 0x5ef   :  { %v3068_v19 = vadd.f32 %v3028_v41, %v2945_v53  ;;  %16639 = vst [vmem:[#allocation26_spill] sm:$0xff] %v11301_v16  ;;  %v3457_v40 = vadd.f32 %v3417_v59, %v3334_v49  ;;  %v3049_v44 = vmul.f32 %v9211_v36, %v11123_v27  ;;  %v9411_v61 = vunpack.c.h.bf16 %v16637_v31 }
 0x5f0   :  { %v2966_v41 = vadd.f32 %v2926_v38, %v2843_v9  ;;  %v3295_v53 = vmul.f32 %v9291_v33, %v11129_v58  ;;  %v3029_v26 = vmul.f32 %v9211_v36, %v11089_v43  ;;  %v3541_v8 = vmul.f32 %v9371_v55, %v11140_v47  ;;  %v16642_v38 = vld [vmem:[#allocation27_spill] sm:$0xff] }
 0x5f1   :  { %v3191_v4 = vadd.f32 %v3151_v17, %v3068_v19  ;;  %v3580_v5 = vadd.f32 %v3540_v39, %v3457_v40  ;;  %v2906_v17 = vmul.f32 %v9171_v46, %v11084_v13  ;;  %v3664_v19 = vmul.f32 %v9411_v61, %v11173_v28 }
 0x5f2   :  { %v11299_v14 = vpop.f32.mrf.mxu2  ;;  %v3089_v50 = vadd.f32 %v3049_v44, %v2966_v41  ;;  %v3152_v24 = vmul.f32 %v9251_v11, %v11102_v18  ;;  %v3275_v49 = vmul.f32 %v9291_v33, %v11116_v51  ;;  %v3398_v46 = vmul.f32 %v9331_v35, %v11143_v45 }
 0x5f3   :  { %v3314_v30 = vadd.f32 %v3274_v7, %v3191_v4  ;;  %v11316_v1 = vadd.f32 %v3663_v29, %v3580_v5  ;;  %v3418_v7 = vmul.f32 %v9331_v35, %v11132_v48  ;;  %v2946_v31 = vadd.f32 %v2906_v17, %v2823_v23  ;;  %v16641_v4 = vld [vmem:[#allocation17_spill] sm:$0xff] }
 0x5f4   :  { %v9134_v36 = vunpack.c.l.bf16 %v16641_v4  ;;  %v3521_v40 = vmul.f32 %v9371_v55, %v11146_v25  ;;  %v9174_v44 = vunpack.c.l.bf16 %v16642_v38  ;;  %v3644_v22 = vmul.f32 %v9411_v61, %v11176_v0 }
 0x5f5   :  { %v3437_v59 = vadd.f32 %v3397_v10, %v3314_v30  ;;  %16640 = vst [vmem:[#allocation36_spill] sm:$0xff] %v11316_v1  ;;  %v3212_v10 = vadd.f32 %v3172_v21, %v3089_v50  ;;  %v3069_v9 = vadd.f32 %v3029_v26, %v2946_v31  ;;  %v16643_v30 = vld [vmem:[#allocation37_spill] sm:$0xff]  ;;  %v16646_v31 = vld [vmem:[#allocation67_spill] sm:$0xff] }
 0x5f6   :  { %v2844_v21 = vmul.f32 %v9134_v36, %v11109_v6  ;;  %v2927_v35 = vmul.f32 %v9174_v44, %v11112_v37  ;;  %v16645_v26 = vld [vmem:[#allocation57_spill] sm:$0xff]  ;;  %v9334_v52 = vunpack.c.l.bf16 %v16646_v31  ;;  %v2824_v12 = vmul.f32 %v9134_v36, %v11081_v56 }
 0x5f7   :  { %v3560_v39 = vadd.f32 %v3520_v62, %v3437_v59  ;;  %v9214_v62 = vunpack.c.l.bf16 %v16643_v30  ;;  %v3335_v11 = vadd.f32 %v3295_v53, %v3212_v10  ;;  %v3192_v33 = vadd.f32 %v3152_v24, %v3069_v9  ;;  %v16644_v59 = vld [vmem:[#allocation47_spill] sm:$0xff] }
 0x5f8   :  { %v9254_v17 = vunpack.c.l.bf16 %v16644_v59  ;;  %v9294_v50 = vunpack.c.l.bf16 %v16645_v26  ;;  %v2967_v53 = vadd.f32 %v2927_v35, %v2844_v21  ;;  %v16648_v24 = vld [vmem:[#allocation87_spill] sm:$0xff]  ;;  %v3399_v2 = vmul.f32 %v9334_v52, %v11143_v45 }
 0x5f9   :  { %v3050_v23 = vmul.f32 %v9214_v62, %v11123_v27  ;;  %v3458_v55 = vadd.f32 %v3418_v7, %v3335_v11  ;;  %v9414_v9 = vunpack.c.l.bf16 %v16648_v24  ;;  %v3419_v11 = vmul.f32 %v9334_v52, %v11132_v48 }
 0x5fa   :  { %v3849_v29 = vpop.f32.mrf.mxu2  ;;  %v3173_v10 = vmul.f32 %v9254_v17, %v11126_v15  ;;  %v9335_v52 = vunpack.c.h.bf16 %v16646_v31 }
 0x5fb   :  { %v3919_v5 = vmul.f32 %v3849_v29, %v11215_v60  ;;  %v3899_v41 = vmul.f32 %v3849_v29, %v11244_v3  ;;  %v16647_v60 = vld [vmem:[#allocation77_spill] sm:$0xff]  ;;  %v3315_v29 = vadd.f32 %v3275_v49, %v3192_v33  ;;  %v11339_v3 = vadd.f32 %v3643_v20, %v3560_v39 }
 0x5fc   :  { %v9374_v42 = vunpack.c.l.bf16 %v16647_v60  ;;  %v3581_v32 = vadd.f32 %v3541_v8, %v3458_v55  ;;  %v3665_v21 = vmul.f32 %v9414_v9, %v11173_v28  ;;  %v2907_v33 = vmul.f32 %v9174_v44, %v11084_v13 }
 0x5fd   :  { %3984 = vadd.xlane.f32.xlu1 %v3919_v5  ;;  %3944 = vadd.xlane.f32.xlu0 %v3899_v41  ;;  %16649 = vst [vmem:[#allocation46_spill] sm:$0xff] %v11339_v3  ;;  %v3296_v5 = vmul.f32 %v9294_v50, %v11129_v58  ;;  %v3438_v7 = vadd.f32 %v3398_v46, %v3315_v29 }
 0x5fe   :  { %v3090_v41 = vadd.f32 %v3050_v23, %v2967_v53  ;;  %v3542_v49 = vmul.f32 %v9374_v42, %v11140_v47  ;;  %v3030_v20 = vmul.f32 %v9214_v62, %v11089_v43  ;;  %v11349_v8 = vadd.f32 %v3664_v19, %v3581_v32 }
 0x5ff   :  { %v3561_v61 = vadd.f32 %v3521_v40, %v3438_v7  ;;  %v3153_v46 = vmul.f32 %v9254_v17, %v11102_v18  ;;  %v2947_v36 = vadd.f32 %v2907_v33, %v2824_v12  ;;  %v3276_v29 = vmul.f32 %v9294_v50, %v11116_v51 }
 0x600   :  { %16650 = vst [vmem:[#allocation56_spill] sm:$0xff] %v11349_v8  ;;  %v3213_v35 = vadd.f32 %v3173_v10, %v3090_v41  ;;  %v3522_v44 = vmul.f32 %v9374_v42, %v11146_v25  ;;  %v9135_v62 = vunpack.c.h.bf16 %v16641_v4  ;;  %v9175_v19 = vunpack.c.h.bf16 %v16642_v38 }
 0x601   :  { %v3070_v32 = vadd.f32 %v3030_v20, %v2947_v36  ;;  %v9215_v40 = vunpack.c.h.bf16 %v16643_v30  ;;  %v9255_v17 = vunpack.c.h.bf16 %v16644_v59  ;;  %v9295_v50 = vunpack.c.h.bf16 %v16645_v26 }
 0x602   :  { %v3852_v39 = vpop.f32.mrf.mxu2  ;;  %v3336_v53 = vadd.f32 %v3296_v5, %v3213_v35  ;;  %v2845_v12 = vmul.f32 %v9135_v62, %v11109_v6  ;;  %v11364_v5 = vadd.f32 %v3644_v22, %v3561_v61  ;;  %v2928_v4 = vmul.f32 %v9175_v19, %v11112_v37 }
 0x603   :  { %v3920_v23 = vmul.f32 %v3852_v39, %v11256_v54  ;;  %v3900_v55 = vmul.f32 %v3852_v39, %v11277_v57  ;;  %v3193_v42 = vadd.f32 %v3153_v46, %v3070_v32  ;;  %v3051_v7 = vmul.f32 %v9215_v40, %v11123_v27  ;;  %v16653_v32 = vld [vmem:[#allocation18_spill] sm:$0xff]  ;;  %v16661_v57 = vld [vmem:[#allocation88_spill] sm:$0xff] }
 0x604   :  { %v3459_v10 = vadd.f32 %v3419_v11, %v3336_v53  ;;  %16651 = vst [vmem:[#allocation66_spill] sm:$0xff] %v11364_v5  ;;  %v3645_v38 = vmul.f32 %v9414_v9, %v11176_v0  ;;  %v3174_v30 = vmul.f32 %v9255_v17, %v11126_v15  ;;  %v9375_v59 = vunpack.c.h.bf16 %v16647_v60 }
 0x605   :  { %3986 = vadd.xlane.f32.xlu2 %v3920_v23  ;;  %3946 = vadd.xlane.f32.xlu1 %v3900_v55  ;;  %v3316_v11 = vadd.f32 %v3276_v29, %v3193_v42  ;;  %v2968_v33 = vadd.f32 %v2928_v4, %v2845_v12  ;;  %v9415_v26 = vunpack.c.h.bf16 %v16648_v24  ;;  %v2825_v31 = vmul.f32 %v9135_v62, %v11081_v56 }
 0x606   :  { %v3582_v41 = vadd.f32 %v3542_v49, %v3459_v10  ;;  %v3297_v20 = vmul.f32 %v9295_v50, %v11129_v58  ;;  %v3420_v39 = vmul.f32 %v9335_v52, %v11132_v48  ;;  %v2908_v61 = vmul.f32 %v9175_v19, %v11084_v13 }
 0x607   :  { %v3031_v49 = vmul.f32 %v9215_v40, %v11089_v43  ;;  %v3439_v60 = vadd.f32 %v3399_v2, %v3316_v11  ;;  %v3091_v46 = vadd.f32 %v3051_v7, %v2968_v33  ;;  %v3543_v24 = vmul.f32 %v9375_v59, %v11140_v47  ;;  %v16655_v7 = vld [vmem:[#allocation38_spill] sm:$0xff]  ;;  %v16656_v33 = vld [vmem:[#allocation48_spill] sm:$0xff] }
 0x608   :  { %v11379_v23 = vadd.f32 %v3665_v21, %v3582_v41  ;;  %v2948_v55 = vadd.f32 %v2908_v61, %v2825_v31  ;;  %v3154_v36 = vmul.f32 %v9255_v17, %v11102_v18  ;;  %v3666_v53 = vmul.f32 %v9415_v26, %v11173_v28  ;;  %v16654_v21 = vld [vmem:[#allocation28_spill] sm:$0xff]  ;;  %v16657_v31 = vld [vmem:[#allocation58_spill] sm:$0xff] }
 0x609   :  { %v3214_v29 = vadd.f32 %v3174_v30, %v3091_v46  ;;  %v3277_v62 = vmul.f32 %v9295_v50, %v11116_v51  ;;  %v9138_v19 = vunpack.c.l.bf16 %v16653_v32  ;;  %v3562_v40 = vadd.f32 %v3522_v44, %v3439_v60  ;;  %v16659_v46 = vld [vmem:[#allocation78_spill] sm:$0xff] }
 0x60a   :  { %v3855_v22 = vpop.f32.mrf.mxu2  ;;  %16652 = vst [vmem:[#allocation76_spill] sm:$0xff] %v11379_v23  ;;  %v3071_v10 = vadd.f32 %v3031_v49, %v2948_v55  ;;  %v3400_v2 = vmul.f32 %v9335_v52, %v11143_v45  ;;  %v9178_v12 = vunpack.c.l.bf16 %v16654_v21  ;;  %v3523_v4 = vmul.f32 %v9375_v59, %v11146_v25  ;;  %v16658_v49 = vld [vmem:[#allocation68_spill] sm:$0xff] }
 0x60b   :  { %v3921_v9 = vmul.f32 %v3855_v22, %v11287_v63  ;;  %v3901_v35 = vmul.f32 %v3855_v22, %v11301_v16  ;;  %v3337_v42 = vadd.f32 %v3297_v20, %v3214_v29  ;;  %v2846_v17 = vmul.f32 %v9138_v19, %v11109_v6  ;;  %v16673_v16 = vld [vmem:[#allocation89_spill] sm:$0xff] }
 0x60c   :  { %v9218_v41 = vunpack.c.l.bf16 %v16655_v7  ;;  %v3194_v30 = vadd.f32 %v3154_v36, %v3071_v10  ;;  %v2929_v11 = vmul.f32 %v9178_v12, %v11112_v37  ;;  %v9258_v50 = vunpack.c.l.bf16 %v16656_v33 }
 0x60d   :  { %3988 = vadd.xlane.f32.xlu0 %v3921_v9  ;;  %3948 = vadd.xlane.f32.xlu2 %v3901_v35  ;;  %v9298_v22 = vunpack.c.l.bf16 %v16657_v31  ;;  %v3460_v44 = vadd.f32 %v3420_v39, %v3337_v42  ;;  %v3646_v61 = vmul.f32 %v9415_v26, %v11176_v0  ;;  %v9338_v20 = vunpack.c.l.bf16 %v16658_v49 }
 0x60e   :  { %v3052_v52 = vmul.f32 %v9218_v41, %v11123_v27  ;;  %v3317_v59 = vadd.f32 %v3277_v62, %v3194_v30  ;;  %v2969_v35 = vadd.f32 %v2929_v11, %v2846_v17  ;;  %v3175_v60 = vmul.f32 %v9258_v50, %v11126_v15 }
 0x60f   :  { %v9378_v55 = vunpack.c.l.bf16 %v16659_v46  ;;  %v11401_v10 = vadd.f32 %v3645_v38, %v3562_v40  ;;  %v3583_v39 = vadd.f32 %v3543_v24, %v3460_v44  ;;  %v3298_v54 = vmul.f32 %v9298_v22, %v11129_v58 }
 0x610   :  { %v3440_v42 = vadd.f32 %v3400_v2, %v3317_v59  ;;  %v3092_v26 = vadd.f32 %v3052_v52, %v2969_v35  ;;  %v9418_v63 = vunpack.c.l.bf16 %v16661_v57  ;;  %v3421_v62 = vmul.f32 %v9338_v20, %v11132_v48 }
 0x611   :  { %16660 = vst [vmem:[#allocation86_spill] sm:$0xff] %v11401_v10  ;;  %v2826_v17 = vmul.f32 %v9138_v19, %v11081_v56  ;;  %v2909_v30 = vmul.f32 %v9178_v12, %v11084_v13  ;;  %v9139_v11 = vunpack.c.h.bf16 %v16653_v32  ;;  %v3544_v24 = vmul.f32 %v9378_v55, %v11140_v47 }
 0x612   :  { %v3858_v9 = vpop.f32.mrf.mxu2  ;;  %v3215_v38 = vadd.f32 %v3175_v60, %v3092_v26  ;;  %v3032_v40 = vmul.f32 %v9218_v41, %v11089_v43  ;;  %v11411_v2 = vadd.f32 %v3666_v53, %v3583_v39  ;;  %v3667_v44 = vmul.f32 %v9418_v63, %v11173_v28 }
 0x613   :  { %v3922_v36 = vmul.f32 %v3858_v9, %v11316_v1  ;;  %v3902_v29 = vmul.f32 %v3858_v9, %v11339_v3  ;;  %v3563_v9 = vadd.f32 %v3523_v4, %v3440_v42  ;;  %v2949_v52 = vadd.f32 %v2909_v30, %v2826_v17 }
 0x614   :  { %16662 = vst [vmem:[#allocation17_spill] sm:$0xff] %v11411_v2  ;;  %v3155_v59 = vmul.f32 %v9258_v50, %v11102_v18  ;;  %v3338_v19 = vadd.f32 %v3298_v54, %v3215_v38  ;;  %v3278_v12 = vmul.f32 %v9298_v22, %v11116_v51  ;;  %v3401_v32 = vmul.f32 %v9338_v20, %v11143_v45 }
 0x615   :  { %3990 = vadd.xlane.f32.xlu1 %v3922_v36  ;;  %3950 = vadd.xlane.f32.xlu0 %v3902_v29  ;;  %v11415_v35 = vadd.f32 %v3646_v61, %v3563_v9  ;;  %v3072_v4 = vadd.f32 %v3032_v40, %v2949_v52  ;;  %v2847_v60 = vmul.f32 %v9139_v11, %v11109_v6  ;;  %v9179_v36 = vunpack.c.h.bf16 %v16654_v21 }
 0x616   :  { %v9219_v53 = vunpack.c.h.bf16 %v16655_v7  ;;  %v3461_v29 = vadd.f32 %v3421_v62, %v3338_v19  ;;  %v9259_v39 = vunpack.c.h.bf16 %v16656_v33  ;;  %v9299_v50 = vunpack.c.h.bf16 %v16657_v31 }
 0x617   :  { %16663 = vst [vmem:[#allocation27_spill] sm:$0xff] %v11415_v35  ;;  %v9339_v61 = vunpack.c.h.bf16 %v16658_v49  ;;  %v3195_v20 = vadd.f32 %v3155_v59, %v3072_v4  ;;  %v2930_v42 = vmul.f32 %v9179_v36, %v11112_v37  ;;  %v3524_v21 = vmul.f32 %v9378_v55, %v11146_v25 }
 0x618   :  { %v3584_v26 = vadd.f32 %v3544_v24, %v3461_v29  ;;  %v3647_v7 = vmul.f32 %v9418_v63, %v11176_v0  ;;  %v3053_v62 = vmul.f32 %v9219_v53, %v11123_v27  ;;  %v3176_v49 = vmul.f32 %v9259_v39, %v11126_v15  ;;  %v16665_v29 = vld [vmem:[#allocation19_spill] sm:$0xff] }
 0x619   :  { %v3318_v33 = vadd.f32 %v3278_v12, %v3195_v20  ;;  %v2970_v31 = vadd.f32 %v2930_v42, %v2847_v60  ;;  %v9379_v17 = vunpack.c.h.bf16 %v16659_v46  ;;  %v3299_v30 = vmul.f32 %v9299_v50, %v11129_v58 }
 0x61a   :  { %v3861_v41 = vpop.f32.mrf.mxu2  ;;  %v9419_v9 = vunpack.c.h.bf16 %v16661_v57  ;;  %v2827_v38 = vmul.f32 %v9139_v11, %v11081_v56  ;;  %v2910_v55 = vmul.f32 %v9179_v36, %v11084_v13  ;;  %v3422_v40 = vmul.f32 %v9339_v61, %v11132_v48 }
 0x61b   :  { %v3923_v54 = vmul.f32 %v3861_v41, %v11349_v8  ;;  %v3903_v22 = vmul.f32 %v3861_v41, %v11364_v5  ;;  %v3441_v24 = vadd.f32 %v3401_v32, %v3318_v33  ;;  %v3093_v63 = vadd.f32 %v3053_v62, %v2970_v31  ;;  %v16667_v62 = vld [vmem:[#allocation39_spill] sm:$0xff]  ;;  %v16668_v31 = vld [vmem:[#allocation49_spill] sm:$0xff] }
 0x61c   :  { %v3033_v52 = vmul.f32 %v9219_v53, %v11089_v43  ;;  %v11439_v59 = vadd.f32 %v3667_v44, %v3584_v26  ;;  %v3545_v19 = vmul.f32 %v9379_v17, %v11140_v47  ;;  %v2950_v12 = vadd.f32 %v2910_v55, %v2827_v38  ;;  %v16666_v53 = vld [vmem:[#allocation29_spill] sm:$0xff]  ;;  %v16669_v38 = vld [vmem:[#allocation59_spill] sm:$0xff] }
 0x61d   :  { %3992 = vadd.xlane.f32.xlu2 %v3923_v54  ;;  %3952 = vadd.xlane.f32.xlu1 %v3903_v22  ;;  %v3156_v46 = vmul.f32 %v9259_v39, %v11102_v18  ;;  %v3564_v4 = vadd.f32 %v3524_v21, %v3441_v24  ;;  %v3216_v60 = vadd.f32 %v3176_v49, %v3093_v63  ;;  %v9142_v54 = vunpack.c.l.bf16 %v16665_v29  ;;  %v16670_v24 = vld [vmem:[#allocation69_spill] sm:$0xff] }
 0x61e   :  { %16664 = vst [vmem:[#allocation37_spill] sm:$0xff] %v11439_v59  ;;  %v3668_v57 = vmul.f32 %v9419_v9, %v11173_v28  ;;  %v3279_v11 = vmul.f32 %v9299_v50, %v11116_v51  ;;  %v3073_v32 = vadd.f32 %v3033_v52, %v2950_v12  ;;  %v3402_v41 = vmul.f32 %v9339_v61, %v11143_v45  ;;  %v16671_v12 = vld [vmem:[#allocation79_spill] sm:$0xff]  ;;  %v16684_v8 = vld [vmem:[#allocation73_spill] sm:$0xff] }
 0x61f   :  { %v9182_v44 = vunpack.c.l.bf16 %v16666_v53  ;;  %v3339_v42 = vadd.f32 %v3299_v30, %v3216_v60  ;;  %v3525_v39 = vmul.f32 %v9379_v17, %v11146_v25  ;;  %v2848_v21 = vmul.f32 %v9142_v54, %v11109_v6 }
 0x620   :  { %v3196_v26 = vadd.f32 %v3156_v46, %v3073_v32  ;;  %v9222_v33 = vunpack.c.l.bf16 %v16667_v62  ;;  %v9262_v49 = vunpack.c.l.bf16 %v16668_v31  ;;  %v9302_v55 = vunpack.c.l.bf16 %v16669_v38 }
 0x621   :  { %v2931_v50 = vmul.f32 %v9182_v44, %v11112_v37  ;;  %v3462_v61 = vadd.f32 %v3422_v40, %v3339_v42  ;;  %v9342_v63 = vunpack.c.l.bf16 %v16670_v24  ;;  %v9382_v46 = vunpack.c.l.bf16 %v16671_v12 }
 0x622   :  { %v3864_v36 = vpop.f32.mrf.mxu2  ;;  %v3319_v52 = vadd.f32 %v3279_v11, %v3196_v26  ;;  %v3054_v17 = vmul.f32 %v9222_v33, %v11123_v27  ;;  %v11459_v60 = vadd.f32 %v3647_v7, %v3564_v4  ;;  %v3648_v32 = vmul.f32 %v9419_v9, %v11176_v0 }
 0x623   :  { %v3924_v22 = vmul.f32 %v3864_v36, %v11379_v23  ;;  %v3904_v20 = vmul.f32 %v3864_v36, %v11401_v10  ;;  %v2971_v30 = vadd.f32 %v2931_v50, %v2848_v21  ;;  %v3585_v36 = vadd.f32 %v3545_v19, %v3462_v61 }
 0x624   :  { %16672 = vst [vmem:[#allocation47_spill] sm:$0xff] %v11459_v60  ;;  %v3442_v40 = vadd.f32 %v3402_v41, %v3319_v52  ;;  %v3300_v42 = vmul.f32 %v9302_v55, %v11129_v58  ;;  %v9422_v1 = vunpack.c.l.bf16 %v16673_v16  ;;  %v3423_v11 = vmul.f32 %v9342_v63, %v11132_v48 }
 0x625   :  { %3994 = vadd.xlane.f32.xlu0 %v3924_v22  ;;  %3954 = vadd.xlane.f32.xlu2 %v3904_v20  ;;  %v3177_v22 = vmul.f32 %v9262_v49, %v11126_v15  ;;  %v3094_v20 = vadd.f32 %v3054_v17, %v2971_v30  ;;  %v2828_v26 = vmul.f32 %v9142_v54, %v11081_v56 }
 0x626   :  { %v2911_v21 = vmul.f32 %v9182_v44, %v11084_v13  ;;  %v3034_v7 = vmul.f32 %v9222_v33, %v11089_v43  ;;  %v11469_v19 = vadd.f32 %v3668_v57, %v3585_v36  ;;  %v3565_v9 = vadd.f32 %v3525_v39, %v3442_v40 }
 0x627   :  { %v3217_v50 = vadd.f32 %v3177_v22, %v3094_v20  ;;  %v3546_v41 = vmul.f32 %v9382_v46, %v11140_v47  ;;  %v3157_v17 = vmul.f32 %v9262_v49, %v11102_v18  ;;  %v3669_v44 = vmul.f32 %v9422_v1, %v11173_v28 }
 0x628   :  { %16674 = vst [vmem:[#allocation57_spill] sm:$0xff] %v11469_v19  ;;  %v2951_v30 = vadd.f32 %v2911_v21, %v2828_v26  ;;  %v11475_v3 = vadd.f32 %v3648_v32, %v3565_v9  ;;  %v3280_v33 = vmul.f32 %v9302_v55, %v11116_v51  ;;  %v3403_v39 = vmul.f32 %v9342_v63, %v11143_v45 }
 0x629   :  { %v3340_v54 = vadd.f32 %v3300_v42, %v3217_v50  ;;  %v3526_v36 = vmul.f32 %v9382_v46, %v11146_v25  ;;  %v9143_v22 = vunpack.c.h.bf16 %v16665_v29  ;;  %v9183_v20 = vunpack.c.h.bf16 %v16666_v53 }
 0x62a   :  { %v3867_v4 = vpop.f32.mrf.mxu2  ;;  %16675 = vst [vmem:[#allocation67_spill] sm:$0xff] %v11475_v3  ;;  %v3074_v57 = vadd.f32 %v3034_v7, %v2951_v30  ;;  %v9223_v49 = vunpack.c.h.bf16 %v16667_v62  ;;  %v9263_v32 = vunpack.c.h.bf16 %v16668_v31  ;;  %v9303_v55 = vunpack.c.h.bf16 %v16669_v38 }
 0x62b   :  { %v3925_v61 = vmul.f32 %v3867_v4, %v11411_v2  ;;  %v3905_v52 = vmul.f32 %v3867_v4, %v11415_v35  ;;  %v3463_v40 = vadd.f32 %v3423_v11, %v3340_v54  ;;  %v2849_v26 = vmul.f32 %v9143_v22, %v11109_v6 }
 0x62c   :  { %v3197_v42 = vadd.f32 %v3157_v17, %v3074_v57  ;;  %v9343_v21 = vunpack.c.h.bf16 %v16670_v24  ;;  %v3649_v63 = vmul.f32 %v9422_v1, %v11176_v0  ;;  %v2932_v46 = vmul.f32 %v9183_v20, %v11112_v37 }
 0x62d   :  { %3996 = vadd.xlane.f32.xlu1 %v3925_v61  ;;  %3956 = vadd.xlane.f32.xlu0 %v3905_v52  ;;  %v3586_v7 = vadd.f32 %v3546_v41, %v3463_v40  ;;  %v3055_v29 = vmul.f32 %v9223_v49, %v11123_v27  ;;  %v11493_v53 = vmul.f32 %v11299_v14, %v11207_v34  ;;  %v9383_v31 = vunpack.c.h.bf16 %v16671_v12 }
 0x62e   :  { %v3320_v11 = vadd.f32 %v3280_v33, %v3197_v42  ;;  %v3178_v62 = vmul.f32 %v9263_v32, %v11126_v15  ;;  %v2972_v38 = vadd.f32 %v2932_v46, %v2849_v26  ;;  %v3301_v24 = vmul.f32 %v9303_v55, %v11129_v58  ;;  %v16678_v46 = vld [vmem:[#allocation23_spill] sm:$0xff] }
 0x62f   :  { %v9423_v9 = vunpack.c.h.bf16 %v16673_v16  ;;  %v2829_v1 = vmul.f32 %v9143_v22, %v11081_v56  ;;  %v3424_v52 = vmul.f32 %v9343_v21, %v11132_v48  ;;  %v11503_v30 = vadd.f32 %v3669_v44, %v3586_v7  ;;  %v16677_v22 = vld [vmem:[#allocation13_spill] sm:$0xff] }
 0x630   :  { %v3443_v61 = vadd.f32 %v3403_v39, %v3320_v11  ;;  %v3095_v17 = vadd.f32 %v3055_v29, %v2972_v38  ;;  %v2912_v12 = vmul.f32 %v9183_v20, %v11084_v13  ;;  %v3035_v54 = vmul.f32 %v9223_v49, %v11089_v43 }
 0x631   :  { %16676 = vst [vmem:[#allocation77_spill] sm:$0xff] %v11503_v30  ;;  %v3547_v16 = vmul.f32 %v9383_v31, %v11140_v47  ;;  %v3670_v57 = vmul.f32 %v9423_v9, %v11173_v28  ;;  %v9119_v40 = vunpack.c.h.bf16 %v16677_v22  ;;  %v3158_v26 = vmul.f32 %v9263_v32, %v11102_v18 }
 0x632   :  { %v3870_v4 = vpop.f32.mrf.mxu2  ;;  %v3566_v33 = vadd.f32 %v3526_v36, %v3443_v61  ;;  %v3218_v42 = vadd.f32 %v3178_v62, %v3095_v17  ;;  %v2952_v39 = vadd.f32 %v2912_v12, %v2829_v1  ;;  %v3281_v44 = vmul.f32 %v9303_v55, %v11116_v51  ;;  %v16682_v1 = vld [vmem:[#allocation53_spill] sm:$0xff]  ;;  %v16683_v61 = vld [vmem:[#allocation63_spill] sm:$0xff] }
 0x633   :  { %v3926_v50 = vmul.f32 %v3870_v4, %v11439_v59  ;;  %v3906_v41 = vmul.f32 %v3870_v4, %v11459_v60  ;;  %v3404_v7 = vmul.f32 %v9343_v21, %v11143_v45  ;;  %v3527_v20 = vmul.f32 %v9383_v31, %v11146_v25  ;;  %v16679_v4 = vld [vmem:[#allocation33_spill] sm:$0xff]  ;;  %v16704_v59 = vld [vmem:[#allocation52_spill] sm:$0xff] }
 0x634   :  { %v2837_v49 = vmul.f32 %v9119_v40, %v11109_v6  ;;  %v9159_v36 = vunpack.c.h.bf16 %v16678_v46  ;;  %v3341_v29 = vadd.f32 %v3301_v24, %v3218_v42  ;;  %v3075_v11 = vadd.f32 %v3035_v54, %v2952_v39 }
 0x635   :  { %3998 = vadd.xlane.f32.xlu2 %v3926_v50  ;;  %3958 = vadd.xlane.f32.xlu1 %v3906_v41  ;;  %v9199_v38 = vunpack.c.h.bf16 %v16679_v4  ;;  %v16680_v50 = vld [vmem:[#allocation43_spill] sm:$0xff]  ;;  %v11518_v62 = vadd.f32 %v3649_v63, %v3566_v33  ;;  %v9279_v55 = vunpack.c.h.bf16 %v16682_v1  ;;  %v9319_v21 = vunpack.c.h.bf16 %v16683_v61 }
 0x636   :  { %v9239_v41 = vunpack.c.h.bf16 %v16680_v50  ;;  %v2920_v32 = vmul.f32 %v9159_v36, %v11112_v37  ;;  %v3464_v31 = vadd.f32 %v3424_v52, %v3341_v29  ;;  %v3198_v12 = vadd.f32 %v3158_v26, %v3075_v11  ;;  %v16685_v26 = vld [vmem:[#allocation83_spill] sm:$0xff] }
 0x637   :  { %16681 = vst [vmem:[#allocation87_spill] sm:$0xff] %v11518_v62  ;;  %v3043_v34 = vmul.f32 %v9199_v38, %v11123_v27  ;;  %v9359_v24 = vunpack.c.h.bf16 %v16684_v8  ;;  %v3650_v23 = vmul.f32 %v9423_v9, %v11176_v0  ;;  %v3289_v10 = vmul.f32 %v9279_v55, %v11129_v58 }
 0x638   :  { %v2960_v39 = vadd.f32 %v2920_v32, %v2837_v49  ;;  %v3166_v63 = vmul.f32 %v9239_v41, %v11126_v15  ;;  %v3587_v33 = vadd.f32 %v3547_v16, %v3464_v31  ;;  %v3321_v5 = vadd.f32 %v3281_v44, %v3198_v12 }
 0x639   :  { %v9399_v29 = vunpack.c.h.bf16 %v16685_v26  ;;  %v2817_v11 = vmul.f32 %v9119_v40, %v11081_v56  ;;  %v2900_v2 = vmul.f32 %v9159_v36, %v11084_v13  ;;  %v3412_v49 = vmul.f32 %v9319_v21, %v11132_v48 }
 0x63a   :  { %v3873_v17 = vpop.f32.mrf.mxu2  ;;  %v3083_v52 = vadd.f32 %v3043_v34, %v2960_v39  ;;  %v3444_v35 = vadd.f32 %v3404_v7, %v3321_v5  ;;  %v3535_v32 = vmul.f32 %v9359_v24, %v11140_v47  ;;  %v3023_v16 = vmul.f32 %v9199_v38, %v11089_v43 }
 0x63b   :  { %v3927_v54 = vmul.f32 %v3873_v17, %v11469_v19  ;;  %v3907_v42 = vmul.f32 %v3873_v17, %v11475_v3  ;;  %v11536_v44 = vadd.f32 %v3670_v57, %v3587_v33  ;;  %v2940_v17 = vadd.f32 %v2900_v2, %v2817_v11  ;;  %v16689_v57 = vld [vmem:[#allocation24_spill] sm:$0xff] }
 0x63c   :  { %v3206_v9 = vadd.f32 %v3166_v63, %v3083_v52  ;;  %v3146_v31 = vmul.f32 %v9239_v41, %v11102_v18  ;;  %v3567_v34 = vadd.f32 %v3527_v20, %v3444_v35  ;;  %v3658_v12 = vmul.f32 %v9399_v29, %v11173_v28  ;;  %v16692_v41 = vld [vmem:[#allocation34_spill] sm:$0xff] }
 0x63d   :  { %4000 = vadd.xlane.f32.xlu0 %v3927_v54  ;;  %3960 = vadd.xlane.f32.xlu2 %v3907_v42  ;;  %16686 = vst [vmem:[#allocation18_spill] sm:$0xff] %v11536_v44  ;;  %v3269_v40 = vmul.f32 %v9279_v55, %v11116_v51  ;;  %v3392_v36 = vmul.f32 %v9319_v21, %v11143_v45  ;;  %v16687_v54 = vld [vmem:[#allocation14_spill] sm:$0xff]  ;;  %v16690_v38 = vunpack.c.l.bf16 %v16689_v57  ;;  %v16693_v55 = vunpack.c.l.bf16 %v16692_v41 }
 0x63e   :  { %v3329_v5 = vadd.f32 %v3289_v10, %v3206_v9  ;;  %v3063_v7 = vadd.f32 %v3023_v16, %v2940_v17  ;;  %v16688_v42 = vunpack.c.l.bf16 %v16687_v54  ;;  %v11548_v33 = vadd.f32 %v3650_v23, %v3567_v34  ;;  %v16694_v17 = vld [vmem:[#allocation44_spill] sm:$0xff]  ;;  %v16696_v34 = vld [vmem:[#allocation54_spill] sm:$0xff] }
 0x63f   :  { %v2921_v63 = vmul.f32 %v16690_v38, %v11112_v37  ;;  %v3515_v35 = vmul.f32 %v9359_v24, %v11146_v25  ;;  %v3638_v20 = vmul.f32 %v9399_v29, %v11176_v0  ;;  %v3044_v10 = vmul.f32 %v16693_v55, %v11123_v27  ;;  %v16698_v29 = vld [vmem:[#allocation64_spill] sm:$0xff] }
 0x640   :  { %v2838_v39 = vmul.f32 %v16688_v42, %v11109_v6  ;;  %16691 = vst [vmem:[#allocation28_spill] sm:$0xff] %v11548_v33  ;;  %v3452_v11 = vadd.f32 %v3412_v49, %v3329_v5  ;;  %v3186_v16 = vadd.f32 %v3146_v31, %v3063_v7  ;;  %v16695_v54 = vunpack.c.l.bf16 %v16694_v17  ;;  %v16701_v31 = vld [vmem:[#allocation22_spill] sm:$0xff] }
 0x641   :  { %v16697_v24 = vunpack.c.l.bf16 %v16696_v34  ;;  %v16699_v57 = vunpack.c.l.bf16 %v16698_v29  ;;  %v16436_v5 = vunpack.c.h.bf16 %v16701_v31  ;;  %v16703_v17 = vld [vmem:[#allocation42_spill] sm:$0xff]  ;;  %v16440_v34 = vunpack.c.h.bf16 %v16704_v59 }
 0x642   :  { %v3876_v2 = vpop.f32.mrf.mxu2  ;;  %v2961_v9 = vadd.f32 %v2921_v63, %v2838_v39  ;;  %v3167_v23 = vmul.f32 %v16695_v54, %v11126_v15  ;;  %v3575_v41 = vadd.f32 %v3535_v32, %v3452_v11  ;;  %v3309_v55 = vadd.f32 %v3269_v40, %v3186_v16  ;;  %v16702_v39 = vld [vmem:[#allocation32_spill] sm:$0xff] }
 0x643   :  { %v3928_v21 = vmul.f32 %v3876_v2, %v11503_v30  ;;  %v3908_v52 = vmul.f32 %v3876_v2, %v11518_v62  ;;  %v3290_v42 = vmul.f32 %v16697_v24, %v11129_v58  ;;  %v3413_v38 = vmul.f32 %v16699_v57, %v11132_v48  ;;  %v16700_v2 = vld [vmem:[#allocation12_spill] sm:$0xff] }
 0x644   :  { %v16439_v49 = vunpack.c.h.bf16 %v16700_v2  ;;  %v3084_v7 = vadd.f32 %v3044_v10, %v2961_v9  ;;  %v16437_v63 = vunpack.c.h.bf16 %v16702_v39  ;;  %v16438_v54 = vunpack.c.h.bf16 %v16703_v17  ;;  %v16706_v10 = vld [vmem:[#allocation74_spill] sm:$0xff]  ;;  %v16708_v16 = vld [vmem:[#allocation84_spill] sm:$0xff] }
 0x645   :  { %4002 = vadd.xlane.f32.xlu2 %v3928_v21  ;;  %3962 = vadd.xlane.f32.xlu1 %v3908_v52  ;;  %v11571_v24 = vadd.f32 %v3658_v12, %v3575_v41  ;;  %v3432_v60 = vadd.f32 %v3392_v36, %v3309_v55  ;;  %v2898_v32 = vmul.f32 %v16436_v5, %v11084_v13  ;;  %v16707_v52 = vunpack.c.l.bf16 %v16706_v10  ;;  %v16710_v55 = vld [vmem:[#allocation62_spill] sm:$0xff] }
 0x646   :  { %v2815_v21 = vmul.f32 %v16439_v49, %v11081_v56  ;;  %v3207_v40 = vadd.f32 %v3167_v23, %v3084_v7  ;;  %v16709_v9 = vunpack.c.l.bf16 %v16708_v16  ;;  %v3021_v12 = vmul.f32 %v16437_v63, %v11089_v43 }
 0x647   :  { %16705 = vst [vmem:[#allocation38_spill] sm:$0xff] %v11571_v24  ;;  %v3536_v11 = vmul.f32 %v16707_v52, %v11140_v47  ;;  %v3555_v36 = vadd.f32 %v3515_v35, %v3432_v60  ;;  %v3144_v41 = vmul.f32 %v16438_v54, %v11102_v18  ;;  %v16445_v23 = vunpack.c.h.bf16 %v16710_v55  ;;  %v16711_v52 = vld [vmem:[#allocation72_spill] sm:$0xff]  ;;  %v16712_v35 = vld [vmem:[#allocation75_spill] sm:$0xff] }
 0x648   :  { %v3659_v29 = vmul.f32 %v16709_v9, %v11173_v28  ;;  %v2938_v57 = vadd.f32 %v2898_v32, %v2815_v21  ;;  %v3330_v5 = vadd.f32 %v3290_v42, %v3207_v40  ;;  %v3267_v10 = vmul.f32 %v16440_v34, %v11116_v51  ;;  %v16714_v40 = vld [vmem:[#allocation82_spill] sm:$0xff] }
 0x649   :  { %v16443_v16 = vunpack.c.h.bf16 %v16711_v52  ;;  %v9118_v9 = vunpack.c.l.bf16 %v16677_v22  ;;  %v3917_v21 = vmul.f32 %v16712_v35, %v11571_v24  ;;  %v11601_v54 = vadd.f32 %v3638_v20, %v3555_v36 }
 0x64a   :  { %v3879_v7 = vpop.f32.mrf.mxu2  ;;  %v3061_v32 = vadd.f32 %v3021_v12, %v2938_v57  ;;  %v3453_v49 = vadd.f32 %v3413_v38, %v3330_v5  ;;  %v3390_v42 = vmul.f32 %v16445_v23, %v11143_v45  ;;  %v16444_v34 = vunpack.c.h.bf16 %v16714_v40 }
 0x64b   :  { %v3929_v63 = vmul.f32 %v3879_v7, %v11536_v44  ;;  %v3909_v60 = vmul.f32 %v3879_v7, %v11548_v33  ;;  %16713 = vst [vmem:[#allocation48_spill] sm:$0xff] %v11601_v54  ;;  %v3513_v7 = vmul.f32 %v16443_v16, %v11146_v25  ;;  %v2836_v24 = vmul.f32 %v9118_v9, %v11109_v6 }
 0x64c   :  { %v3184_v22 = vadd.f32 %v3144_v41, %v3061_v32  ;;  %v9158_v20 = vunpack.c.l.bf16 %v16678_v46  ;;  %v3576_v38 = vadd.f32 %v3536_v11, %v3453_v49  ;;  %v9198_v5 = vunpack.c.l.bf16 %v16679_v4 }
 0x64d   :  { %3942 = vadd.xlane.f32.xlu2 %v11493_v53  ;;  %4004 = vadd.xlane.f32.xlu1 %v3929_v63  ;;  %v9238_v12 = vunpack.c.l.bf16 %v16680_v50  ;;  %v9278_v36 = vunpack.c.l.bf16 %v16682_v1  ;;  %v9318_v63 = vunpack.c.l.bf16 %v16683_v61  ;;  %v9358_v41 = vunpack.c.l.bf16 %v16684_v8 }
 0x64e   :  { %3964 = vadd.xlane.f32.xlu0 %v3909_v60  ;;  %v3307_v57 = vadd.f32 %v3267_v10, %v3184_v22  ;;  %v2919_v53 = vmul.f32 %v9158_v20, %v11112_v37  ;;  %v3897_v32 = vmul.f32 %v16712_v35, %v11601_v54  ;;  %v11621_v16 = vadd.f32 %v3659_v29, %v3576_v38 }
 0x64f   :  { %v3636_v46 = vmul.f32 %v16444_v34, %v11176_v0  ;;  %v3042_v4 = vmul.f32 %v9198_v5, %v11123_v27  ;;  %v3165_v49 = vmul.f32 %v9238_v12, %v11126_v15  ;;  %v3288_v11 = vmul.f32 %v9278_v36, %v11129_v58 }
 0x650   :  { %16715 = vst [vmem:[#allocation58_spill] sm:$0xff] %v11621_v16  ;;  %v3430_v50 = vadd.f32 %v3390_v42, %v3307_v57  ;;  %v2959_v1 = vadd.f32 %v2919_v53, %v2836_v24  ;;  %v3411_v61 = vmul.f32 %v9318_v63, %v11132_v48  ;;  %v9398_v8 = vunpack.c.l.bf16 %v16685_v26 }
 0x651   :  { %v2816_v10 = vmul.f32 %v9118_v9, %v11081_v56  ;;  %v2899_v29 = vmul.f32 %v9158_v20, %v11084_v13  ;;  %v3534_v22 = vmul.f32 %v9358_v41, %v11140_v47  ;;  %v3022_v38 = vmul.f32 %v9198_v5, %v11089_v43 }
 0x652   :  { %v3553_v60 = vadd.f32 %v3513_v7, %v3430_v50  ;;  %v3082_v35 = vadd.f32 %v3042_v4, %v2959_v1  ;;  %v3918_v24 = vmul.f32 %v11299_v14, %v11621_v16  ;;  %v3657_v42 = vmul.f32 %v9398_v8, %v11173_v28 }
 0x653   :  { %v2939_v57 = vadd.f32 %v2899_v29, %v2816_v10  ;;  %v3145_v53 = vmul.f32 %v9238_v12, %v11102_v18  ;;  %v3268_v9 = vmul.f32 %v9278_v36, %v11116_v51  ;;  %v3391_v7 = vmul.f32 %v9318_v63, %v11143_v45 }
 0x654   :  { %v3205_v26 = vadd.f32 %v3165_v49, %v3082_v35  ;;  %v9114_v20 = vunpack.c.l.bf16 %v16700_v2  ;;  %v11642_v4 = vadd.f32 %v3636_v46, %v3553_v60  ;;  %v9154_v14 = vunpack.c.l.bf16 %v16701_v31 }
 0x655   :  { %3980 = vadd.xlane.f32.xlu2 %v3917_v21  ;;  %3940 = vadd.xlane.f32.xlu1 %v3897_v32  ;;  %v3062_v5 = vadd.f32 %v3022_v38, %v2939_v57  ;;  %v9194_v50 = vunpack.c.l.bf16 %v16702_v39  ;;  %v3514_v12 = vmul.f32 %v9358_v41, %v11146_v25  ;;  %v9234_v32 = vunpack.c.l.bf16 %v16703_v17  ;;  %v16717_v57 = vld [vmem:[#allocation25_spill] sm:$0xff] }
 0x656   :  { %3982 = vadd.xlane.f32.xlu0 %v3918_v24  ;;  %16716 = vst [vmem:[#allocation68_spill] sm:$0xff] %v11642_v4  ;;  %v3328_v1 = vadd.f32 %v3288_v11, %v3205_v26  ;;  %v2834_v21 = vmul.f32 %v9114_v20, %v11109_v6  ;;  %v2917_v63 = vmul.f32 %v9154_v14, %v11112_v37  ;;  %v9274_v46 = vunpack.c.l.bf16 %v16704_v59 }
 0x657   :  { %v3185_v36 = vadd.f32 %v3145_v53, %v3062_v5  ;;  %v3040_v49 = vmul.f32 %v9194_v50, %v11123_v27  ;;  %v3637_v29 = vmul.f32 %v9398_v8, %v11176_v0  ;;  %v9314_v60 = vunpack.c.l.bf16 %v16710_v55 }
 0x658   :  { %v3451_v10 = vadd.f32 %v3411_v61, %v3328_v1  ;;  %v9354_v11 = vunpack.c.l.bf16 %v16711_v52  ;;  %v2957_v41 = vadd.f32 %v2917_v63, %v2834_v21  ;;  %v3163_v38 = vmul.f32 %v9234_v32, %v11126_v15 }
 0x659   :  { %v3308_v35 = vadd.f32 %v3268_v9, %v3185_v36  ;;  %v9394_v24 = vunpack.c.l.bf16 %v16714_v40  ;;  %v3895_v53 = vmul.f32 %v16717_v57, %v11642_v4  ;;  %v3286_v5 = vmul.f32 %v9274_v46, %v11129_v58 }
 0x65a   :  { %v3574_v26 = vadd.f32 %v3534_v22, %v3451_v10  ;;  %v2814_v61 = vmul.f32 %v9114_v20, %v11081_v56  ;;  %v3080_v8 = vadd.f32 %v3040_v49, %v2957_v41  ;;  %v3409_v34 = vmul.f32 %v9314_v60, %v11132_v48 }
 0x65b   :  { %v3431_v1 = vadd.f32 %v3391_v7, %v3308_v35  ;;  %v2897_v23 = vmul.f32 %v9154_v14, %v11084_v13  ;;  %v3532_v21 = vmul.f32 %v9354_v11, %v11140_v47  ;;  %v3655_v36 = vmul.f32 %v9394_v24, %v11173_v28  ;;  %v16719_v7 = vld [vmem:[#allocation45_spill] sm:$0xff] }
 0x65c   :  { %v11663_v9 = vadd.f32 %v3657_v42, %v3574_v26  ;;  %v3020_v63 = vmul.f32 %v9194_v50, %v11089_v43  ;;  %v3203_v10 = vadd.f32 %v3163_v38, %v3080_v8  ;;  %v3143_v20 = vmul.f32 %v9234_v32, %v11102_v18 }
 0x65d   :  { %3936 = vadd.xlane.f32.xlu2 %v3895_v53  ;;  %v3554_v22 = vadd.f32 %v3514_v12, %v3431_v1  ;;  %v2937_v4 = vadd.f32 %v2897_v23, %v2814_v61  ;;  %v3266_v35 = vmul.f32 %v9274_v46, %v11116_v51  ;;  %v3389_v14 = vmul.f32 %v9314_v60, %v11143_v45 }
 0x65e   :  { %16718 = vst [vmem:[#allocation78_spill] sm:$0xff] %v11663_v9  ;;  %v3916_v49 = vmul.f32 %v16719_v7, %v11663_v9  ;;  %v16720_v42 = vunpack.c.h.bf16 %v16700_v2  ;;  %v3326_v26 = vadd.f32 %v3286_v5, %v3203_v10  ;;  %v16722_v23 = vunpack.c.h.bf16 %v16701_v31 }
 0x65f   :  { %v11676_v53 = vadd.f32 %v3637_v29, %v3554_v22  ;;  %v3060_v50 = vadd.f32 %v3020_v63, %v2937_v4  ;;  %v3512_v32 = vmul.f32 %v9354_v11, %v11146_v25  ;;  %v3635_v38 = vmul.f32 %v9394_v24, %v11176_v0  ;;  %v16728_v22 = vld [vmem:[#allocation30_spill] sm:$0xff] }
 0x660   :  { %v2835_v41 = vmul.f32 %v16720_v42, %v11109_v6  ;;  %v2918_v12 = vmul.f32 %v16722_v23, %v11112_v37  ;;  %3978 = vadd.xlane.f32.xlu1 %v3916_v49  ;;  %v16723_v46 = vunpack.c.h.bf16 %v16702_v39  ;;  %v16724_v2 = vunpack.c.h.bf16 %v16703_v17  ;;  %v16727_v39 = vld [vmem:[#allocation20_spill] sm:$0xff] }
 0x661   :  { %16721 = vst [vmem:[#allocation88_spill] sm:$0xff] %v11676_v53  ;;  %v3896_v4 = vmul.f32 %v16719_v7, %v11676_v53  ;;  %v3449_v5 = vadd.f32 %v3409_v34, %v3326_v26  ;;  %v3183_v61 = vadd.f32 %v3143_v20, %v3060_v50  ;;  %v16725_v1 = vunpack.c.h.bf16 %v16704_v59  ;;  %v16729_v7 = vld [vmem:[#allocation40_spill] sm:$0xff]  ;;  %v11700_v20 = vpop.f32.mrf.mxu2 }
 0x662   :  { %v3041_v60 = vmul.f32 %v16723_v46, %v11123_v27  ;;  %v3164_v29 = vmul.f32 %v16724_v2, %v11126_v15  ;;  %v2958_v31 = vadd.f32 %v2918_v12, %v2835_v41  ;;  %v16726_v24 = vunpack.c.h.bf16 %v16710_v55  ;;  %v16730_v41 = vld [vmem:[#allocation50_spill] sm:$0xff]  ;;  %v16731_v50 = vld [vmem:[#allocation60_spill] sm:$0xff] }
 0x663   :  { %v3287_v11 = vmul.f32 %v16725_v1, %v11129_v58  ;;  %v16453_v63 = vunpack.c.h.bf16 %v16727_v39  ;;  %v16451_v10 = vunpack.c.h.bf16 %v16728_v22  ;;  %3938 = vadd.xlane.f32.xlu0 %v3896_v4  ;;  %v3572_v17 = vadd.f32 %v3532_v21, %v3449_v5 }
 0x664   :  { %v3410_v8 = vmul.f32 %v16726_v24, %v11132_v48  ;;  %v3306_v49 = vadd.f32 %v3266_v35, %v3183_v61  ;;  %v3081_v42 = vadd.f32 %v3041_v60, %v2958_v31  ;;  %v16449_v34 = vunpack.c.h.bf16 %v16729_v7  ;;  %v16734_v61 = vld [vmem:[#allocation70_spill] sm:$0xff] }
 0x665   :  { %v2831_v59 = vmul.f32 %v16453_v63, %v11081_v56  ;;  %v2914_v55 = vmul.f32 %v16451_v10, %v11084_v13  ;;  %v16448_v26 = vunpack.c.h.bf16 %v16730_v41  ;;  %v16450_v23 = vunpack.c.h.bf16 %v16731_v50 }
 0x666   :  { %v11710_v12 = vadd.f32 %v3655_v36, %v3572_v17  ;;  %v3429_v21 = vadd.f32 %v3389_v14, %v3306_v49  ;;  %v3204_v35 = vadd.f32 %v3164_v29, %v3081_v42  ;;  %v3037_v46 = vmul.f32 %v16449_v34, %v11089_v43  ;;  %v16735_v36 = vld [vmem:[#allocation92_spill] sm:$0xff] }
 0x667   :  { %v16733_v60 = vunpack.c.h.bf16 %v16711_v52  ;;  %v2954_v4 = vadd.f32 %v2914_v55, %v2831_v59  ;;  %v3160_v5 = vmul.f32 %v16448_v26, %v11102_v18  ;;  %v16452_v31 = vunpack.c.h.bf16 %v16734_v61  ;;  %v16737_v42 = vld [vmem:[#allocation80_spill] sm:$0xff]  ;;  %v16738_v55 = vld [vmem:[#allocation21_spill] sm:$0xff] }
 0x668   :  { %16732 = vst [vmem:[#allocation19_spill] sm:$0xff] %v11710_v12  ;;  %v3914_v1 = vmul.f32 %v16735_v36, %v11710_v12  ;;  %v3552_v14 = vadd.f32 %v3512_v32, %v3429_v21  ;;  %v3327_v29 = vadd.f32 %v3287_v11, %v3204_v35  ;;  %v16736_v24 = vunpack.c.h.bf16 %v16714_v40  ;;  %v16740_v11 = vld [vmem:[#allocation31_spill] sm:$0xff]  ;;  %v16741_v35 = vld [vmem:[#allocation90_spill] sm:$0xff] }
 0x669   :  { %v3533_v2 = vmul.f32 %v16733_v60, %v11140_v47  ;;  %v3077_v49 = vadd.f32 %v3037_v46, %v2954_v4  ;;  %v3283_v52 = vmul.f32 %v16450_v23, %v11116_v51  ;;  %v16460_v59 = vunpack.c.h.bf16 %v16737_v42 }
 0x66a   :  { %v3656_v17 = vmul.f32 %v16736_v24, %v11173_v28  ;;  %v9150_v60 = vunpack.c.l.bf16 %v16738_v55  ;;  %3974 = vadd.xlane.f32.xlu2 %v3914_v1  ;;  %v11732_v26 = vadd.f32 %v3635_v38, %v3552_v14  ;;  %v3450_v34 = vadd.f32 %v3410_v8, %v3327_v29  ;;  %v16742_v24 = vld [vmem:[#allocation41_spill] sm:$0xff]  ;;  %v16743_v8 = vld [vmem:[#allocation51_spill] sm:$0xff] }
 0x66b   :  { %v3406_v32 = vmul.f32 %v16452_v31, %v11143_v45  ;;  %v9190_v40 = vunpack.c.l.bf16 %v16740_v11  ;;  %v3200_v21 = vadd.f32 %v3160_v5, %v3077_v49  ;;  %v9230_v23 = vunpack.c.l.bf16 %v16742_v24  ;;  %v16744_v49 = vld [vmem:[#allocation61_spill] sm:$0xff] }
 0x66c   :  { %16739 = vst [vmem:[#allocation29_spill] sm:$0xff] %v11732_v26  ;;  %v2852_v4 = vmul.f32 %v9150_v60, %v11109_v6  ;;  %v3894_v10 = vmul.f32 %v16735_v36, %v11732_v26  ;;  %v3573_v1 = vadd.f32 %v3533_v2, %v3450_v34  ;;  %v9270_v14 = vunpack.c.l.bf16 %v16743_v8  ;;  %v16746_v34 = vld [vmem:[#allocation71_spill] sm:$0xff]  ;;  %v11754_v26 = vpop.f32.mrf.mxu2 }
 0x66d   :  { %v2935_v38 = vmul.f32 %v9190_v40, %v11112_v37  ;;  %v3323_v29 = vadd.f32 %v3283_v52, %v3200_v21  ;;  %v3529_v31 = vmul.f32 %v16460_v59, %v11146_v25  ;;  %v3058_v5 = vmul.f32 %v9230_v23, %v11123_v27  ;;  %v16748_v59 = vld [vmem:[#allocation81_spill] sm:$0xff] }
 0x66e   :  { %v9310_v63 = vunpack.c.l.bf16 %v16744_v49  ;;  %3934 = vadd.xlane.f32.xlu1 %v3894_v10  ;;  %v11750_v46 = vadd.f32 %v3656_v17, %v3573_v1  ;;  %v3181_v36 = vmul.f32 %v9270_v14, %v11126_v15  ;;  %v9350_v2 = vunpack.c.l.bf16 %v16746_v34 }
 0x66f   :  { %v2975_v12 = vadd.f32 %v2935_v38, %v2852_v4  ;;  %v3446_v9 = vadd.f32 %v3406_v32, %v3323_v29  ;;  %v16747_v52 = vunpack.c.h.bf16 %v16741_v35  ;;  %v9390_v53 = vunpack.c.l.bf16 %v16748_v59 }
 0x670   :  { %16745 = vst [vmem:[#allocation39_spill] sm:$0xff] %v11750_v46  ;;  %v3915_v54 = vmul.f32 %v16717_v57, %v11750_v46  ;;  %v3304_v17 = vmul.f32 %v9310_v63, %v11129_v58  ;;  %v2832_v4 = vmul.f32 %v9150_v60, %v11081_v56  ;;  %v2915_v38 = vmul.f32 %v9190_v40, %v11084_v13 }
 0x671   :  { %v3652_v21 = vmul.f32 %v16747_v52, %v11176_v0  ;;  %v3098_v10 = vadd.f32 %v3058_v5, %v2975_v12  ;;  %v3569_v1 = vadd.f32 %v3529_v31, %v3446_v9  ;;  %v3038_v16 = vmul.f32 %v9230_v23, %v11089_v43  ;;  %v16749_v52 = vld [vmem:[#allocation91_spill] sm:$0xff] }
 0x672   :  { %3976 = vadd.xlane.f32.xlu0 %v3915_v54  ;;  %v3427_v29 = vmul.f32 %v9350_v2, %v11132_v48  ;;  %v9430_v19 = vunpack.c.l.bf16 %v16749_v52  ;;  %v2955_v30 = vadd.f32 %v2915_v38, %v2832_v4  ;;  %v3161_v57 = vmul.f32 %v9270_v14, %v11102_v18  ;;  %v11781_v38 = vpop.xlane.xlu0 %3944 }
 0x673   :  { %v3221_v32 = vadd.f32 %v3181_v36, %v3098_v10  ;;  %v11768_v3 = vadd.f32 %v3652_v21, %v3569_v1  ;;  %v3550_v5 = vmul.f32 %v9390_v53, %v11140_v47  ;;  %v3284_v23 = vmul.f32 %v9310_v63, %v11116_v51  ;;  %v11777_v21 = vpop.xlane.xlu1 %3984 }
 0x674   :  { %v3078_v31 = vadd.f32 %v3038_v16, %v2955_v30  ;;  %v3673_v60 = vmul.f32 %v9430_v19, %v11173_v28  ;;  %v3407_v36 = vmul.f32 %v9350_v2, %v11143_v45  ;;  %v9151_v14 = vunpack.c.h.bf16 %v16738_v55 }
 0x675   :  { %16750 = vst [vmem:[#allocation49_spill] sm:$0xff] %v11768_v3  ;;  %v3344_v12 = vadd.f32 %v3304_v17, %v3221_v32  ;;  %v3911_v9 = vmul.f32 %v11754_v26, %v11768_v3  ;;  %v3888_v17 = vpop.f32.mrf.mxu2  ;;  %v3530_v1 = vmul.f32 %v9390_v53, %v11146_v25  ;;  %v3653_v16 = vmul.f32 %v9430_v19, %v11176_v0 }
 0x676   :  { %v3201_v40 = vadd.f32 %v3161_v57, %v3078_v31  ;;  %v4119_v63 = vmul.f32 %v11777_v21, %v11777_v21  ;;  %v2833_v2 = vmul.f32 %v9151_v14, %v11081_v56  ;;  %v9231_v55 = vunpack.c.h.bf16 %v16742_v24 }
 0x677   :  { %v3467_v54 = vadd.f32 %v3427_v29, %v3344_v12  ;;  %3968 = vadd.xlane.f32.xlu1 %v3911_v9  ;;  %v9191_v29 = vunpack.c.h.bf16 %v16740_v11  ;;  %v4099_v53 = vmul.f32 %v11781_v38, %v11781_v38  ;;  %v2853_v12 = vmul.f32 %v9151_v14, %v11109_v6 }
 0x678   :  { %v3324_v4 = vadd.f32 %v3284_v23, %v3201_v40  ;;  %v3039_v23 = vmul.f32 %v9231_v55, %v11089_v43  ;;  %v3059_v11 = vmul.f32 %v9231_v55, %v11123_v27  ;;  %v9311_v24 = vunpack.c.h.bf16 %v16744_v49 }
 0x679   :  { %v3590_v10 = vadd.f32 %v3550_v5, %v3467_v54  ;;  %v9271_v5 = vunpack.c.h.bf16 %v16743_v8  ;;  %v2916_v9 = vmul.f32 %v9191_v29, %v11084_v13  ;;  %v2936_v31 = vmul.f32 %v9191_v29, %v11112_v37 }
 0x67a   :  { %v3447_v32 = vadd.f32 %v3407_v36, %v3324_v4  ;;  %v11804_v36 = vadd.f32 1.0, %v4119_v63  ;;  %v11808_v4 = vadd.f32 1.0, %v4099_v53  ;;  %v3305_v49 = vmul.f32 %v9311_v24, %v11129_v58 }
 0x67b   :  { %v11783_v30 = vadd.f32 %v3673_v60, %v3590_v10  ;;  %v2956_v60 = vadd.f32 %v2916_v9, %v2833_v2  ;;  %v3162_v40 = vmul.f32 %v9271_v5, %v11102_v18  ;;  %v2976_v8 = vadd.f32 %v2936_v31, %v2853_v12 }
 0x67c   :  { %v3570_v19 = vadd.f32 %v3530_v1, %v3447_v32  ;;  %v3182_v14 = vmul.f32 %v9271_v5, %v11126_v15  ;;  %v3285_v32 = vmul.f32 %v9311_v24, %v11116_v51  ;;  %v9391_v2 = vunpack.c.h.bf16 %v16748_v59 }
 0x67d   :  { %16751 = vst [vmem:[#allocation59_spill] sm:$0xff] %v11783_v30  ;;  %v3932_v57 = vmul.f32 %v3888_v17, %v11783_v30  ;;  %v3079_v1 = vadd.f32 %v3039_v23, %v2956_v60  ;;  %v3099_v29 = vadd.f32 %v3059_v11, %v2976_v8  ;;  %v9431_v55 = vunpack.c.h.bf16 %v16749_v52 }
 0x67e   :  { %v11801_v54 = vadd.f32 %v3653_v16, %v3570_v19  ;;  %v9351_v16 = vunpack.c.h.bf16 %v16746_v34  ;;  %9525 = vrcp.f32 %v11804_v36  ;;  %v3531_v5 = vmul.f32 %v9391_v2, %v11146_v25 }
 0x67f   :  { %4010 = vadd.xlane.f32.xlu0 %v3932_v57  ;;  %v3202_v63 = vadd.f32 %v3162_v40, %v3079_v1  ;;  %v3222_v57 = vadd.f32 %v3182_v14, %v3099_v29  ;;  %9527 = vrcp.f32 %v11808_v4  ;;  %v16753_v34 = vunpack.c.h.bf16 %v16727_v39  ;;  %v11835_v29 = vpop.xlane.xlu2 %3986 }
 0x680   :  { %16752 = vst [vmem:[#allocation69_spill] sm:$0xff] %v11801_v54  ;;  %v3912_v10 = vmul.f32 %v3888_v17, %v11801_v54  ;;  %v3408_v17 = vmul.f32 %v9351_v16, %v11143_v45  ;;  %v3428_v53 = vmul.f32 %v9351_v16, %v11132_v48  ;;  %v3551_v9 = vmul.f32 %v9391_v2, %v11140_v47  ;;  %v3891_v2 = vpop.f32.mrf.mxu2 }
 0x681   :  { %v3325_v12 = vadd.f32 %v3285_v32, %v3202_v63  ;;  %v2851_v59 = vmul.f32 %v16753_v34, %v11109_v6  ;;  %v3345_v19 = vadd.f32 %v3305_v49, %v3222_v57  ;;  %v3654_v31 = vmul.f32 %v9431_v55, %v11176_v0  ;;  %v11839_v63 = vpop.xlane.xlu1 %3946 }
 0x682   :  { %3970 = vadd.xlane.f32.xlu2 %v3912_v10  ;;  %v16754_v23 = vunpack.c.h.bf16 %v16728_v22  ;;  %v16755_v24 = vunpack.c.h.bf16 %v16729_v7  ;;  %v3674_v8 = vmul.f32 %v9431_v55, %v11173_v28  ;;  %v16756_v1 = vunpack.c.h.bf16 %v16730_v41 }
 0x683   :  { %v3448_v52 = vadd.f32 %v3408_v17, %v3325_v12  ;;  %v3468_v40 = vadd.f32 %v3428_v53, %v3345_v19  ;;  %v16758_v55 = vunpack.c.h.bf16 %v16731_v50  ;;  %v16760_v34 = vunpack.c.h.bf16 %v16734_v61 }
 0x684   :  { %v2934_v11 = vmul.f32 %v16754_v23, %v11112_v37  ;;  %v3057_v60 = vmul.f32 %v16755_v24, %v11123_v27  ;;  %v3180_v32 = vmul.f32 %v16756_v1, %v11126_v15  ;;  %v11837_v49 = vpop.eup %9525  ;;  %v4120_v19 = vmul.f32 %v11835_v29, %v11835_v29 }
 0x685   :  { %v3571_v14 = vadd.f32 %v3531_v5, %v3448_v52  ;;  %v3591_v16 = vadd.f32 %v3551_v9, %v3468_v40  ;;  %v11841_v57 = vpop.eup %9527  ;;  %v3303_v12 = vmul.f32 %v16758_v55, %v11129_v58  ;;  %v9146_v23 = vunpack.c.l.bf16 %v16727_v39 }
 0x686   :  { %v2974_v10 = vadd.f32 %v2934_v11, %v2851_v59  ;;  %v3426_v59 = vmul.f32 %v16760_v34, %v11132_v48  ;;  %v4550_v11 = vmul.f32 %v11837_v49, %v11804_v36  ;;  %v4250_v24 = vmul.f32 %v11841_v57, %v11808_v4 }
 0x687   :  { %v11843_v17 = vadd.f32 %v3654_v31, %v3571_v14  ;;  %v11848_v5 = vadd.f32 %v3674_v8, %v3591_v16  ;;  %v4100_v31 = vmul.f32 %v11839_v63, %v11839_v63  ;;  %v11864_v40 = vadd.f32 1.0, %v4120_v19 }
 0x688   :  { %v3097_v53 = vadd.f32 %v3057_v60, %v2974_v10  ;;  %v16761_v14 = vunpack.c.h.bf16 %v16737_v42  ;;  %v9186_v39 = vunpack.c.l.bf16 %v16728_v22  ;;  %v4039_v16 = vand.u32 2147483647, %v11777_v21 }
 0x689   :  { %16757 = vst [vmem:[#allocation79_spill] sm:$0xff] %v11843_v17  ;;  %v3913_v9 = vmul.f32 %v3891_v2, %v11843_v17  ;;  %v3933_v60 = vmul.f32 %v3891_v2, %v11848_v5  ;;  %v11869_v1 = vadd.f32 1.0, %v4100_v31  ;;  %v16762_v2 = vunpack.c.h.bf16 %v16741_v35 }
 0x68a   :  { %16759 = vst [vmem:[#allocation89_spill] sm:$0xff] %v11848_v5  ;;  %v3220_v52 = vadd.f32 %v3180_v32, %v3097_v53  ;;  %v3549_v10 = vmul.f32 %v16761_v14, %v11140_v47  ;;  %v2850_v32 = vmul.f32 %v9146_v23, %v11109_v6  ;;  %v4251_v34 = vsub.f32 1.0, %v4250_v24 }
 0x68b   :  { %3972 = vadd.xlane.f32.xlu0 %v3913_v9  ;;  %4012 = vadd.xlane.f32.xlu1 %v3933_v60  ;;  %v3672_v55 = vmul.f32 %v16762_v2, %v11173_v28  ;;  %9529 = vrcp.f32 %v11864_v40  ;;  %v2933_v19 = vmul.f32 %v9186_v39, %v11112_v37  ;;  %v9226_v22 = vunpack.c.l.bf16 %v16729_v7 }
 0x68c   :  { %v3343_v8 = vadd.f32 %v3303_v12, %v3220_v52  ;;  %v4551_v12 = vsub.f32 1.0, %v4550_v11  ;;  %9531 = vrcp.f32 %v11869_v1  ;;  %v9266_v6 = vunpack.c.l.bf16 %v16730_v41 }
 0x68d   :  { %v4019_v52 = vand.u32 2147483647, %v11781_v38  ;;  %v9306_v31 = vunpack.c.l.bf16 %v16731_v50  ;;  %v9346_v60 = vunpack.c.l.bf16 %v16734_v61  ;;  %v4558_v11 = vand.u32 2147483647, %v11804_v36 }
 0x68e   :  { %v3466_v53 = vadd.f32 %v3426_v59, %v3343_v8  ;;  %v2973_v59 = vadd.f32 %v2933_v19, %v2850_v32  ;;  %v3056_v37 = vmul.f32 %v9226_v22, %v11123_v27  ;;  %v3179_v8 = vmul.f32 %v9266_v6, %v11126_v15 }
 0x68f   :  { %v4552_v14 = vmul.f32 %v11837_v49, %v4551_v12  ;;  %vm4554_vm4 = vweird.f32 %v11804_v36  ;;  %v4252_v7 = vmul.f32 %v11841_v57, %v4251_v34  ;;  %v9386_v41 = vunpack.c.l.bf16 %v16737_v42  ;;  %v11913_v12 = vpop.xlane.xlu0 %3988 }
 0x690   :  { %v3589_v9 = vadd.f32 %v3549_v10, %v3466_v53  ;;  %v3096_v61 = vadd.f32 %v3056_v37, %v2973_v59  ;;  %v3302_v10 = vmul.f32 %v9306_v31, %v11129_v58  ;;  %v2830_v32 = vmul.f32 %v9146_v23, %v11081_v56 }
 0x691   :  { %v11898_v53 = vpop.eup %9529  ;;  %v4560_v27 = vand.u32 2147483648, %v11804_v36  ;;  %vm4254_vm5 = vweird.f32 %v11808_v4  ;;  %v4258_v15 = vand.u32 2147483647, %v11808_v4  ;;  %v3425_v2 = vmul.f32 %v9346_v60, %v11132_v48 }
 0x692   :  { %v11886_v24 = vadd.f32 %v3672_v55, %v3589_v9  ;;  %v11904_v55 = vpop.eup %9531  ;;  %vm11906_vm6 = vcmp.eq.f32.partialorder %v4558_v11, 8.507059e+37  ;;  %v3219_v58 = vadd.f32 %v3179_v8, %v3096_v61  ;;  %v9426_v56 = vunpack.c.l.bf16 %v16741_v35  ;;  %v11921_v11 = vpop.xlane.xlu2 %3948 }
 0x693   :  { %v3036_v23 = vmul.f32 %v9226_v22, %v11089_v43  ;;  %v4553_v34 = vadd.f32 %v11837_v49, %v4552_v14  ;;  %vm4555_vm7 = vweird.f32 %v11837_v49  ;;  %v4253_v48 = vadd.f32 %v11841_v57, %v4252_v7 }
 0x694   :  { %16763 = vst [vmem:[#allocation13_spill] sm:$0xff] %v11886_v24  ;;  %v3931_v50 = vmul.f32 %v11754_v26, %v11886_v24  ;;  %v2913_v26 = vmul.f32 %v9186_v39, %v11084_v13  ;;  %vm4255_vm8 = vweird.f32 %v11841_v57  ;;  %v3342_v19 = vadd.f32 %v3302_v10, %v3219_v58  ;;  %vm11932_vm9 = vmor %vm4554_vm4, %vm4555_vm7 }
 0x695   :  { %v3548_v9 = vmul.f32 %v9386_v41, %v11140_v47  ;;  %v3159_v35 = vmul.f32 %v9266_v6, %v11102_v18  ;;  %v4260_v13 = vand.u32 2147483648, %v11808_v4  ;;  %v4565_v43 = vmul.f32 %v11898_v53, %v11864_v40  ;;  %vm11945_vm10 = vmor %vm4254_vm5, %vm4255_vm8 }
 0x696   :  { %4008 = vadd.xlane.f32.xlu2 %v3931_v50  ;;  %v2953_v59 = vadd.f32 %v2913_v26, %v2830_v32  ;;  %v4265_v39 = vmul.f32 %v11904_v55, %v11869_v1  ;;  %v4121_v22 = vmul.f32 %v11913_v12, %v11913_v12  ;;  %v3465_v18 = vadd.f32 %v3425_v2, %v3342_v19 }
 0x697   :  { %v3671_v6 = vmul.f32 %v9426_v56, %v11173_v28  ;;  %v3282_v8 = vmul.f32 %v9306_v31, %v11116_v51  ;;  %v4557_v14 = vsel %vm11932_vm9, %v11837_v49, %v4553_v34  ;;  %v4561_v7 = vor.u32 1.1754944e-38, %v4560_v27  ;;  %v11958_v27 = vpop.xlane.xlu1 %3990 }
 0x698   :  { %v3076_v37 = vadd.f32 %v3036_v23, %v2953_v59  ;;  %v11949_v50 = vadd.f32 1.0, %v4121_v22  ;;  %v4101_v28 = vmul.f32 %v11921_v11, %v11921_v11  ;;  %v4257_v51 = vsel %vm11945_vm10, %v11841_v57, %v4253_v48 }
 0x699   :  { %v3588_v31 = vadd.f32 %v3548_v9, %v3465_v18  ;;  %v3405_v61 = vmul.f32 %v9346_v60, %v11143_v45  ;;  %v4261_v10 = vor.u32 1.1754944e-38, %v4260_v13  ;;  %v4566_v32 = vsub.f32 1.0, %v4565_v43 }
 0x69a   :  { %v3199_v49 = vadd.f32 %v3159_v35, %v3076_v37  ;;  %v4266_v4 = vsub.f32 1.0, %v4265_v39  ;;  %9533 = vrcp.f32 %v11949_v50  ;;  %vm4259_vm11 = vcmp.eq.f32.partialorder %v4258_v15, 8.507059e+37  ;;  %v11999_v43 = vpop.xlane.xlu2 %3992 }
 0x69b   :  { %v11960_v2 = vadd.f32 %v3671_v6, %v3588_v31  ;;  %v3528_v26 = vmul.f32 %v9386_v41, %v11146_v25  ;;  %v4079_v57 = vmul.f32 %v4039_v16, %v11777_v21  ;;  %v4562_v45 = vsel %vm11906_vm6, %v4561_v7, %v4557_v14  ;;  %v11975_v25 = vpop.xlane.xlu0 %3950 }
 0x69c   :  { %v3322_v58 = vadd.f32 %v3282_v8, %v3199_v49  ;;  %v4262_v60 = vsel %vm4259_vm11, %v4261_v10, %v4257_v51  ;;  %v11968_v23 = vadd.f32 1.0, %v4101_v28  ;;  %v3651_v15 = vmul.f32 %v9426_v56, %v11176_v0 }
 0x69d   :  { %16770 = vst [vmem:[#allocation23_spill] sm:$0xff] %v11960_v2  ;;  %v3930_v34 = vmul.f32 %v11700_v20, %v11960_v2  ;;  %v4122_v19 = vmul.f32 %v11958_v27, %v11958_v27  ;;  %v4059_v21 = vmul.f32 %v4019_v52, %v11781_v38  ;;  %v4567_v16 = vmul.f32 %v11898_v53, %v4566_v32 }
 0x69e   :  { %v3445_v48 = vadd.f32 %v3405_v61, %v3322_v58  ;;  %v4267_v41 = vmul.f32 %v11904_v55, %v4266_v4  ;;  %9535 = vrcp.f32 %v11968_v23  ;;  %v11983_v42 = vmul.f32 %v4562_v45, %v4079_v57 }
 0x69f   :  { %4006 = vadd.xlane.f32.xlu1 %v3930_v34  ;;  %v11987_v56 = vmul.f32 %v4262_v60, %v4059_v21  ;;  %v4040_v59 = vand.u32 2147483647, %v11835_v29  ;;  %v11990_v35 = vadd.f32 1.0, %v4122_v19  ;;  %v4102_v38 = vmul.f32 %v11975_v25, %v11975_v25 }
 0x6a0   :  { %v3568_v9 = vadd.f32 %v3528_v26, %v3445_v48  ;;  %v11985_v0 = vpop.eup %9533  ;;  %vm4570_vm12 = vweird.f32 %v11898_v53  ;;  %v4575_v52 = vand.u32 2147483648, %v11864_v40  ;;  %vm4270_vm13 = vweird.f32 %v11904_v55 }
 0x6a1   :  { %v4568_v39 = vadd.f32 %v11898_v53, %v4567_v16  ;;  %v4268_v22 = vadd.f32 %v11904_v55, %v4267_v41  ;;  %v4580_v47 = vmul.f32 %v11985_v0, %v11949_v50  ;;  %9537 = vrcp.f32 %v11990_v35 }
 0x6a2   :  { %v11997_v13 = vadd.f32 %v3651_v15, %v3568_v9  ;;  %vm4569_vm14 = vweird.f32 %v11864_v40  ;;  %v4573_v18 = vand.u32 2147483647, %v11864_v40  ;;  %v4275_v6 = vand.u32 2147483648, %v11869_v1 }
 0x6a3   :  { %vm12013_vm15 = vmor %vm4569_vm14, %vm4570_vm12  ;;  %vm4269_vm1 = vweird.f32 %v11869_v1  ;;  %v4273_v7 = vand.u32 2147483647, %v11869_v1  ;;  %v12019_v36 = vadd.f32 1.0, %v4102_v38  ;;  %v4123_v40 = vmul.f32 %v11999_v43, %v11999_v43  ;;  %v12032_v1 = vpop.xlane.xlu1 %3952 }
 0x6a4   :  { %16771 = vst [vmem:[#allocation33_spill] sm:$0xff] %v11997_v13  ;;  %v3910_v37 = vmul.f32 %v11700_v20, %v11997_v13  ;;  %v12011_v8 = vpop.eup %9535  ;;  %v4080_v28 = vmul.f32 %v4040_v59, %v11835_v29  ;;  %v4576_v51 = vor.u32 1.1754944e-38, %v4575_v52  ;;  %v4020_v20 = vand.u32 2147483647, %v11839_v63  ;;  %vm12027_vm2 = vmor %vm4269_vm1, %vm4270_vm13 }
 0x6a5   :  { %v4041_v49 = vand.u32 2147483647, %v11913_v12  ;;  %v4572_v61 = vsel %vm12013_vm15, %v11898_v53, %v4568_v39  ;;  %v4272_v29 = vsel %vm12027_vm2, %v11904_v55, %v4268_v22  ;;  %v4581_v10 = vsub.f32 1.0, %v4580_v47  ;;  %v12080_v47 = vpop.xlane.xlu0 %3994 }
 0x6a6   :  { %3966 = vadd.xlane.f32.xlu0 %v3910_v37  ;;  %9539 = vrcp.f32 %v12019_v36  ;;  %v4276_v32 = vor.u32 1.1754944e-38, %v4275_v6  ;;  %v4021_v4 = vand.u32 2147483647, %v11921_v11  ;;  %v4280_v58 = vmul.f32 %v12011_v8, %v11968_v23 }
 0x6a7   :  { %v12044_v26 = vadd.f32 1.0, %v4123_v40  ;;  %v12046_v57 = vpop.eup %9537  ;;  %vm4574_vm4 = vcmp.eq.f32.partialorder %v4573_v18, 8.507059e+37  ;;  %vm4274_vm5 = vcmp.eq.f32.partialorder %v4273_v7, 8.507059e+37  ;;  %v4588_v53 = vand.u32 2147483647, %v11949_v50 }
 0x6a8   :  { %v4103_v55 = vmul.f32 %v12032_v1, %v12032_v1  ;;  %v4577_v45 = vsel %vm4574_vm4, %v4576_v51, %v4572_v61  ;;  %v4060_v60 = vmul.f32 %v4020_v20, %v11839_v63  ;;  %v4277_v34 = vsel %vm4274_vm5, %v4276_v32, %v4272_v29 }
 0x6a9   :  { %v4590_v48 = vand.u32 2147483648, %v11949_v50  ;;  %v12054_v15 = vmul.f32 %v4041_v49, %v11913_v12  ;;  %v4582_v19 = vmul.f32 %v11985_v0, %v4581_v10  ;;  %v4595_v21 = vmul.f32 %v12046_v57, %v11990_v35 }
 0x6aa   :  { %9541 = vrcp.f32 %v12044_v26  ;;  %vm4584_vm6 = vweird.f32 %v11949_v50  ;;  %v12062_v16 = vmul.f32 %v4021_v4, %v11921_v11  ;;  %v4281_v41 = vsub.f32 1.0, %v4280_v58 }
 0x6ab   :  { %v4042_v63 = vand.u32 2147483647, %v11958_v27  ;;  %v12067_v59 = vmul.f32 %v4577_v45, %v4080_v28  ;;  %v12069_v12 = vmul.f32 %v4277_v34, %v4060_v60  ;;  %vm12071_vm7 = vcmp.eq.f32.partialorder %v4588_v53, 8.507059e+37  ;;  %v12092_v28 = vpop.xlane.xlu2 %3954 }
 0x6ac   :  { %v12065_v9 = vpop.eup %9539  ;;  %v12075_v52 = vadd.f32 1.0, %v4103_v55  ;;  %v4591_v39 = vor.u32 1.1754944e-38, %v4590_v48  ;;  %vm4284_vm8 = vweird.f32 %v11968_v23  ;;  %v4288_v11 = vand.u32 2147483647, %v11968_v23 }
 0x6ad   :  { %v4290_v22 = vand.u32 2147483648, %v11968_v23  ;;  %v4583_v18 = vadd.f32 %v11985_v0, %v4582_v19  ;;  %vm4585_vm9 = vweird.f32 %v11985_v0  ;;  %v4596_v6 = vsub.f32 1.0, %v4595_v21 }
 0x6ae   :  { %9543 = vrcp.f32 %v12075_v52  ;;  %v4282_v37 = vmul.f32 %v12011_v8, %v4281_v41  ;;  %v12087_v14 = vmul.f32 %v4042_v63, %v11958_v27  ;;  %v4022_v7 = vand.u32 2147483647, %v11975_v25  ;;  %vm12103_vm10 = vmor %vm4584_vm6, %vm4585_vm9 }
 0x6af   :  { %v4295_v40 = vmul.f32 %v12065_v9, %v12019_v36  ;;  %v4603_v20 = vand.u32 2147483647, %v11990_v35  ;;  %v4605_v31 = vand.u32 2147483648, %v11990_v35  ;;  %v4043_v49 = vand.u32 2147483647, %v11999_v43 }
 0x6b0   :  { %v12094_v51 = vpop.eup %9541  ;;  %v4124_v61 = vmul.f32 %v12080_v47, %v12080_v47  ;;  %vm12107_vm11 = vcmp.eq.f32.partialorder %v4288_v11, 8.507059e+37  ;;  %v4291_v10 = vor.u32 1.1754944e-38, %v4290_v22  ;;  %vm4599_vm12 = vweird.f32 %v11990_v35 }
 0x6b1   :  { %v4610_v32 = vmul.f32 %v12094_v51, %v12044_v26  ;;  %v4587_v4 = vsel %vm12103_vm10, %v11985_v0, %v4583_v18  ;;  %v4597_v50 = vmul.f32 %v12046_v57, %v4596_v6  ;;  %v4104_v53 = vmul.f32 %v12092_v28, %v12092_v28  ;;  %v12154_v18 = vpop.xlane.xlu1 %3996 }
 0x6b2   :  { %v12118_v58 = vadd.f32 1.0, %v4124_v61  ;;  %v4283_v55 = vadd.f32 %v12011_v8, %v4282_v37  ;;  %vm4285_vm13 = vweird.f32 %v12011_v8  ;;  %v12125_v45 = vmul.f32 %v4022_v7, %v11975_v25 }
 0x6b3   :  { %v4296_v60 = vsub.f32 1.0, %v4295_v40  ;;  %vm12129_vm14 = vcmp.eq.f32.partialorder %v4603_v20, 8.507059e+37  ;;  %v4606_v0 = vor.u32 1.1754944e-38, %v4605_v31  ;;  %v4305_v19 = vand.u32 2147483648, %v12019_v36  ;;  %vm12145_vm1 = vmor %vm4284_vm8, %vm4285_vm13 }
 0x6b4   :  { %v12127_v34 = vpop.eup %9543  ;;  %v12135_v21 = vmul.f32 %v4043_v49, %v11999_v43  ;;  %9545 = vrcp.f32 %v12118_v58  ;;  %v4592_v41 = vsel %vm12071_vm7, %v4591_v39, %v4587_v4  ;;  %vm4299_vm15 = vweird.f32 %v12019_v36 }
 0x6b5   :  { %v4303_v25 = vand.u32 2147483647, %v12019_v36  ;;  %v4611_v63 = vsub.f32 1.0, %v4610_v32  ;;  %v4023_v11 = vand.u32 2147483647, %v12032_v1  ;;  %v4598_v43 = vadd.f32 %v12046_v57, %v4597_v50  ;;  %v12185_v32 = vpop.xlane.xlu0 %3956 }
 0x6b6   :  { %vm4600_vm2 = vweird.f32 %v12046_v57  ;;  %v4044_v38 = vand.u32 2147483647, %v12080_v47  ;;  %v12152_v39 = vadd.f32 1.0, %v4104_v53  ;;  %v4287_v6 = vsel %vm12145_vm1, %v12011_v8, %v4283_v55 }
 0x6b7   :  { %v4297_v23 = vmul.f32 %v12065_v9, %v4296_v60  ;;  %v4618_v37 = vand.u32 2147483647, %v12044_v26  ;;  %v4310_v7 = vmul.f32 %v12127_v34, %v12075_v52  ;;  %v12164_v40 = vmul.f32 %v4592_v41, %v12054_v15  ;;  %vm12170_vm5 = vmor %vm4599_vm12, %vm4600_vm2 }
 0x6b8   :  { %v4306_v20 = vor.u32 1.1754944e-38, %v4305_v19  ;;  %vm4614_vm4 = vweird.f32 %v12044_v26  ;;  %9547 = vrcp.f32 %v12152_v39  ;;  %vm12174_vm6 = vcmp.eq.f32.partialorder %v4303_v25, 8.507059e+37 }
 0x6b9   :  { %v4612_v49 = vmul.f32 %v12094_v51, %v4611_v63  ;;  %v4620_v15 = vand.u32 2147483648, %v12044_v26  ;;  %v12181_v61 = vmul.f32 %v4023_v11, %v12032_v1  ;;  %v4125_v27 = vmul.f32 %v12154_v18, %v12154_v18  ;;  %v12198_v1 = vpop.xlane.xlu2 %3998 }
 0x6ba   :  { %v12187_v35 = vpop.eup %9545  ;;  %v4292_v4 = vsel %vm12107_vm11, %v4291_v10, %v4287_v6  ;;  %v4602_v50 = vsel %vm12170_vm5, %v12046_v57, %v4598_v43  ;;  %vm4300_vm7 = vweird.f32 %v12065_v9  ;;  %v12196_v53 = vmul.f32 %v4044_v38, %v12080_v47 }
 0x6bb   :  { %v4298_v55 = vadd.f32 %v12065_v9, %v4297_v23  ;;  %vm12201_vm8 = vcmp.eq.f32.partialorder %v4618_v37, 8.507059e+37  ;;  %v4311_v19 = vsub.f32 1.0, %v4310_v7  ;;  %v4320_v29 = vand.u32 2147483648, %v12075_v52  ;;  %vm12229_vm10 = vmor %vm4299_vm15, %vm4300_vm7 }
 0x6bc   :  { %v4625_v10 = vmul.f32 %v12187_v35, %v12118_v58  ;;  %v4318_v57 = vand.u32 2147483647, %v12075_v52  ;;  %v4024_v41 = vand.u32 2147483647, %v12092_v28  ;;  %v12210_v47 = vadd.f32 1.0, %v4125_v27 }
 0x6bd   :  { %v4105_v25 = vmul.f32 %v12185_v32, %v12185_v32  ;;  %v4607_v63 = vsel %vm12129_vm14, %v4606_v0, %v4602_v50  ;;  %v4613_v11 = vadd.f32 %v12094_v51, %v4612_v49  ;;  %vm4615_vm9 = vweird.f32 %v12094_v51 }
 0x6be   :  { %v4126_v22 = vmul.f32 %v12198_v1, %v12198_v1  ;;  %v12220_v43 = vpop.eup %9547  ;;  %v12223_v38 = vmul.f32 %v4292_v4, %v12062_v16  ;;  %v4621_v48 = vor.u32 1.1754944e-38, %v4620_v15  ;;  %vm4314_vm11 = vweird.f32 %v12075_v52  ;;  %vm12244_vm12 = vmor %vm4614_vm4, %vm4615_vm9 }
 0x6bf   :  { %9549 = vrcp.f32 %v12210_v47  ;;  %v4302_v0 = vsel %vm12229_vm10, %v12065_v9, %v4298_v55  ;;  %v4312_v16 = vmul.f32 %v12127_v34, %v4311_v19  ;;  %v4321_v23 = vor.u32 1.1754944e-38, %v4320_v29  ;;  %v3959_v29 = vpop.xlane.xlu1 %3958 }
 0x6c0   :  { %v4626_v37 = vsub.f32 1.0, %v4625_v10  ;;  %v12240_v7 = vmul.f32 %v4607_v63, %v12087_v14  ;;  %v12249_v31 = vmul.f32 %v4024_v41, %v12092_v28  ;;  %v4325_v49 = vmul.f32 %v12220_v43, %v12152_v39 }
 0x6c1   :  { %v12253_v9 = vadd.f32 1.0, %v4105_v25  ;;  %v4617_v15 = vsel %vm12244_vm12, %v12094_v51, %v4613_v11  ;;  %vm12258_vm13 = vcmp.eq.f32.partialorder %v4318_v57, 8.507059e+37  ;;  %v4633_v26 = vand.u32 2147483647, %v12118_v58  ;;  %v12292_v60 = vpop.xlane.xlu2 %3960 }
 0x6c2   :  { %v4635_v27 = vand.u32 2147483648, %v12118_v58  ;;  %v12264_v4 = vadd.f32 1.0, %v4126_v22  ;;  %v4307_v28 = vsel %vm12174_vm6, %v4306_v20, %v4302_v0  ;;  %v4335_v50 = vand.u32 2147483648, %v12152_v39  ;;  %v12290_v22 = vpop.xlane.xlu0 %4000 }
 0x6c3   :  { %v4045_v55 = vand.u32 2147483647, %v12154_v18  ;;  %9551 = vrcp.f32 %v12253_v9  ;;  %v4313_v51 = vadd.f32 %v12127_v34, %v4312_v16  ;;  %vm4315_vm14 = vweird.f32 %v12127_v34 }
 0x6c4   :  { %v4627_v19 = vmul.f32 %v12187_v35, %v4626_v37  ;;  %9553 = vrcp.f32 %v12264_v4  ;;  %v4622_v20 = vsel %vm12201_vm8, %v4621_v48, %v4617_v15  ;;  %vm4629_vm15 = vweird.f32 %v12118_v58  ;;  %vm12298_vm2 = vmor %vm4314_vm11, %vm4315_vm14 }
 0x6c5   :  { %v12275_v10 = vpop.eup %9549  ;;  %v4326_v8 = vsub.f32 1.0, %v4325_v49  ;;  %v4025_v57 = vand.u32 2147483647, %v12185_v32  ;;  %v12282_v41 = vmul.f32 %v4307_v28, %v12125_v45  ;;  %vm12284_vm1 = vcmp.eq.f32.partialorder %v4633_v26, 8.507059e+37 }
 0x6c6   :  { %v4636_v63 = vor.u32 1.1754944e-38, %v4635_v27  ;;  %v4640_v11 = vmul.f32 %v12275_v10, %v12210_v47  ;;  %vm4329_vm4 = vweird.f32 %v12152_v39  ;;  %v4333_v45 = vand.u32 2147483647, %v12152_v39 }
 0x6c7   :  { %v12304_v48 = vor.u32 1.1754944e-38, %v4335_v50  ;;  %v12307_v0 = vmul.f32 %v4045_v55, %v12154_v18  ;;  %v4106_v16 = vmul.f32 %v3959_v29, %v3959_v29  ;;  %v12310_v37 = vmul.f32 %v4622_v20, %v12135_v21 }
 0x6c8   :  { %v4317_v52 = vsel %vm12298_vm2, %v12127_v34, %v4313_v51  ;;  %v4628_v36 = vadd.f32 %v12187_v35, %v4627_v19  ;;  %vm4630_vm5 = vweird.f32 %v12187_v35  ;;  %v4327_v15 = vmul.f32 %v12220_v43, %v4326_v8 }
 0x6c9   :  { %v12317_v49 = vpop.eup %9551  ;;  %v12321_v26 = vmul.f32 %v4025_v57, %v12185_v32  ;;  %v12323_v18 = vadd.f32 1.0, %v4106_v16  ;;  %v4127_v21 = vmul.f32 %v12290_v22, %v12290_v22  ;;  %v4641_v28 = vsub.f32 1.0, %v4640_v11  ;;  %vm12336_vm6 = vmor %vm4629_vm15, %vm4630_vm5 }
 0x6ca   :  { %v12327_v27 = vpop.eup %9553  ;;  %v4340_v34 = vmul.f32 %v12317_v49, %v12253_v9  ;;  %v4046_v50 = vand.u32 2147483647, %v12198_v1  ;;  %v4026_v55 = vand.u32 2147483647, %v3959_v29  ;;  %v4322_v51 = vsel %vm12258_vm13, %v4321_v23, %v4317_v52 }
 0x6cb   :  { %vm12340_vm7 = vcmp.eq.f32.partialorder %v4333_v45, 8.507059e+37  ;;  %v4650_v20 = vand.u32 2147483648, %v12210_v47  ;;  %v4655_v8 = vmul.f32 %v12327_v27, %v12264_v4  ;;  %9555 = vrcp.f32 %v12323_v18 }
 0x6cc   :  { %v4632_v23 = vsel %vm12336_vm6, %v12187_v35, %v4628_v36  ;;  %vm4330_vm8 = vweird.f32 %v12220_v43  ;;  %vm4644_vm9 = vweird.f32 %v12210_v47  ;;  %v4648_v58 = vand.u32 2147483647, %v12210_v47 }
 0x6cd   :  { %v4341_v14 = vsub.f32 1.0, %v4340_v34  ;;  %v4328_v57 = vadd.f32 %v12220_v43, %v4327_v15  ;;  %v4348_v11 = vand.u32 2147483647, %v12253_v9  ;;  %v4656_v6 = vsub.f32 1.0, %v4655_v8  ;;  %vm12375_vm10 = vmor %vm4329_vm4, %vm4330_vm8 }
 0x6ce   :  { %v12356_v45 = vadd.f32 1.0, %v4127_v21  ;;  %v12359_v16 = vmul.f32 %v4322_v51, %v12181_v61  ;;  %v4642_v52 = vmul.f32 %v12275_v10, %v4641_v28  ;;  %v12363_v35 = vmul.f32 %v4046_v50, %v12198_v1 }
 0x6cf   :  { %v12365_v36 = vmul.f32 %v4026_v55, %v3959_v29  ;;  %v4637_v34 = vsel %vm12284_vm1, %v4636_v63, %v4632_v23  ;;  %v4651_v32 = vor.u32 1.1754944e-38, %v4650_v20  ;;  %v4342_v15 = vmul.f32 %v12317_v49, %v4341_v14  ;;  %v12387_v63 = vpop.xlane.xlu2 %4002 }
 0x6d0   :  { %9557 = vrcp.f32 %v12356_v45  ;;  %vm12379_vm11 = vcmp.eq.f32.partialorder %v4648_v58, 8.507059e+37  ;;  %vm4344_vm12 = vweird.f32 %v12253_v9  ;;  %v4350_v29 = vand.u32 2147483648, %v12253_v9 }
 0x6d1   :  { %vm4659_vm13 = vweird.f32 %v12264_v4  ;;  %v4663_v25 = vand.u32 2147483647, %v12264_v4  ;;  %v12389_v21 = vpop.eup %9555  ;;  %v4332_v39 = vsel %vm12375_vm10, %v12220_v43, %v4328_v57  ;;  %vm12394_vm14 = vcmp.eq.f32.partialorder %v4348_v11, 8.507059e+37  ;;  %v12408_v43 = vpop.xlane.xlu1 %3962 }
 0x6d2   :  { %v4657_v50 = vmul.f32 %v12327_v27, %v4656_v6  ;;  %v4665_v55 = vand.u32 2147483648, %v12264_v4  ;;  %v4107_v51 = vmul.f32 %v12292_v60, %v12292_v60  ;;  %v12403_v20 = vmul.f32 %v4637_v34, %v12196_v53 }
 0x6d3   :  { %v4643_v8 = vadd.f32 %v12275_v10, %v4642_v52  ;;  %vm4645_vm15 = vweird.f32 %v12275_v10  ;;  %vm4345_vm1 = vweird.f32 %v12317_v49  ;;  %v4343_v23 = vadd.f32 %v12317_v49, %v4342_v15 }
 0x6d4   :  { %v4355_v58 = vmul.f32 %v12389_v21, %v12323_v18  ;;  %v12413_v14 = vadd.f32 1.0, %v4107_v51  ;;  %v4128_v57 = vmul.f32 %v12387_v63, %v12387_v63  ;;  %v4337_v53 = vsel %vm12340_vm7, %v12304_v48, %v4332_v39  ;;  %vm12429_vm4 = vmor %vm4644_vm9, %vm4645_vm15 }
 0x6d5   :  { %v4351_v11 = vor.u32 1.1754944e-38, %v4350_v29  ;;  %vm12420_vm2 = vcmp.eq.f32.partialorder %v4663_v25, 8.507059e+37  ;;  %v4047_v52 = vand.u32 2147483647, %v12290_v22  ;;  %v4658_v61 = vadd.f32 %v12327_v27, %v4657_v50  ;;  %vm12443_vm6 = vmor %vm4344_vm12, %vm4345_vm1 }
 0x6d6   :  { %v12425_v34 = vpop.eup %9557  ;;  %vm4660_vm5 = vweird.f32 %v12327_v27  ;;  %v4666_v48 = vor.u32 1.1754944e-38, %v4665_v55  ;;  %9559 = vrcp.f32 %v12413_v14  ;;  %v4647_v19 = vsel %vm12429_vm4, %v12275_v10, %v4643_v8 }
 0x6d7   :  { %v4365_v29 = vand.u32 2147483648, %v12323_v18  ;;  %v4670_v25 = vmul.f32 %v12425_v34, %v12356_v45  ;;  %v4027_v39 = vand.u32 2147483647, %v12292_v60  ;;  %v4347_v50 = vsel %vm12443_vm6, %v12317_v49, %v4343_v23  ;;  %vm12463_vm7 = vmor %vm4659_vm13, %vm4660_vm5 }
 0x6d8   :  { %v4356_v10 = vsub.f32 1.0, %v4355_v58  ;;  %v12454_v55 = vadd.f32 1.0, %v4128_v57  ;;  %v4108_v9 = vmul.f32 %v12408_v43, %v12408_v43  ;;  %v12459_v51 = vmul.f32 %v4337_v53, %v12249_v31 }
 0x6d9   :  { %v4363_v15 = vand.u32 2147483647, %v12323_v18  ;;  %v12469_v47 = vmul.f32 %v4047_v52, %v12290_v22  ;;  %v4671_v49 = vsub.f32 1.0, %v4670_v25  ;;  %v4652_v23 = vsel %vm12379_vm11, %v4651_v32, %v4647_v19  ;;  %v12500_v25 = vpop.xlane.xlu1 %4004 }
 0x6da   :  { %v4662_v31 = vsel %vm12463_vm7, %v12327_v27, %v4658_v61  ;;  %vm4359_vm8 = vweird.f32 %v12323_v18  ;;  %v4680_v4 = vand.u32 2147483648, %v12356_v45  ;;  %9561 = vrcp.f32 %v12454_v55  ;;  %v3943_v61 = vpop.xlane.xlu2 %3942 }
 0x6db   :  { %v4352_v58 = vsel %vm12394_vm14, %v4351_v11, %v4347_v50  ;;  %v4678_v22 = vand.u32 2147483647, %v12356_v45  ;;  %v12483_v57 = vmul.f32 %v4027_v39, %v12292_v60  ;;  %v12485_v1 = vadd.f32 1.0, %v4108_v9 }
 0x6dc   :  { %v12487_v32 = vpop.eup %9559  ;;  %v4357_v27 = vmul.f32 %v12389_v21, %v4356_v10  ;;  %v4366_v53 = vor.u32 1.1754944e-38, %v4365_v29  ;;  %vm4674_vm9 = vweird.f32 %v12356_v45  ;;  %v4048_v52 = vand.u32 2147483647, %v12387_v63 }
 0x6dd   :  { %v12493_v28 = vmul.f32 %v4652_v23, %v12307_v0  ;;  %v4667_v11 = vsel %vm12420_vm2, %v4666_v48, %v4662_v31  ;;  %v4672_v60 = vmul.f32 %v12425_v34, %v4671_v49  ;;  %v4370_v19 = vmul.f32 %v12487_v32, %v12413_v14 }
 0x6de   :  { %v12503_v29 = vmul.f32 %v4352_v58, %v12321_v26  ;;  %vm4360_vm10 = vweird.f32 %v12389_v21  ;;  %vm12506_vm11 = vcmp.eq.f32.partialorder %v4363_v15, 8.507059e+37  ;;  %v4681_v0 = vor.u32 1.1754944e-38, %v4680_v4 }
 0x6df   :  { %9563 = vrcp.f32 %v12485_v1  ;;  %vm12511_vm12 = vcmp.eq.f32.partialorder %v4678_v22, 8.507059e+37  ;;  %v4371_v48 = vsub.f32 1.0, %v4370_v19  ;;  %v4378_v50 = vand.u32 2147483647, %v12413_v14  ;;  %v12533_v22 = vpop.xlane.xlu0 %3964  ;;  %vm12545_vm15 = vmor %vm4359_vm8, %vm4360_vm10 }
 0x6e0   :  { %v4380_v10 = vand.u32 2147483648, %v12413_v14  ;;  %v4098_v26 = vmul.f32 %v3943_v61, %v3943_v61  ;;  %v12517_v9 = vpop.eup %9561  ;;  %v12520_v8 = vmul.f32 %v4667_v11, %v12363_v35  ;;  %v4358_v15 = vadd.f32 %v12389_v21, %v4357_v27 }
 0x6e1   :  { %v12524_v49 = vmul.f32 %v4048_v52, %v12387_v63  ;;  %v4129_v23 = vmul.f32 %v12500_v25, %v12500_v25  ;;  %v4673_v31 = vadd.f32 %v12425_v34, %v4672_v60  ;;  %vm4675_vm13 = vweird.f32 %v12425_v34 }
 0x6e2   :  { %v4372_v4 = vmul.f32 %v12487_v32, %v4371_v48  ;;  %v4685_v58 = vmul.f32 %v12517_v9, %v12454_v55  ;;  %vm4374_vm14 = vweird.f32 %v12413_v14  ;;  %v4028_v35 = vand.u32 2147483647, %v12408_v43  ;;  %vm12563_vm2 = vmor %vm4674_vm9, %vm4675_vm13  ;;  %v3981_v18 = vpop.xlane.xlu2 %3980 }
 0x6e3   :  { %v12537_v63 = vadd.f32 1.0, %v4098_v26  ;;  %v12539_v27 = vadd.f32 1.0, %v4129_v23  ;;  %vm12549_vm1 = vcmp.eq.f32.partialorder %v4378_v50, 8.507059e+37  ;;  %v4381_v60 = vor.u32 1.1754944e-38, %v4380_v10 }
 0x6e4   :  { %v4695_v19 = vand.u32 2147483648, %v12454_v55  ;;  %v4018_v48 = vand.u32 2147483647, %v3943_v61  ;;  %v4362_v23 = vsel %vm12545_vm15, %v12389_v21, %v4358_v15  ;;  %v4686_v50 = vsub.f32 1.0, %v4685_v58 }
 0x6e5   :  { %v12554_v26 = vpop.eup %9563  ;;  %9565 = vrcp.f32 %v12537_v63  ;;  %v4109_v10 = vmul.f32 %v12533_v22, %v12533_v22  ;;  %v4677_v13 = vsel %vm12563_vm2, %v12425_v34, %v4673_v31  ;;  %v4373_v21 = vadd.f32 %v12487_v32, %v4372_v4 }
 0x6e6   :  { %vm4375_vm4 = vweird.f32 %v12487_v32  ;;  %v4385_v45 = vmul.f32 %v12554_v26, %v12485_v1  ;;  %vm4689_vm5 = vweird.f32 %v12454_v55  ;;  %v4693_v15 = vand.u32 2147483647, %v12454_v55 }
 0x6e7   :  { %v12580_v58 = vmul.f32 %v4028_v35, %v12408_v43  ;;  %v4395_v52 = vand.u32 2147483648, %v12485_v1  ;;  %9567 = vrcp.f32 %v12539_v27  ;;  %v4367_v34 = vsel %vm12506_vm11, %v4366_v53, %v4362_v23  ;;  %vm12591_vm6 = vmor %vm4374_vm14, %vm4375_vm4 }
 0x6e8   :  { %v4696_v31 = vor.u32 1.1754944e-38, %v4695_v19  ;;  %v4386_v4 = vsub.f32 1.0, %v4385_v45  ;;  %v4393_v2 = vand.u32 2147483647, %v12485_v1  ;;  %v4682_v3 = vsel %vm12511_vm12, %v4681_v0, %v4677_v13 }
 0x6e9   :  { %v4687_v35 = vmul.f32 %v12517_v9, %v4686_v50  ;;  %v4049_v24 = vand.u32 2147483647, %v12500_v25  ;;  %v12597_v30 = vadd.f32 1.0, %v4109_v10  ;;  %v4377_v53 = vsel %vm12591_vm6, %v12487_v32, %v4373_v21 }
 0x6ea   :  { %v4387_v39 = vmul.f32 %v12554_v26, %v4386_v4  ;;  %v12603_v6 = vmul.f32 %v4018_v48, %v3943_v61  ;;  %v4117_v13 = vmul.f32 %v3981_v18, %v3981_v18  ;;  %v12608_v0 = vmul.f32 %v4367_v34, %v12365_v36  ;;  %v12713_v61 = vpop.xlane.xlu2 %3936 }
 0x6eb   :  { %v12605_v14 = vpop.eup %9565  ;;  %vm12610_vm7 = vcmp.eq.f32.partialorder %v4693_v15, 8.507059e+37  ;;  %vm4389_vm8 = vweird.f32 %v12485_v1  ;;  %v4396_v23 = vor.u32 1.1754944e-38, %v4395_v52  ;;  %9569 = vrcp.f32 %v12597_v30  ;;  %v12641_v52 = vpop.xlane.xlu1 %3940 }
 0x6ec   :  { %v12617_v32 = vmul.f32 %v4682_v3, %v12469_v47  ;;  %vm4690_vm9 = vweird.f32 %v12517_v9  ;;  %vm12620_vm10 = vcmp.eq.f32.partialorder %v4393_v2, 8.507059e+37  ;;  %v4235_v36 = vmul.f32 %v12605_v14, %v12537_v63 }
 0x6ed   :  { %v4245_v48 = vand.u32 2147483648, %v12537_v63  ;;  %v12627_v50 = vpop.eup %9567  ;;  %v4382_v10 = vsel %vm12549_vm1, %v4381_v60, %v4377_v53  ;;  %v4688_v21 = vadd.f32 %v12517_v9, %v4687_v35  ;;  %v12633_v3 = vmul.f32 %v4049_v24, %v12500_v25  ;;  %vm12653_vm12 = vmor %vm4689_vm5, %vm4690_vm9 }
 0x6ee   :  { %v12635_v47 = vadd.f32 1.0, %v4117_v13  ;;  %v4388_v2 = vadd.f32 %v12554_v26, %v4387_v39  ;;  %vm4390_vm11 = vweird.f32 %v12554_v26  ;;  %v4236_v45 = vsub.f32 1.0, %v4235_v36 }
 0x6ef   :  { %v4700_v15 = vmul.f32 %v12627_v50, %v12539_v27  ;;  %v4243_v11 = vand.u32 2147483647, %v12537_v63  ;;  %v4029_v60 = vand.u32 2147483647, %v12533_v22  ;;  %v4037_v34 = vand.u32 2147483647, %v3981_v18  ;;  %vm12667_vm14 = vmor %vm4389_vm8, %vm4390_vm11 }
 0x6f0   :  { %9571 = vrcp.f32 %v12635_v47  ;;  %v12647_v24 = vmul.f32 %v4382_v10, %v12483_v57  ;;  %vm4239_vm13 = vweird.f32 %v12537_v63  ;;  %v4246_v4 = vor.u32 1.1754944e-38, %v4245_v48 }
 0x6f1   :  { %v4701_v43 = vsub.f32 1.0, %v4700_v15  ;;  %v12658_v35 = vpop.eup %9569  ;;  %v4692_v53 = vsel %vm12653_vm12, %v12517_v9, %v4688_v21  ;;  %v4237_v57 = vmul.f32 %v12605_v14, %v4236_v45  ;;  %vm4704_vm15 = vweird.f32 %v12539_v27 }
 0x6f2   :  { %v4097_v39 = vmul.f32 %v12641_v52, %v12641_v52  ;;  %v4392_v13 = vsel %vm12667_vm14, %v12554_v26, %v4388_v2  ;;  %v4708_v36 = vand.u32 2147483647, %v12539_v27  ;;  %v4400_v1 = vmul.f32 %v12658_v35, %v12597_v30  ;;  %v12800_v54 = vpop.xlane.xlu2 %3974 }
 0x6f3   :  { %v4702_v9 = vmul.f32 %v12627_v50, %v4701_v43  ;;  %vm12682_vm1 = vcmp.eq.f32.partialorder %v4243_v11, 8.507059e+37  ;;  %v4710_v10 = vand.u32 2147483648, %v12539_v27  ;;  %v12688_v21 = vmul.f32 %v4029_v60, %v12533_v22  ;;  %v3983_v60 = vpop.xlane.xlu0 %3982 }
 0x6f4   :  { %v12690_v45 = vmul.f32 %v4037_v34, %v3981_v18  ;;  %v12692_v15 = vadd.f32 1.0, %v4097_v39  ;;  %v4697_v26 = vsel %vm12610_vm7, %v4696_v31, %v4692_v53  ;;  %vm4240_vm2 = vweird.f32 %v12605_v14 }
 0x6f5   :  { %v4401_v2 = vsub.f32 1.0, %v4400_v1  ;;  %v4410_v11 = vand.u32 2147483648, %v12597_v30  ;;  %v4397_v43 = vsel %vm12620_vm10, %v4396_v23, %v4392_v13  ;;  %v4238_v22 = vadd.f32 %v12605_v14, %v4237_v57  ;;  %vm12727_vm7 = vmor %vm4239_vm13, %vm4240_vm2 }
 0x6f6   :  { %v12698_v25 = vpop.eup %9571  ;;  %v4408_v18 = vand.u32 2147483647, %v12597_v30  ;;  %9573 = vrcp.f32 %v12692_v15  ;;  %v4703_v19 = vadd.f32 %v12627_v50, %v4702_v9  ;;  %vm4705_vm4 = vweird.f32 %v12627_v50 }
 0x6f7   :  { %vm12707_vm5 = vcmp.eq.f32.partialorder %v4708_v36, 8.507059e+37  ;;  %v4520_v34 = vmul.f32 %v12698_v25, %v12635_v47  ;;  %v12716_v23 = vmul.f32 %v4697_v26, %v12524_v49  ;;  %v4711_v53 = vor.u32 1.1754944e-38, %v4710_v10  ;;  %vm12737_vm8 = vmor %vm4704_vm15, %vm4705_vm4 }
 0x6f8   :  { %v4402_v55 = vmul.f32 %v12658_v35, %v4401_v2  ;;  %vm4404_vm6 = vweird.f32 %v12597_v30  ;;  %v12721_v57 = vmul.f32 %v4397_v43, %v12580_v58  ;;  %v4411_v13 = vor.u32 1.1754944e-38, %v4410_v11  ;;  %v12754_v11 = vpop.xlane.xlu1 %3978 }
 0x6f9   :  { %v4521_v9 = vsub.f32 1.0, %v4520_v34  ;;  %v4528_v49 = vand.u32 2147483647, %v12635_v47  ;;  %v4242_v36 = vsel %vm12727_vm7, %v12605_v14, %v4238_v22  ;;  %vm12741_vm9 = vcmp.eq.f32.partialorder %v4408_v18, 8.507059e+37 }
 0x6fa   :  { %vm4524_vm10 = vweird.f32 %v12635_v47  ;;  %v4118_v1 = vmul.f32 %v3983_v60, %v3983_v60  ;;  %v4095_v10 = vmul.f32 %v12713_v61, %v12713_v61  ;;  %v4707_v14 = vsel %vm12737_vm8, %v12627_v50, %v4703_v19 }
 0x6fb   :  { %v4522_v27 = vmul.f32 %v12698_v25, %v4521_v9  ;;  %v4530_v26 = vand.u32 2147483648, %v12635_v47  ;;  %v4017_v2 = vand.u32 2147483647, %v12641_v52  ;;  %v4403_v22 = vadd.f32 %v12658_v35, %v4402_v55  ;;  %v3939_v30 = vpop.xlane.xlu0 %3938 }
 0x6fc   :  { %v12756_v43 = vpop.eup %9573  ;;  %vm4405_vm11 = vweird.f32 %v12658_v35  ;;  %v12760_v18 = vadd.f32 1.0, %v4118_v1  ;;  %v12762_v34 = vadd.f32 1.0, %v4095_v10  ;;  %v4247_v50 = vsel %vm12682_vm1, %v4246_v4, %v4242_v36 }
 0x6fd   :  { %vm12766_vm12 = vcmp.eq.f32.partialorder %v4528_v49, 8.507059e+37  ;;  %v4220_v39 = vmul.f32 %v12756_v43, %v12692_v15  ;;  %v4038_v9 = vand.u32 2147483647, %v3983_v60  ;;  %v4712_v55 = vsel %vm12707_vm5, %v4711_v53, %v4707_v14  ;;  %vm12780_vm13 = vmor %vm4404_vm6, %vm4405_vm11 }
 0x6fe   :  { %v4228_v58 = vand.u32 2147483647, %v12692_v15  ;;  %9575 = vrcp.f32 %v12760_v18  ;;  %v4116_v1 = vmul.f32 %v12754_v11, %v12754_v11  ;;  %v4523_v48 = vadd.f32 %v12698_v25, %v4522_v27 }
 0x6ff   :  { %vm4525_vm14 = vweird.f32 %v12698_v25  ;;  %v4221_v49 = vsub.f32 1.0, %v4220_v39  ;;  %9577 = vrcp.f32 %v12762_v34  ;;  %v4407_v31 = vsel %vm12780_vm13, %v12658_v35, %v4403_v22 }
 0x700   :  { %v4531_v53 = vor.u32 1.1754944e-38, %v4530_v26  ;;  %v12791_v36 = vmul.f32 %v4017_v2, %v12641_v52  ;;  %vm4224_vm15 = vweird.f32 %v12692_v15  ;;  %v12795_v10 = vmul.f32 %v4247_v50, %v12603_v6  ;;  %vm12807_vm1 = vmor %vm4524_vm10, %vm4525_vm14 }
 0x701   :  { %v4222_v14 = vmul.f32 %v12756_v43, %v4221_v49  ;;  %v4230_v27 = vand.u32 2147483648, %v12692_v15  ;;  %v4015_v39 = vand.u32 2147483647, %v12713_v61  ;;  %v12803_v35 = vmul.f32 %v4712_v55, %v12633_v3 }
 0x702   :  { %vm12811_vm2 = vcmp.eq.f32.partialorder %v4228_v58, 8.507059e+37  ;;  %v12815_v26 = vmul.f32 %v4038_v9, %v3983_v60  ;;  %v12817_v2 = vadd.f32 1.0, %v4116_v1  ;;  %v4412_v22 = vsel %vm12741_vm9, %v4411_v13, %v4407_v31 }
 0x703   :  { %v4527_v3 = vsel %vm12807_vm1, %v12698_v25, %v4523_v48  ;;  %v4545_v47 = vand.u32 2147483648, %v12760_v18  ;;  %v4096_v50 = vmul.f32 %v3939_v30, %v3939_v30  ;;  %v4223_v58 = vadd.f32 %v12756_v43, %v4222_v14 }
 0x704   :  { %v12825_v55 = vpop.eup %9575  ;;  %vm4225_vm4 = vweird.f32 %v12756_v43  ;;  %9579 = vrcp.f32 %v12817_v2  ;;  %v4114_v60 = vmul.f32 %v12800_v54, %v12800_v54  ;;  %v4231_v13 = vor.u32 1.1754944e-38, %v4230_v27 }
 0x705   :  { %v12832_v63 = vpop.eup %9577  ;;  %v4535_v25 = vmul.f32 %v12825_v55, %v12760_v18  ;;  %v12837_v9 = vmul.f32 %v4015_v39, %v12713_v61  ;;  %v4036_v1 = vand.u32 2147483647, %v12754_v11  ;;  %v12841_v4 = vmul.f32 %v4412_v22, %v12688_v21  ;;  %vm12850_vm5 = vmor %vm4224_vm15, %vm4225_vm4 }
 0x706   :  { %v4532_v48 = vsel %vm12766_vm12, %v4531_v53, %v4527_v3  ;;  %v4543_v49 = vand.u32 2147483647, %v12760_v18  ;;  %v4190_v31 = vmul.f32 %v12832_v63, %v12762_v34  ;;  %vm4539_vm6 = vweird.f32 %v12760_v18 }
 0x707   :  { %v4536_v61 = vsub.f32 1.0, %v4535_v25  ;;  %v12855_v27 = vor.u32 1.1754944e-38, %v4545_v47  ;;  %v4200_v21 = vand.u32 2147483648, %v12762_v34  ;;  %v12858_v19 = vadd.f32 1.0, %v4096_v50 }
 0x708   :  { %v4227_v53 = vsel %vm12850_vm5, %v12756_v43, %v4223_v58  ;;  %v4191_v39 = vsub.f32 1.0, %v4190_v31  ;;  %v4016_v52 = vand.u32 2147483647, %v3939_v30  ;;  %v12863_v15 = vadd.f32 1.0, %v4114_v60 }
 0x709   :  { %v12866_v22 = vmul.f32 %v4532_v48, %v12690_v45  ;;  %v4537_v3 = vmul.f32 %v12825_v55, %v4536_v61  ;;  %vm4194_vm7 = vweird.f32 %v12762_v34  ;;  %v4198_v47 = vand.u32 2147483647, %v12762_v34  ;;  %v3935_v45 = vpop.xlane.xlu1 %3934 }
 0x70a   :  { %9581 = vrcp.f32 %v12858_v19  ;;  %v12872_v50 = vpop.eup %9579  ;;  %v4513_v25 = vand.u32 2147483647, %v12817_v2  ;;  %v4515_v43 = vand.u32 2147483648, %v12817_v2  ;;  %v4034_v58 = vand.u32 2147483647, %v12800_v54 }
 0x70b   :  { %16860 = vst [vmem:[#allocation43_spill] sm:$0xff] %v12866_v22  ;;  %9583 = vrcp.f32 %v12863_v15  ;;  %v4232_v60 = vsel %vm12811_vm2, %v4231_v13, %v4227_v53  ;;  %vm12880_vm8 = vcmp.eq.f32.partialorder %v4543_v49, 8.507059e+37  ;;  %v4192_v31 = vmul.f32 %v12832_v63, %v4191_v39  ;;  %v16884_v53 = vld [vmem:[#allocation77_spill] sm:$0xff] }
 0x70c   :  { %v12886_v14 = vmul.f32 %v4036_v1, %v12754_v11  ;;  %v4505_v61 = vmul.f32 %v12872_v50, %v12817_v2  ;;  %vm4540_vm9 = vweird.f32 %v12825_v55  ;;  %v4201_v5 = vor.u32 1.1754944e-38, %v4200_v21 }
 0x70d   :  { %vm4509_vm10 = vweird.f32 %v12817_v2  ;;  %v12892_v17 = vmul.f32 %v4016_v52, %v3939_v30  ;;  %v4538_v6 = vadd.f32 %v12825_v55, %v4537_v3  ;;  %vm4195_vm11 = vweird.f32 %v12832_v63  ;;  %vm12923_vm14 = vmor %vm4539_vm6, %vm4540_vm9 }
 0x70e   :  { %vm12896_vm12 = vcmp.eq.f32.partialorder %v4198_v47, 8.507059e+37  ;;  %v4506_v11 = vsub.f32 1.0, %v4505_v61  ;;  %v4094_v1 = vmul.f32 %v3935_v45, %v3935_v45  ;;  %v12901_v49 = vmul.f32 %v4232_v60, %v12791_v36  ;;  %v3977_v36 = vpop.xlane.xlu0 %3976  ;;  %vm12943_vm1 = vmor %vm4194_vm7, %vm4195_vm11 }
 0x70f   :  { %vm12903_vm13 = vcmp.eq.f32.partialorder %v4513_v25, 8.507059e+37  ;;  %v4516_v21 = vor.u32 1.1754944e-38, %v4515_v43  ;;  %v4215_v30 = vand.u32 2147483648, %v12858_v19  ;;  %v12909_v39 = vmul.f32 %v4034_v58, %v12800_v54 }
 0x710   :  { %16865 = vst [vmem:[#allocation53_spill] sm:$0xff] %v12901_v49  ;;  %v12911_v52 = vpop.eup %9581  ;;  %v4193_v3 = vadd.f32 %v12832_v63, %v4192_v31  ;;  %v4507_v47 = vmul.f32 %v12872_v50, %v4506_v11  ;;  %v4014_v61 = vand.u32 2147483647, %v3935_v45  ;;  %v12915_v46 = vadd.f32 1.0, %v4094_v1 }
 0x711   :  { %v12917_v25 = vpop.eup %9583  ;;  %vm4510_vm15 = vweird.f32 %v12872_v50  ;;  %v4205_v54 = vmul.f32 %v12911_v52, %v12858_v19  ;;  %v4213_v58 = vand.u32 2147483647, %v12858_v19  ;;  %v4483_v60 = vand.u32 2147483647, %v12863_v15 }
 0x712   :  { %v4542_v31 = vsel %vm12923_vm14, %v12825_v55, %v4538_v6  ;;  %v4508_v11 = vadd.f32 %v12872_v50, %v4507_v47  ;;  %v4475_v18 = vmul.f32 %v12917_v25, %v12863_v15  ;;  %9585 = vrcp.f32 %v12915_v46  ;;  %vm12954_vm5 = vmor %vm4509_vm10, %vm4510_vm15 }
 0x713   :  { %v4206_v22 = vsub.f32 1.0, %v4205_v54  ;;  %vm4209_vm2 = vweird.f32 %v12858_v19  ;;  %v4216_v43 = vor.u32 1.1754944e-38, %v4215_v30  ;;  %vm4479_vm4 = vweird.f32 %v12863_v15 }
 0x714   :  { %v4197_v55 = vsel %vm12943_vm1, %v12832_v63, %v4193_v3  ;;  %v4476_v34 = vsub.f32 1.0, %v4475_v18  ;;  %v4485_v47 = vand.u32 2147483648, %v12863_v15  ;;  %v4115_v49 = vmul.f32 %v3977_v36, %v3977_v36 }
 0x715   :  { %v4547_v30 = vsel %vm12880_vm8, %v12855_v27, %v4542_v31  ;;  %v4512_v54 = vsel %vm12954_vm5, %v12872_v50, %v4508_v11  ;;  %v4207_v63 = vmul.f32 %v12911_v52, %v4206_v22  ;;  %v12966_v3 = vmul.f32 %v4014_v61, %v3935_v45 }
 0x716   :  { %vm12968_vm6 = vcmp.eq.f32.partialorder %v4213_v58, 8.507059e+37  ;;  %v4477_v18 = vmul.f32 %v12917_v25, %v4476_v34  ;;  %vm12973_vm7 = vcmp.eq.f32.partialorder %v4483_v60, 8.507059e+37  ;;  %v4035_v48 = vand.u32 2147483647, %v3977_v36 }
 0x717   :  { %v12977_v27 = vadd.f32 1.0, %v4115_v49  ;;  %v4202_v50 = vsel %vm12896_vm12, %v4201_v5, %v4197_v55  ;;  %vm4210_vm8 = vweird.f32 %v12911_v52  ;;  %vm4480_vm9 = vweird.f32 %v12917_v25  ;;  %v4011_v55 = vpop.xlane.xlu0 %4010 }
 0x718   :  { %v4185_v22 = vand.u32 2147483648, %v12915_v46  ;;  %v12984_v45 = vpop.eup %9585  ;;  %v4517_v61 = vsel %vm12903_vm13, %v4516_v21, %v4512_v54  ;;  %v4208_v58 = vadd.f32 %v12911_v52, %v4207_v63  ;;  %v4478_v60 = vadd.f32 %v12917_v25, %v4477_v18  ;;  %vm13001_vm10 = vmor %vm4209_vm2, %vm4210_vm8 }
 0x719   :  { %9587 = vrcp.f32 %v12977_v27  ;;  %v12992_v13 = vmul.f32 %v4547_v30, %v12815_v26  ;;  %v4486_v5 = vor.u32 1.1754944e-38, %v4485_v47  ;;  %v4175_v49 = vmul.f32 %v12984_v45, %v12915_v46  ;;  %v3969_v26 = vpop.xlane.xlu1 %3968  ;;  %vm13016_vm12 = vmor %vm4479_vm4, %vm4480_vm9 }
 0x71a   :  { %v12997_v31 = vmul.f32 %v4202_v50, %v12837_v9  ;;  %vm4179_vm11 = vweird.f32 %v12915_v46  ;;  %v4183_v21 = vand.u32 2147483647, %v12915_v46  ;;  %v13007_v11 = vmul.f32 %v4035_v48, %v3977_v36  ;;  %v3971_v36 = vpop.xlane.xlu2 %3970 }
 0x71b   :  { %v13010_v6 = vmul.f32 %v4517_v61, %v12886_v14  ;;  %v4176_v19 = vsub.f32 1.0, %v4175_v49  ;;  %v4186_v34 = vor.u32 1.1754944e-38, %v4185_v22  ;;  %v4789_v47 = vmul.f32 %v12841_v4, %v11548_v33  ;;  %v16896_v33 = vld [vmem:[#allocation37_spill] sm:$0xff] }
 0x71c   :  { %v4212_v30 = vsel %vm13001_vm10, %v12911_v52, %v4208_v58  ;;  %v4482_v14 = vsel %vm13016_vm12, %v12917_v25, %v4478_v60  ;;  %v4809_v15 = vmul.f32 %v12803_v35, %v11536_v44  ;;  %v9864_v54 = vmov 2.0  }
 0x71d   :  { %9589 = vrcp.f32 %v9864_v54  ;;  %v4177_v63 = vmul.f32 %v12984_v45, %v4176_v19  ;;  %v4788_v18 = vmul.f32 %v12721_v57, %v11518_v62  ;;  %v4111_v4 = vmul.f32 %v3969_v26, %v3969_v26 }
 0x71e   :  { %v4132_v48 = vmul.f32 %v4011_v55, %v4011_v55  ;;  %vm4180_vm13 = vweird.f32 %v12984_v45  ;;  %vm13036_vm14 = vcmp.eq.f32.partialorder %v4183_v21, 8.507059e+37  ;;  %v4498_v25 = vand.u32 2147483647, %v12977_v27 }
 0x71f   :  { %v13033_v50 = vpop.eup %9587  ;;  %v4500_v35 = vand.u32 2147483648, %v12977_v27  ;;  %v4112_v22 = vmul.f32 %v3971_v36, %v3971_v36  ;;  %v4217_v61 = vsel %vm12968_vm6, %v4216_v43, %v4212_v30  ;;  %v4487_v57 = vsel %vm12973_vm7, %v4486_v5, %v4482_v14  ;;  %vm13069_vm15 = vmor %vm4179_vm11, %vm4180_vm13 }
 0x720   :  { %v4490_v58 = vmul.f32 %v13033_v50, %v12977_v27  ;;  %v13048_v60 = vadd.f32 1.0, %v4111_v4  ;;  %v4178_v49 = vadd.f32 %v12984_v45, %v4177_v63  ;;  %v4808_v21 = vmul.f32 %v12716_v23, %v16884_v53  ;;  %v16897_v53 = vld [vmem:[#allocation27_spill] sm:$0xff] }
 0x721   :  { %v4031_v9 = vand.u32 2147483647, %v3969_v26  ;;  %v13053_v19 = vadd.f32 1.0, %v4132_v48  ;;  %v4052_v43 = vand.u32 2147483647, %v4011_v55  ;;  %v13056_v2 = vadd.f32 1.0, %v4112_v22 }
 0x722   :  { %v4491_v54 = vsub.f32 1.0, %v4490_v58  ;;  %9591 = vrcp.f32 %v13048_v60  ;;  %v13059_v5 = vmul.f32 %v4217_v61, %v12892_v17  ;;  %v4829_v30 = vadd.f32 %v4809_v15, %v4789_v47 }
 0x723   :  { %v9590_v1 = vpop.eup %9589  ;;  %9593 = vrcp.f32 %v13053_v19  ;;  %v4032_v14 = vand.u32 2147483647, %v3971_v36  ;;  %v13063_v63 = vmul.f32 %v4487_v57, %v12909_v39  ;;  %v13073_v4 = vor.u32 1.1754944e-38, %v4500_v35 }
 0x724   :  { %v4835_v48 = vmul.f32 2.0, %v9590_v1  ;;  %v4440_v17 = vand.u32 2147483648, %v13048_v60  ;;  %v4182_v47 = vsel %vm13069_vm15, %v12984_v45, %v4178_v49  ;;  %v4492_v39 = vmul.f32 %v13033_v50, %v4491_v54 }
 0x725   :  { %v4828_v15 = vadd.f32 %v4808_v21, %v4788_v18  ;;  %v13080_v22 = vmul.f32 %v4031_v9, %v3969_v26  ;;  %vm4494_vm1 = vweird.f32 %v12977_v27  ;;  %vm4495_vm2 = vweird.f32 %v13033_v50 }
 0x726   :  { %v4836_v46 = vsub.f32 1.0, %v4835_v48  ;;  %v13084_v61 = vmul.f32 %v4052_v43, %v4011_v55  ;;  %9595 = vrcp.f32 %v13056_v2  ;;  %vm4434_vm4 = vweird.f32 %v13048_v60  ;;  %vm13143_vm13 = vmor %vm4494_vm1, %vm4495_vm2 }
 0x727   :  { %v4438_v35 = vand.u32 2147483647, %v13048_v60  ;;  %v4753_v45 = vand.u32 2147483647, %v13053_v19  ;;  %v13090_v57 = vmul.f32 %v4032_v14, %v3971_v36  ;;  %v13096_v26 = vsel %vm13036_vm14, %v4186_v34, %v4182_v47  ;;  %v16889_v14 = vld [vmem:[#allocation67_spill] sm:$0xff]  ;;  %v16894_v47 = vld [vmem:[#allocation57_spill] sm:$0xff] }
 0x728   :  { %v13092_v18 = vpop.eup %9591  ;;  %v4837_v58 = vmul.f32 %v9590_v1, %v4836_v46  ;;  %vm4839_vm5 = vweird.f32 %v9590_v1  ;;  %v4441_v55 = vor.u32 1.1754944e-38, %v4440_v17  ;;  %v4493_v21 = vadd.f32 %v13033_v50, %v4492_v39  ;;  %v16895_v46 = vld [vmem:[#allocation47_spill] sm:$0xff] }
 0x729   :  { %v9594_v49 = vpop.eup %9593  ;;  %v4430_v9 = vmul.f32 %v13092_v18, %v13048_v60  ;;  %vm4749_vm6 = vweird.f32 %v13053_v19  ;;  %v4755_v36 = vand.u32 2147483648, %v13053_v19  ;;  %vm13103_vm7 = vcmp.eq.f32.partialorder %v4498_v25, 8.507059e+37 }
 0x72a   :  { %v4838_v52 = vadd.f32 %v9590_v1, %v4837_v58  ;;  %v4745_v34 = vmul.f32 %v9594_v49, %v13053_v19  ;;  %v4453_v43 = vand.u32 2147483647, %v13056_v2  ;;  %v4787_v23 = vmul.f32 %v12647_v24, %v16889_v14 }
 0x72b   :  { %v4431_v48 = vsub.f32 1.0, %v4430_v9  ;;  %vm4435_vm8 = vweird.f32 %v13092_v18  ;;  %vm13112_vm9 = vcmp.eq.f32.partialorder %v4438_v35, 8.507059e+37  ;;  %vm13116_vm10 = vcmp.eq.f32.partialorder %v4753_v45, 8.507059e+37 }
 0x72c   :  { %vm4449_vm11 = vweird.f32 %v13056_v2  ;;  %v4807_v39 = vmul.f32 %v12617_v32, %v16894_v47  ;;  %v4786_v58 = vmul.f32 %v12608_v0, %v16895_v46  ;;  %v13125_v24 = vpop.eup %9595  ;;  %v13128_v9 = vsel %vm4839_vm5, %v9590_v1, %v4838_v52  ;;  %v16901_v46 = vld [vmem:[#allocation86_spill] sm:$0xff]  ;;  %vm13159_vm14 = vmor %vm4434_vm4, %vm4435_vm8 }
 0x72d   :  { %v4746_v35 = vsub.f32 1.0, %v4745_v34  ;;  %vm4750_vm12 = vweird.f32 %v9594_v49  ;;  %v4806_v45 = vmul.f32 %v12520_v8, %v16896_v33  ;;  %v4856_v44 = vmul.f32 %v13128_v9, %v4829_v30 }
 0x72e   :  { %v4432_v62 = vmul.f32 %v13092_v18, %v4431_v48  ;;  %v4445_v32 = vmul.f32 %v13125_v24, %v13056_v2  ;;  %v4785_v0 = vmul.f32 %v12503_v29, %v16897_v53  ;;  %v4855_v14 = vmul.f32 %v13128_v9, %v4828_v15  ;;  %v16900_v48 = vld [vmem:[#allocation17_spill] sm:$0xff]  ;;  %vm13172_vm1 = vmor %vm4749_vm6, %vm4750_vm12 }
 0x72f   :  { %v4747_v47 = vmul.f32 %v9594_v49, %v4746_v35  ;;  %v4827_v1 = vadd.f32 %v4807_v39, %v4787_v23  ;;  %v4826_v52 = vadd.f32 %v4806_v45, %v4786_v58  ;;  %4867 = vmatpush.msrb.mxu3 %v4856_v44  ;;  %v4805_v29 = vmul.f32 %v12493_v28, %v16900_v48  ;;  %v4009_v23 = vpop.xlane.xlu2 %4008  ;;  %v16904_v28 = vld [vmem:[#allocation76_spill] sm:$0xff]  ;;  %v16909_v44 = vld [vmem:[#allocation66_spill] sm:$0xff] }
 0x730   :  { %v4433_v30 = vadd.f32 %v13092_v18, %v4432_v62  ;;  %v4446_v34 = vsub.f32 1.0, %v4445_v32  ;;  %v4784_v15 = vmul.f32 %v12459_v51, %v16901_v46  ;;  %v4497_v39 = vsel %vm13143_vm13, %v13033_v50, %v4493_v21 }
 0x731   :  { %v4748_v62 = vadd.f32 %v9594_v49, %v4747_v47  ;;  %vm4450_vm15 = vweird.f32 %v13125_v24  ;;  %v4804_v27 = vmul.f32 %v12403_v20, %v16904_v28  ;;  %4868 = vmatpush.msrb.mxu3 %v4855_v14  ;;  %v4854_v21 = vmul.f32 %v13128_v9, %v4827_v1 }
 0x732   :  { %v4437_v51 = vsel %vm13159_vm14, %v13092_v18, %v4433_v30  ;;  %v4447_v60 = vmul.f32 %v13125_v24, %v4446_v34  ;;  %v4825_v47 = vadd.f32 %v4805_v29, %v4785_v0  ;;  %v4756_v14 = vor.u32 1.1754944e-38, %v4755_v36  ;;  %v4013_v18 = vpop.xlane.xlu1 %4012  ;;  %vm13194_vm2 = vmor %vm4449_vm11, %vm4450_vm15 }
 0x733   :  { %v4752_v20 = vsel %vm13172_vm1, %v9594_v49, %v4748_v62  ;;  %v4455_v58 = vand.u32 2147483648, %v13056_v2  ;;  %v4131_v35 = vmul.f32 %v4009_v23, %v4009_v23  ;;  %v4502_v19 = vsel %vm13103_vm7, %v13073_v4, %v4497_v39  ;;  %4869 = vmatpush.msrb.mxu3 %v4854_v21  ;;  %v3973_v2 = vpop.xlane.xlu0 %3972 }
 0x734   :  { %v4448_v45 = vadd.f32 %v13125_v24, %v4447_v60  ;;  %v4853_v32 = vmul.f32 %v13128_v9, %v4826_v52  ;;  %v4824_v8 = vadd.f32 %v4804_v27, %v4784_v15  ;;  %v4442_v0 = vsel %vm13112_vm9, %v4441_v55, %v4437_v51  ;;  %v16910_v51 = vld [vmem:[#allocation56_spill] sm:$0xff] }
 0x735   :  { %v4757_v49 = vsel %vm13116_vm10, %v4756_v14, %v4752_v20  ;;  %v4051_v4 = vand.u32 2147483647, %v4009_v23  ;;  %v13198_v54 = vadd.f32 1.0, %v4131_v35  ;;  %v13202_v1 = vmul.f32 %v13096_v26, %v12966_v3  ;;  %v16913_v14 = vld [vmem:[#allocation26_spill] sm:$0xff] }
 0x736   :  { %v4452_v55 = vsel %vm13194_vm2, %v13125_v24, %v4448_v45  ;;  %4870 = vmatpush.msrb.mxu3 %v4853_v32  ;;  %v4852_v17 = vmul.f32 %v13128_v9, %v4825_v47  ;;  %v4133_v25 = vmul.f32 %v4013_v18, %v4013_v18  ;;  %v13209_v52 = vmul.f32 %v4502_v19, %v13007_v11  ;;  %v16912_v47 = vld [vmem:[#allocation36_spill] sm:$0xff] }
 0x737   :  { %vm4454_vm4 = vcmp.eq.f32.partialorder %v4453_v43, 8.507059e+37  ;;  %v4456_v30 = vor.u32 1.1754944e-38, %v4455_v58  ;;  %9597 = vrcp.f32 %v13198_v54  ;;  %v13213_v34 = vmul.f32 %v4442_v0, %v13080_v22  ;;  %v16914_v58 = vld [vmem:[#allocation16_spill] sm:$0xff] }
 0x738   :  { %v13216_v3 = vmul.f32 %v4757_v49, %v13084_v61  ;;  %4871 = vmatpush.msrb.mxu3 %v4852_v17  ;;  %v4851_v26 = vmul.f32 %v13128_v9, %v4824_v8  ;;  %v13219_v24 = vadd.f32 1.0, %v4133_v25  ;;  %v13221_v15 = vmul.f32 %v4051_v4, %v4009_v23  ;;  %v16911_v23 = vld [vmem:[#allocation46_spill] sm:$0xff]  ;;  %v16918_v25 = vld [vmem:[#allocation65_spill] sm:$0xff] }
 0x739   :  { %v4457_v29 = vsel %vm4454_vm4, %v4456_v30, %v4452_v55  ;;  %v4053_v11 = vand.u32 2147483647, %v4013_v18  ;;  %v4113_v39 = vmul.f32 %v3973_v2, %v3973_v2  ;;  %v4738_v43 = vand.u32 2147483647, %v13198_v54 }
 0x73a   :  { %4872 = vmatpush.msrb.mxu3 %v4851_v26  ;;  %9599 = vrcp.f32 %v13219_v24  ;;  %v4033_v22 = vand.u32 2147483647, %v3973_v2  ;;  %v4783_v61 = vmul.f32 %v12359_v16, %v16909_v44  ;;  %v4740_v62 = vand.u32 2147483648, %v13198_v54  ;;  %v4007_v36 = vpop.xlane.xlu1 %4006 }
 0x73b   :  { %v13228_v27 = vadd.f32 1.0, %v4113_v39  ;;  %v4803_v50 = vmul.f32 %v12310_v37, %v16910_v51  ;;  %v4782_v60 = vmul.f32 %v12282_v41, %v16911_v23  ;;  %v13235_v21 = vmul.f32 %v4457_v29, %v13090_v57  ;;  %v3967_v26 = vpop.xlane.xlu0 %3966 }
 0x73c   :  { %vm4734_vm5 = vweird.f32 %v13198_v54  ;;  %v4802_v20 = vmul.f32 %v12240_v7, %v16912_v47  ;;  %v4781_v16 = vmul.f32 %v12223_v38, %v16913_v14  ;;  %v4801_v35 = vmul.f32 %v12164_v40, %v16914_v58 }
 0x73d   :  { %v9598_v19 = vpop.eup %9597  ;;  %v13244_v45 = vmul.f32 %v4053_v11, %v4013_v18  ;;  %v4768_v37 = vand.u32 2147483647, %v13219_v24  ;;  %v4770_v41 = vand.u32 2147483648, %v13219_v24  ;;  %9601 = vrcp.f32 %v13228_v27  ;;  %v16917_v18 = vld [vmem:[#allocation85_spill] sm:$0xff] }
 0x73e   :  { %v4730_v57 = vmul.f32 %v9598_v19, %v13198_v54  ;;  %vm13250_vm6 = vcmp.eq.f32.partialorder %v4738_v43, 8.507059e+37  ;;  %v13254_v7 = vmul.f32 %v4033_v22, %v3973_v2  ;;  %v4823_v38 = vadd.f32 %v4803_v50, %v4783_v61  ;;  %v16922_v54 = vld [vmem:[#allocation35_spill] sm:$0xff] }
 0x73f   :  { %v4741_v8 = vor.u32 1.1754944e-38, %v4740_v62  ;;  %v4822_v40 = vadd.f32 %v4802_v20, %v4782_v60  ;;  %v4821_v0 = vadd.f32 %v4801_v35, %v4781_v16  ;;  %v4780_v49 = vmul.f32 %v12069_v12, %v16917_v18 }
 0x740   :  { %v9600_v4 = vpop.eup %9599  ;;  %v4731_v55 = vsub.f32 1.0, %v4730_v57  ;;  %vm4764_vm7 = vweird.f32 %v13219_v24  ;;  %v4850_v17 = vmul.f32 %v13128_v9, %v4823_v38  ;;  %v4800_v30 = vmul.f32 %v12067_v59, %v16918_v25 }
 0x741   :  { %vm4735_vm8 = vweird.f32 %v9598_v19  ;;  %v4760_v2 = vmul.f32 %v9600_v4, %v13219_v24  ;;  %vm13263_vm9 = vcmp.eq.f32.partialorder %v4768_v37, 8.507059e+37  ;;  %v4771_v11 = vor.u32 1.1754944e-38, %v4770_v41 }
 0x742   :  { %v4468_v12 = vand.u32 2147483647, %v13228_v27  ;;  %v4732_v39 = vmul.f32 %v9598_v19, %v4731_v55  ;;  %vm4464_vm10 = vweird.f32 %v13228_v27  ;;  %4873 = vmatpush.msrb.mxu3 %v4850_v17  ;;  %v4849_v43 = vmul.f32 %v13128_v9, %v4822_v40  ;;  %vm4736_vm12 = vmor %vm4734_vm5, %vm4735_vm8  ;;  %v16921_v40 = vld [vmem:[#allocation55_spill] sm:$0xff] }
 0x743   :  { %v4820_v22 = vadd.f32 %v4800_v30, %v4780_v49  ;;  %v4130_v61 = vmul.f32 %v4007_v36, %v4007_v36  ;;  %v9602_v59 = vpop.eup %9601  ;;  %v4761_v62 = vsub.f32 1.0, %v4760_v2  ;;  %vm4765_vm11 = vweird.f32 %v9600_v4 }
 0x744   :  { %v4470_v50 = vand.u32 2147483648, %v13228_v27  ;;  %v4110_v60 = vmul.f32 %v3967_v26, %v3967_v26  ;;  %v4733_v20 = vadd.f32 %v9598_v19, %v4732_v39  ;;  %v4460_v16 = vmul.f32 %v9602_v59, %v13228_v27  ;;  %4874 = vmatpush.msrb.mxu3 %v4849_v43  ;;  %vm4766_vm13 = vmor %vm4764_vm7, %vm4765_vm11 }
 0x745   :  { %v4848_v35 = vmul.f32 %v13128_v9, %v4821_v0  ;;  %v4050_v37 = vand.u32 2147483647, %v4007_v36  ;;  %v4762_v41 = vmul.f32 %v9600_v4, %v4761_v62  ;;  %v13276_v57 = vadd.f32 1.0, %v4130_v61 }
 0x746   :  { %v4030_v38 = vand.u32 2147483647, %v3967_v26  ;;  %v4779_v49 = vmul.f32 %v11987_v56, %v16921_v40  ;;  %v4737_v55 = vsel %vm4736_vm12, %v9598_v19, %v4733_v20  ;;  %v4461_v17 = vsub.f32 1.0, %v4460_v16  ;;  %v16927_v16 = vld [vmem:[#allocation48_spill] sm:$0xff] }
 0x747   :  { %4875 = vmatpush.msrb.mxu3 %v4848_v35  ;;  %v4847_v30 = vmul.f32 %v13128_v9, %v4820_v22  ;;  %v13281_v2 = vadd.f32 1.0, %v4110_v60  ;;  %v4742_v0 = vsel %vm13250_vm6, %v4741_v8, %v4737_v55  ;;  %v4763_v39 = vadd.f32 %v9600_v4, %v4762_v41  ;;  %v16928_v35 = vld [vmem:[#allocation53_spill] sm:$0xff] }
 0x748   :  { %9603 = vrcp.f32 %v13276_v57  ;;  %v4799_v43 = vmul.f32 %v11983_v42, %v16922_v54  ;;  %v4462_v56 = vmul.f32 %v9602_v59, %v4461_v17  ;;  %vm4465_vm14 = vweird.f32 %v9602_v59 }
 0x749   :  { %vm13291_vm15 = vcmp.eq.f32.partialorder %v4468_v12, 8.507059e+37  ;;  %v4471_v22 = vor.u32 1.1754944e-38, %v4470_v50  ;;  %4876 = vmatpush.msrb.mxu3 %v4847_v30  ;;  %v4767_v32 = vsel %vm4766_vm13, %v9600_v4, %v4763_v39  ;;  %v13295_v8 = vmul.f32 %v4050_v37, %v4007_v36  ;;  %vm4466_vm1 = vmor %vm4464_vm10, %vm4465_vm14  ;;  %v16931_v39 = vld [vmem:[#allocation88_spill] sm:$0xff] }
 0x74a   :  { %v13297_v61 = vmul.f32 %v4030_v38, %v3967_v26  ;;  %9605 = vrcp.f32 %v13281_v2  ;;  %v4743_v42 = vmul.f32 %v4742_v0, %v13221_v15  ;;  %v4772_v24 = vsel %vm13263_vm9, %v4771_v11, %v4767_v32  ;;  %v16925_v15 = vld [vmem:[#allocation15_spill] sm:$0xff]  ;;  %v16926_v11 = vld [vmem:[#allocation58_spill] sm:$0xff] }
 0x74b   :  { %v4463_v62 = vadd.f32 %v9602_v59, %v4462_v56  ;;  %v4723_v12 = vand.u32 2147483647, %v13276_v57  ;;  %v4773_v60 = vmul.f32 %v4772_v24, %v13244_v45  ;;  %v4725_v36 = vand.u32 2147483648, %v13276_v57  ;;  %v16932_v56 = vld [vmem:[#allocation78_spill] sm:$0xff] }
 0x74c   :  { %v4423_v4 = vand.u32 2147483647, %v13281_v2  ;;  %v4819_v26 = vadd.f32 %v4799_v43, %v4779_v49  ;;  %vm4719_vm2 = vweird.f32 %v13276_v57  ;;  %v4778_v29 = vmul.f32 %v12795_v10, %v16925_v15  ;;  %v16930_v49 = vld [vmem:[#allocation43_spill] sm:$0xff] }
 0x74d   :  { %v4467_v50 = vsel %vm4466_vm1, %v9602_v59, %v4463_v62  ;;  %v4798_v20 = vmul.f32 %v12992_v13, %v16926_v11  ;;  %v4777_v45 = vmul.f32 %v16928_v35, %v16927_v16  ;;  %v4425_v41 = vand.u32 2147483648, %v13281_v2  ;;  %v16929_v59 = vld [vmem:[#allocation38_spill] sm:$0xff]  ;;  %v16935_v35 = vld [vmem:[#allocation29_spill] sm:$0xff] }
 0x74e   :  { %v9604_v37 = vpop.eup %9603  ;;  %v4472_v27 = vsel %vm13291_vm15, %v4471_v22, %v4467_v50  ;;  %v4846_v38 = vmul.f32 %v13128_v9, %v4819_v26  ;;  %v4797_v55 = vmul.f32 %v16930_v49, %v16929_v59  ;;  %vm4419_vm5 = vweird.f32 %v13281_v2  ;;  %v16933_v22 = vld [vmem:[#allocation68_spill] sm:$0xff] }
 0x74f   :  { %v4473_v17 = vmul.f32 %v4472_v27, %v13254_v7  ;;  %v4715_v10 = vmul.f32 %v9604_v37, %v13276_v57  ;;  %vm4720_vm4 = vweird.f32 %v9604_v37  ;;  %v4818_v13 = vadd.f32 %v4798_v20, %v4778_v29  ;;  %v16934_v29 = vld [vmem:[#allocation39_spill] sm:$0xff] }
 0x750   :  { %v9606_v30 = vpop.eup %9605  ;;  %4877 = vmatpush.msrb.mxu3 %v4846_v38  ;;  %v4817_v0 = vadd.f32 %v4797_v55, %v4777_v45  ;;  %v4776_v43 = vmul.f32 %v13059_v5, %v16931_v39  ;;  %v4796_v19 = vmul.f32 %v13010_v6, %v16932_v56  ;;  %v4775_v32 = vmul.f32 %v12997_v31, %v16933_v22  ;;  %v16936_v27 = vld [vmem:[#allocation19_spill] sm:$0xff]  ;;  %vm4721_vm7 = vmor %vm4719_vm2, %vm4720_vm4 }
 0x751   :  { %v4716_v24 = vsub.f32 1.0, %v4715_v10  ;;  %v4415_v7 = vmul.f32 %v9606_v30, %v13281_v2  ;;  %vm4420_vm6 = vweird.f32 %v9606_v30  ;;  %v4845_v62 = vmul.f32 %v13128_v9, %v4818_v13  ;;  %v16937_v38 = vld [vmem:[#allocation79_spill] sm:$0xff]  ;;  %v16938_v13 = vld [vmem:[#allocation89_spill] sm:$0xff] }
 0x752   :  { %v4844_v26 = vmul.f32 %v13128_v9, %v4817_v0  ;;  %v4816_v50 = vadd.f32 %v4796_v19, %v4776_v43  ;;  %v4795_v20 = vmul.f32 %v13209_v52, %v16934_v29  ;;  %v4774_v5 = vmul.f32 %v13202_v1, %v16935_v35  ;;  %v16939_v43 = vld [vmem:[#allocation69_spill] sm:$0xff]  ;;  %vm4421_vm10 = vmor %vm4419_vm5, %vm4420_vm6 }
 0x753   :  { %v4717_v45 = vmul.f32 %v9604_v37, %v4716_v24  ;;  %v4416_v6 = vsub.f32 1.0, %v4415_v7  ;;  %4878 = vmatpush.msrb.mxu3 %v4845_v62  ;;  %v4794_v31 = vmul.f32 %v13063_v63, %v16936_v27  ;;  %v4793_v49 = vmul.f32 %v4473_v17, %v16937_v38  ;;  %v16940_v24 = vld [vmem:[#allocation59_spill] sm:$0xff] }
 0x754   :  { %v4843_v55 = vmul.f32 %v13128_v9, %v4816_v50  ;;  %v4815_v10 = vadd.f32 %v4795_v20, %v4775_v32  ;;  %v4813_v0 = vmul.f32 %v4773_v60, %v16938_v13  ;;  %v4792_v19 = vmul.f32 %v13235_v21, %v16939_v43 }
 0x755   :  { %v4718_v52 = vadd.f32 %v9604_v37, %v4717_v45  ;;  %v4417_v22 = vmul.f32 %v9606_v30, %v4416_v6  ;;  %4879 = vmatpush.msrb.mxu3 %v4844_v26  ;;  %v4814_v1 = vadd.f32 %v4794_v31, %v4774_v5  ;;  %v4812_v7 = vmul.f32 %v13216_v3, %v16940_v24  ;;  %v16943_v26 = vld [vmem:[#allocation13_spill] sm:$0xff]  ;;  %v16945_v6 = vld [vmem:[#allocation23_spill] sm:$0xff] }
 0x756   :  { %vm4724_vm8 = vcmp.eq.f32.partialorder %v4723_v12, 8.507059e+37  ;;  %v4726_v63 = vor.u32 1.1754944e-38, %v4725_v36  ;;  %vm13350_vm9 = vcmp.eq.f32.partialorder %v4423_v4, 8.507059e+37  ;;  %v4833_v60 = vadd.f32 %v4813_v0, %v4793_v49  ;;  %v16944_v12 = vld [vmem:[#allocation49_spill] sm:$0xff] }
 0x757   :  { %v4722_v32 = vsel %vm4721_vm7, %v9604_v37, %v4718_v52  ;;  %v4418_v21 = vadd.f32 %v9606_v30, %v4417_v22  ;;  %4880 = vmatpush.msrb.mxu3 %v4843_v55  ;;  %v4842_v62 = vmul.f32 %v13128_v9, %v4815_v10  ;;  %v4811_v50 = vmul.f32 %v4743_v42, %v16943_v26  ;;  %v3735_v22 = vld [vmem:[%s16303_s5] sm:$0xff]  ;;  %v3737_v10 = vld [vmem:[%s16303_s5 + $0x10] sm:$0xff]  ;;  %v3736_v0 = vld [vmem:[%s16303_s5 + $0x8] sm:$0xff] }
 0x758   :  { %v4727_v20 = vsel %vm4724_vm8, %v4726_v63, %v4722_v32  ;;  %v4426_v3 = vor.u32 1.1754944e-38, %v4425_v41  ;;  %v4841_v57 = vmul.f32 %v13128_v9, %v4814_v1  ;;  %v4791_v36 = vmul.f32 %v13213_v34, %v16944_v12 }
 0x759   :  { %v4728_v4 = vmul.f32 %v4727_v20, %v13295_v8  ;;  %v4422_v37 = vsel %vm4421_vm10, %v9606_v30, %v4418_v21  ;;  %4881 = vmatpush.msrb.mxu3 %v4842_v62  ;;  %v4860_v42 = vmul.f32 %v13128_v9, %v4833_v60  ;;  %v4832_v5 = vadd.f32 %v4812_v7, %v4792_v19  ;;  %v16946_v30 = vld [vmem:[#allocation33_spill] sm:$0xff]  ;;  %v3738_v19 = vld [vmem:[%s16303_s5 + $0x18] sm:$0xff] }
 0x75a   :  { %v4427_v2 = vsel %vm13350_vm9, %v4426_v3, %v4422_v37  ;;  %v4831_v45 = vadd.f32 %v4811_v50, %v4791_v36 }
 0x75b   :  { %v4428_v41 = vmul.f32 %v4427_v2, %v13297_v61  ;;  %4882 = vmatpush.msrb.mxu3 %v4841_v57  ;;  %v4810_v34 = vmul.f32 %v4728_v4, %v16945_v6  ;;  %v4859_v8 = vmul.f32 %v13128_v9, %v4832_v5 }
 0x75c   :  { %4883 = vmatmul.f32.vlgmr.msrb.gmra.mxu3 %v3735_v22  ;;  %v4858_v49 = vmul.f32 %v13128_v9, %v4831_v45 }
 0x75d   :  { %4902 = vmatpush.msra.mxu3 %v4860_v42  ;;  %v4790_v31 = vmul.f32 %v4428_v41, %v16946_v30 }
 0x75f   :  { %4903 = vmatpush.msra.mxu3 %v4859_v8  ;;  %v4830_v55 = vadd.f32 %v4810_v34, %v4790_v31 }
 0x761   :  { %4904 = vmatpush.msra.mxu3 %v4858_v49  ;;  %v4857_v61 = vmul.f32 %v13128_v9, %v4830_v55 }
 0x763   :  { %4905 = vmatpush.msra.mxu3 %v4857_v61 }
 0x764   :  { %4886 = vmatmul.f32.gmra.mxu3 %v3737_v10 }
 0x76c   :  { %8600 = vmatmul.msk.f32.vlgmr.msra.gmra.mxu3 %vm675_vm0, %v3736_v0 }
 0x774   :  { %8601 = vmatmul.msk.f32.gmra.mxu3 %vm675_vm0, %v3738_v19 }
 0x7df   :  { %v4884_v52 = vpop.f32.mrf.mxu3 }
 0x7e7   :  { %v4887_v1 = vpop.f32.mrf.mxu3 }
 0x7ef   :  { %v4907_v7 = vpop.f32.mrf.mxu3 }
 0x7f0   :  { %v13386_v63 = vadd.f32 %v4907_v7, %v4884_v52 }
 0x7f2   :  { %16947 = vst [vmem:[#allocation63_spill] sm:$0xff] %v13386_v63  ;;  %4913 = vmax.xlane.f32.xlu0 %v13386_v63 }
 0x7f7   :  { %v4910_v17 = vpop.f32.mrf.mxu3 }
 0x7f8   :  { %v13389_v60 = vadd.f32 %v4910_v17, %v4887_v1 }
 0x7fa   :  { %16948 = vst [vmem:[#allocation73_spill] sm:$0xff] %v13389_v60  ;;  %4915 = vmax.xlane.f32.xlu2 %v13389_v60 }
 0x865   :  { %v4914_v32 = vpop.xlane.xlu0 %4913 }
 0x866   :  { %v4917_v21 = vsub.f32 %v13386_v63, %v4914_v32 }
 0x868   :  { %v4919_v62 = vmul.f32 1.442695, %v4917_v21 }
 0x86a   :  { %9607 = vpow2.f32 %v4919_v62 }
 0x86d   :  { %v4916_v50 = vpop.xlane.xlu2 %4915 }
 0x86e   :  { %v4918_v20 = vsub.f32 %v13389_v60, %v4916_v50  ;;  %v9783_v50 = vld [vmem:[%s16302_s4] sm:$0xff] }
 0x870   :  { %v9608_v3 = vpop.eup %9607  ;;  %v4921_v57 = vmul.f32 1.442695, %v4918_v20  ;;  %v9784_v20 = vld [vmem:[%s16302_s4 + $0x8] sm:$0xff] }
 0x871   :  { %4923 = vadd.xlane.f32.xlu2 %v9608_v3 }
 0x872   :  { %9609 = vpow2.f32 %v4921_v57  ;;  %v9785_v57 = vld [vmem:[%s16302_s4 + $0x10] sm:$0xff] }
 0x878   :  { %v9610_v36 = vpop.eup %9609 }
 0x879   :  { %4925 = vadd.xlane.f32.xlu1 %v9610_v36 }
 0x8e4   :  { %v4924_v4 = vpop.xlane.xlu2 %4923 }
 0x8e5   :  { %9611 = vrcp.f32 %v4924_v4  ;;  %vm4932_vm12 = vweird.f32 %v4924_v4  ;;  %v4938_v49 = vand.u32 2147483648, %v4924_v4  ;;  %v4936_v61 = vand.u32 2147483647, %v4924_v4 }
 0x8e7   :  { %v4939_v1 = vor.u32 1.1754944e-38, %v4938_v49  ;;  %vm4937_vm4 = vcmp.eq.f32.partialorder %v4936_v61, 8.507059e+37  ;;  %v9800_v61 = vld [vmem:[%s16302_s4 + $0x88] sm:$0xff] }
 0x8eb   :  { %v9612_v37 = vpop.eup %9611 }
 0x8ec   :  { %v4928_v22 = vmul.f32 %v9612_v37, %v4924_v4  ;;  %v4926_v42 = vpop.xlane.xlu1 %4925  ;;  %vm4933_vm11 = vweird.f32 %v9612_v37  ;;  %v9788_v4 = vld [vmem:[%s16302_s4 + $0x28] sm:$0xff] }
 0x8ed   :  { %9613 = vrcp.f32 %v4926_v42  ;;  %v4953_v31 = vand.u32 2147483648, %v4926_v42  ;;  %v4951_v10 = vand.u32 2147483647, %v4926_v42  ;;  %vm4934_vm14 = vmor %vm4932_vm12, %vm4933_vm11  ;;  %vm4947_vm15 = vweird.f32 %v4926_v42 }
 0x8ee   :  { %v4929_v5 = vsub.f32 1.0, %v4928_v22  ;;  %v9790_v22 = vld [vmem:[%s16302_s4 + $0x38] sm:$0xff] }
 0x8ef   :  { %v4954_v52 = vor.u32 1.1754944e-38, %v4953_v31  ;;  %vm4952_vm2 = vcmp.eq.f32.partialorder %v4951_v10, 8.507059e+37  ;;  %v9798_v31 = vld [vmem:[%s16302_s4 + $0x78] sm:$0xff] }
 0x8f0   :  { %v4930_v2 = vmul.f32 %v9612_v37, %v4929_v5  ;;  %v9792_v5 = vld [vmem:[%s16302_s4 + $0x48] sm:$0xff] }
 0x8f2   :  { %v4931_v8 = vadd.f32 %v9612_v37, %v4930_v2  ;;  %v9793_v2 = vld [vmem:[%s16302_s4 + $0x50] sm:$0xff] }
 0x8f3   :  { %v9614_v41 = vpop.eup %9613 }
 0x8f4   :  { %v4943_v45 = vmul.f32 %v9614_v41, %v4926_v42  ;;  %vm4948_vm13 = vweird.f32 %v9614_v41  ;;  %v4935_v19 = vsel %vm4934_vm14, %v9612_v37, %v4931_v8  ;;  %v9789_v37 = vld [vmem:[%s16302_s4 + $0x30] sm:$0xff]  ;;  %v9791_v42 = vld [vmem:[%s16302_s4 + $0x40] sm:$0xff] }
 0x8f5   :  { %vm4949_vm1 = vmor %vm4947_vm15, %vm4948_vm13  ;;  %v4940_v32 = vsel %vm4937_vm4, %v4939_v1, %v4935_v19  ;;  %v9797_v8 = vld [vmem:[%s16302_s4 + $0x70] sm:$0xff]  ;;  %v9802_v1 = vld [vmem:[%s16302_s4 + $0x98] sm:$0xff] }
 0x8f6   :  { %v4944_v34 = vsub.f32 1.0, %v4943_v45  ;;  %v4941_v62 = vmul.f32 %v9608_v3, %v4940_v32  ;;  %v9786_v3 = vld [vmem:[%s16302_s4 + $0x18] sm:$0xff]  ;;  %v9795_v45 = vld [vmem:[%s16302_s4 + $0x60] sm:$0xff]  ;;  %v9801_v19 = vld [vmem:[%s16302_s4 + $0x90] sm:$0xff] }
 0x8f8   :  { %v4945_v55 = vmul.f32 %v9614_v41, %v4944_v34  ;;  %v9796_v34 = vld [vmem:[%s16302_s4 + $0x68] sm:$0xff] }
 0x8fa   :  { %v4946_v0 = vadd.f32 %v9614_v41, %v4945_v55  ;;  %v9799_v55 = vld [vmem:[%s16302_s4 + $0x80] sm:$0xff] }
 0x8fc   :  { %v4950_v7 = vsel %vm4949_vm1, %v9614_v41, %v4946_v0  ;;  %v9794_v41 = vld [vmem:[%s16302_s4 + $0x58] sm:$0xff] }
 0x8fd   :  { %v4955_v17 = vsel %vm4952_vm2, %v4954_v52, %v4950_v7 }
 0x8fe   :  { %v4956_v21 = vmul.f32 %v9610_v36, %v4955_v17  ;;  %v9787_v36 = vld [vmem:[%s16302_s4 + $0x20] sm:$0xff] }
 0x900   :  { %4971 = vmatpush.msra.mxu1 %v4956_v21 }
 0x902   :  { %4972 = vmatpush.msra.mxu1 %v4941_v62 }
 0x903   :  { %8602 = vmatmul.msk.f32.vlgmr.msra.gmra.mxu1 %vm3756_vm3, %v9783_v50 }
 0x90b   :  { %8603 = vmatmul.msk.f32.gmra.mxu1 %vm3756_vm3, %v9784_v20 }
 0x913   :  { %8604 = vmatmul.msk.f32.gmra.mxu1 %vm3756_vm3, %v9785_v57 }
 0x91b   :  { %8605 = vmatmul.msk.f32.gmra.mxu1 %vm3756_vm3, %v9786_v3 }
 0x923   :  { %8606 = vmatmul.msk.f32.gmra.mxu1 %vm3756_vm3, %v9787_v36 }
 0x92b   :  { %8607 = vmatmul.msk.f32.gmra.mxu1 %vm3756_vm3, %v9788_v4 }
 0x933   :  { %8608 = vmatmul.msk.f32.gmra.mxu1 %vm3756_vm3, %v9789_v37 }
 0x93b   :  { %8609 = vmatmul.msk.f32.gmra.mxu1 %vm3756_vm3, %v9790_v22 }
 0x943   :  { %8610 = vmatmul.msk.f32.gmra.mxu1 %vm3756_vm3, %v9791_v42 }
 0x94b   :  { %8611 = vmatmul.msk.f32.gmra.mxu1 %vm3756_vm3, %v9792_v5 }
 0x953   :  { %8612 = vmatmul.msk.f32.gmra.mxu1 %vm3756_vm3, %v9793_v2 }
 0x95b   :  { %8613 = vmatmul.msk.f32.gmra.mxu1 %vm3756_vm3, %v9794_v41 }
 0x963   :  { %8614 = vmatmul.msk.f32.gmra.mxu1 %vm3756_vm3, %v9795_v45 }
 0x96b   :  { %8615 = vmatmul.msk.f32.gmra.mxu1 %vm3756_vm3, %v9796_v34 }
 0x973   :  { %8616 = vmatmul.msk.f32.gmra.mxu1 %vm3756_vm3, %v9797_v8 }
 0x97b   :  { %8617 = vmatmul.msk.f32.gmra.mxu1 %vm3756_vm3, %v9798_v31 }
 0x980   :  { %v13458_v49 = vpop.f32.mrf.mxu1 }
 0x983   :  { %8618 = vmatmul.msk.f32.gmra.mxu1 %vm3756_vm3, %v9799_v55 }
 0x988   :  { %v13464_v10 = vpop.f32.mrf.mxu1 }
 0x98b   :  { %8619 = vmatmul.msk.f32.gmra.mxu1 %vm3756_vm3, %v9800_v61 }
 0x990   :  { %v13470_v0 = vpop.f32.mrf.mxu1 }
 0x993   :  { %8620 = vmatmul.msk.f32.gmra.mxu1 %vm3756_vm3, %v9801_v19 }
 0x998   :  { %v13476_v52 = vpop.f32.mrf.mxu1 }
 0x99b   :  { %8621 = vmatmul.msk.f32.gmra.mxu1 %vm3756_vm3, %v9802_v1  ;;  %v16949_v1 = vld [vmem:[#allocation47_spill] sm:$0xff] }
 0x9a0   :  { %v4986_v7 = vpop.f32.mrf.mxu1 }
 0x9a8   :  { %v4989_v17 = vpop.f32.mrf.mxu1 }
 0x9a9   :  { %v5059_v32 = vmul.f32 %v4989_v17, %v16922_v54  ;;  %v5039_v21 = vmul.f32 %v4989_v17, %v16921_v40 }
 0x9ab   :  { %5124 = vadd.xlane.f32.xlu0 %v5059_v32  ;;  %5084 = vadd.xlane.f32.xlu2 %v5039_v21  ;;  %v16950_v21 = vld [vmem:[#allocation57_spill] sm:$0xff] }
 0x9b0   :  { %v4992_v62 = vpop.f32.mrf.mxu1 }
 0x9b1   :  { %v5060_v50 = vmul.f32 %v4992_v62, %v16918_v25  ;;  %v5040_v20 = vmul.f32 %v4992_v62, %v16917_v18 }
 0x9b3   :  { %5126 = vadd.xlane.f32.xlu1 %v5060_v50  ;;  %5086 = vadd.xlane.f32.xlu0 %v5040_v20  ;;  %v16951_v50 = vld [vmem:[#allocation67_spill] sm:$0xff] }
 0x9b8   :  { %v4995_v57 = vpop.f32.mrf.mxu1 }
 0x9b9   :  { %v5061_v3 = vmul.f32 %v4995_v57, %v16914_v58  ;;  %v5041_v36 = vmul.f32 %v4995_v57, %v16913_v14 }
 0x9bb   :  { %5128 = vadd.xlane.f32.xlu2 %v5061_v3  ;;  %5088 = vadd.xlane.f32.xlu1 %v5041_v36  ;;  %v16952_v3 = vld [vmem:[#allocation77_spill] sm:$0xff] }
 0x9c0   :  { %v4998_v4 = vpop.f32.mrf.mxu1 }
 0x9c1   :  { %v5062_v37 = vmul.f32 %v4998_v4, %v16912_v47  ;;  %v5042_v22 = vmul.f32 %v4998_v4, %v16911_v23  ;;  %v16953_v4 = vld [vmem:[#allocation87_spill] sm:$0xff] }
 0x9c3   :  { %5130 = vadd.xlane.f32.xlu0 %v5062_v37  ;;  %5090 = vadd.xlane.f32.xlu2 %v5042_v22 }
 0x9c8   :  { %v5001_v42 = vpop.f32.mrf.mxu1 }
 0x9c9   :  { %v5063_v5 = vmul.f32 %v5001_v42, %v16910_v51  ;;  %v5043_v2 = vmul.f32 %v5001_v42, %v16909_v44  ;;  %v5058_v42 = vmul.f32 %v4986_v7, %v16926_v11 }
 0x9cb   :  { %5132 = vadd.xlane.f32.xlu1 %v5063_v5  ;;  %5092 = vadd.xlane.f32.xlu0 %v5043_v2  ;;  %v16954_v5 = vld [vmem:[#allocation18_spill] sm:$0xff] }
 0x9d0   :  { %v5004_v41 = vpop.f32.mrf.mxu1 }
 0x9d1   :  { %v5064_v45 = vmul.f32 %v5004_v41, %v16904_v28  ;;  %v5044_v34 = vmul.f32 %v5004_v41, %v16901_v46  ;;  %v16955_v41 = vld [vmem:[#allocation28_spill] sm:$0xff] }
 0x9d3   :  { %5134 = vadd.xlane.f32.xlu2 %v5064_v45  ;;  %5094 = vadd.xlane.f32.xlu1 %v5044_v34 }
 0x9d8   :  { %v5007_v8 = vpop.f32.mrf.mxu1 }
 0x9d9   :  { %v5065_v31 = vmul.f32 %v5007_v8, %v16900_v48  ;;  %v5045_v55 = vmul.f32 %v5007_v8, %v16897_v53  ;;  %v5036_v8 = vmul.f32 %v13470_v0, %v16931_v39 }
 0x9db   :  { %5136 = vadd.xlane.f32.xlu0 %v5065_v31  ;;  %5096 = vadd.xlane.f32.xlu2 %v5045_v55  ;;  %v5038_v31 = vmul.f32 %v4986_v7, %v16925_v15  ;;  %v5037_v55 = vmul.f32 %v13476_v52, %v16927_v16 }
 0x9e0   :  { %v5010_v61 = vpop.f32.mrf.mxu1 }
 0x9e1   :  { %v5066_v19 = vmul.f32 %v5010_v61, %v16896_v33  ;;  %v5046_v17 = vmul.f32 %v5010_v61, %v16949_v1 }
 0x9e3   :  { %5138 = vadd.xlane.f32.xlu1 %v5066_v19  ;;  %5098 = vadd.xlane.f32.xlu0 %v5046_v17  ;;  %v5055_v19 = vmul.f32 %v13464_v10, %v16934_v29  ;;  %v5057_v17 = vmul.f32 %v13476_v52, %v16929_v59 }
 0x9e8   :  { %v5013_v32 = vpop.f32.mrf.mxu1 }
 0x9e9   :  { %v5067_v62 = vmul.f32 %v5013_v32, %v16950_v21  ;;  %v5047_v20 = vmul.f32 %v5013_v32, %v16951_v50  ;;  %v5056_v32 = vmul.f32 %v13470_v0, %v16932_v56  ;;  %v5054_v0 = vmul.f32 %v13458_v49, %v16936_v27 }
 0x9eb   :  { %5140 = vadd.xlane.f32.xlu2 %v5067_v62  ;;  %5100 = vadd.xlane.f32.xlu1 %v5047_v20  ;;  %v16956_v62 = vld [vmem:[#allocation68_spill] sm:$0xff] }
 0x9ec   :  { %v5035_v20 = vmul.f32 %v13464_v10, %v16956_v62 }
 0x9f0   :  { %v5016_v57 = vpop.f32.mrf.mxu1 }
 0x9f1   :  { %v5068_v36 = vmul.f32 %v5016_v57, %v16952_v3  ;;  %v5048_v37 = vmul.f32 %v5016_v57, %v16953_v4 }
 0x9f3   :  { %5142 = vadd.xlane.f32.xlu0 %v5068_v36  ;;  %5102 = vadd.xlane.f32.xlu2 %v5048_v37  ;;  %v5034_v36 = vmul.f32 %v13458_v49, %v16935_v35 }
 0x9f8   :  { %v5019_v22 = vpop.f32.mrf.mxu1 }
 0x9f9   :  { %v5069_v2 = vmul.f32 %v5019_v22, %v16954_v5  ;;  %v5049_v45 = vmul.f32 %v5019_v22, %v16955_v41 }
 0x9fb   :  { %5122 = vadd.xlane.f32.xlu2 %v5058_v42  ;;  %5144 = vadd.xlane.f32.xlu1 %v5069_v2 }
 0x9fc   :  { %5104 = vadd.xlane.f32.xlu0 %v5049_v45 }
 0xa00   :  { %v5022_v34 = vpop.f32.mrf.mxu1 }
 0xa03   :  { %5078 = vadd.xlane.f32.xlu2 %v5036_v8  ;;  %5082 = vadd.xlane.f32.xlu1 %v5038_v31 }
 0xa04   :  { %5080 = vadd.xlane.f32.xlu0 %v5037_v55 }
 0xa08   :  { %v5025_v61 = vpop.f32.mrf.mxu1 }
 0xa09   :  { %v5051_v22 = vmul.f32 %v5025_v61, %v16944_v12 }
 0xa0b   :  { %5116 = vadd.xlane.f32.xlu2 %v5055_v19  ;;  %5120 = vadd.xlane.f32.xlu1 %v5057_v17  ;;  %v5050_v17 = vmul.f32 %v5022_v34, %v16946_v30 }
 0xa0c   :  { %5118 = vadd.xlane.f32.xlu0 %v5056_v32 }
 0xa10   :  { %v5028_v7 = vpop.f32.mrf.mxu1 }
 0xa11   :  { %v5072_v57 = vmul.f32 %v5028_v7, %v16940_v24  ;;  %v5052_v19 = vmul.f32 %v5028_v7, %v16939_v43  ;;  %v5071_v7 = vmul.f32 %v5025_v61, %v16943_v26 }
 0xa13   :  { %5076 = vadd.xlane.f32.xlu1 %v5035_v20  ;;  %5150 = vadd.xlane.f32.xlu2 %v5072_v57 }
 0xa14   :  { %5074 = vadd.xlane.f32.xlu0 %v5034_v36 }
 0xa18   :  { %v5031_v37 = vpop.f32.mrf.mxu1 }
 0xa19   :  { %v5053_v52 = vmul.f32 %v5031_v37, %v16937_v38  ;;  %v5073_v8 = vmul.f32 %v5031_v37, %v16938_v13 }
 0xa1b   :  { %5114 = vadd.xlane.f32.xlu1 %v5054_v0  ;;  %5112 = vadd.xlane.f32.xlu2 %v5053_v52 }
 0xa1c   :  { %5108 = vadd.xlane.f32.xlu0 %v5051_v22 }
 0xa1e   :  { %v5125_v10 = vpop.xlane.xlu0 %5124  ;;  %v5085_v42 = vpop.xlane.xlu2 %5084 }
 0xa1f   :  { %v5259_v2 = vmul.f32 %v5125_v10, %v5125_v10  ;;  %v5239_v45 = vmul.f32 %v5085_v42, %v5085_v42 }
 0xa21   :  { %v5299_v31 = vadd.f32 1.0, %v5259_v2  ;;  %v13526_v55 = vadd.f32 1.0, %v5239_v45  ;;  %v5070_v2 = vmul.f32 %v5022_v34, %v16945_v6 }
 0xa23   :  { %9615 = vrcp.f32 %v5299_v31  ;;  %5110 = vadd.xlane.f32.xlu1 %v5052_v19  ;;  %5106 = vadd.xlane.f32.xlu2 %v5050_v17  ;;  %v5179_v19 = vand.u32 2147483647, %v5125_v10  ;;  %v5159_v17 = vand.u32 2147483647, %v5085_v42  ;;  %v5398_v38 = vand.u32 2147483647, %v13526_v55 }
 0xa24   :  { %9617 = vrcp.f32 %v13526_v55  ;;  %5152 = vadd.xlane.f32.xlu0 %v5073_v8  ;;  %vm5694_vm6 = vweird.f32 %v5299_v31  ;;  %vm5394_vm7 = vweird.f32 %v13526_v55 }
 0xa25   :  { %v13557_v30 = vmul.f32 %v5159_v17, %v5085_v42  ;;  %vm13588_vm11 = vcmp.eq.f32.partialorder %v5398_v38, 8.507059e+37 }
 0xa26   :  { %v5127_v49 = vpop.xlane.xlu1 %5126  ;;  %v5087_v32 = vpop.xlane.xlu0 %5086 }
 0xa27   :  { %v5260_v20 = vmul.f32 %v5127_v49, %v5127_v49  ;;  %v5240_v57 = vmul.f32 %v5087_v32, %v5087_v32 }
 0xa29   :  { %v13531_v36 = vpop.eup %9615  ;;  %v13533_v37 = vadd.f32 1.0, %v5260_v20  ;;  %v13535_v52 = vadd.f32 1.0, %v5240_v57 }
 0xa2a   :  { %v13538_v0 = vpop.eup %9617  ;;  %v5690_v22 = vmul.f32 %v13531_v36, %v5299_v31  ;;  %vm5695_vm5 = vweird.f32 %v13531_v36 }
 0xa2b   :  { %v5390_v45 = vmul.f32 %v13538_v0, %v13526_v55  ;;  %9619 = vrcp.f32 %v13533_v37  ;;  %5148 = vadd.xlane.f32.xlu1 %v5071_v7  ;;  %v5219_v7 = vmul.f32 %v5179_v19, %v5125_v10  ;;  %v5400_v10 = vand.u32 2147483648, %v13526_v55  ;;  %vm13584_vm10 = vmor %vm5694_vm6, %vm5695_vm5 }
 0xa2c   :  { %9621 = vrcp.f32 %v13535_v52  ;;  %5146 = vadd.xlane.f32.xlu0 %v5070_v2  ;;  %v5691_v8 = vsub.f32 1.0, %v5690_v22  ;;  %v5180_v19 = vand.u32 2147483647, %v5127_v49  ;;  %vm5395_vm9 = vweird.f32 %v13538_v0 }
 0xa2d   :  { %v5391_v61 = vsub.f32 1.0, %v5390_v45  ;;  %v5698_v45 = vand.u32 2147483647, %v5299_v31  ;;  %vm13605_vm12 = vmor %vm5394_vm7, %vm5395_vm9  ;;  %vm5709_vm13 = vweird.f32 %v13533_v37  ;;  %vm5409_vm14 = vweird.f32 %v13535_v52 }
 0xa2e   :  { %v13546_v20 = vpop.xlane.xlu2 %5128  ;;  %v13550_v60 = vpop.xlane.xlu1 %5088  ;;  %v5692_v63 = vmul.f32 %v13531_v36, %v5691_v8  ;;  %v5700_v8 = vand.u32 2147483648, %v5299_v31  ;;  %v13597_v62 = vmul.f32 %v5180_v19, %v5127_v49 }
 0xa2f   :  { %v5261_v57 = vmul.f32 %v13546_v20, %v13546_v20  ;;  %v5392_v26 = vmul.f32 %v13538_v0, %v5391_v61  ;;  %v5241_v43 = vmul.f32 %v13550_v60, %v13550_v60  ;;  %v5160_v61 = vand.u32 2147483647, %v5087_v32 }
 0xa30   :  { %v5693_v42 = vadd.f32 %v13531_v36, %v5692_v63  ;;  %vm13576_vm8 = vcmp.eq.f32.partialorder %v5698_v45, 8.507059e+37  ;;  %v5701_v31 = vor.u32 1.1754944e-38, %v5700_v8 }
 0xa31   :  { %v13552_v34 = vpop.eup %9619  ;;  %v13561_v2 = vadd.f32 1.0, %v5261_v57  ;;  %v5393_v24 = vadd.f32 %v13538_v0, %v5392_v26  ;;  %v13582_v63 = vadd.f32 1.0, %v5241_v43  ;;  %v5200_v8 = vmul.f32 %v5160_v61, %v5087_v32 }
 0xa32   :  { %v13555_v6 = vpop.eup %9621  ;;  %v5705_v22 = vmul.f32 %v13552_v34, %v13533_v37  ;;  %v5697_v26 = vsel %vm13584_vm10, %v13531_v36, %v5693_v42  ;;  %v5715_v42 = vand.u32 2147483648, %v13533_v37  ;;  %v5413_v32 = vand.u32 2147483647, %v13535_v52 }
 0xa33   :  { %v5405_v12 = vmul.f32 %v13555_v6, %v13535_v52  ;;  %9623 = vrcp.f32 %v13561_v2  ;;  %v5397_v49 = vsel %vm13605_vm12, %v13538_v0, %v5393_v24  ;;  %v5702_v19 = vsel %vm13576_vm8, %v5701_v31, %v5697_v26 }
 0xa34   :  { %v5706_v17 = vsub.f32 1.0, %v5705_v22  ;;  %9625 = vrcp.f32 %v13582_v63  ;;  %vm5710_vm15 = vweird.f32 %v13552_v34  ;;  %v5181_v0 = vand.u32 2147483647, %v13546_v20 }
 0xa35   :  { %v5406_v57 = vsub.f32 1.0, %v5405_v12  ;;  %v5401_v12 = vor.u32 1.1754944e-38, %v5400_v10  ;;  %v5713_v10 = vand.u32 2147483647, %v13533_v37  ;;  %vm5410_vm1 = vweird.f32 %v13555_v6  ;;  %vm13649_vm4 = vmor %vm5709_vm13, %vm5710_vm15 }
 0xa36   :  { %v13574_v13 = vpop.xlane.xlu0 %5130  ;;  %v5707_v43 = vmul.f32 %v13552_v34, %v5706_v17  ;;  %v5415_v17 = vand.u32 2147483648, %v13535_v52  ;;  %v13625_v61 = vpop.xlane.xlu2 %5090  ;;  %v5703_v26 = vmul.f32 %v5702_v19, %v5219_v7  ;;  %vm13653_vm5 = vcmp.eq.f32.partialorder %v5413_v32, 8.507059e+37  ;;  %vm13668_vm6 = vmor %vm5409_vm14, %vm5410_vm1 }
 0xa37   :  { %v5262_v45 = vmul.f32 %v13574_v13, %v13574_v13  ;;  %v5407_v35 = vmul.f32 %v13555_v6, %v5406_v57  ;;  %v5402_v27 = vsel %vm13588_vm11, %v5401_v12, %v5397_v49  ;;  %vm13637_vm2 = vcmp.eq.f32.partialorder %v5713_v10, 8.507059e+37 }
 0xa38   :  { %v5708_v24 = vadd.f32 %v13552_v34, %v5707_v43  ;;  %v5716_v43 = vor.u32 1.1754944e-38, %v5715_v42  ;;  %v5242_v59 = vmul.f32 %v13625_v61, %v13625_v61  ;;  %v5161_v49 = vand.u32 2147483647, %v13550_v60 }
 0xa39   :  { %v13601_v56 = vpop.eup %9623  ;;  %v13611_v36 = vadd.f32 1.0, %v5262_v45  ;;  %v5408_v57 = vadd.f32 %v13555_v6, %v5407_v35  ;;  %v5416_v35 = vor.u32 1.1754944e-38, %v5415_v17  ;;  %v5403_v42 = vmul.f32 %v5402_v27, %v13557_v30 }
 0xa3a   :  { %v5720_v55 = vmul.f32 %v13601_v56, %v13561_v2  ;;  %v13635_v45 = vpop.eup %9625  ;;  %v5712_v37 = vsel %vm13649_vm4, %v13552_v34, %v5708_v24  ;;  %v13673_v19 = vmul.f32 %v5181_v0, %v13546_v20  ;;  %v13675_v32 = vadd.f32 1.0, %v5242_v59 }
 0xa3b   :  { %9627 = vrcp.f32 %v13611_v36  ;;  %v5420_v10 = vmul.f32 %v13635_v45, %v13582_v63  ;;  %v5412_v30 = vsel %vm13668_vm6, %v13555_v6, %v5408_v57  ;;  %v13688_v27 = vmul.f32 %v5703_v26, %v16922_v54 }
 0xa3c   :  { %v5721_v31 = vsub.f32 1.0, %v5720_v55  ;;  %vm5724_vm7 = vweird.f32 %v13561_v2  ;;  %v5728_v59 = vand.u32 2147483647, %v13561_v2  ;;  %9629 = vrcp.f32 %v13675_v32 }
 0xa3d   :  { %16973 = vst [vmem:[#allocation83_spill] sm:$0xff] %v13688_v27  ;;  %v5717_v6 = vsel %vm13637_vm2, %v5716_v43, %v5712_v37  ;;  %v5730_v20 = vand.u32 2147483648, %v13561_v2  ;;  %v13697_v0 = vmul.f32 %v5161_v49, %v13550_v60  ;;  %v5421_v57 = vsub.f32 1.0, %v5420_v10 }
 0xa3e   :  { %v13643_v29 = vpop.xlane.xlu1 %5132  ;;  %v13645_v22 = vpop.xlane.xlu0 %5092  ;;  %v5722_v17 = vmul.f32 %v13601_v56, %v5721_v31  ;;  %v5417_v31 = vsel %vm13653_vm5, %v5416_v35, %v5412_v30  ;;  %v5182_v26 = vand.u32 2147483647, %v13574_v13  ;;  %vm5725_vm8 = vweird.f32 %v13601_v56 }
 0xa3f   :  { %v5263_v34 = vmul.f32 %v13643_v29, %v13643_v29  ;;  %v5243_v52 = vmul.f32 %v13645_v22, %v13645_v22  ;;  %v5428_v38 = vand.u32 2147483647, %v13582_v63  ;;  %v13712_v60 = vmul.f32 %v5403_v42, %v16921_v40  ;;  %vm13726_vm10 = vmor %vm5724_vm7, %vm5725_vm8 }
 0xa40   :  { %v5723_v54 = vadd.f32 %v13601_v56, %v5722_v17  ;;  %v5718_v7 = vmul.f32 %v5717_v6, %v13597_v62  ;;  %v5430_v35 = vand.u32 2147483648, %v13582_v63  ;;  %v5418_v49 = vmul.f32 %v5417_v31, %v5200_v8 }
 0xa41   :  { %v13685_v24 = vpop.eup %9627  ;;  %v13704_v55 = vadd.f32 1.0, %v5263_v34  ;;  %v13709_v43 = vadd.f32 1.0, %v5243_v52  ;;  %16974 = vst [vmem:[#allocation14_spill] sm:$0xff] %v13712_v60  ;;  %vm13717_vm9 = vcmp.eq.f32.partialorder %v5728_v59, 8.507059e+37  ;;  %v5731_v37 = vor.u32 1.1754944e-38, %v5730_v20 }
 0xa42   :  { %v5735_v12 = vmul.f32 %v13685_v24, %v13611_v36  ;;  %v5422_v30 = vmul.f32 %v13635_v45, %v5421_v57  ;;  %v13722_v17 = vpop.eup %9629  ;;  %vm5424_vm11 = vweird.f32 %v13582_v63  ;;  %v13732_v62 = vmul.f32 %v5182_v26, %v13574_v13 }
 0xa43   :  { %9631 = vrcp.f32 %v13704_v55  ;;  %v5727_v34 = vsel %vm13726_vm10, %v13601_v56, %v5723_v54  ;;  %vm13738_vm12 = vcmp.eq.f32.partialorder %v5428_v38, 8.507059e+37  ;;  %v5745_v2 = vand.u32 2147483648, %v13611_v36 }
 0xa44   :  { %v5736_v8 = vsub.f32 1.0, %v5735_v12  ;;  %9633 = vrcp.f32 %v13709_v43  ;;  %v5162_v59 = vand.u32 2147483647, %v13625_v61  ;;  %v5435_v6 = vmul.f32 %v13722_v17, %v13675_v32 }
 0xa45   :  { %v13749_v20 = vmul.f32 %v5718_v7, %v16918_v25  ;;  %v5431_v57 = vor.u32 1.1754944e-38, %v5430_v35  ;;  %vm5739_vm13 = vweird.f32 %v13611_v36  ;;  %v5743_v54 = vand.u32 2147483647, %v13611_v36 }
 0xa46   :  { %v13746_v13 = vpop.xlane.xlu2 %5134  ;;  %v13754_v56 = vmul.f32 %v5418_v49, %v16917_v18  ;;  %v5423_v31 = vadd.f32 %v13635_v45, %v5422_v30  ;;  %vm5425_vm14 = vweird.f32 %v13635_v45  ;;  %v5183_v26 = vand.u32 2147483647, %v13643_v29  ;;  %v13759_v12 = vpop.xlane.xlu1 %5094 }
 0xa47   :  { %16981 = vst [vmem:[#allocation24_spill] sm:$0xff] %v13749_v20  ;;  %v5732_v7 = vsel %vm13717_vm9, %v5731_v37, %v5727_v34  ;;  %v5737_v35 = vmul.f32 %v13685_v24, %v5736_v8  ;;  %v5436_v42 = vsub.f32 1.0, %v5435_v6  ;;  %v5264_v49 = vmul.f32 %v13746_v13, %v13746_v13  ;;  %vm13778_vm15 = vmor %vm5424_vm11, %vm5425_vm14 }
 0xa48   :  { %v5746_v18 = vor.u32 1.1754944e-38, %v5745_v2  ;;  %v13769_v30 = vmul.f32 %v5162_v59, %v13625_v61  ;;  %v5163_v40 = vand.u32 2147483647, %v13645_v22  ;;  %vm5740_vm1 = vweird.f32 %v13685_v24 }
 0xa49   :  { %v13761_v38 = vpop.eup %9631  ;;  %vm13783_vm2 = vcmp.eq.f32.partialorder %v5743_v54, 8.507059e+37  ;;  %v5443_v61 = vand.u32 2147483647, %v13675_v32  ;;  %v13788_v8 = vadd.f32 1.0, %v5264_v49  ;;  %v5244_v34 = vmul.f32 %v13759_v12, %v13759_v12  ;;  %vm13826_vm6 = vmor %vm5739_vm13, %vm5740_vm1 }
 0xa4a   :  { %v5750_v25 = vmul.f32 %v13761_v38, %v13704_v55  ;;  %v13774_v27 = vpop.eup %9633  ;;  %v5733_v2 = vmul.f32 %v5732_v7, %v13673_v19  ;;  %v5427_v63 = vsel %vm13778_vm15, %v13635_v45, %v5423_v31  ;;  %v5445_v59 = vand.u32 2147483648, %v13675_v32 }
 0xa4b   :  { %v5450_v6 = vmul.f32 %v13774_v27, %v13709_v43  ;;  %v5738_v54 = vadd.f32 %v13685_v24, %v5737_v35  ;;  %v5437_v60 = vmul.f32 %v13722_v17, %v5436_v42  ;;  %9635 = vrcp.f32 %v13788_v8 }
 0xa4c   :  { %v5751_v49 = vsub.f32 1.0, %v5750_v25  ;;  %vm5439_vm4 = vweird.f32 %v13675_v32  ;;  %v13804_v19 = vmul.f32 %v5183_v26, %v13643_v29  ;;  %v13807_v7 = vmul.f32 %v5163_v40, %v13645_v22 }
 0xa4d   :  { %v5451_v45 = vsub.f32 1.0, %v5450_v6  ;;  %v5432_v31 = vsel %vm13738_vm12, %v5431_v57, %v5427_v63  ;;  %vm13811_vm5 = vcmp.eq.f32.partialorder %v5443_v61, 8.507059e+37  ;;  %v5758_v25 = vand.u32 2147483647, %v13704_v55 }
 0xa4e   :  { %v5760_v35 = vand.u32 2147483648, %v13704_v55  ;;  %v13817_v42 = vadd.f32 1.0, %v5244_v34  ;;  %v13820_v29 = vmul.f32 %v5733_v2, %v16914_v58  ;;  %vm5440_vm7 = vweird.f32 %v13722_v17  ;;  %v13832_v52 = vpop.xlane.xlu0 %5136  ;;  %v13844_v63 = vpop.xlane.xlu2 %5096 }
 0xa4f   :  { %v5446_v22 = vor.u32 1.1754944e-38, %v5445_v59  ;;  %vm5754_vm8 = vweird.f32 %v13704_v55  ;;  %v5742_v57 = vsel %vm13826_vm6, %v13685_v24, %v5738_v54  ;;  %v5438_v26 = vadd.f32 %v13722_v17, %v5437_v60  ;;  %vm13862_vm11 = vmor %vm5439_vm4, %vm5440_vm7 }
 0xa50   :  { %v5752_v61 = vmul.f32 %v13761_v38, %v5751_v49  ;;  %9637 = vrcp.f32 %v13817_v42  ;;  %v5433_v36 = vmul.f32 %v5432_v31, %v13697_v0  ;;  %v5452_v34 = vmul.f32 %v13774_v27, %v5451_v45 }
 0xa51   :  { %vm5454_vm9 = vweird.f32 %v13709_v43  ;;  %v5458_v2 = vand.u32 2147483647, %v13709_v43  ;;  %v13846_v59 = vpop.eup %9635  ;;  %vm13848_vm10 = vcmp.eq.f32.partialorder %v5758_v25, 8.507059e+37  ;;  %v5761_v60 = vor.u32 1.1754944e-38, %v5760_v35 }
 0xa52   :  { %v5460_v6 = vand.u32 2147483648, %v13709_v43  ;;  %v5184_v54 = vand.u32 2147483647, %v13746_v13  ;;  %v5265_v0 = vmul.f32 %v13832_v52, %v13832_v52  ;;  %v5747_v49 = vsel %vm13783_vm2, %v5746_v18, %v5742_v57 }
 0xa53   :  { %vm5755_vm12 = vweird.f32 %v13761_v38  ;;  %v5765_v31 = vmul.f32 %v13846_v59, %v13788_v8  ;;  %v5164_v25 = vand.u32 2147483647, %v13759_v12  ;;  %v5442_v37 = vsel %vm13862_vm11, %v13722_v17, %v5438_v26 }
 0xa54   :  { %v5753_v18 = vadd.f32 %v13761_v38, %v5752_v61  ;;  %v13874_v35 = vadd.f32 1.0, %v5265_v0  ;;  %v5245_v32 = vmul.f32 %v13844_v63, %v13844_v63  ;;  %v5453_v40 = vadd.f32 %v13774_v27, %v5452_v34  ;;  %vm13899_vm15 = vmor %vm5754_vm8, %vm5755_vm12 }
 0xa55   :  { %vm5455_vm13 = vweird.f32 %v13774_v27  ;;  %vm13880_vm14 = vcmp.eq.f32.partialorder %v5458_v2, 8.507059e+37  ;;  %v5766_v58 = vsub.f32 1.0, %v5765_v31  ;;  %v13887_v17 = vmul.f32 %v5433_v36, %v16913_v14 }
 0xa56   :  { %v13884_v20 = vpop.eup %9637  ;;  %v5748_v26 = vmul.f32 %v5747_v49, %v13732_v62  ;;  %v5461_v61 = vor.u32 1.1754944e-38, %v5460_v6  ;;  %9639 = vrcp.f32 %v13874_v35  ;;  %v13891_v0 = vpop.xlane.xlu1 %5138  ;;  %v5447_v34 = vsel %vm13811_vm5, %v5446_v22, %v5442_v37  ;;  %vm13916_vm1 = vmor %vm5454_vm9, %vm5455_vm13 }
 0xa57   :  { %v13904_v36 = vmul.f32 %v5184_v54, %v13746_v13  ;;  %v5773_v62 = vand.u32 2147483647, %v13788_v8  ;;  %v5465_v6 = vmul.f32 %v13884_v20, %v13817_v42  ;;  %v5757_v10 = vsel %vm13899_vm15, %v13761_v38, %v5753_v18  ;;  %v13932_v31 = vpop.xlane.xlu0 %5098 }
 0xa58   :  { %v5775_v13 = vand.u32 2147483648, %v13788_v8  ;;  %v13922_v22 = vmul.f32 %v5164_v25, %v13759_v12  ;;  %v13924_v54 = vadd.f32 1.0, %v5245_v32  ;;  %v5457_v49 = vsel %vm13916_vm1, %v13774_v27, %v5453_v40 }
 0xa59   :  { %v5767_v38 = vmul.f32 %v13846_v59, %v5766_v58  ;;  %v5466_v45 = vsub.f32 1.0, %v5465_v6  ;;  %v5266_v43 = vmul.f32 %v13891_v0, %v13891_v0  ;;  %v13935_v37 = vmul.f32 %v5748_v26, %v16912_v47 }
 0xa5a   :  { %v5448_v12 = vmul.f32 %v5447_v34, %v13769_v30  ;;  %vm5769_vm2 = vweird.f32 %v13788_v8  ;;  %9641 = vrcp.f32 %v13924_v54  ;;  %v5762_v27 = vsel %vm13848_vm10, %v5761_v60, %v5757_v10 }
 0xa5b   :  { %vm13942_vm4 = vcmp.eq.f32.partialorder %v5773_v62, 8.507059e+37  ;;  %v5473_v25 = vand.u32 2147483647, %v13817_v42  ;;  %v5185_v18 = vand.u32 2147483647, %v13832_v52  ;;  %v13948_v32 = vadd.f32 1.0, %v5266_v43 }
 0xa5c   :  { %v13950_v40 = vpop.eup %9639  ;;  %v5462_v30 = vsel %vm13880_vm14, %v5461_v61, %v5457_v49  ;;  %v5776_v26 = vor.u32 1.1754944e-38, %v5775_v13  ;;  %v5467_v34 = vmul.f32 %v13884_v20, %v5466_v45  ;;  %v5246_v24 = vmul.f32 %v13932_v31, %v13932_v31 }
 0xa5d   :  { %v5768_v60 = vadd.f32 %v13846_v59, %v5767_v38  ;;  %vm5770_vm5 = vweird.f32 %v13846_v59  ;;  %v5475_v2 = vand.u32 2147483648, %v13817_v42  ;;  %v5780_v62 = vmul.f32 %v13950_v40, %v13874_v35 }
 0xa5e   :  { %v13963_v6 = vmul.f32 %v5448_v12, %v16911_v23  ;;  %v5763_v57 = vmul.f32 %v5762_v27, %v13804_v19  ;;  %vm5469_vm6 = vweird.f32 %v13817_v42  ;;  %9643 = vrcp.f32 %v13948_v32  ;;  %vm13981_vm8 = vmor %vm5769_vm2, %vm5770_vm5  ;;  %v13989_v43 = vpop.xlane.xlu2 %5140  ;;  %v14023_v19 = vpop.xlane.xlu1 %5100 }
 0xa5f   :  { %v5463_v61 = vmul.f32 %v5462_v30, %v13807_v7  ;;  %vm13969_vm7 = vcmp.eq.f32.partialorder %v5473_v25, 8.507059e+37  ;;  %v13974_v55 = vmul.f32 %v5185_v18, %v13832_v52  ;;  %v5790_v13 = vand.u32 2147483648, %v13874_v35 }
 0xa60   :  { %v13977_v49 = vpop.eup %9641  ;;  %v5468_v38 = vadd.f32 %v13884_v20, %v5467_v34  ;;  %vm5470_vm9 = vweird.f32 %v13884_v20  ;;  %v5781_v7 = vsub.f32 1.0, %v5780_v62  ;;  %v13987_v45 = vadd.f32 1.0, %v5246_v24 }
 0xa61   :  { %v5772_v52 = vsel %vm13981_vm8, %v13846_v59, %v5768_v60  ;;  %v5476_v12 = vor.u32 1.1754944e-38, %v5475_v2  ;;  %v5165_v8 = vand.u32 2147483647, %v13844_v63  ;;  %v5480_v27 = vmul.f32 %v13977_v49, %v13924_v54  ;;  %vm14008_vm10 = vmor %vm5469_vm6, %vm5470_vm9 }
 0xa62   :  { %v13998_v25 = vmul.f32 %v5763_v57, %v16910_v51  ;;  %v5788_v18 = vand.u32 2147483647, %v13874_v35  ;;  %v5186_v30 = vand.u32 2147483647, %v13891_v0  ;;  %9645 = vrcp.f32 %v13987_v45 }
 0xa63   :  { %v14004_v34 = vmul.f32 %v5463_v61, %v16909_v44  ;;  %vm5784_vm11 = vweird.f32 %v13874_v35  ;;  %v5791_v24 = vor.u32 1.1754944e-38, %v5790_v13  ;;  %v5481_v60 = vsub.f32 1.0, %v5480_v27 }
 0xa64   :  { %v14013_v2 = vpop.eup %9643  ;;  %v5777_v62 = vsel %vm13942_vm4, %v5776_v26, %v5772_v52  ;;  %v5472_v57 = vsel %vm14008_vm10, %v13884_v20, %v5468_v38  ;;  %v5782_v61 = vmul.f32 %v13950_v40, %v5781_v7  ;;  %v5267_v42 = vmul.f32 %v13989_v43, %v13989_v43 }
 0xa65   :  { %v14026_v44 = vmul.f32 %v5165_v8, %v13844_v63  ;;  %v5488_v13 = vand.u32 2147483647, %v13924_v54  ;;  %v5490_v27 = vand.u32 2147483648, %v13924_v54  ;;  %v5795_v58 = vmul.f32 %v14013_v2, %v13948_v32 }
 0xa66   :  { %vm14032_vm12 = vcmp.eq.f32.partialorder %v5788_v18, 8.507059e+37  ;;  %v5482_v20 = vmul.f32 %v13977_v49, %v5481_v60  ;;  %vm5484_vm13 = vweird.f32 %v13924_v54  ;;  %v14039_v38 = vmul.f32 %v5186_v30, %v13891_v0 }
 0xa67   :  { %v14041_v63 = vadd.f32 1.0, %v5267_v42  ;;  %v5778_v7 = vmul.f32 %v5777_v62, %v13904_v36  ;;  %v5477_v52 = vsel %vm13969_vm7, %v5476_v12, %v5472_v57  ;;  %v5166_v8 = vand.u32 2147483647, %v13932_v31  ;;  %v14061_v62 = vpop.xlane.xlu0 %5142 }
 0xa68   :  { %v5247_v18 = vmul.f32 %v14023_v19, %v14023_v19  ;;  %v14049_v59 = vpop.eup %9645  ;;  %v5783_v60 = vadd.f32 %v13950_v40, %v5782_v61  ;;  %vm5785_vm14 = vweird.f32 %v13950_v40  ;;  %v5796_v0 = vsub.f32 1.0, %v5795_v58 }
 0xa69   :  { %9647 = vrcp.f32 %v14041_v63  ;;  %vm14054_vm15 = vcmp.eq.f32.partialorder %v5488_v13, 8.507059e+37  ;;  %v5491_v36 = vor.u32 1.1754944e-38, %v5490_v27  ;;  %v5805_v10 = vand.u32 2147483648, %v13948_v32  ;;  %v14067_v13 = vpop.xlane.xlu2 %5102  ;;  %vm14074_vm2 = vmor %vm5784_vm11, %vm5785_vm14 }
 0xa6a   :  { %v5495_v12 = vmul.f32 %v14049_v59, %v13987_v45  ;;  %v5478_v57 = vmul.f32 %v5477_v52, %v13922_v22  ;;  %v5483_v61 = vadd.f32 %v13977_v49, %v5482_v20  ;;  %vm5485_vm1 = vweird.f32 %v13977_v49 }
 0xa6b   :  { %v5803_v42 = vand.u32 2147483647, %v13948_v32  ;;  %v14070_v58 = vmul.f32 %v5778_v7, %v16904_v28  ;;  %vm5799_vm4 = vweird.f32 %v13948_v32  ;;  %v14079_v52 = vadd.f32 1.0, %v5247_v18  ;;  %vm14092_vm5 = vmor %vm5484_vm13, %vm5485_vm1 }
 0xa6c   :  { %v5496_v22 = vsub.f32 1.0, %v5495_v12  ;;  %v5787_v20 = vsel %vm14074_vm2, %v13950_v40, %v5783_v60  ;;  %v5797_v51 = vmul.f32 %v14013_v2, %v5796_v0  ;;  %v14086_v7 = vmul.f32 %v5166_v8, %v13932_v31 }
 0xa6d   :  { %v5268_v35 = vmul.f32 %v14061_v62, %v14061_v62  ;;  %v5806_v18 = vor.u32 1.1754944e-38, %v5805_v10  ;;  %vm5499_vm6 = vweird.f32 %v13987_v45  ;;  %9649 = vrcp.f32 %v14079_v52 }
 0xa6e   :  { %v5497_v12 = vmul.f32 %v14049_v59, %v5496_v22  ;;  %v14102_v31 = vmul.f32 %v5478_v57, %v16901_v46  ;;  %v5487_v54 = vsel %vm14092_vm5, %v13977_v49, %v5483_v61  ;;  %vm14107_vm7 = vcmp.eq.f32.partialorder %v5803_v42, 8.507059e+37 }
 0xa6f   :  { %v14099_v40 = vpop.eup %9647  ;;  %v5503_v60 = vand.u32 2147483647, %v13987_v45  ;;  %v5505_v0 = vand.u32 2147483648, %v13987_v45  ;;  %v5792_v10 = vsel %vm14032_vm12, %v5791_v24, %v5787_v20  ;;  %v5187_v27 = vand.u32 2147483647, %v13989_v43 }
 0xa70   :  { %v5810_v57 = vmul.f32 %v14099_v40, %v14041_v63  ;;  %v5248_v28 = vmul.f32 %v14067_v13, %v14067_v13  ;;  %v5798_v49 = vadd.f32 %v14013_v2, %v5797_v51  ;;  %vm5800_vm8 = vweird.f32 %v14013_v2 }
 0xa71   :  { %v5167_v61 = vand.u32 2147483647, %v14023_v19  ;;  %v14123_v42 = vadd.f32 1.0, %v5268_v35  ;;  %v5492_v26 = vsel %vm14054_vm15, %v5491_v36, %v5487_v54  ;;  %v5498_v24 = vadd.f32 %v14049_v59, %v5497_v12  ;;  %vm14140_vm11 = vmor %vm5799_vm4, %vm5800_vm8 }
 0xa72   :  { %vm5500_vm9 = vweird.f32 %v14049_v59  ;;  %v5811_v22 = vsub.f32 1.0, %v5810_v57  ;;  %v5793_v20 = vmul.f32 %v5792_v10, %v13974_v55  ;;  %vm14130_vm10 = vcmp.eq.f32.partialorder %v5503_v60, 8.507059e+37 }
 0xa73   :  { %v5820_v51 = vand.u32 2147483648, %v14041_v63  ;;  %9651 = vrcp.f32 %v14123_v42  ;;  %v14136_v35 = vpop.eup %9649  ;;  %v5506_v36 = vor.u32 1.1754944e-38, %v5505_v0  ;;  %v14145_v12 = vmul.f32 %v5187_v27, %v13989_v43  ;;  %vm14156_vm12 = vmor %vm5499_vm6, %vm5500_vm9  ;;  %v14165_v27 = vpop.xlane.xlu2 %5122 }
 0xa74   :  { %v5818_v55 = vand.u32 2147483647, %v14041_v63  ;;  %v14148_v54 = vadd.f32 1.0, %v5248_v28  ;;  %v5493_v60 = vmul.f32 %v5492_v26, %v14026_v44  ;;  %v5802_v10 = vsel %vm14140_vm11, %v14013_v2, %v5798_v49 }
 0xa75   :  { %v14161_v0 = vmul.f32 %v5167_v61, %v14023_v19  ;;  %v5510_v43 = vmul.f32 %v14136_v35, %v14079_v52  ;;  %v5502_v44 = vsel %vm14156_vm12, %v14049_v59, %v5498_v24  ;;  %v5812_v2 = vmul.f32 %v14099_v40, %v5811_v22  ;;  %v14187_v22 = vpop.xlane.xlu1 %5144 }
 0xa76   :  { %vm5814_vm13 = vweird.f32 %v14041_v63  ;;  %9653 = vrcp.f32 %v14148_v54  ;;  %v14174_v45 = vmul.f32 %v5793_v20, %v16900_v48  ;;  %v5821_v19 = vor.u32 1.1754944e-38, %v5820_v51 }
 0xa77   :  { %v5511_v57 = vsub.f32 1.0, %v5510_v43  ;;  %v5188_v28 = vand.u32 2147483647, %v14061_v62  ;;  %v5807_v49 = vsel %vm14107_vm7, %v5806_v18, %v5802_v10  ;;  %vm14179_vm14 = vcmp.eq.f32.partialorder %v5818_v55, 8.507059e+37 }
 0xa78   :  { %v5518_v59 = vand.u32 2147483647, %v14079_v52  ;;  %v5168_v26 = vand.u32 2147483647, %v14067_v13  ;;  %v5258_v24 = vmul.f32 %v14165_v27, %v14165_v27  ;;  %v14192_v51 = vmul.f32 %v5493_v60, %v16897_v53 }
 0xa79   :  { %v14189_v20 = vpop.eup %9651  ;;  %v5507_v18 = vsel %vm14130_vm10, %v5506_v36, %v5502_v44  ;;  %vm5815_vm15 = vweird.f32 %v14099_v40  ;;  %v5520_v8 = vand.u32 2147483648, %v14079_v52  ;;  %v5813_v30 = vadd.f32 %v14099_v40, %v5812_v2 }
 0xa7a   :  { %v5512_v55 = vmul.f32 %v14136_v35, %v5511_v57  ;;  %v5825_v10 = vmul.f32 %v14189_v20, %v14123_v42  ;;  %v14202_v32 = vadd.f32 1.0, %v5258_v24  ;;  %v5808_v43 = vmul.f32 %v5807_v49, %v14039_v38  ;;  %vm14222_vm4 = vmor %vm5814_vm13, %vm5815_vm15 }
 0xa7b   :  { %vm5514_vm1 = vweird.f32 %v14079_v52  ;;  %v5833_v46 = vand.u32 2147483647, %v14123_v42  ;;  %v5269_v36 = vmul.f32 %v14187_v22, %v14187_v22  ;;  %v5508_v44 = vmul.f32 %v5507_v18, %v14086_v7  ;;  %v14246_v23 = vpop.xlane.xlu2 %5078 }
 0xa7c   :  { %v14209_v60 = vpop.eup %9653  ;;  %vm14212_vm2 = vcmp.eq.f32.partialorder %v5518_v59, 8.507059e+37  ;;  %v5826_v57 = vsub.f32 1.0, %v5825_v10  ;;  %v5835_v24 = vand.u32 2147483648, %v14123_v42  ;;  %9655 = vrcp.f32 %v14202_v32 }
 0xa7d   :  { %vm5515_vm5 = vweird.f32 %v14136_v35  ;;  %v5521_v7 = vor.u32 1.1754944e-38, %v5520_v8  ;;  %v14228_v49 = vmul.f32 %v5188_v28, %v14061_v62  ;;  %v5525_v59 = vmul.f32 %v14209_v60, %v14148_v54  ;;  %v5105_v8 = vpop.xlane.xlu0 %5104 }
 0xa7e   :  { %v5817_v18 = vsel %vm14222_vm4, %v14099_v40, %v5813_v30  ;;  %v5513_v10 = vadd.f32 %v14136_v35, %v5512_v55  ;;  %v5827_v63 = vmul.f32 %v14189_v20, %v5826_v57  ;;  %v14237_v53 = vadd.f32 1.0, %v5269_v36  ;;  %vm14263_vm8 = vmor %vm5514_vm1, %vm5515_vm5 }
 0xa7f   :  { %v14240_v48 = vmul.f32 %v5808_v43, %v16896_v33  ;;  %vm5829_vm6 = vweird.f32 %v14123_v42  ;;  %v14244_v62 = vmul.f32 %v5168_v26, %v14067_v13  ;;  %v5526_v28 = vsub.f32 1.0, %v5525_v59 }
 0xa80   :  { %v14249_v40 = vmul.f32 %v5508_v44, %v16949_v1  ;;  %vm14251_vm7 = vcmp.eq.f32.partialorder %v5833_v46, 8.507059e+37  ;;  %v5836_v55 = vor.u32 1.1754944e-38, %v5835_v24  ;;  %v5178_v43 = vand.u32 2147483647, %v14165_v27 }
 0xa81   :  { %9657 = vrcp.f32 %v14237_v53  ;;  %v5822_v13 = vsel %vm14179_vm14, %v5821_v19, %v5817_v18  ;;  %vm5830_vm9 = vweird.f32 %v14189_v20  ;;  %v5527_v46 = vmul.f32 %v14209_v60, %v5526_v28 }
 0xa82   :  { %v5533_v36 = vand.u32 2147483647, %v14148_v54  ;;  %v14270_v44 = vpop.eup %9655  ;;  %v5517_v19 = vsel %vm14263_vm8, %v14136_v35, %v5513_v10  ;;  %v5828_v61 = vadd.f32 %v14189_v20, %v5827_v63  ;;  %v5249_v57 = vmul.f32 %v5105_v8, %v5105_v8  ;;  %vm14297_vm12 = vmor %vm5829_vm6, %vm5830_vm9 }
 0xa83   :  { %v5236_v52 = vmul.f32 %v14246_v23, %v14246_v23  ;;  %vm5529_vm10 = vweird.f32 %v14148_v54  ;;  %v5535_v24 = vand.u32 2147483648, %v14148_v54  ;;  %v5675_v38 = vmul.f32 %v14270_v44, %v14202_v32 }
 0xa84   :  { %v5189_v59 = vand.u32 2147483647, %v14187_v22  ;;  %v5528_v18 = vadd.f32 %v14209_v60, %v5527_v46  ;;  %vm5530_vm11 = vweird.f32 %v14209_v60  ;;  %v14286_v35 = vmul.f32 %v5178_v43, %v14165_v27 }
 0xa85   :  { %v14288_v10 = vadd.f32 1.0, %v5249_v57  ;;  %v5823_v63 = vmul.f32 %v5822_v13, %v14145_v12  ;;  %v5522_v28 = vsel %vm14212_vm2, %v5521_v7, %v5517_v19  ;;  %vm14301_vm13 = vcmp.eq.f32.partialorder %v5533_v36, 8.507059e+37  ;;  %vm14315_vm14 = vmor %vm5529_vm10, %vm5530_vm11 }
 0xa86   :  { %v14305_v27 = vadd.f32 1.0, %v5236_v52  ;;  %v5832_v12 = vsel %vm14297_vm12, %v14189_v20, %v5828_v61  ;;  %v5676_v2 = vsub.f32 1.0, %v5675_v38  ;;  %v5169_v7 = vand.u32 2147483647, %v5105_v8  ;;  %v14331_v52 = vpop.xlane.xlu1 %5082 }
 0xa87   :  { %v14307_v43 = vpop.eup %9657  ;;  %9659 = vrcp.f32 %v14288_v10  ;;  %v5536_v13 = vor.u32 1.1754944e-38, %v5535_v24  ;;  %v5685_v36 = vand.u32 2147483648, %v14202_v32  ;;  %v14321_v19 = vmul.f32 %v5189_v59, %v14187_v22 }
 0xa88   :  { %v5840_v57 = vmul.f32 %v14307_v43, %v14237_v53  ;;  %v5523_v20 = vmul.f32 %v5522_v28, %v14161_v0  ;;  %v5532_v61 = vsel %vm14315_vm14, %v14209_v60, %v5528_v18  ;;  %v5683_v54 = vand.u32 2147483647, %v14202_v32 }
 0xa89   :  { %9661 = vrcp.f32 %v14305_v27  ;;  %v5837_v24 = vsel %vm14251_vm7, %v5836_v55, %v5832_v12  ;;  %v5848_v38 = vand.u32 2147483647, %v14237_v53  ;;  %v5850_v59 = vand.u32 2147483648, %v14237_v53  ;;  %v14349_v12 = vpop.xlane.xlu0 %5080 }
 0xa8a   :  { %v5841_v22 = vsub.f32 1.0, %v5840_v57  ;;  %v14338_v0 = vmul.f32 %v5823_v63, %v16950_v21  ;;  %v5677_v28 = vmul.f32 %v14270_v44, %v5676_v2  ;;  %vm5679_vm15 = vweird.f32 %v14202_v32 }
 0xa8b   :  { %v14342_v60 = vmul.f32 %v5169_v7, %v5105_v8  ;;  %v5537_v18 = vsel %vm14301_vm13, %v5536_v13, %v5532_v61  ;;  %v5686_v26 = vor.u32 1.1754944e-38, %v5685_v36  ;;  %v5238_v55 = vmul.f32 %v14331_v52, %v14331_v52 }
 0xa8c   :  { %v5842_v30 = vmul.f32 %v14307_v43, %v5841_v22  ;;  %v14354_v63 = vmul.f32 %v5523_v20, %v16951_v50  ;;  %v5838_v2 = vmul.f32 %v5837_v24, %v14228_v49  ;;  %vm14357_vm1 = vcmp.eq.f32.partialorder %v5683_v54, 8.507059e+37 }
 0xa8d   :  { %v14351_v42 = vpop.eup %9659  ;;  %vm5844_vm2 = vweird.f32 %v14237_v53  ;;  %v5156_v46 = vand.u32 2147483647, %v14246_v23  ;;  %vm5680_vm4 = vweird.f32 %v14270_v44  ;;  %vm14364_vm5 = vcmp.eq.f32.partialorder %v5848_v38, 8.507059e+37 }
 0xa8e   :  { %v5851_v13 = vor.u32 1.1754944e-38, %v5850_v59  ;;  %v5540_v36 = vmul.f32 %v14351_v42, %v14288_v10  ;;  %v5538_v49 = vmul.f32 %v5537_v18, %v14244_v62  ;;  %v5678_v20 = vadd.f32 %v14270_v44, %v5677_v28  ;;  %v5117_v59 = vpop.xlane.xlu2 %5116  ;;  %vm14394_vm7 = vmor %vm5679_vm15, %vm5680_vm4 }
 0xa8f   :  { %v14370_v57 = vpop.eup %9661  ;;  %v14374_v61 = vadd.f32 1.0, %v5238_v55  ;;  %v5237_v54 = vmul.f32 %v14349_v12, %v14349_v12  ;;  %v5843_v24 = vadd.f32 %v14307_v43, %v5842_v30  ;;  %vm5845_vm6 = vweird.f32 %v14307_v43 }
 0xa90   :  { %v5541_v22 = vsub.f32 1.0, %v5540_v36  ;;  %v5345_v38 = vmul.f32 %v14370_v57, %v14305_v27  ;;  %v14383_v50 = vmul.f32 %v5838_v2, %v16952_v3  ;;  %v5548_v62 = vand.u32 2147483647, %v14288_v10  ;;  %vm14406_vm9 = vmor %vm5844_vm2, %vm5845_vm6 }
 0xa91   :  { %v14387_v28 = vmul.f32 %v5156_v46, %v14246_v23  ;;  %9663 = vrcp.f32 %v14374_v61  ;;  %vm5544_vm8 = vweird.f32 %v14288_v10  ;;  %v5550_v55 = vand.u32 2147483648, %v14288_v10  ;;  %v14464_v21 = vpop.xlane.xlu0 %5118 }
 0xa92   :  { %v5542_v30 = vmul.f32 %v14351_v42, %v5541_v22  ;;  %v5346_v2 = vsub.f32 1.0, %v5345_v38  ;;  %v5682_v23 = vsel %vm14394_vm7, %v14270_v44, %v5678_v20  ;;  %vm5349_vm10 = vweird.f32 %v14305_v27  ;;  %v14421_v20 = vpop.xlane.xlu1 %5120 }
 0xa93   :  { %v14411_v32 = vadd.f32 1.0, %v5237_v54  ;;  %v5255_v36 = vmul.f32 %v5117_v59, %v5117_v59  ;;  %v14414_v22 = vmul.f32 %v5538_v49, %v16953_v4  ;;  %v5847_v38 = vsel %vm14406_vm9, %v14307_v43, %v5843_v24 }
 0xa94   :  { %v5347_v44 = vmul.f32 %v14370_v57, %v5346_v2  ;;  %v5353_v53 = vand.u32 2147483647, %v14305_v27  ;;  %v5543_v18 = vadd.f32 %v14351_v42, %v5542_v30  ;;  %vm5545_vm11 = vweird.f32 %v14351_v42 }
 0xa95   :  { %vm14425_vm12 = vcmp.eq.f32.partialorder %v5548_v62, 8.507059e+37  ;;  %9665 = vrcp.f32 %v14411_v32  ;;  %v5687_v49 = vsel %vm14357_vm1, %v5686_v26, %v5682_v23  ;;  %v5551_v43 = vor.u32 1.1754944e-38, %v5550_v55  ;;  %vm14445_vm13 = vmor %vm5544_vm8, %vm5545_vm11 }
 0xa96   :  { %v5355_v24 = vand.u32 2147483648, %v14305_v27  ;;  %v14433_v2 = vadd.f32 1.0, %v5255_v36  ;;  %v5852_v30 = vsel %vm14364_vm5, %v5851_v13, %v5847_v38  ;;  %v5158_v62 = vand.u32 2147483647, %v14331_v52 }
 0xa97   :  { %v14435_v46 = vpop.eup %9663  ;;  %v5157_v4 = vand.u32 2147483647, %v14349_v12  ;;  %v5257_v3 = vmul.f32 %v14421_v20, %v14421_v20  ;;  %v5348_v8 = vadd.f32 %v14370_v57, %v5347_v44  ;;  %vm5350_vm14 = vweird.f32 %v14370_v57 }
 0xa98   :  { %vm14451_vm15 = vcmp.eq.f32.partialorder %v5353_v53, 8.507059e+37  ;;  %v5375_v13 = vmul.f32 %v14435_v46, %v14374_v61  ;;  %v5688_v55 = vmul.f32 %v5687_v49, %v14286_v35  ;;  %v5547_v10 = vsel %vm14445_vm13, %v14351_v42, %v5543_v18  ;;  %vm14470_vm1 = vmor %vm5349_vm10, %vm5350_vm14 }
 0xa99   :  { %v5175_v23 = vand.u32 2147483647, %v5117_v59  ;;  %9667 = vrcp.f32 %v14433_v2  ;;  %v5853_v36 = vmul.f32 %v5852_v30, %v14321_v19  ;;  %v5356_v38 = vor.u32 1.1754944e-38, %v5355_v24 }
 0xa9a   :  { %v5376_v44 = vsub.f32 1.0, %v5375_v13  ;;  %v5383_v53 = vand.u32 2147483647, %v14374_v61  ;;  %v14475_v42 = vmul.f32 %v5158_v62, %v14331_v52  ;;  %v5385_v18 = vand.u32 2147483648, %v14374_v61 }
 0xa9b   :  { %v14466_v1 = vpop.eup %9665  ;;  %v14479_v19 = vmul.f32 %v5157_v4, %v14349_v12  ;;  %v14481_v49 = vadd.f32 1.0, %v5257_v3  ;;  %v5552_v24 = vsel %vm14425_vm12, %v5551_v43, %v5547_v10  ;;  %v5352_v27 = vsel %vm14470_vm1, %v14370_v57, %v5348_v8 }
 0xa9c   :  { %v5377_v30 = vmul.f32 %v14435_v46, %v5376_v44  ;;  %v5360_v52 = vmul.f32 %v14466_v1, %v14411_v32  ;;  %v14492_v62 = vmul.f32 %v5688_v55, %v16926_v11  ;;  %vm5379_vm2 = vweird.f32 %v14374_v61  ;;  %v5077_v55 = vpop.xlane.xlu1 %5076 }
 0xa9d   :  { %v14495_v4 = vmul.f32 %v5175_v23, %v5117_v59  ;;  %9669 = vrcp.f32 %v14481_v49  ;;  %v14499_v3 = vmul.f32 %v5853_v36, %v16954_v5  ;;  %vm14501_vm4 = vcmp.eq.f32.partialorder %v5383_v53, 8.507059e+37 }
 0xa9e   :  { %v5361_v57 = vsub.f32 1.0, %v5360_v52  ;;  %v5370_v54 = vand.u32 2147483648, %v14411_v32  ;;  %v5553_v26 = vmul.f32 %v5552_v24, %v14342_v60  ;;  %v5357_v59 = vsel %vm14451_vm15, %v5356_v38, %v5352_v27 }
 0xa9f   :  { %v14506_v43 = vpop.eup %9667  ;;  %v5368_v8 = vand.u32 2147483647, %v14411_v32  ;;  %v5256_v13 = vmul.f32 %v14464_v21, %v14464_v21  ;;  %v5378_v10 = vadd.f32 %v14435_v46, %v5377_v30  ;;  %vm5380_vm5 = vweird.f32 %v14435_v46 }
 0xaa0   :  { %v5386_v23 = vor.u32 1.1754944e-38, %v5385_v18  ;;  %v5630_v36 = vmul.f32 %v14506_v43, %v14433_v2  ;;  %v5362_v44 = vmul.f32 %v14466_v1, %v5361_v57  ;;  %vm5364_vm6 = vweird.f32 %v14411_v32  ;;  %vm14529_vm7 = vmor %vm5379_vm2, %vm5380_vm5 }
 0xaa1   :  { %v5177_v60 = vand.u32 2147483647, %v14421_v20  ;;  %v14521_v7 = vadd.f32 1.0, %v5256_v13  ;;  %v5358_v38 = vmul.f32 %v5357_v59, %v14387_v28  ;;  %v5371_v53 = vor.u32 1.1754944e-38, %v5370_v54  ;;  %v14547_v59 = vpop.xlane.xlu0 %5074 }
 0xaa2   :  { %v5631_v35 = vsub.f32 1.0, %v5630_v36  ;;  %v5235_v24 = vmul.f32 %v5077_v55, %v5077_v55  ;;  %v5929_v18 = vmul.f32 %v5553_v26, %v16955_v41  ;;  %vm14533_vm8 = vcmp.eq.f32.partialorder %v5368_v8, 8.507059e+37 }
 0xaa3   :  { %v14524_v27 = vpop.eup %9669  ;;  %vm5634_vm9 = vweird.f32 %v14433_v2  ;;  %v5638_v28 = vand.u32 2147483647, %v14433_v2  ;;  %9671 = vrcp.f32 %v14521_v7  ;;  %v5382_v57 = vsel %vm14529_vm7, %v14435_v46, %v5378_v10 }
 0xaa4   :  { %v5632_v61 = vmul.f32 %v14506_v43, %v5631_v35  ;;  %v5640_v54 = vand.u32 2147483648, %v14433_v2  ;;  %v5660_v26 = vmul.f32 %v14524_v27, %v14481_v49  ;;  %v5363_v8 = vadd.f32 %v14466_v1, %v5362_v44 }
 0xaa5   :  { %vm5365_vm10 = vweird.f32 %v14466_v1  ;;  %v14552_v13 = vmul.f32 %v5177_v60, %v14421_v20  ;;  %v5176_v36 = vand.u32 2147483647, %v14464_v21  ;;  %v14556_v46 = vmul.f32 %v5358_v38, %v16931_v39  ;;  %v14566_v60 = vpop.xlane.xlu2 %5150 }
 0xaa6   :  { %v5661_v10 = vsub.f32 1.0, %v5660_v26  ;;  %v5668_v35 = vand.u32 2147483647, %v14481_v49  ;;  %v14559_v30 = vadd.f32 1.0, %v5235_v24  ;;  %v5387_v41 = vsel %vm14501_vm4, %v5386_v23, %v5382_v57  ;;  %vm14570_vm11 = vmor %vm5364_vm6, %vm5365_vm10 }
 0xaa7   :  { %v5670_v44 = vand.u32 2147483648, %v14481_v49  ;;  %v5155_v5 = vand.u32 2147483647, %v5077_v55  ;;  %v5234_v20 = vmul.f32 %v14547_v59, %v14547_v59  ;;  %v5633_v24 = vadd.f32 %v14506_v43, %v5632_v61 }
 0xaa8   :  { %vm5635_vm12 = vweird.f32 %v14506_v43  ;;  %vm14576_vm13 = vcmp.eq.f32.partialorder %v5638_v28, 8.507059e+37  ;;  %9673 = vrcp.f32 %v14559_v30  ;;  %v5367_v32 = vsel %vm14570_vm11, %v14466_v1, %v5363_v8 }
 0xaa9   :  { %v14581_v23 = vpop.eup %9671  ;;  %v5641_v57 = vor.u32 1.1754944e-38, %v5640_v54  ;;  %v5662_v26 = vmul.f32 %v14524_v27, %v5661_v10  ;;  %vm5664_vm14 = vweird.f32 %v14481_v49  ;;  %v5388_v61 = vmul.f32 %v5387_v41, %v14475_v42  ;;  %vm14598_vm15 = vmor %vm5634_vm9, %vm5635_vm12 }
 0xaaa   :  { %v14590_v28 = vmul.f32 %v5176_v36, %v14464_v21  ;;  %v5645_v33 = vmul.f32 %v14581_v23, %v14521_v7  ;;  %v5272_v47 = vmul.f32 %v14566_v60, %v14566_v60  ;;  %vm14602_vm1 = vcmp.eq.f32.partialorder %v5668_v35, 8.507059e+37 }
 0xaab   :  { %v5671_v41 = vor.u32 1.1754944e-38, %v5670_v44  ;;  %v14606_v42 = vmul.f32 %v5155_v5, %v5077_v55  ;;  %v14608_v21 = vadd.f32 1.0, %v5234_v20  ;;  %v5372_v8 = vsel %vm14533_vm8, %v5371_v53, %v5367_v32 }
 0xaac   :  { %v5637_v2 = vsel %vm14598_vm15, %v14506_v43, %v5633_v24  ;;  %v5646_v36 = vsub.f32 1.0, %v5645_v33  ;;  %vm5649_vm2 = vweird.f32 %v14521_v7  ;;  %v5663_v10 = vadd.f32 %v14524_v27, %v5662_v26  ;;  %v14635_v24 = vpop.xlane.xlu1 %5114 }
 0xaad   :  { %vm5665_vm4 = vweird.f32 %v14524_v27  ;;  %v5653_v35 = vand.u32 2147483647, %v14521_v7  ;;  %9675 = vrcp.f32 %v14608_v21  ;;  %v14623_v55 = vmul.f32 %v5388_v61, %v16925_v15 }
 0xaae   :  { %v14620_v5 = vpop.eup %9673  ;;  %v5647_v53 = vmul.f32 %v14581_v23, %v5646_v36  ;;  %v5655_v43 = vand.u32 2147483648, %v14521_v7  ;;  %v14627_v33 = vadd.f32 1.0, %v5272_v47  ;;  %v5373_v52 = vmul.f32 %v5372_v8, %v14479_v19  ;;  %vm14639_vm5 = vmor %vm5664_vm14, %vm5665_vm4 }
 0xaaf   :  { %v5642_v44 = vsel %vm14576_vm13, %v5641_v57, %v5637_v2  ;;  %v5330_v20 = vmul.f32 %v14620_v5, %v14559_v30  ;;  %v5969_v38 = vadd.f32 %v14499_v3, %v5929_v18  ;;  %v5340_v47 = vand.u32 2147483648, %v14559_v30 }
 0xab0   :  { %v5154_v19 = vand.u32 2147483647, %v14547_v59  ;;  %v5192_v12 = vand.u32 2147483647, %v14566_v60  ;;  %9677 = vrcp.f32 %v14627_v33  ;;  %v5667_v3 = vsel %vm14639_vm5, %v14524_v27, %v5663_v10 }
 0xab1   :  { %v5648_v18 = vadd.f32 %v14581_v23, %v5647_v53  ;;  %vm5650_vm6 = vweird.f32 %v14581_v23  ;;  %v5331_v49 = vsub.f32 1.0, %v5330_v20  ;;  %v5643_v57 = vmul.f32 %v5642_v44, %v14495_v4  ;;  %v14667_v4 = vpop.xlane.xlu0 %5108 }
 0xab2   :  { %v5338_v26 = vand.u32 2147483647, %v14559_v30  ;;  %v5989_v61 = vmul.f32 %v5969_v38, %v13128_v9  ;;  %v5254_v1 = vmul.f32 %v14635_v24, %v14635_v24  ;;  %v14660_v2 = vmul.f32 %v5373_v52, %v16927_v16  ;;  %vm14673_vm9 = vmor %vm5649_vm2, %vm5650_vm6  ;;  %v17076_v38 = vld [vmem:[#allocation39_spill] sm:$0xff] }
 0xab3   :  { %v14657_v8 = vpop.eup %9675  ;;  %vm14662_vm7 = vcmp.eq.f32.partialorder %v5653_v35, 8.507059e+37  ;;  %v5656_v36 = vor.u32 1.1754944e-38, %v5655_v43  ;;  %vm5334_vm8 = vweird.f32 %v14559_v30  ;;  %v5672_v10 = vsel %vm14602_vm1, %v5671_v41, %v5667_v3 }
 0xab4   :  { %v5332_v52 = vmul.f32 %v14620_v5, %v5331_v49  ;;  %v5341_v35 = vor.u32 1.1754944e-38, %v5340_v47  ;;  %v5315_v44 = vmul.f32 %v14657_v8, %v14608_v21  ;;  %5994 = vmatpush.msrb.mxu3 %v5989_v61  ;;  %v5652_v43 = vsel %vm14673_vm9, %v14581_v23, %v5648_v18 }
 0xab5   :  { %v14684_v54 = vmul.f32 %v5154_v19, %v14547_v59  ;;  %v14686_v41 = vadd.f32 1.0, %v5254_v1  ;;  %v5968_v7 = vadd.f32 %v14383_v50, %v14414_v22  ;;  %v14693_v32 = vmul.f32 %v5643_v57, %v17076_v38 }
 0xab6   :  { %v14690_v20 = vpop.eup %9677  ;;  %vm14695_vm10 = vcmp.eq.f32.partialorder %v5338_v26, 8.507059e+37  ;;  %v5316_v3 = vsub.f32 1.0, %v5315_v44  ;;  %v14700_v23 = vmul.f32 %v5192_v12, %v14566_v60  ;;  %v5251_v59 = vmul.f32 %v14667_v4, %v14667_v4 }
 0xab7   :  { %v5673_v19 = vmul.f32 %v5672_v10, %v14552_v13  ;;  %v5323_v50 = vand.u32 2147483647, %v14608_v21  ;;  %v5885_v22 = vmul.f32 %v14690_v20, %v14627_v33  ;;  %9679 = vrcp.f32 %v14686_v41  ;;  %v17079_v10 = vld [vmem:[#allocation38_spill] sm:$0xff] }
 0xab8   :  { %v5657_v18 = vsel %vm14662_vm7, %v5656_v36, %v5652_v43  ;;  %v5333_v49 = vadd.f32 %v14620_v5, %v5332_v52  ;;  %vm5335_vm11 = vweird.f32 %v14620_v5  ;;  %v5317_v60 = vmul.f32 %v14657_v8, %v5316_v3  ;;  %v14722_v36 = vpop.xlane.xlu2 %5112 }
 0xab9   :  { %v5325_v12 = vand.u32 2147483648, %v14608_v21  ;;  %v5886_v57 = vsub.f32 1.0, %v5885_v22  ;;  %v5895_v13 = vand.u32 2147483648, %v14627_v33  ;;  %v5988_v26 = vmul.f32 %v5968_v7, %v13128_v9  ;;  %vm14730_vm13 = vmor %vm5334_vm8, %vm5335_vm11 }
 0xaba   :  { %vm5319_vm12 = vweird.f32 %v14608_v21  ;;  %v5893_v61 = vand.u32 2147483647, %v14627_v33  ;;  %v5174_v1 = vand.u32 2147483647, %v14635_v24  ;;  %v14720_v27 = vadd.f32 1.0, %v5251_v59 }
 0xabb   :  { %v14725_v53 = vmul.f32 %v5673_v19, %v17079_v10  ;;  %v5658_v52 = vmul.f32 %v5657_v18, %v14590_v28  ;;  %vm14734_vm14 = vcmp.eq.f32.partialorder %v5323_v50, 8.507059e+37  ;;  %v5887_v7 = vmul.f32 %v14690_v20, %v5886_v57  ;;  %5995 = vmatpush.msrb.mxu3 %v5988_v26  ;;  %v17088_v26 = vld [vmem:[#allocation78_spill] sm:$0xff] }
 0xabc   :  { %v5337_v3 = vsel %vm14730_vm13, %v14620_v5, %v5333_v49  ;;  %v5318_v59 = vadd.f32 %v14657_v8, %v5317_v60  ;;  %vm5320_vm15 = vweird.f32 %v14657_v8  ;;  %9681 = vrcp.f32 %v14720_v27 }
 0xabd   :  { %v14745_v30 = vpop.eup %9679  ;;  %v5326_v28 = vor.u32 1.1754944e-38, %v5325_v12  ;;  %vm5889_vm1 = vweird.f32 %v14627_v33  ;;  %v5896_v19 = vor.u32 1.1754944e-38, %v5895_v13  ;;  %v5253_v50 = vmul.f32 %v14722_v36, %v14722_v36  ;;  %vm14765_vm5 = vmor %vm5319_vm12, %vm5320_vm15 }
 0xabe   :  { %vm5890_vm2 = vweird.f32 %v14690_v20  ;;  %vm14751_vm4 = vcmp.eq.f32.partialorder %v5893_v61, 8.507059e+37  ;;  %v14756_v5 = vmul.f32 %v5174_v1, %v14635_v24  ;;  %v5615_v18 = vmul.f32 %v14745_v30, %v14686_v41 }
 0xabf   :  { %v5171_v49 = vand.u32 2147483647, %v14667_v4  ;;  %v5342_v60 = vsel %vm14695_vm10, %v5341_v35, %v5337_v3  ;;  %v5888_v57 = vadd.f32 %v14690_v20, %v5887_v7  ;;  %v14770_v13 = vadd.f32 1.0, %v5253_v50  ;;  %vm14793_vm7 = vmor %vm5889_vm1, %vm5890_vm2  ;;  %v14800_v7 = vpop.xlane.xlu1 %5110 }
 0xac0   :  { %v5967_v24 = vadd.f32 %v14338_v0, %v14354_v63  ;;  %v14775_v61 = vmul.f32 %v5658_v52, %v17088_v26  ;;  %v5322_v35 = vsel %vm14765_vm5, %v14657_v8, %v5318_v59  ;;  %v5616_v47 = vsub.f32 1.0, %v5615_v18  ;;  %v14810_v59 = vpop.xlane.xlu0 %5152  ;;  %v14857_v22 = vpop.xlane.xlu2 %5106 }
 0xac1   :  { %v5966_v21 = vadd.f32 %v14240_v48, %v14249_v40  ;;  %vm5619_vm6 = vweird.f32 %v14686_v41  ;;  %v5623_v1 = vand.u32 2147483647, %v14686_v41  ;;  %v5173_v44 = vand.u32 2147483647, %v14722_v36 }
 0xac2   :  { %9683 = vrcp.f32 %v14770_v13  ;;  %v14786_v0 = vpop.eup %9681  ;;  %v5343_v63 = vmul.f32 %v5342_v60, %v14606_v42  ;;  %v5617_v48 = vmul.f32 %v14745_v30, %v5616_v47  ;;  %v5625_v40 = vand.u32 2147483648, %v14686_v41 }
 0xac3   :  { %v5987_v52 = vmul.f32 %v5967_v24, %v13128_v9  ;;  %v5327_v3 = vsel %vm14734_vm14, %v5326_v28, %v5322_v35  ;;  %v5892_v42 = vsel %vm14793_vm7, %v14690_v20, %v5888_v57  ;;  %vm5620_vm8 = vweird.f32 %v14745_v30 }
 0xac4   :  { %v5570_v33 = vmul.f32 %v14786_v0, %v14720_v27  ;;  %v5618_v50 = vadd.f32 %v14745_v30, %v5617_v48  ;;  %v5986_v18 = vmul.f32 %v5966_v21, %v13128_v9  ;;  %v5965_v43 = vadd.f32 %v14174_v45, %v14192_v51  ;;  %v17093_v51 = vld [vmem:[#allocation68_spill] sm:$0xff]  ;;  %vm14844_vm10 = vmor %vm5619_vm6, %vm5620_vm8 }
 0xac5   :  { %5996 = vmatpush.msrb.mxu3 %v5987_v52  ;;  %v5964_v28 = vadd.f32 %v14070_v58, %v14102_v31  ;;  %vm14818_vm9 = vcmp.eq.f32.partialorder %v5623_v1, 8.507059e+37  ;;  %v14823_v60 = vmul.f32 %v5171_v49, %v14667_v4  ;;  %v5252_v57 = vmul.f32 %v14800_v7, %v14800_v7 }
 0xac6   :  { %v5571_v12 = vsub.f32 1.0, %v5570_v33  ;;  %v5578_v24 = vand.u32 2147483647, %v14720_v27  ;;  %v5580_v35 = vand.u32 2147483648, %v14720_v27  ;;  %v5985_v45 = vmul.f32 %v5965_v43, %v13128_v9  ;;  %v17098_v33 = vld [vmem:[#allocation29_spill] sm:$0xff] }
 0xac7   :  { %5997 = vmatpush.msrb.mxu3 %v5986_v18  ;;  %v5273_v58 = vmul.f32 %v14810_v59, %v14810_v59  ;;  %v14835_v47 = vmul.f32 %v5343_v63, %v17093_v51  ;;  %v5328_v4 = vmul.f32 %v5327_v3, %v14684_v54  ;;  %v5897_v49 = vsel %vm14751_vm4, %v5896_v19, %v5892_v42 }
 0xac8   :  { %v14832_v31 = vpop.eup %9683  ;;  %v14848_v1 = vadd.f32 1.0, %v5252_v57  ;;  %v5622_v63 = vsel %vm14844_vm10, %v14745_v30, %v5618_v50  ;;  %v5572_v8 = vmul.f32 %v14786_v0, %v5571_v12  ;;  %v5984_v19 = vmul.f32 %v5964_v28, %v13128_v9  ;;  %v17099_v12 = vld [vmem:[#allocation59_spill] sm:$0xff] }
 0xac9   :  { %v5600_v54 = vmul.f32 %v14832_v31, %v14770_v13  ;;  %5998 = vmatpush.msrb.mxu3 %v5985_v45  ;;  %v5626_v41 = vor.u32 1.1754944e-38, %v5625_v40  ;;  %vm5574_vm11 = vweird.f32 %v14720_v27  ;;  %v14861_v48 = vmul.f32 %v5173_v44, %v14722_v36 }
 0xaca   :  { %9685 = vrcp.f32 %v14848_v1  ;;  %v5898_v30 = vmul.f32 %v5897_v49, %v14700_v23  ;;  %vm14865_vm12 = vcmp.eq.f32.partialorder %v5578_v24, 8.507059e+37  ;;  %v5581_v3 = vor.u32 1.1754944e-38, %v5580_v35 }
 0xacb   :  { %5999 = vmatpush.msrb.mxu3 %v5984_v19  ;;  %v14869_v42 = vadd.f32 1.0, %v5273_v58  ;;  %v14872_v50 = vmul.f32 %v5328_v4, %v17098_v33  ;;  %v5627_v40 = vsel %vm14818_vm9, %v5626_v41, %v5622_v63  ;;  %v5601_v36 = vsub.f32 1.0, %v5600_v54 }
 0xacc   :  { %v5250_v44 = vmul.f32 %v14857_v22, %v14857_v22  ;;  %v5573_v23 = vadd.f32 %v14786_v0, %v5572_v8  ;;  %vm5575_vm13 = vweird.f32 %v14786_v0  ;;  %v5610_v18 = vand.u32 2147483648, %v14770_v13 }
 0xacd   :  { %9687 = vrcp.f32 %v14869_v42  ;;  %vm5604_vm14 = vweird.f32 %v14770_v13  ;;  %v5608_v43 = vand.u32 2147483647, %v14770_v13  ;;  %v5172_v28 = vand.u32 2147483647, %v14800_v7  ;;  %vm14898_vm15 = vmor %vm5574_vm11, %vm5575_vm13 }
 0xace   :  { %v5193_v20 = vand.u32 2147483647, %v14810_v59  ;;  %v14887_v57 = vmul.f32 %v5898_v30, %v17099_v12  ;;  %v5628_v24 = vmul.f32 %v5627_v40, %v14756_v5  ;;  %v14890_v35 = vadd.f32 1.0, %v5250_v44 }
 0xacf   :  { %v5963_v45 = vadd.f32 %v13998_v25, %v14004_v34  ;;  %v5602_v49 = vmul.f32 %v14832_v31, %v5601_v36  ;;  %v5593_v21 = vand.u32 2147483647, %v14848_v1  ;;  %v5595_v63 = vand.u32 2147483648, %v14848_v1  ;;  %v14928_v36 = vpop.xlane.xlu1 %5148 }
 0xad0   :  { %v14894_v58 = vpop.eup %9685  ;;  %v5962_v5 = vadd.f32 %v13935_v37, %v13963_v6  ;;  %v5577_v25 = vsel %vm14898_vm15, %v14786_v0, %v5573_v23  ;;  %v5611_v34 = vor.u32 1.1754944e-38, %v5610_v18  ;;  %9689 = vrcp.f32 %v14890_v35  ;;  %v17104_v0 = vld [vmem:[#allocation19_spill] sm:$0xff] }
 0xad1   :  { %v5585_v27 = vmul.f32 %v14894_v58, %v14848_v1  ;;  %vm5605_vm1 = vweird.f32 %v14832_v31  ;;  %vm14914_vm2 = vcmp.eq.f32.partialorder %v5608_v43, 8.507059e+37  ;;  %v14919_v54 = vmul.f32 %v5172_v28, %v14800_v7  ;;  %v14938_v43 = vpop.xlane.xlu0 %5146 }
 0xad2   :  { %vm5589_vm4 = vweird.f32 %v14848_v1  ;;  %v5233_v37 = vmul.f32 %v5193_v20, %v14810_v59  ;;  %v14924_v19 = vmul.f32 %v5628_v24, %v17104_v0  ;;  %v5170_v30 = vand.u32 2147483647, %v14857_v22  ;;  %vm14956_vm7 = vmor %vm5604_vm14, %vm5605_vm1  ;;  %v17112_v1 = vld [vmem:[#allocation14_spill] sm:$0xff] }
 0xad3   :  { %v9688_v6 = vpop.eup %9687  ;;  %v5586_v41 = vsub.f32 1.0, %v5585_v27  ;;  %v5983_v40 = vmul.f32 %v5963_v45, %v13128_v9  ;;  %v5582_v44 = vsel %vm14865_vm12, %v5581_v3, %v5577_v25  ;;  %v5603_v7 = vadd.f32 %v14832_v31, %v5602_v49  ;;  %v17107_v3 = vld [vmem:[#allocation24_spill] sm:$0xff] }
 0xad4   :  { %vm14933_vm5 = vcmp.eq.f32.partialorder %v5593_v21, 8.507059e+37  ;;  %v5596_v59 = vor.u32 1.1754944e-38, %v5595_v63  ;;  %v5900_v18 = vmul.f32 %v9688_v6, %v14869_v42  ;;  %v5982_v20 = vmul.f32 %v5962_v5, %v13128_v9 }
 0xad5   :  { %v5587_v28 = vmul.f32 %v14894_v58, %v5586_v41  ;;  %6000 = vmatpush.msrb.mxu3 %v5983_v40  ;;  %v5961_v52 = vadd.f32 %v13820_v29, %v13887_v17  ;;  %v5960_v24 = vadd.f32 %v17107_v3, %v13754_v56  ;;  %vm5590_vm6 = vweird.f32 %v14894_v58 }
 0xad6   :  { %v5901_v45 = vsub.f32 1.0, %v5900_v18  ;;  %v5908_v4 = vand.u32 2147483647, %v14869_v42  ;;  %v5271_v49 = vmul.f32 %v14928_v36, %v14928_v36  ;;  %v14950_v21 = vpop.eup %9689  ;;  %v5910_v29 = vand.u32 2147483648, %v14869_v42  ;;  %vm14974_vm9 = vmor %vm5589_vm4, %vm5590_vm6 }
 0xad7   :  { %v5588_v56 = vadd.f32 %v14894_v58, %v5587_v28  ;;  %6001 = vmatpush.msrb.mxu3 %v5982_v20  ;;  %v5981_v17 = vmul.f32 %v5961_v52, %v13128_v9  ;;  %v5270_v5 = vmul.f32 %v14938_v43, %v14938_v43  ;;  %v5607_v25 = vsel %vm14956_vm7, %v14832_v31, %v5603_v7  ;;  %v17113_v52 = vld [vmem:[#allocation83_spill] sm:$0xff] }
 0xad8   :  { %v5902_v27 = vmul.f32 %v9688_v6, %v5901_v45  ;;  %vm5905_vm8 = vweird.f32 %v9688_v6  ;;  %v5555_v13 = vmul.f32 %v14950_v21, %v14890_v35  ;;  %vm5904_vm10 = vweird.f32 %v14869_v42 }
 0xad9   :  { %6002 = vmatpush.msrb.mxu3 %v5981_v17  ;;  %v5980_v40 = vmul.f32 %v5960_v24, %v13128_v9  ;;  %v14980_v18 = vadd.f32 1.0, %v5271_v49  ;;  %v14982_v31 = vadd.f32 1.0, %v5270_v5  ;;  %v5592_v7 = vsel %vm14974_vm9, %v14894_v58, %v5588_v56  ;;  %vm5906_vm11 = vmor %vm5904_vm10, %vm5905_vm8 }
 0xada   :  { %v5903_v28 = vadd.f32 %v9688_v6, %v5902_v27  ;;  %v5556_v20 = vsub.f32 1.0, %v5555_v13  ;;  %v5959_v3 = vadd.f32 %v17113_v52, %v17112_v1  ;;  %v5612_v45 = vsel %vm14914_vm2, %v5611_v34, %v5607_v25 }
 0xadb   :  { %vm5909_vm12 = vcmp.eq.f32.partialorder %v5908_v4, 8.507059e+37  ;;  %v5911_v42 = vor.u32 1.1754944e-38, %v5910_v29  ;;  %6003 = vmatpush.msrb.mxu3 %v5980_v40  ;;  %9691 = vrcp.f32 %v14980_v18  ;;  %v5563_v49 = vand.u32 2147483647, %v14890_v35 }
 0xadc   :  { %v5907_v24 = vsel %vm5906_vm11, %v9688_v6, %v5903_v28  ;;  %v5565_v63 = vand.u32 2147483648, %v14890_v35  ;;  %9693 = vrcp.f32 %v14982_v31  ;;  %v14996_v58 = vmul.f32 %v5582_v44, %v14823_v60 }
 0xadd   :  { %v5597_v8 = vsel %vm14933_vm5, %v5596_v59, %v5592_v7  ;;  %v5912_v34 = vsel %vm5909_vm12, %v5911_v42, %v5907_v24  ;;  %v5557_v4 = vmul.f32 %v14950_v21, %v5556_v20  ;;  %v5613_v56 = vmul.f32 %v5612_v45, %v14861_v48 }
 0xade   :  { %v5913_v29 = vmul.f32 %v5912_v34, %v5233_v37  ;;  %v5210_v6 = vmul.f32 %v5170_v30, %v14857_v22  ;;  %v5191_v17 = vand.u32 2147483647, %v14928_v36  ;;  %vm5559_vm13 = vweird.f32 %v14890_v35  ;;  %v17116_v30 = vld [vmem:[#allocation89_spill] sm:$0xff] }
 0xadf   :  { %v5979_v5 = vmul.f32 %v5959_v3, %v13128_v9  ;;  %v5958_v60 = vadd.f32 %v14492_v62, %v14623_v55  ;;  %v5957_v44 = vadd.f32 %v14725_v53, %v14660_v2  ;;  %v5598_v23 = vmul.f32 %v5597_v8, %v14919_v54  ;;  %v17117_v53 = vld [vmem:[#allocation79_spill] sm:$0xff] }
 0xae0   :  { %vm5560_vm14 = vweird.f32 %v14950_v21  ;;  %vm15012_vm15 = vcmp.eq.f32.partialorder %v5563_v49, 8.507059e+37  ;;  %v5566_v22 = vor.u32 1.1754944e-38, %v5565_v63  ;;  %v5953_v59 = vmul.f32 %v5913_v29, %v17116_v30 }
 0xae1   :  { %v9692_v37 = vpop.eup %9691  ;;  %v5558_v25 = vadd.f32 %v14950_v21, %v5557_v4  ;;  %6004 = vmatpush.msrb.mxu3 %v5979_v5  ;;  %v5978_v62 = vmul.f32 %v5958_v60, %v13128_v9  ;;  %v5956_v55 = vadd.f32 %v14775_v61, %v14556_v46  ;;  %v5933_v54 = vmul.f32 %v5613_v56, %v17117_v53  ;;  %v17118_v61 = vld [vmem:[#allocation69_spill] sm:$0xff]  ;;  %vm15036_vm1 = vmor %vm5559_vm13, %vm5560_vm14 }
 0xae2   :  { %v9694_v2 = vpop.eup %9693  ;;  %v5231_v27 = vmul.f32 %v5191_v17, %v14928_v36  ;;  %v5870_v13 = vmul.f32 %v9692_v37, %v14980_v18  ;;  %v5190_v41 = vand.u32 2147483647, %v14938_v43  ;;  %v5977_v7 = vmul.f32 %v5957_v44, %v13128_v9 }
 0xae3   :  { %v5855_v40 = vmul.f32 %v9694_v2, %v14982_v31  ;;  %6005 = vmatpush.msrb.mxu3 %v5978_v62  ;;  %v5955_v28 = vadd.f32 %v14693_v32, %v14835_v47  ;;  %v5954_v46 = vadd.f32 %v14924_v19, %v14872_v50  ;;  %v5932_v20 = vmul.f32 %v5598_v23, %v17118_v61  ;;  %v17123_v62 = vld [vmem:[#allocation33_spill] sm:$0xff] }
 0xae4   :  { %v5871_v1 = vsub.f32 1.0, %v5870_v13  ;;  %v5878_v52 = vand.u32 2147483647, %v14980_v18  ;;  %v5880_v3 = vand.u32 2147483648, %v14980_v18  ;;  %v5562_v32 = vsel %vm15036_vm1, %v14950_v21, %v5558_v25  ;;  %v17122_v25 = vld [vmem:[#allocation13_spill] sm:$0xff] }
 0xae5   :  { %v5856_v47 = vsub.f32 1.0, %v5855_v40  ;;  %6006 = vmatpush.msrb.mxu3 %v5977_v7  ;;  %v5976_v50 = vmul.f32 %v5956_v55, %v13128_v9  ;;  %v5973_v19 = vadd.f32 %v5953_v59, %v5933_v54  ;;  %vm5875_vm2 = vweird.f32 %v9692_v37  ;;  %v9804_v40 = vld [vmem:[%s16303_s5 + $0x10] sm:$0xff] }
 0xae6   :  { %v5872_v45 = vmul.f32 %v9692_v37, %v5871_v1  ;;  %v5863_v35 = vand.u32 2147483647, %v14982_v31  ;;  %v5865_v42 = vand.u32 2147483648, %v14982_v31  ;;  %vm5860_vm4 = vweird.f32 %v9694_v2 }
 0xae7   :  { %v5857_v24 = vmul.f32 %v9694_v2, %v5856_v47  ;;  %6007 = vmatpush.msrb.mxu3 %v5976_v50  ;;  %v5975_v49 = vmul.f32 %v5955_v28, %v13128_v9  ;;  %v5974_v63 = vmul.f32 %v5954_v46, %v13128_v9  ;;  %v5567_v21 = vsel %vm15012_vm15, %v5566_v22, %v5562_v32  ;;  %v9803_v22 = vld [vmem:[%s16303_s5] sm:$0xff]  ;;  %v9806_v28 = vld [vmem:[%s16303_s5 + $0x18] sm:$0xff]  ;;  %v17126_v47 = vld [vmem:[#allocation73_spill] sm:$0xff] }
 0xae8   :  { %v5873_v8 = vadd.f32 %v9692_v37, %v5872_v45  ;;  %vm5874_vm5 = vweird.f32 %v14980_v18  ;;  %vm5859_vm6 = vweird.f32 %v14982_v31  ;;  %v5881_v34 = vor.u32 1.1754944e-38, %v5880_v3 }
 0xae9   :  { %vm5876_vm7 = vmor %vm5874_vm5, %vm5875_vm2  ;;  %v5858_v4 = vadd.f32 %v9694_v2, %v5857_v24  ;;  %6008 = vmatpush.msrb.mxu3 %v5975_v49  ;;  %v5993_v56 = vmul.f32 %v5973_v19, %v13128_v9  ;;  %v5972_v29 = vadd.f32 %v14887_v57, %v5932_v20  ;;  %vm5879_vm8 = vcmp.eq.f32.partialorder %v5878_v52, 8.507059e+37  ;;  %v17125_v52 = vld [vmem:[#allocation63_spill] sm:$0xff] }
 0xaea   :  { %v5877_v17 = vsel %vm5876_vm7, %v9692_v37, %v5873_v8  ;;  %v5230_v5 = vmul.f32 %v5190_v41, %v14938_v43  ;;  %vm5861_vm9 = vmor %vm5859_vm6, %vm5860_vm4  ;;  %v5866_v60 = vor.u32 1.1754944e-38, %v5865_v42  ;;  %v5568_v44 = vmul.f32 %v5567_v21, %v5210_v6  ;;  %v17121_v43 = vld [vmem:[#allocation49_spill] sm:$0xff] }
 0xaeb   :  { %v5882_v23 = vsel %vm5879_vm8, %v5881_v34, %v5877_v17  ;;  %v5862_v18 = vsel %vm5861_vm9, %v9694_v2, %v5858_v4  ;;  %vm5864_vm10 = vcmp.eq.f32.partialorder %v5863_v35, 8.507059e+37  ;;  %6009 = vmatpush.msrb.mxu3 %v5974_v63  ;;  %v5992_v37 = vmul.f32 %v5972_v29, %v13128_v9  ;;  %v17124_v2 = vld [vmem:[#allocation23_spill] sm:$0xff] }
 0xaec   :  { %v5883_v31 = vmul.f32 %v5882_v23, %v5231_v27  ;;  %v5867_v48 = vsel %vm5864_vm10, %v5866_v60, %v5862_v18  ;;  %6010 = vmatmul.f32.vlgmr.msrb.gmra.mxu3 %v9803_v22  ;;  %v5931_v59 = vmul.f32 %v14996_v58, %v17121_v43  ;;  %v5930_v55 = vmul.f32 %v5568_v44, %v17123_v62  ;;  %v9805_v58 = vld [vmem:[%s16303_s5 + $0x8] sm:$0xff] }
 0xaed   :  { %v5868_v57 = vmul.f32 %v5867_v48, %v5230_v5  ;;  %6029 = vmatpush.msra.mxu3 %v5993_v56 }
 0xaee   :  { %v5951_v6 = vmul.f32 %v5883_v31, %v17122_v25 }
 0xaef   :  { %v5950_v54 = vmul.f32 %v5868_v57, %v17124_v2  ;;  %6030 = vmatpush.msra.mxu3 %v5992_v37 }
 0xaf0   :  { %v5971_v27 = vadd.f32 %v5951_v6, %v5931_v59 }
 0xaf1   :  { %v5970_v13 = vadd.f32 %v5950_v54, %v5930_v55 }
 0xaf2   :  { %v5991_v41 = vmul.f32 %v5971_v27, %v13128_v9 }
 0xaf3   :  { %v5990_v7 = vmul.f32 %v5970_v13, %v13128_v9 }
 0xaf4   :  { %6013 = vmatmul.f32.gmra.mxu3 %v9804_v40 }
 0xaf5   :  { %6031 = vmatpush.msra.mxu3 %v5991_v41 }
 0xaf7   :  { %6032 = vmatpush.msra.mxu3 %v5990_v7  ;;  %v9807_v7 = vld [vmem:[%s16302_s4] sm:$0xff] }
 0xafc   :  { %8622 = vmatmul.msk.f32.vlgmr.msra.gmra.mxu3 %vm675_vm0, %v9805_v58  ;;  %v9808_v58 = vld [vmem:[%s16302_s4 + $0x8] sm:$0xff] }
 0xb04   :  { %8623 = vmatmul.msk.f32.gmra.mxu3 %vm675_vm0, %v9806_v28  ;;  %v9809_v28 = vld [vmem:[%s16302_s4 + $0x10] sm:$0xff] }
 0xb6f   :  { %v6011_v46 = vpop.f32.mrf.mxu3 }
 0xb77   :  { %v6014_v20 = vpop.f32.mrf.mxu3 }
 0xb7f   :  { %v6034_v36 = vpop.f32.mrf.mxu3 }
 0xb80   :  { %v6035_v1 = vadd.f32 %v6034_v36, %v6011_v46  ;;  %v9810_v46 = vld [vmem:[%s16302_s4 + $0x18] sm:$0xff]  ;;  %v9812_v36 = vld [vmem:[%s16302_s4 + $0x28] sm:$0xff] }
 0xb82   :  { %v6040_v3 = vadd.f32 %v6035_v1, %v17125_v52  ;;  %v9813_v1 = vld [vmem:[%s16302_s4 + $0x30] sm:$0xff]  ;;  %v9814_v52 = vld [vmem:[%s16302_s4 + $0x38] sm:$0xff] }
 0xb84   :  { %6042 = vmax.xlane.f32.xlu2 %v6040_v3 }
 0xb87   :  { %v6037_v9 = vpop.f32.mrf.mxu3 }
 0xb88   :  { %v6038_v32 = vadd.f32 %v6037_v9, %v6014_v20  ;;  %v9811_v20 = vld [vmem:[%s16302_s4 + $0x20] sm:$0xff]  ;;  %v9816_v9 = vld [vmem:[%s16302_s4 + $0x48] sm:$0xff] }
 0xb8a   :  { %v6041_v50 = vadd.f32 %v6038_v32, %v17126_v47  ;;  %v9817_v32 = vld [vmem:[%s16302_s4 + $0x50] sm:$0xff]  ;;  %v9818_v47 = vld [vmem:[%s16302_s4 + $0x58] sm:$0xff] }
 0xb8c   :  { %6044 = vmax.xlane.f32.xlu1 %v6041_v50 }
 0xbf7   :  { %v6043_v19 = vpop.xlane.xlu2 %6042 }
 0xbf8   :  { %v6046_v45 = vsub.f32 %v6040_v3, %v6043_v19  ;;  %v9815_v3 = vld [vmem:[%s16302_s4 + $0x40] sm:$0xff]  ;;  %v9820_v19 = vld [vmem:[%s16302_s4 + $0x68] sm:$0xff] }
 0xbfa   :  { %v6048_v35 = vmul.f32 1.442695, %v6046_v45  ;;  %v9821_v45 = vld [vmem:[%s16302_s4 + $0x70] sm:$0xff] }
 0xbfc   :  { %9695 = vpow2.f32 %v6048_v35  ;;  %v9822_v35 = vld [vmem:[%s16302_s4 + $0x78] sm:$0xff] }
 0xbff   :  { %v6045_v42 = vpop.xlane.xlu1 %6044 }
 0xc00   :  { %v6047_v24 = vsub.f32 %v6041_v50, %v6045_v42  ;;  %v9819_v50 = vld [vmem:[%s16302_s4 + $0x60] sm:$0xff] }
 0xc01   :  { %v9823_v42 = vld [vmem:[%s16302_s4 + $0x80] sm:$0xff] }
 0xc02   :  { %v9696_v49 = vpop.eup %9695  ;;  %v6050_v63 = vmul.f32 1.442695, %v6047_v24 }
 0xc03   :  { %6052 = vadd.xlane.f32.xlu1 %v9696_v49 }
 0xc04   :  { %9697 = vpow2.f32 %v6050_v63 }
 0xc0a   :  { %v9698_v21 = vpop.eup %9697 }
 0xc0b   :  { %6054 = vadd.xlane.f32.xlu0 %v9698_v21 }
 0xc76   :  { %v6053_v8 = vpop.xlane.xlu1 %6052 }
 0xc77   :  { %9699 = vrcp.f32 %v6053_v8  ;;  %vm6061_vm12 = vweird.f32 %v6053_v8  ;;  %v6067_v18 = vand.u32 2147483648, %v6053_v8  ;;  %v6065_v57 = vand.u32 2147483647, %v6053_v8 }
 0xc79   :  { %v6068_v6 = vor.u32 1.1754944e-38, %v6067_v18  ;;  %vm6066_vm4 = vcmp.eq.f32.partialorder %v6065_v57, 8.507059e+37 }
 0xc7d   :  { %v9700_v34 = vpop.eup %9699 }
 0xc7e   :  { %v6057_v4 = vmul.f32 %v9700_v34, %v6053_v8  ;;  %v6055_v56 = vpop.xlane.xlu0 %6054  ;;  %vm6062_vm11 = vweird.f32 %v9700_v34 }
 0xc7f   :  { %9701 = vrcp.f32 %v6055_v56  ;;  %v6082_v31 = vand.u32 2147483648, %v6055_v56  ;;  %v6080_v22 = vand.u32 2147483647, %v6055_v56  ;;  %vm6063_vm14 = vmor %vm6061_vm12, %vm6062_vm11  ;;  %vm6076_vm15 = vweird.f32 %v6055_v56 }
 0xc80   :  { %v6058_v29 = vsub.f32 1.0, %v6057_v4 }
 0xc81   :  { %v6083_v55 = vor.u32 1.1754944e-38, %v6082_v31  ;;  %vm6081_vm2 = vcmp.eq.f32.partialorder %v6080_v22, 8.507059e+37  ;;  %v17128_v31 = vld [vmem:[#allocation55_spill] sm:$0xff] }
 0xc82   :  { %v6059_v17 = vmul.f32 %v9700_v34, %v6058_v29 }
 0xc84   :  { %v6060_v23 = vadd.f32 %v9700_v34, %v6059_v17 }
 0xc85   :  { %v9702_v5 = vpop.eup %9701 }
 0xc86   :  { %v6072_v60 = vmul.f32 %v9702_v5, %v6055_v56  ;;  %vm6077_vm13 = vweird.f32 %v9702_v5  ;;  %v6064_v59 = vsel %vm6063_vm14, %v9700_v34, %v6060_v23  ;;  %v17127_v23 = vld [vmem:[#allocation35_spill] sm:$0xff] }
 0xc87   :  { %vm6078_vm1 = vmor %vm6076_vm15, %vm6077_vm13  ;;  %v6069_v13 = vsel %vm6066_vm4, %v6068_v6, %v6064_v59 }
 0xc88   :  { %v6073_v44 = vsub.f32 1.0, %v6072_v60  ;;  %v6070_v40 = vmul.f32 %v9696_v49, %v6069_v13  ;;  %v17133_v13 = vld [vmem:[#allocation46_spill] sm:$0xff] }
 0xc8a   :  { %v6074_v48 = vmul.f32 %v9702_v5, %v6073_v44 }
 0xc8c   :  { %v6075_v37 = vadd.f32 %v9702_v5, %v6074_v48 }
 0xc8e   :  { %v6079_v54 = vsel %vm6078_vm1, %v9702_v5, %v6075_v37 }
 0xc8f   :  { %v6084_v27 = vsel %vm6081_vm2, %v6083_v55, %v6079_v54  ;;  %v17132_v54 = vld [vmem:[#allocation36_spill] sm:$0xff] }
 0xc90   :  { %v6085_v41 = vmul.f32 %v9698_v21, %v6084_v27  ;;  %v9824_v21 = vld [vmem:[%s16302_s4 + $0x88] sm:$0xff] }
 0xc92   :  { %6100 = vmatpush.msrb.mxu3 %v6085_v41 }
 0xc94   :  { %6101 = vmatpush.msrb.mxu3 %v6070_v40 }
 0xc95   :  { %8624 = vmatmul.msk.f32.vlgmr.msrb.gmra.mxu3 %vm3756_vm3, %v9807_v7  ;;  %v17134_v7 = vld [vmem:[#allocation56_spill] sm:$0xff] }
 0xc9d   :  { %8625 = vmatmul.msk.f32.gmra.mxu3 %vm3756_vm3, %v9808_v58 }
 0xca5   :  { %8626 = vmatmul.msk.f32.gmra.mxu3 %vm3756_vm3, %v9809_v28  ;;  %v17135_v28 = vld [vmem:[#allocation66_spill] sm:$0xff] }
 0xcad   :  { %8627 = vmatmul.msk.f32.gmra.mxu3 %vm3756_vm3, %v9810_v46 }
 0xcb5   :  { %8628 = vmatmul.msk.f32.gmra.mxu3 %vm3756_vm3, %v9811_v20 }
 0xcbd   :  { %8629 = vmatmul.msk.f32.gmra.mxu3 %vm3756_vm3, %v9812_v36  ;;  %v17136_v36 = vld [vmem:[#allocation76_spill] sm:$0xff] }
 0xcc5   :  { %8630 = vmatmul.msk.f32.gmra.mxu3 %vm3756_vm3, %v9813_v1 }
 0xccd   :  { %8631 = vmatmul.msk.f32.gmra.mxu3 %vm3756_vm3, %v9814_v52 }
 0xcd5   :  { %8632 = vmatmul.msk.f32.gmra.mxu3 %vm3756_vm3, %v9815_v3 }
 0xcdd   :  { %8633 = vmatmul.msk.f32.gmra.mxu3 %vm3756_vm3, %v9816_v9  ;;  %v17138_v9 = vld [vmem:[#allocation17_spill] sm:$0xff] }
 0xce5   :  { %8634 = vmatmul.msk.f32.gmra.mxu3 %vm3756_vm3, %v9817_v32 }
 0xced   :  { %8635 = vmatmul.msk.f32.gmra.mxu3 %vm3756_vm3, %v9818_v47  ;;  %v17139_v47 = vld [vmem:[#allocation27_spill] sm:$0xff] }
 0xcf5   :  { %8636 = vmatmul.msk.f32.gmra.mxu3 %vm3756_vm3, %v9819_v50 }
 0xcfd   :  { %8637 = vmatmul.msk.f32.gmra.mxu3 %vm3756_vm3, %v9820_v19 }
 0xd05   :  { %8638 = vmatmul.msk.f32.gmra.mxu3 %vm3756_vm3, %v9821_v45  ;;  %v17140_v45 = vld [vmem:[#allocation37_spill] sm:$0xff] }
 0xd0d   :  { %8639 = vmatmul.msk.f32.gmra.mxu3 %vm3756_vm3, %v9822_v35 }
 0xd15   :  { %8640 = vmatmul.msk.f32.gmra.mxu3 %vm3756_vm3, %v9823_v42  ;;  %v17141_v42 = vld [vmem:[#allocation47_spill] sm:$0xff] }
 0xd18   :  { %v6103_v24 = vpop.f32.mrf.mxu3 }
 0xd19   :  { %v6183_v49 = vmul.f32 %v6103_v24, %v17104_v0  ;;  %v6163_v63 = vmul.f32 %v6103_v24, %v17098_v33  ;;  %v9825_v0 = vld [vmem:[%s16302_s4 + $0x90] sm:$0xff] }
 0xd1b   :  { %6243 = vadd.xlane.f32.xlu1 %v6183_v49  ;;  %6203 = vadd.xlane.f32.xlu2 %v6163_v63  ;;  %v17142_v63 = vld [vmem:[#allocation57_spill] sm:$0xff] }
 0xd1d   :  { %8641 = vmatmul.msk.f32.gmra.mxu3 %vm3756_vm3, %v9824_v21 }
 0xd20   :  { %v6106_v8 = vpop.f32.mrf.mxu3 }
 0xd21   :  { %v6184_v34 = vmul.f32 %v6106_v8, %v17076_v38  ;;  %v6164_v4 = vmul.f32 %v6106_v8, %v17093_v51  ;;  %v9826_v38 = vld [vmem:[%s16302_s4 + $0x98] sm:$0xff] }
 0xd22   :  { %v17143_v8 = vld [vmem:[#allocation67_spill] sm:$0xff] }
 0xd23   :  { %6245 = vadd.xlane.f32.xlu2 %v6184_v34  ;;  %6205 = vadd.xlane.f32.xlu0 %v6164_v4 }
 0xd25   :  { %8642 = vmatmul.msk.f32.gmra.mxu3 %vm3756_vm3, %v9825_v0  ;;  %v17144_v0 = vld [vmem:[#allocation77_spill] sm:$0xff] }
 0xd28   :  { %v6109_v33 = vpop.f32.mrf.mxu3 }
 0xd29   :  { %v6185_v56 = vmul.f32 %v6109_v33, %v17088_v26  ;;  %v6165_v29 = vmul.f32 %v6109_v33, %v16931_v39 }
 0xd2b   :  { %6247 = vadd.xlane.f32.xlu0 %v6185_v56  ;;  %6207 = vadd.xlane.f32.xlu1 %v6165_v29  ;;  %v17145_v56 = vld [vmem:[#allocation87_spill] sm:$0xff] }
 0xd2d   :  { %8643 = vmatmul.msk.f32.gmra.mxu3 %vm3756_vm3, %v9826_v38 }
 0xd30   :  { %v6112_v51 = vpop.f32.mrf.mxu3 }
 0xd31   :  { %v6186_v17 = vmul.f32 %v6112_v51, %v17079_v10  ;;  %v6166_v5 = vmul.f32 %v6112_v51, %v16927_v16  ;;  %v17129_v10 = vld [vmem:[#allocation65_spill] sm:$0xff] }
 0xd32   :  { %v17130_v16 = vld [vmem:[#allocation85_spill] sm:$0xff] }
 0xd33   :  { %6249 = vadd.xlane.f32.xlu1 %v6186_v17  ;;  %6209 = vadd.xlane.f32.xlu2 %v6166_v5 }
 0xd38   :  { %v6115_v60 = vpop.f32.mrf.mxu3 }
 0xd39   :  { %v6187_v26 = vmul.f32 %v6115_v60, %v16926_v11  ;;  %v6167_v39 = vmul.f32 %v6115_v60, %v16925_v15  ;;  %v17131_v11 = vld [vmem:[#allocation16_spill] sm:$0xff] }
 0xd3b   :  { %6251 = vadd.xlane.f32.xlu2 %v6187_v26  ;;  %6211 = vadd.xlane.f32.xlu0 %v6167_v39 }
 0xd40   :  { %v6118_v44 = vpop.f32.mrf.mxu3 }
 0xd41   :  { %v6188_v18 = vmul.f32 %v6118_v44, %v17127_v23  ;;  %v6168_v48 = vmul.f32 %v6118_v44, %v17128_v31  ;;  %v17146_v44 = vld [vmem:[#allocation18_spill] sm:$0xff] }
 0xd43   :  { %6253 = vadd.xlane.f32.xlu0 %v6188_v18  ;;  %6213 = vadd.xlane.f32.xlu1 %v6168_v48  ;;  %v17147_v18 = vld [vmem:[#allocation28_spill] sm:$0xff] }
 0xd48   :  { %v6121_v22 = vpop.f32.mrf.mxu3 }
 0xd49   :  { %v6189_v57 = vmul.f32 %v6121_v22, %v17129_v10  ;;  %v6169_v37 = vmul.f32 %v6121_v22, %v17130_v16 }
 0xd4b   :  { %6255 = vadd.xlane.f32.xlu1 %v6189_v57  ;;  %6215 = vadd.xlane.f32.xlu2 %v6169_v37 }
 0xd50   :  { %v6124_v59 = vpop.f32.mrf.mxu3 }
 0xd51   :  { %v6190_v6 = vmul.f32 %v6124_v59, %v17131_v11  ;;  %v6170_v15 = vmul.f32 %v6124_v59, %v16913_v14  ;;  %v17137_v14 = vld [vmem:[#allocation86_spill] sm:$0xff] }
 0xd53   :  { %6257 = vadd.xlane.f32.xlu2 %v6190_v6  ;;  %6217 = vadd.xlane.f32.xlu0 %v6170_v15 }
 0xd58   :  { %v6127_v55 = vpop.f32.mrf.mxu3 }
 0xd59   :  { %v6191_v27 = vmul.f32 %v6127_v55, %v17132_v54  ;;  %v6171_v41 = vmul.f32 %v6127_v55, %v17133_v13 }
 0xd5b   :  { %6259 = vadd.xlane.f32.xlu0 %v6191_v27  ;;  %6219 = vadd.xlane.f32.xlu1 %v6171_v41 }
 0xd60   :  { %v6130_v40 = vpop.f32.mrf.mxu3 }
 0xd61   :  { %v6192_v58 = vmul.f32 %v6130_v40, %v17134_v7  ;;  %v6172_v46 = vmul.f32 %v6130_v40, %v17135_v28 }
 0xd63   :  { %6261 = vadd.xlane.f32.xlu1 %v6192_v58  ;;  %6221 = vadd.xlane.f32.xlu2 %v6172_v46 }
 0xd68   :  { %v6133_v20 = vpop.f32.mrf.mxu3 }
 0xd69   :  { %v6193_v1 = vmul.f32 %v6133_v20, %v17136_v36  ;;  %v6173_v52 = vmul.f32 %v6133_v20, %v17137_v14 }
 0xd6b   :  { %6263 = vadd.xlane.f32.xlu2 %v6193_v1  ;;  %6223 = vadd.xlane.f32.xlu0 %v6173_v52 }
 0xd70   :  { %v6136_v3 = vpop.f32.mrf.mxu3 }
 0xd71   :  { %v6194_v32 = vmul.f32 %v6136_v3, %v17138_v9  ;;  %v6174_v50 = vmul.f32 %v6136_v3, %v17139_v47 }
 0xd73   :  { %6265 = vadd.xlane.f32.xlu0 %v6194_v32  ;;  %6225 = vadd.xlane.f32.xlu1 %v6174_v50 }
 0xd78   :  { %v6139_v19 = vpop.f32.mrf.mxu3 }
 0xd79   :  { %v6195_v35 = vmul.f32 %v6139_v19, %v17140_v45  ;;  %v6175_v24 = vmul.f32 %v6139_v19, %v17141_v42 }
 0xd7b   :  { %6267 = vadd.xlane.f32.xlu1 %v6195_v35  ;;  %6227 = vadd.xlane.f32.xlu2 %v6175_v24 }
 0xd80   :  { %v6142_v49 = vpop.f32.mrf.mxu3 }
 0xd81   :  { %v6196_v21 = vmul.f32 %v6142_v49, %v17142_v63  ;;  %v6176_v34 = vmul.f32 %v6142_v49, %v17143_v8 }
 0xd83   :  { %6269 = vadd.xlane.f32.xlu2 %v6196_v21  ;;  %6229 = vadd.xlane.f32.xlu0 %v6176_v34 }
 0xd88   :  { %v6145_v4 = vpop.f32.mrf.mxu3 }
 0xd89   :  { %v6197_v33 = vmul.f32 %v6145_v4, %v17144_v0  ;;  %v6177_v29 = vmul.f32 %v6145_v4, %v17145_v56 }
 0xd8b   :  { %6271 = vadd.xlane.f32.xlu0 %v6197_v33  ;;  %6231 = vadd.xlane.f32.xlu1 %v6177_v29 }
 0xd8e   :  { %v6244_v38 = vpop.xlane.xlu1 %6243  ;;  %v6204_v51 = vpop.xlane.xlu2 %6203 }
 0xd8f   :  { %v6383_v17 = vmul.f32 %v6244_v38, %v6244_v38  ;;  %v6363_v5 = vmul.f32 %v6204_v51, %v6204_v51  ;;  %v6303_v59 = vand.u32 2147483647, %v6244_v38  ;;  %v6283_v11 = vand.u32 2147483647, %v6204_v51 }
 0xd90   :  { %v6148_v60 = vpop.f32.mrf.mxu3 }
 0xd91   :  { %v6423_v26 = vadd.f32 1.0, %v6383_v17  ;;  %v6403_v39 = vadd.f32 1.0, %v6363_v5  ;;  %v6198_v23 = vmul.f32 %v6148_v60, %v17146_v44  ;;  %v6178_v31 = vmul.f32 %v6148_v60, %v17147_v18 }
 0xd92   :  { %v6343_v20 = vmul.f32 %v6303_v59, %v6244_v38  ;;  %v6323_v36 = vmul.f32 %v6283_v11, %v6204_v51 }
 0xd93   :  { %9703 = vrcp.f32 %v6423_v26  ;;  %6273 = vadd.xlane.f32.xlu1 %v6198_v23  ;;  %6233 = vadd.xlane.f32.xlu2 %v6178_v31  ;;  %v6752_v41 = vand.u32 2147483647, %v6423_v26  ;;  %v6754_v40 = vand.u32 2147483648, %v6423_v26  ;;  %v6452_v28 = vand.u32 2147483647, %v6403_v39 }
 0xd94   :  { %9705 = vrcp.f32 %v6403_v39  ;;  %v6454_v46 = vand.u32 2147483648, %v6403_v39  ;;  %vm6748_vm3 = vweird.f32 %v6423_v26  ;;  %vm6448_vm6 = vweird.f32 %v6403_v39 }
 0xd95   :  { %vm15210_vm7 = vcmp.eq.f32.partialorder %v6752_v41, 8.507059e+37  ;;  %v6755_v9 = vor.u32 1.1754944e-38, %v6754_v40  ;;  %vm15214_vm9 = vcmp.eq.f32.partialorder %v6452_v28, 8.507059e+37 }
 0xd96   :  { %v6246_v48 = vpop.xlane.xlu2 %6245  ;;  %v15194_v22 = vpop.xlane.xlu0 %6205  ;;  %v6455_v19 = vor.u32 1.1754944e-38, %v6454_v46 }
 0xd97   :  { %v6384_v10 = vmul.f32 %v6246_v48, %v6246_v48  ;;  %v6364_v57 = vmul.f32 %v15194_v22, %v15194_v22  ;;  %v6304_v14 = vand.u32 2147483647, %v6246_v48  ;;  %v6284_v63 = vand.u32 2147483647, %v15194_v22 }
 0xd98   :  { %v6151_v16 = vpop.f32.mrf.mxu3 }
 0xd99   :  { %v9704_v37 = vpop.eup %9703  ;;  %v15198_v6 = vadd.f32 1.0, %v6384_v10  ;;  %v15200_v15 = vadd.f32 1.0, %v6364_v57  ;;  %v6199_v27 = vmul.f32 %v6151_v16, %v17124_v2  ;;  %v6179_v13 = vmul.f32 %v6151_v16, %v17123_v62 }
 0xd9a   :  { %v9706_v55 = vpop.eup %9705  ;;  %v6744_v54 = vmul.f32 %v9704_v37, %v6423_v26  ;;  %vm6749_vm5 = vweird.f32 %v9704_v37  ;;  %v6344_v49 = vmul.f32 %v6304_v14, %v6246_v48  ;;  %v6324_v18 = vmul.f32 %v6284_v63, %v15194_v22 }
 0xd9b   :  { %v6444_v7 = vmul.f32 %v9706_v55, %v6403_v39  ;;  %9707 = vrcp.f32 %v15198_v6  ;;  %6275 = vadd.xlane.f32.xlu2 %v6199_v27  ;;  %6235 = vadd.xlane.f32.xlu0 %v6179_v13  ;;  %vm6449_vm8 = vweird.f32 %v9706_v55  ;;  %vm6750_vm10 = vmor %vm6748_vm3, %vm6749_vm5  ;;  %v6767_v38 = vand.u32 2147483647, %v15198_v6 }
 0xd9c   :  { %v6745_v58 = vsub.f32 1.0, %v6744_v54  ;;  %9709 = vrcp.f32 %v15200_v15  ;;  %vm6450_vm11 = vmor %vm6448_vm6, %vm6449_vm8  ;;  %v6769_v26 = vand.u32 2147483648, %v15198_v6  ;;  %v6469_v44 = vand.u32 2147483648, %v15200_v15 }
 0xd9d   :  { %v6445_v1 = vsub.f32 1.0, %v6444_v7  ;;  %v6467_v16 = vand.u32 2147483647, %v15200_v15  ;;  %vm6763_vm14 = vweird.f32 %v15198_v6  ;;  %vm6463_vm15 = vweird.f32 %v15200_v15 }
 0xd9e   :  { %v6746_v52 = vmul.f32 %v9704_v37, %v6745_v58  ;;  %v15206_v62 = vpop.xlane.xlu0 %6247  ;;  %v15208_v2 = vpop.xlane.xlu1 %6207  ;;  %vm6768_vm2 = vcmp.eq.f32.partialorder %v6767_v38, 8.507059e+37  ;;  %v6770_v22 = vor.u32 1.1754944e-38, %v6769_v26 }
 0xd9f   :  { %v6446_v32 = vmul.f32 %v9706_v55, %v6445_v1  ;;  %v6385_v45 = vmul.f32 %v15206_v62, %v15206_v62  ;;  %v6365_v33 = vmul.f32 %v15208_v2, %v15208_v2  ;;  %v6305_v41 = vand.u32 2147483647, %v15206_v62 }
 0xda0   :  { %v6747_v47 = vadd.f32 %v9704_v37, %v6746_v52  ;;  %v15220_v35 = vpop.f32.mrf.mxu3  ;;  %vm6468_vm3 = vcmp.eq.f32.partialorder %v6467_v16, 8.507059e+37 }
 0xda1   :  { %v9708_v42 = vpop.eup %9707  ;;  %v6447_v24 = vadd.f32 %v9706_v55, %v6446_v32  ;;  %v6180_v21 = vmul.f32 %v15220_v35, %v17121_v43  ;;  %v15228_v0 = vadd.f32 1.0, %v6385_v45  ;;  %v15246_v31 = vadd.f32 1.0, %v6365_v33 }
 0xda2   :  { %v9710_v8 = vpop.eup %9709  ;;  %v6751_v34 = vsel %vm6750_vm10, %v9704_v37, %v6747_v47  ;;  %v6759_v4 = vmul.f32 %v9708_v42, %v15198_v6  ;;  %vm6764_vm12 = vweird.f32 %v9708_v42  ;;  %v6345_v3 = vmul.f32 %v6305_v41, %v15206_v62 }
 0xda3   :  { %v6756_v56 = vsel %vm15210_vm7, %v6755_v9, %v6751_v34  ;;  %v6451_v29 = vsel %vm6450_vm11, %v9706_v55, %v6447_v24  ;;  %v6459_v51 = vmul.f32 %v9710_v8, %v15200_v15  ;;  %6237 = vadd.xlane.f32.xlu1 %v6180_v21  ;;  %9711 = vrcp.f32 %v15228_v0  ;;  %vm6765_vm1 = vmor %vm6763_vm14, %vm6764_vm12 }
 0xda4   :  { %v15236_v43 = vmul.f32 %v6756_v56, %v6343_v20  ;;  %v6456_v17 = vsel %vm15214_vm9, %v6455_v19, %v6451_v29  ;;  %v6760_v5 = vsub.f32 1.0, %v6759_v4  ;;  %vm6464_vm13 = vweird.f32 %v9710_v8 }
 0xda5   :  { %v15241_v60 = vmul.f32 %v6456_v17, %v6323_v36  ;;  %v6460_v39 = vsub.f32 1.0, %v6459_v51  ;;  %9713 = vrcp.f32 %v15246_v31  ;;  %v6470_v55 = vor.u32 1.1754944e-38, %v6469_v44  ;;  %vm6465_vm4 = vmor %vm6463_vm15, %vm6464_vm13 }
 0xda6   :  { %v6761_v23 = vmul.f32 %v9708_v42, %v6760_v5  ;;  %v6250_v48 = vpop.xlane.xlu1 %6249  ;;  %v15248_v10 = vpop.xlane.xlu2 %6209  ;;  %v6285_v20 = vand.u32 2147483647, %v15208_v2  ;;  %v6782_v14 = vand.u32 2147483647, %v15228_v0  ;;  %v6784_v9 = vand.u32 2147483648, %v15228_v0 }
 0xda7   :  { %v6461_v57 = vmul.f32 %v9710_v8, %v6460_v39  ;;  %v6386_v37 = vmul.f32 %v6250_v48, %v6250_v48  ;;  %v6366_v6 = vmul.f32 %v15248_v10, %v15248_v10  ;;  %v6306_v32 = vand.u32 2147483647, %v6250_v48 }
 0xda8   :  { %v6762_v59 = vadd.f32 %v9708_v42, %v6761_v23  ;;  %v6157_v54 = vpop.f32.mrf.mxu3  ;;  %vm6778_vm6 = vweird.f32 %v15228_v0  ;;  %v6482_v62 = vand.u32 2147483647, %v15246_v31  ;;  %vm6783_vm7 = vcmp.eq.f32.partialorder %v6782_v14, 8.507059e+37 }
 0xda9   :  { %v6462_v11 = vadd.f32 %v9710_v8, %v6461_v57  ;;  %v9712_v27 = vpop.eup %9711  ;;  %v15256_v40 = vadd.f32 1.0, %v6386_v37  ;;  %v15270_v47 = vadd.f32 1.0, %v6366_v6  ;;  %v6785_v34 = vor.u32 1.1754944e-38, %v6784_v9 }
 0xdaa   :  { %v6766_v13 = vsel %vm6765_vm1, %v9708_v42, %v6762_v59  ;;  %v6774_v58 = vmul.f32 %v9712_v27, %v15228_v0  ;;  %vm6779_vm5 = vweird.f32 %v9712_v27  ;;  %v6201_v42 = vmul.f32 %v6157_v54, %v17099_v12 }
 0xdab   :  { %v6771_v15 = vsel %vm6768_vm2, %v6770_v22, %v6766_v13  ;;  %v6466_v7 = vsel %vm6465_vm4, %v9710_v8, %v6462_v11  ;;  %9715 = vrcp.f32 %v15256_v40  ;;  %v9714_v52 = vpop.eup %9713  ;;  %v6484_v8 = vand.u32 2147483648, %v15246_v31  ;;  %vm6780_vm8 = vmor %vm6778_vm6, %vm6779_vm5 }
 0xdac   :  { %v15261_v28 = vmul.f32 %v6771_v15, %v6344_v49  ;;  %v6471_v46 = vsel %vm6468_vm3, %v6470_v55, %v6466_v7  ;;  %v6775_v1 = vsub.f32 1.0, %v6774_v58  ;;  %v6474_v45 = vmul.f32 %v9714_v52, %v15246_v31  ;;  %6279 = vadd.xlane.f32.xlu1 %v6201_v42 }
 0xdad   :  { %v15264_v36 = vmul.f32 %v6471_v46, %v6324_v18  ;;  %v6325_v49 = vmul.f32 %v6285_v20, %v15208_v2  ;;  %9717 = vrcp.f32 %v15270_v47  ;;  %vm6478_vm9 = vweird.f32 %v15246_v31 }
 0xdae   :  { %v15272_v50 = vpop.xlane.xlu0 %6211  ;;  %v6776_v19 = vmul.f32 %v9712_v27, %v6775_v1  ;;  %v15276_v24 = vpop.xlane.xlu2 %6251  ;;  %v6475_v21 = vsub.f32 1.0, %v6474_v45  ;;  %v6181_v12 = vmul.f32 %v6157_v54, %v17118_v61  ;;  %vm6479_vm10 = vweird.f32 %v9714_v52 }
 0xdaf   :  { %v6387_v4 = vmul.f32 %v15276_v24, %v15276_v24  ;;  %v6346_v56 = vmul.f32 %v6306_v32, %v6250_v48  ;;  %vm15287_vm11 = vcmp.eq.f32.partialorder %v6482_v62, 8.507059e+37  ;;  %v6286_v5 = vand.u32 2147483647, %v15248_v10  ;;  %vm6480_vm12 = vmor %vm6478_vm9, %vm6479_vm10 }
 0xdb0   :  { %v6777_v63 = vadd.f32 %v9712_v27, %v6776_v19  ;;  %v6476_v33 = vmul.f32 %v9714_v52, %v6475_v21  ;;  %v6160_v29 = vpop.f32.mrf.mxu3  ;;  %6239 = vadd.xlane.f32.xlu2 %v6181_v12  ;;  %v6485_v39 = vor.u32 1.1754944e-38, %v6484_v8  ;;  %v6799_v48 = vand.u32 2147483648, %v15256_v40 }
 0xdb1   :  { %v9716_v2 = vpop.eup %9715  ;;  %v15295_v44 = vadd.f32 1.0, %v6387_v4  ;;  %v6367_v57 = vmul.f32 %v15272_v50, %v15272_v50  ;;  %v6182_v16 = vmul.f32 %v6160_v29, %v17117_v53  ;;  %v6797_v59 = vand.u32 2147483647, %v15256_v40 }
 0xdb2   :  { %v6781_v0 = vsel %vm6780_vm8, %v9712_v27, %v6777_v63  ;;  %v6789_v17 = vmul.f32 %v9716_v2, %v15256_v40  ;;  %v6477_v26 = vadd.f32 %v9714_v52, %v6476_v33  ;;  %vm6794_vm13 = vweird.f32 %v9716_v2 }
 0xdb3   :  { %v6786_v38 = vsel %vm6783_vm7, %v6785_v34, %v6781_v0  ;;  %v9718_v23 = vpop.eup %9717  ;;  %9719 = vrcp.f32 %v15295_v44  ;;  %v6202_v27 = vmul.f32 %v6160_v29, %v17116_v30  ;;  %6241 = vadd.xlane.f32.xlu0 %v6182_v16  ;;  %vm6793_vm14 = vweird.f32 %v15256_v40 }
 0xdb4   :  { %v15293_v61 = vmul.f32 %v6786_v38, %v6345_v3  ;;  %v6790_v18 = vsub.f32 1.0, %v6789_v17  ;;  %v6481_v37 = vsel %vm6480_vm12, %v9714_v52, %v6477_v26  ;;  %v6489_v22 = vmul.f32 %v9718_v23, %v15270_v47  ;;  %vm6795_vm15 = vmor %vm6793_vm14, %vm6794_vm13 }
 0xdb5   :  { %v6486_v31 = vsel %vm15287_vm11, %v6485_v39, %v6481_v37  ;;  %v15316_v41 = vadd.f32 1.0, %v6367_v57  ;;  %v6800_v15 = vor.u32 1.1754944e-38, %v6799_v48  ;;  %v6499_v7 = vand.u32 2147483648, %v15270_v47 }
 0xdb6   :  { %v15306_v11 = vpop.xlane.xlu0 %6253  ;;  %v15308_v55 = vpop.xlane.xlu1 %6213  ;;  %v6791_v54 = vmul.f32 %v9716_v2, %v6790_v18  ;;  %v15313_v53 = vmul.f32 %v6486_v31, %v6325_v49  ;;  %v6490_v13 = vsub.f32 1.0, %v6489_v22  ;;  %vm6494_vm1 = vweird.f32 %v9718_v23 }
 0xdb7   :  { %v6388_v58 = vmul.f32 %v15306_v11, %v15306_v11  ;;  %v6497_v30 = vand.u32 2147483647, %v15270_v47  ;;  %9721 = vrcp.f32 %v15316_v41  ;;  %vm6798_vm2 = vcmp.eq.f32.partialorder %v6797_v59, 8.507059e+37 }
 0xdb8   :  { %v6792_v6 = vadd.f32 %v9716_v2, %v6791_v54  ;;  %v6491_v46 = vmul.f32 %v9718_v23, %v6490_v13  ;;  %vm6493_vm4 = vweird.f32 %v15270_v47  ;;  %v6307_v40 = vand.u32 2147483647, %v15276_v24  ;;  %6281 = vadd.xlane.f32.xlu2 %v6202_v27 }
 0xdb9   :  { %v9720_v1 = vpop.eup %9719  ;;  %v6287_v3 = vand.u32 2147483647, %v15272_v50  ;;  %v15326_v9 = vadd.f32 1.0, %v6388_v58  ;;  %v6326_v19 = vmul.f32 %v6286_v5, %v15248_v10  ;;  %vm6495_vm3 = vmor %vm6493_vm4, %vm6494_vm1  ;;  %v6500_v45 = vor.u32 1.1754944e-38, %v6499_v7 }
 0xdba   :  { %v6796_v20 = vsel %vm6795_vm15, %v9716_v2, %v6792_v6  ;;  %v6492_v52 = vadd.f32 %v9718_v23, %v6491_v46  ;;  %v6804_v42 = vmul.f32 %v9720_v1, %v15295_v44  ;;  %vm6498_vm5 = vcmp.eq.f32.partialorder %v6497_v30, 8.507059e+37 }
 0xdbb   :  { %v6801_v14 = vsel %vm6798_vm2, %v6800_v15, %v6796_v20  ;;  %v6812_v62 = vand.u32 2147483647, %v15295_v44  ;;  %9723 = vrcp.f32 %v15326_v9  ;;  %v6347_v21 = vmul.f32 %v6307_v40, %v15276_v24 }
 0xdbc   :  { %v15328_v32 = vmul.f32 %v6801_v14, %v6346_v56  ;;  %v6496_v49 = vsel %vm6495_vm3, %v9718_v23, %v6492_v52  ;;  %v6805_v8 = vsub.f32 1.0, %v6804_v42  ;;  %v6814_v34 = vand.u32 2147483648, %v15295_v44 }
 0xdbd   :  { %v6501_v63 = vsel %vm6498_vm5, %v6500_v45, %v6496_v49  ;;  %v9722_v10 = vpop.eup %9721  ;;  %v6327_v4 = vmul.f32 %v6287_v3, %v15272_v50  ;;  %v6368_v2 = vmul.f32 %v15308_v55, %v15308_v55  ;;  %v6200_v0 = vmul.f32 %v15220_v35, %v17122_v25 }
 0xdbe   :  { %v15333_v47 = vpop.xlane.xlu2 %6215  ;;  %v15339_v12 = vmul.f32 %v6501_v63, %v6326_v19  ;;  %v15346_v33 = vpop.xlane.xlu1 %6255  ;;  %v6806_v56 = vmul.f32 %v9720_v1, %v6805_v8  ;;  %vm6808_vm6 = vweird.f32 %v15295_v44  ;;  %vm6809_vm7 = vweird.f32 %v9720_v1 }
 0xdbf   :  { %v6504_v24 = vmul.f32 %v9722_v10, %v15316_v41  ;;  %vm15350_vm8 = vcmp.eq.f32.partialorder %v6812_v62, 8.507059e+37  ;;  %v6512_v50 = vand.u32 2147483647, %v15316_v41  ;;  %v6308_v38 = vand.u32 2147483647, %v15306_v11  ;;  %6277 = vadd.xlane.f32.xlu0 %v6200_v0  ;;  %vm6810_vm9 = vmor %vm6808_vm6, %vm6809_vm7 }
 0xdc0   :  { %v15356_v51 = vadd.f32 1.0, %v6368_v2  ;;  %v6807_v25 = vadd.f32 %v9720_v1, %v6806_v56  ;;  %v6815_v35 = vor.u32 1.1754944e-38, %v6814_v34  ;;  %v6389_v5 = vmul.f32 %v15346_v33, %v15346_v33 }
 0xdc1   :  { %v6505_v17 = vsub.f32 1.0, %v6504_v24  ;;  %v9724_v26 = vpop.eup %9723  ;;  %vm6508_vm10 = vweird.f32 %v15316_v41  ;;  %v6514_v39 = vand.u32 2147483648, %v15316_v41  ;;  %v6369_v44 = vmul.f32 %v15333_v47, %v15333_v47 }
 0xdc2   :  { %9725 = vrcp.f32 %v15356_v51  ;;  %v6811_v23 = vsel %vm6810_vm9, %v9720_v1, %v6807_v25  ;;  %vm6509_vm11 = vweird.f32 %v9722_v10  ;;  %v6819_v48 = vmul.f32 %v9724_v26, %v15326_v9 }
 0xdc3   :  { %v6506_v18 = vmul.f32 %v9722_v10, %v6505_v17  ;;  %v6816_v57 = vsel %vm15350_vm8, %v6815_v35, %v6811_v23  ;;  %vm15368_vm12 = vcmp.eq.f32.partialorder %v6512_v50, 8.507059e+37  ;;  %v6348_v37 = vmul.f32 %v6308_v38, %v15306_v11  ;;  %vm6510_vm13 = vmor %vm6508_vm10, %vm6509_vm11 }
 0xdc4   :  { %v6288_v59 = vand.u32 2147483647, %v15308_v55  ;;  %v15374_v22 = vmul.f32 %v6816_v57, %v6347_v21  ;;  %v6820_v54 = vsub.f32 1.0, %v6819_v48  ;;  %v15376_v27 = vadd.f32 1.0, %v6389_v5 }
 0xdc5   :  { %v6507_v31 = vadd.f32 %v9722_v10, %v6506_v18  ;;  %v6515_v6 = vor.u32 1.1754944e-38, %v6514_v39  ;;  %v6827_v15 = vand.u32 2147483647, %v15326_v9  ;;  %v6829_v7 = vand.u32 2147483648, %v15326_v9 }
 0xdc6   :  { %v15378_v13 = vpop.xlane.xlu2 %6257  ;;  %v15384_v58 = vadd.f32 1.0, %v6369_v44  ;;  %v6821_v46 = vmul.f32 %v9724_v26, %v6820_v54  ;;  %vm6824_vm14 = vweird.f32 %v9724_v26  ;;  %9727 = vrcp.f32 %v15376_v27  ;;  %v15387_v30 = vpop.xlane.xlu0 %6217 }
 0xdc7   :  { %v6511_v11 = vsel %vm6510_vm13, %v9722_v10, %v6507_v31  ;;  %v6527_v41 = vand.u32 2147483647, %v15356_v51  ;;  %v6390_v1 = vmul.f32 %v15378_v13, %v15378_v13  ;;  %vm6823_vm15 = vweird.f32 %v15326_v9 }
 0xdc8   :  { %v9726_v20 = vpop.eup %9725  ;;  %v6516_v40 = vsel %vm15368_vm12, %v6515_v6, %v6511_v11  ;;  %9729 = vrcp.f32 %v15384_v58  ;;  %v6822_v52 = vadd.f32 %v9724_v26, %v6821_v46  ;;  %vm6825_vm1 = vmor %vm6823_vm15, %vm6824_vm14  ;;  %v6830_v19 = vor.u32 1.1754944e-38, %v6829_v7 }
 0xdc9   :  { %v15395_v14 = vmul.f32 %v6516_v40, %v6327_v4  ;;  %v6519_v3 = vmul.f32 %v9726_v20, %v15356_v51  ;;  %v6328_v45 = vmul.f32 %v6288_v59, %v15308_v55  ;;  %v6529_v42 = vand.u32 2147483648, %v15356_v51 }
 0xdca   :  { %v6309_v49 = vand.u32 2147483647, %v15346_v33  ;;  %v6826_v62 = vsel %vm6825_vm1, %v9724_v26, %v6822_v52  ;;  %vm6828_vm2 = vcmp.eq.f32.partialorder %v6827_v15, 8.507059e+37  ;;  %v6289_v21 = vand.u32 2147483647, %v15333_v47 }
 0xdcb   :  { %v6520_v63 = vsub.f32 1.0, %v6519_v3  ;;  %v6831_v8 = vsel %vm6828_vm2, %v6830_v19, %v6826_v62  ;;  %vm6523_vm4 = vweird.f32 %v15356_v51  ;;  %vm15404_vm3 = vcmp.eq.f32.partialorder %v6527_v41, 8.507059e+37 }
 0xdcc   :  { %v15408_v34 = vadd.f32 1.0, %v6390_v1  ;;  %v9728_v10 = vpop.eup %9727  ;;  %v15410_v55 = vmul.f32 %v6831_v8, %v6348_v37  ;;  %vm6524_vm5 = vweird.f32 %v9726_v20  ;;  %v6370_v2 = vmul.f32 %v15387_v30, %v15387_v30 }
 0xdcd   :  { %v6521_v4 = vmul.f32 %v9726_v20, %v6520_v63  ;;  %v6530_v56 = vor.u32 1.1754944e-38, %v6529_v42  ;;  %v6349_v24 = vmul.f32 %v6309_v49, %v15346_v33  ;;  %v6834_v29 = vmul.f32 %v9728_v10, %v15376_v27  ;;  %vm6525_vm6 = vmor %vm6523_vm4, %vm6524_vm5 }
 0xdce   :  { %v9730_v0 = vpop.eup %9729  ;;  %9731 = vrcp.f32 %v15408_v34  ;;  %v15417_v50 = vpop.xlane.xlu1 %6219  ;;  %v6329_v25 = vmul.f32 %v6289_v21, %v15333_v47  ;;  %v6310_v17 = vand.u32 2147483647, %v15378_v13  ;;  %v6842_v26 = vand.u32 2147483647, %v15376_v27 }
 0xdcf   :  { %v6522_v38 = vadd.f32 %v9726_v20, %v6521_v4  ;;  %v6534_v35 = vmul.f32 %v9730_v0, %v15384_v58  ;;  %v6835_v5 = vsub.f32 1.0, %v6834_v29  ;;  %v6844_v33 = vand.u32 2147483648, %v15376_v27  ;;  %v15430_v48 = vpop.xlane.xlu0 %6259 }
 0xdd0   :  { %v15426_v39 = vadd.f32 1.0, %v6370_v2  ;;  %v6542_v18 = vand.u32 2147483647, %v15384_v58  ;;  %v6544_v47 = vand.u32 2147483648, %v15384_v58  ;;  %vm6839_vm7 = vweird.f32 %v9728_v10 }
 0xdd1   :  { %v6526_v44 = vsel %vm6525_vm6, %v9726_v20, %v6522_v38  ;;  %v6535_v23 = vsub.f32 1.0, %v6534_v35  ;;  %v6836_v51 = vmul.f32 %v9728_v10, %v6835_v5  ;;  %vm6838_vm8 = vweird.f32 %v15376_v27 }
 0xdd2   :  { %v6531_v57 = vsel %vm15404_vm3, %v6530_v56, %v6526_v44  ;;  %9733 = vrcp.f32 %v15426_v39  ;;  %vm6539_vm9 = vweird.f32 %v9730_v0  ;;  %vm6843_vm10 = vcmp.eq.f32.partialorder %v6842_v26, 8.507059e+37  ;;  %vm6840_vm11 = vmor %vm6838_vm8, %vm6839_vm7 }
 0xdd3   :  { %v15435_v16 = vmul.f32 %v6531_v57, %v6328_v45  ;;  %v6536_v37 = vmul.f32 %v9730_v0, %v6535_v23  ;;  %v6837_v31 = vadd.f32 %v9728_v10, %v6836_v51  ;;  %v6845_v54 = vor.u32 1.1754944e-38, %v6844_v33 }
 0xdd4   :  { %v9732_v59 = vpop.eup %9731  ;;  %v6391_v6 = vmul.f32 %v15430_v48, %v15430_v48  ;;  %vm6538_vm12 = vweird.f32 %v15384_v58  ;;  %vm6543_vm13 = vcmp.eq.f32.partialorder %v6542_v18, 8.507059e+37  ;;  %v6545_v46 = vor.u32 1.1754944e-38, %v6544_v47 }
 0xdd5   :  { %v6537_v15 = vadd.f32 %v9730_v0, %v6536_v37  ;;  %v6849_v7 = vmul.f32 %v9732_v59, %v15408_v34  ;;  %v6841_v11 = vsel %vm6840_vm11, %v9728_v10, %v6837_v31  ;;  %vm6540_vm14 = vmor %vm6538_vm12, %vm6539_vm9  ;;  %v6857_v27 = vand.u32 2147483647, %v15408_v34 }
 0xdd6   :  { %v15443_v20 = vadd.f32 1.0, %v6391_v6  ;;  %v6846_v40 = vsel %vm6843_vm10, %v6845_v54, %v6841_v11  ;;  %v6371_v52 = vmul.f32 %v15417_v50, %v15417_v50  ;;  %v6859_v45 = vand.u32 2147483648, %v15408_v34  ;;  %v15451_v42 = vpop.xlane.xlu1 %6261  ;;  %v15453_v49 = vpop.xlane.xlu2 %6221 }
 0xdd7   :  { %v6541_v41 = vsel %vm6540_vm14, %v9730_v0, %v6537_v15  ;;  %v6850_v1 = vsub.f32 1.0, %v6849_v7  ;;  %v15447_v19 = vmul.f32 %v6846_v40, %v6349_v24  ;;  %vm6854_vm15 = vweird.f32 %v9732_v59 }
 0xdd8   :  { %v9734_v3 = vpop.eup %9733  ;;  %v6546_v58 = vsel %vm6543_vm13, %v6545_v46, %v6541_v41  ;;  %9735 = vrcp.f32 %v15443_v20  ;;  %v6350_v8 = vmul.f32 %v6310_v17, %v15378_v13  ;;  %vm6853_vm1 = vweird.f32 %v15408_v34 }
 0xdd9   :  { %v15455_v62 = vmul.f32 %v6546_v58, %v6329_v25  ;;  %v6851_v63 = vmul.f32 %v9732_v59, %v6850_v1  ;;  %v6549_v21 = vmul.f32 %v9734_v3, %v15426_v39  ;;  %v6290_v9 = vand.u32 2147483647, %v15387_v30  ;;  %vm6855_vm2 = vmor %vm6853_vm1, %vm6854_vm15 }
 0xdda   :  { %v15461_v10 = vadd.f32 1.0, %v6371_v52  ;;  %v6311_v0 = vand.u32 2147483647, %v15430_v48  ;;  %v6392_v56 = vmul.f32 %v15451_v42, %v15451_v42  ;;  %vm6858_vm4 = vcmp.eq.f32.partialorder %v6857_v27, 8.507059e+37 }
 0xddb   :  { %v6852_v4 = vadd.f32 %v9732_v59, %v6851_v63  ;;  %v6550_v2 = vsub.f32 1.0, %v6549_v21  ;;  %v6860_v24 = vor.u32 1.1754944e-38, %v6859_v45  ;;  %v6559_v29 = vand.u32 2147483648, %v15426_v39 }
 0xddc   :  { %9737 = vrcp.f32 %v15461_v10  ;;  %vm6554_vm3 = vweird.f32 %v9734_v3  ;;  %v6557_v38 = vand.u32 2147483647, %v15426_v39  ;;  %v6330_v17 = vmul.f32 %v6290_v9, %v15387_v30 }
 0xddd   :  { %v6856_v13 = vsel %vm6855_vm2, %v9732_v59, %v6852_v4  ;;  %v6551_v34 = vmul.f32 %v9734_v3, %v6550_v2  ;;  %vm6553_vm5 = vweird.f32 %v15426_v39  ;;  %v15471_v5 = vadd.f32 1.0, %v6392_v56 }
 0xdde   :  { %v9736_v25 = vpop.eup %9735  ;;  %v6861_v35 = vsel %vm6858_vm4, %v6860_v24, %v6856_v13  ;;  %v6351_v44 = vmul.f32 %v6311_v0, %v15430_v48  ;;  %v15477_v18 = vpop.xlane.xlu0 %6223  ;;  %vm6555_vm6 = vmor %vm6553_vm5, %vm6554_vm3  ;;  %v6560_v47 = vor.u32 1.1754944e-38, %v6559_v29  ;;  %v6872_v57 = vand.u32 2147483647, %v15443_v20 }
 0xddf   :  { %v15473_v26 = vmul.f32 %v6861_v35, %v6350_v8  ;;  %v6552_v33 = vadd.f32 %v9734_v3, %v6551_v34  ;;  %v6864_v23 = vmul.f32 %v9736_v25, %v15443_v20  ;;  %v6291_v51 = vand.u32 2147483647, %v15417_v50  ;;  %v15487_v6 = vpop.xlane.xlu2 %6263 }
 0xde0   :  { %9739 = vrcp.f32 %v15471_v5  ;;  %vm6558_vm7 = vcmp.eq.f32.partialorder %v6557_v38, 8.507059e+37  ;;  %v6874_v37 = vand.u32 2147483648, %v15443_v20  ;;  %vm6868_vm8 = vweird.f32 %v15443_v20 }
 0xde1   :  { %v6556_v30 = vsel %vm6555_vm6, %v9734_v3, %v6552_v33  ;;  %v6865_v39 = vsub.f32 1.0, %v6864_v23  ;;  %v6312_v48 = vand.u32 2147483647, %v15451_v42  ;;  %v6372_v54 = vmul.f32 %v15453_v49, %v15453_v49 }
 0xde2   :  { %v9738_v59 = vpop.eup %9737  ;;  %v6561_v31 = vsel %vm6558_vm7, %v6560_v47, %v6556_v30  ;;  %vm6869_vm9 = vweird.f32 %v9736_v25  ;;  %vm15492_vm10 = vcmp.eq.f32.partialorder %v6872_v57, 8.507059e+37  ;;  %v6331_v27 = vmul.f32 %v6291_v51, %v15417_v50 }
 0xde3   :  { %v15489_v15 = vmul.f32 %v6561_v31, %v6330_v17  ;;  %v6866_v7 = vmul.f32 %v9736_v25, %v6865_v39  ;;  %v6564_v11 = vmul.f32 %v9738_v59, %v15461_v10  ;;  %v6572_v40 = vand.u32 2147483647, %v15461_v10  ;;  %vm6870_vm11 = vmor %vm6868_vm8, %vm6869_vm9 }
 0xde4   :  { %v15498_v41 = vadd.f32 1.0, %v6372_v54  ;;  %v6875_v52 = vor.u32 1.1754944e-38, %v6874_v37  ;;  %v6393_v58 = vmul.f32 %v15487_v6, %v15487_v6  ;;  %vm6568_vm12 = vweird.f32 %v15461_v10 }
 0xde5   :  { %v6867_v1 = vadd.f32 %v9736_v25, %v6866_v7  ;;  %v6565_v3 = vsub.f32 1.0, %v6564_v11  ;;  %v6574_v63 = vand.u32 2147483648, %v15461_v10  ;;  %v6352_v50 = vmul.f32 %v6312_v48, %v15451_v42 }
 0xde6   :  { %v9740_v45 = vpop.eup %9739  ;;  %9741 = vrcp.f32 %v15498_v41  ;;  %vm6569_vm13 = vweird.f32 %v9738_v59  ;;  %vm15511_vm14 = vcmp.eq.f32.partialorder %v6572_v40, 8.507059e+37  ;;  %v6292_v20 = vand.u32 2147483647, %v15453_v49  ;;  %v6266_v13 = vpop.xlane.xlu0 %6265 }
 0xde7   :  { %v6871_v21 = vsel %vm6870_vm11, %v9736_v25, %v6867_v1  ;;  %v6566_v8 = vmul.f32 %v9738_v59, %v6565_v3  ;;  %v6879_v9 = vmul.f32 %v9740_v45, %v15471_v5  ;;  %v15516_v0 = vadd.f32 1.0, %v6393_v58  ;;  %vm6570_vm15 = vmor %vm6568_vm12, %vm6569_vm13  ;;  %v15528_v33 = vpop.xlane.xlu1 %6225 }
 0xde8   :  { %v6876_v4 = vsel %vm15492_vm10, %v6875_v52, %v6871_v21  ;;  %v6887_v29 = vand.u32 2147483647, %v15471_v5  ;;  %v6575_v34 = vor.u32 1.1754944e-38, %v6574_v63  ;;  %vm6883_vm1 = vweird.f32 %v15471_v5 }
 0xde9   :  { %v15518_v56 = vmul.f32 %v6876_v4, %v6351_v44  ;;  %v6567_v42 = vadd.f32 %v9738_v59, %v6566_v8  ;;  %v6880_v24 = vsub.f32 1.0, %v6879_v9  ;;  %v6889_v38 = vand.u32 2147483648, %v15471_v5 }
 0xdea   :  { %9743 = vrcp.f32 %v15516_v0  ;;  %vm6884_vm2 = vweird.f32 %v9740_v45  ;;  %v6373_v17 = vmul.f32 %v15477_v18, %v15477_v18  ;;  %v6332_v23 = vmul.f32 %v6292_v20, %v15453_v49 }
 0xdeb   :  { %v6571_v25 = vsel %vm6570_vm15, %v9738_v59, %v6567_v42  ;;  %v6881_v35 = vmul.f32 %v9740_v45, %v6880_v24  ;;  %v6313_v47 = vand.u32 2147483647, %v15487_v6  ;;  %v6394_v57 = vmul.f32 %v6266_v13, %v6266_v13  ;;  %vm6885_vm3 = vmor %vm6883_vm1, %vm6884_vm2 }
 0xdec   :  { %v9742_v44 = vpop.eup %9741  ;;  %v6576_v10 = vsel %vm15511_vm14, %v6575_v34, %v6571_v25  ;;  %vm6888_vm4 = vcmp.eq.f32.partialorder %v6887_v29, 8.507059e+37  ;;  %v6890_v37 = vor.u32 1.1754944e-38, %v6889_v38  ;;  %v6293_v59 = vand.u32 2147483647, %v15477_v18 }
 0xded   :  { %v15534_v51 = vmul.f32 %v6576_v10, %v6331_v27  ;;  %v6882_v30 = vadd.f32 %v9740_v45, %v6881_v35  ;;  %v6579_v39 = vmul.f32 %v9742_v44, %v15498_v41  ;;  %v15540_v31 = vadd.f32 1.0, %v6373_v17 }
 0xdee   :  { %v15542_v48 = vadd.f32 1.0, %v6394_v57  ;;  %v6587_v7 = vand.u32 2147483647, %v15498_v41  ;;  %v6589_v11 = vand.u32 2147483648, %v15498_v41  ;;  %v6902_v40 = vand.u32 2147483647, %v15516_v0  ;;  %v15556_v21 = vpop.xlane.xlu2 %6227 }
 0xdef   :  { %v6886_v49 = vsel %vm6885_vm3, %v9740_v45, %v6882_v30  ;;  %v6580_v54 = vsub.f32 1.0, %v6579_v39  ;;  %9745 = vrcp.f32 %v15540_v31  ;;  %v6374_v5 = vmul.f32 %v15528_v33, %v15528_v33  ;;  %v15567_v24 = vpop.xlane.xlu1 %6267 }
 0xdf0   :  { %v9744_v46 = vpop.eup %9743  ;;  %v6891_v27 = vsel %vm6888_vm4, %v6890_v37, %v6886_v49  ;;  %vm6584_vm5 = vweird.f32 %v9742_v44  ;;  %v6353_v58 = vmul.f32 %v6313_v47, %v15487_v6  ;;  %v6904_v45 = vand.u32 2147483648, %v15516_v0 }
 0xdf1   :  { %v15550_v1 = vmul.f32 %v6891_v27, %v6352_v50  ;;  %v6581_v52 = vmul.f32 %v9742_v44, %v6580_v54  ;;  %v6894_v3 = vmul.f32 %v9744_v46, %v15516_v0  ;;  %v6314_v63 = vand.u32 2147483647, %v6266_v13 }
 0xdf2   :  { %9747 = vrcp.f32 %v15542_v48  ;;  %vm6583_vm6 = vweird.f32 %v15498_v41  ;;  %vm6588_vm7 = vcmp.eq.f32.partialorder %v6587_v7, 8.507059e+37  ;;  %v6590_v50 = vor.u32 1.1754944e-38, %v6589_v11 }
 0xdf3   :  { %v6582_v8 = vadd.f32 %v9742_v44, %v6581_v52  ;;  %v6895_v9 = vsub.f32 1.0, %v6894_v3  ;;  %vm6585_vm8 = vmor %vm6583_vm6, %vm6584_vm5  ;;  %vm6898_vm9 = vweird.f32 %v15516_v0  ;;  %v6333_v4 = vmul.f32 %v6293_v59, %v15477_v18 }
 0xdf4   :  { %v15561_v2 = vadd.f32 1.0, %v6374_v5  ;;  %vm6899_vm10 = vweird.f32 %v9744_v46  ;;  %vm15563_vm11 = vcmp.eq.f32.partialorder %v6902_v40, 8.507059e+37  ;;  %v6905_v34 = vor.u32 1.1754944e-38, %v6904_v45 }
 0xdf5   :  { %v6586_v6 = vsel %vm6585_vm8, %v9742_v44, %v6582_v8  ;;  %v6896_v20 = vmul.f32 %v9744_v46, %v6895_v9  ;;  %v9746_v41 = vpop.eup %9745  ;;  %v6354_v38 = vmul.f32 %v6314_v63, %v6266_v13  ;;  %v6294_v17 = vand.u32 2147483647, %v15528_v33  ;;  %vm6900_vm12 = vmor %vm6898_vm9, %vm6899_vm10 }
 0xdf6   :  { %v6591_v29 = vsel %vm6588_vm7, %v6590_v50, %v6586_v6  ;;  %9749 = vrcp.f32 %v15561_v2  ;;  %v6594_v35 = vmul.f32 %v9746_v41, %v15540_v31  ;;  %v6602_v10 = vand.u32 2147483647, %v15540_v31  ;;  %v15599_v5 = vpop.xlane.xlu2 %6269  ;;  %v15601_v52 = vpop.xlane.xlu0 %6229 }
 0xdf7   :  { %v15570_v25 = vmul.f32 %v6591_v29, %v6332_v23  ;;  %v6897_v18 = vadd.f32 %v9744_v46, %v6896_v20  ;;  %v6604_v47 = vand.u32 2147483648, %v15540_v31  ;;  %v6315_v57 = vand.u32 2147483647, %v15567_v24 }
 0xdf8   :  { %v9748_v44 = vpop.eup %9747  ;;  %v6395_v13 = vmul.f32 %v15567_v24, %v15567_v24  ;;  %v6595_v30 = vsub.f32 1.0, %v6594_v35  ;;  %v6917_v37 = vand.u32 2147483647, %v15542_v48  ;;  %vm6599_vm13 = vweird.f32 %v9746_v41 }
 0xdf9   :  { %v6901_v23 = vsel %vm6900_vm12, %v9744_v46, %v6897_v18  ;;  %v6909_v39 = vmul.f32 %v9748_v44, %v15542_v48  ;;  %v6919_v0 = vand.u32 2147483648, %v15542_v48  ;;  %v6375_v46 = vmul.f32 %v15556_v21, %v15556_v21 }
 0xdfa   :  { %v6906_v59 = vsel %vm15563_vm11, %v6905_v34, %v6901_v23  ;;  %v15586_v49 = vadd.f32 1.0, %v6395_v13  ;;  %v6596_v7 = vmul.f32 %v9746_v41, %v6595_v30  ;;  %vm6598_vm14 = vweird.f32 %v15540_v31 }
 0xdfb   :  { %v15588_v54 = vmul.f32 %v6906_v59, %v6353_v58  ;;  %v6910_v11 = vsub.f32 1.0, %v6909_v39  ;;  %vm15593_vm15 = vcmp.eq.f32.partialorder %v6602_v10, 8.507059e+37  ;;  %vm6913_vm1 = vweird.f32 %v15542_v48  ;;  %vm6600_vm4 = vmor %vm6598_vm14, %vm6599_vm13 }
 0xdfc   :  { %v9750_v27 = vpop.eup %9749  ;;  %9751 = vrcp.f32 %v15586_v49  ;;  %v6597_v3 = vadd.f32 %v9746_v41, %v6596_v7  ;;  %vm6914_vm2 = vweird.f32 %v9748_v44  ;;  %v6605_v31 = vor.u32 1.1754944e-38, %v6604_v47 }
 0xdfd   :  { %v6911_v58 = vmul.f32 %v9748_v44, %v6910_v11  ;;  %v6609_v45 = vmul.f32 %v9750_v27, %v15561_v2  ;;  %vm15605_vm3 = vcmp.eq.f32.partialorder %v6917_v37, 8.507059e+37  ;;  %v6920_v8 = vor.u32 1.1754944e-38, %v6919_v0  ;;  %vm6915_vm5 = vmor %vm6913_vm1, %vm6914_vm2 }
 0xdfe   :  { %v15609_v9 = vadd.f32 1.0, %v6375_v46  ;;  %v6601_v50 = vsel %vm6600_vm4, %v9746_v41, %v6597_v3  ;;  %v6396_v42 = vmul.f32 %v15599_v5, %v15599_v5  ;;  %v6617_v34 = vand.u32 2147483647, %v15561_v2 }
 0xdff   :  { %v6912_v6 = vadd.f32 %v9748_v44, %v6911_v58  ;;  %v6610_v20 = vsub.f32 1.0, %v6609_v45  ;;  %v6606_v29 = vsel %vm15593_vm15, %v6605_v31, %v6601_v50  ;;  %v6619_v18 = vand.u32 2147483648, %v15561_v2 }
 0xe00   :  { %9753 = vrcp.f32 %v15609_v9  ;;  %v15620_v35 = vmul.f32 %v6606_v29, %v6333_v4  ;;  %vm6614_vm6 = vweird.f32 %v9750_v27  ;;  %v6295_v23 = vand.u32 2147483647, %v15556_v21  ;;  %v15631_v4 = vpop.xlane.xlu1 %6231 }
 0xe01   :  { %v6916_v41 = vsel %vm6915_vm5, %v9748_v44, %v6912_v6  ;;  %v6611_v10 = vmul.f32 %v9750_v27, %v6610_v20  ;;  %v15625_v30 = vadd.f32 1.0, %v6396_v42  ;;  %vm6613_vm7 = vweird.f32 %v15561_v2 }
 0xe02   :  { %v9752_v47 = vpop.eup %9751  ;;  %v6921_v13 = vsel %vm15605_vm3, %v6920_v8, %v6916_v41  ;;  %v6334_v44 = vmul.f32 %v6294_v17, %v15528_v33  ;;  %vm6615_vm8 = vmor %vm6613_vm7, %vm6614_vm6  ;;  %v6620_v59 = vor.u32 1.1754944e-38, %v6619_v18  ;;  %v6932_v0 = vand.u32 2147483647, %v15586_v49  ;;  %v15641_v17 = vpop.xlane.xlu0 %6271 }
 0xe03   :  { %v15627_v48 = vmul.f32 %v6921_v13, %v6354_v38  ;;  %v6612_v39 = vadd.f32 %v9750_v27, %v6611_v10  ;;  %v6924_v37 = vmul.f32 %v9752_v47, %v15586_v49  ;;  %9755 = vrcp.f32 %v15625_v30 }
 0xe04   :  { %vm6618_vm9 = vcmp.eq.f32.partialorder %v6617_v34, 8.507059e+37  ;;  %v6355_v38 = vmul.f32 %v6315_v57, %v15567_v24  ;;  %v6934_v2 = vand.u32 2147483648, %v15586_v49  ;;  %v6335_v3 = vmul.f32 %v6295_v23, %v15556_v21 }
 0xe05   :  { %v6616_v7 = vsel %vm6615_vm8, %v9750_v27, %v6612_v39  ;;  %v6925_v11 = vsub.f32 1.0, %v6924_v37  ;;  %v6376_v33 = vmul.f32 %v15601_v52, %v15601_v52  ;;  %vm6929_vm10 = vweird.f32 %v9752_v47 }
 0xe06   :  { %v9754_v46 = vpop.eup %9753  ;;  %v6621_v40 = vsel %vm6618_vm9, %v6620_v59, %v6616_v7  ;;  %vm6928_vm11 = vweird.f32 %v15586_v49  ;;  %vm15647_vm12 = vcmp.eq.f32.partialorder %v6932_v0, 8.507059e+37  ;;  %v6632_v57 = vand.u32 2147483647, %v15609_v9 }
 0xe07   :  { %v15643_v58 = vmul.f32 %v6621_v40, %v6334_v44  ;;  %v6926_v45 = vmul.f32 %v9752_v47, %v6925_v11  ;;  %v6624_v27 = vmul.f32 %v9754_v46, %v15609_v9  ;;  %v15652_v21 = vadd.f32 1.0, %v6376_v33  ;;  %vm6930_vm13 = vmor %vm6928_vm11, %vm6929_vm10 }
 0xe08   :  { %v6316_v8 = vand.u32 2147483647, %v15599_v5  ;;  %v6397_v50 = vmul.f32 %v15641_v17, %v15641_v17  ;;  %v6935_v20 = vor.u32 1.1754944e-38, %v6934_v2  ;;  %vm6628_vm14 = vweird.f32 %v15609_v9  ;;  %v15673_v44 = vpop.xlane.xlu1 %6273 }
 0xe09   :  { %v6927_v31 = vadd.f32 %v9752_v47, %v6926_v45  ;;  %v6625_v63 = vsub.f32 1.0, %v6624_v27  ;;  %v9756_v6 = vpop.eup %9755  ;;  %v6634_v49 = vand.u32 2147483648, %v15609_v9  ;;  %9757 = vrcp.f32 %v15652_v21 }
 0xe0a   :  { %vm6629_vm15 = vweird.f32 %v9754_v46  ;;  %v6939_v34 = vmul.f32 %v9756_v6, %v15625_v30  ;;  %vm15663_vm1 = vcmp.eq.f32.partialorder %v6632_v57, 8.507059e+37  ;;  %v6947_v10 = vand.u32 2147483647, %v15625_v30 }
 0xe0b   :  { %v6931_v42 = vsel %vm6930_vm13, %v9752_v47, %v6927_v31  ;;  %v6626_v29 = vmul.f32 %v9754_v46, %v6625_v63  ;;  %v15668_v13 = vadd.f32 1.0, %v6397_v50  ;;  %v6356_v47 = vmul.f32 %v6316_v8, %v15599_v5  ;;  %vm6630_vm2 = vmor %vm6628_vm14, %vm6629_vm15  ;;  %v15682_v5 = vpop.xlane.xlu2 %6233 }
 0xe0c   :  { %v6936_v18 = vsel %vm15647_vm12, %v6935_v20, %v6931_v42  ;;  %v6940_v37 = vsub.f32 1.0, %v6939_v34  ;;  %v6635_v59 = vor.u32 1.1754944e-38, %v6634_v49  ;;  %v6949_v0 = vand.u32 2147483648, %v15625_v30 }
 0xe0d   :  { %v15670_v23 = vmul.f32 %v6936_v18, %v6355_v38  ;;  %v6627_v39 = vadd.f32 %v9754_v46, %v6626_v29  ;;  %v6296_v7 = vand.u32 2147483647, %v15601_v52  ;;  %9759 = vrcp.f32 %v15668_v13 }
 0xe0e   :  { %v6941_v40 = vmul.f32 %v9756_v6, %v6940_v37  ;;  %vm6944_vm4 = vweird.f32 %v9756_v6  ;;  %v6377_v38 = vmul.f32 %v15631_v4, %v15631_v4  ;;  %vm6943_vm3 = vweird.f32 %v15625_v30 }
 0xe0f   :  { %v6631_v11 = vsel %vm6630_vm2, %v9754_v46, %v6627_v39  ;;  %v9758_v2 = vpop.eup %9757  ;;  %vm15687_vm5 = vcmp.eq.f32.partialorder %v6947_v10, 8.507059e+37  ;;  %v6398_v46 = vmul.f32 %v15673_v44, %v15673_v44  ;;  %v6317_v57 = vand.u32 2147483647, %v15641_v17  ;;  %vm6945_vm6 = vmor %vm6943_vm3, %vm6944_vm4 }
 0xe10   :  { %v6636_v9 = vsel %vm15663_vm1, %v6635_v59, %v6631_v11  ;;  %v6942_v27 = vadd.f32 %v9756_v6, %v6941_v40  ;;  %v6639_v24 = vmul.f32 %v9758_v2, %v15652_v21  ;;  %v6950_v31 = vor.u32 1.1754944e-38, %v6949_v0 }
 0xe11   :  { %v15693_v45 = vmul.f32 %v6636_v9, %v6335_v3  ;;  %v6336_v63 = vmul.f32 %v6296_v7, %v15601_v52  ;;  %v15698_v8 = vadd.f32 1.0, %v6377_v38  ;;  %v15700_v30 = vadd.f32 1.0, %v6398_v46 }
 0xe12   :  { %v6946_v50 = vsel %vm6945_vm6, %v9756_v6, %v6942_v27  ;;  %v6640_v20 = vsub.f32 1.0, %v6639_v24  ;;  %v6647_v49 = vand.u32 2147483647, %v15652_v21  ;;  %v6297_v3 = vand.u32 2147483647, %v15631_v4 }
 0xe13   :  { %v9760_v42 = vpop.eup %9759  ;;  %v6951_v29 = vsel %vm15687_vm5, %v6950_v31, %v6946_v50  ;;  %v6649_v34 = vand.u32 2147483648, %v15652_v21  ;;  %9761 = vrcp.f32 %v15698_v8  ;;  %v6378_v52 = vmul.f32 %v15682_v5, %v15682_v5  ;;  %v15723_v9 = vpop.xlane.xlu2 %6275 }
 0xe14   :  { %v15710_v18 = vmul.f32 %v6951_v29, %v6356_v47  ;;  %v6641_v41 = vmul.f32 %v9758_v2, %v6640_v20  ;;  %vm6644_vm7 = vweird.f32 %v9758_v2  ;;  %v6954_v6 = vmul.f32 %v9760_v42, %v15668_v13 }
 0xe15   :  { %v6357_v10 = vmul.f32 %v6317_v57, %v15641_v17  ;;  %v6962_v39 = vand.u32 2147483647, %v15668_v13  ;;  %v6964_v37 = vand.u32 2147483648, %v15668_v13  ;;  %9763 = vrcp.f32 %v15700_v30 }
 0xe16   :  { %v6642_v59 = vadd.f32 %v9758_v2, %v6641_v41  ;;  %vm6643_vm8 = vweird.f32 %v15652_v21  ;;  %v6955_v0 = vsub.f32 1.0, %v6954_v6  ;;  %v6318_v7 = vand.u32 2147483647, %v15673_v44 }
 0xe17   :  { %vm6645_vm9 = vmor %vm6643_vm8, %vm6644_vm7  ;;  %vm6648_vm10 = vcmp.eq.f32.partialorder %v6647_v49, 8.507059e+37  ;;  %v6650_v47 = vor.u32 1.1754944e-38, %v6649_v34  ;;  %v6337_v11 = vmul.f32 %v6297_v3, %v15631_v4  ;;  %v15720_v40 = vadd.f32 1.0, %v6378_v52  ;;  %v15739_v3 = vpop.xlane.xlu0 %6235 }
 0xe18   :  { %v6646_v17 = vsel %vm6645_vm9, %v9758_v2, %v6642_v59  ;;  %v6956_v38 = vmul.f32 %v9760_v42, %v6955_v0  ;;  %vm6958_vm11 = vweird.f32 %v15668_v13  ;;  %vm6959_vm12 = vweird.f32 %v9760_v42 }
 0xe19   :  { %v9762_v33 = vpop.eup %9761  ;;  %v6651_v46 = vsel %vm6648_vm10, %v6650_v47, %v6646_v17  ;;  %vm15725_vm13 = vcmp.eq.f32.partialorder %v6962_v39, 8.507059e+37  ;;  %v6965_v27 = vor.u32 1.1754944e-38, %v6964_v37  ;;  %9765 = vrcp.f32 %v15720_v40  ;;  %vm6960_vm14 = vmor %vm6958_vm11, %vm6959_vm12 }
 0xe1a   :  { %v15730_v24 = vmul.f32 %v6651_v46, %v6336_v63  ;;  %v6957_v4 = vadd.f32 %v9760_v42, %v6956_v38  ;;  %v6654_v2 = vmul.f32 %v9762_v33, %v15698_v8  ;;  %v6358_v57 = vmul.f32 %v6318_v7, %v15673_v44  ;;  %v15743_v44 = vpop.xlane.xlu1 %6237 }
 0xe1b   :  { %v9764_v13 = vpop.eup %9763  ;;  %v6662_v31 = vand.u32 2147483647, %v15698_v8  ;;  %v6664_v50 = vand.u32 2147483648, %v15698_v8  ;;  %v6298_v20 = vand.u32 2147483647, %v15682_v5  ;;  %v6399_v49 = vmul.f32 %v15723_v9, %v15723_v9 }
 0xe1c   :  { %v6961_v63 = vsel %vm6960_vm14, %v9760_v42, %v6957_v4  ;;  %v6655_v29 = vsub.f32 1.0, %v6654_v2  ;;  %v6969_v34 = vmul.f32 %v9764_v13, %v15700_v30  ;;  %v6977_v52 = vand.u32 2147483647, %v15700_v30 }
 0xe1d   :  { %v6966_v41 = vsel %vm15725_vm13, %v6965_v27, %v6961_v63  ;;  %vm6659_vm15 = vweird.f32 %v9762_v33  ;;  %v6979_v6 = vand.u32 2147483648, %v15700_v30  ;;  %v15748_v39 = vadd.f32 1.0, %v6399_v49 }
 0xe1e   :  { %v15750_v37 = vmul.f32 %v6966_v41, %v6357_v10  ;;  %v6656_v59 = vmul.f32 %v9762_v33, %v6655_v29  ;;  %v6970_v0 = vsub.f32 1.0, %v6969_v34  ;;  %v6379_v42 = vmul.f32 %v15739_v3, %v15739_v3 }
 0xe1f   :  { %v9766_v7 = vpop.eup %9765  ;;  %vm6658_vm1 = vweird.f32 %v15698_v8  ;;  %vm15755_vm2 = vcmp.eq.f32.partialorder %v6662_v31, 8.507059e+37  ;;  %vm6973_vm4 = vweird.f32 %v15700_v30  ;;  %9767 = vrcp.f32 %v15748_v39 }
 0xe20   :  { %v6657_v17 = vadd.f32 %v9762_v33, %v6656_v59  ;;  %v6971_v38 = vmul.f32 %v9764_v13, %v6970_v0  ;;  %vm6974_vm3 = vweird.f32 %v9764_v13  ;;  %v6669_v10 = vmul.f32 %v9766_v7, %v15720_v40  ;;  %vm6660_vm5 = vmor %vm6658_vm1, %vm6659_vm15 }
 0xe21   :  { %v6665_v46 = vor.u32 1.1754944e-38, %v6664_v50  ;;  %vm15763_vm6 = vcmp.eq.f32.partialorder %v6977_v52, 8.507059e+37  ;;  %v6980_v8 = vor.u32 1.1754944e-38, %v6979_v6  ;;  %v15767_v27 = vadd.f32 1.0, %v6379_v42  ;;  %vm6975_vm7 = vmor %vm6973_vm4, %vm6974_vm3 }
 0xe22   :  { %v6661_v4 = vsel %vm6660_vm5, %v9762_v33, %v6657_v17  ;;  %v6972_v2 = vadd.f32 %v9764_v13, %v6971_v38  ;;  %v6670_v31 = vsub.f32 1.0, %v6669_v10  ;;  %v6380_v49 = vmul.f32 %v15743_v44, %v15743_v44 }
 0xe23   :  { %v6666_v63 = vsel %vm15755_vm2, %v6665_v46, %v6661_v4  ;;  %v6677_v50 = vand.u32 2147483647, %v15720_v40  ;;  %v6679_v29 = vand.u32 2147483648, %v15720_v40  ;;  %9769 = vrcp.f32 %v15767_v27  ;;  %v15784_v0 = vpop.xlane.xlu2 %6239 }
 0xe24   :  { %v15778_v34 = vmul.f32 %v6666_v63, %v6337_v11  ;;  %v6976_v33 = vsel %vm6975_vm7, %v9764_v13, %v6972_v2  ;;  %v6671_v52 = vmul.f32 %v9766_v7, %v6670_v31  ;;  %vm6674_vm8 = vweird.f32 %v9766_v7  ;;  %v15790_v11 = vpop.xlane.xlu1 %6279 }
 0xe25   :  { %v9768_v41 = vpop.eup %9767  ;;  %v6981_v6 = vsel %vm15763_vm6, %v6980_v8, %v6976_v33  ;;  %v15782_v59 = vadd.f32 1.0, %v6380_v49  ;;  %vm6673_vm9 = vweird.f32 %v15720_v40  ;;  %v6680_v13 = vor.u32 1.1754944e-38, %v6679_v29 }
 0xe26   :  { %v15786_v30 = vmul.f32 %v6981_v6, %v6358_v57  ;;  %v6672_v42 = vadd.f32 %v9766_v7, %v6671_v52  ;;  %v6984_v47 = vmul.f32 %v9768_v41, %v15748_v39  ;;  %vm6675_vm10 = vmor %vm6673_vm9, %vm6674_vm8  ;;  %v6319_v17 = vand.u32 2147483647, %v15723_v9  ;;  %v15803_v29 = vpop.xlane.xlu0 %6241 }
 0xe27   :  { %v6299_v38 = vand.u32 2147483647, %v15739_v3  ;;  %9771 = vrcp.f32 %v15782_v59  ;;  %v6338_v10 = vmul.f32 %v6298_v20, %v15682_v5  ;;  %vm6678_vm11 = vcmp.eq.f32.partialorder %v6677_v50, 8.507059e+37 }
 0xe28   :  { %v6676_v46 = vsel %vm6675_vm10, %v9766_v7, %v6672_v42  ;;  %v6985_v57 = vsub.f32 1.0, %v6984_v47  ;;  %v6992_v40 = vand.u32 2147483647, %v15748_v39  ;;  %v6994_v4 = vand.u32 2147483648, %v15748_v39 }
 0xe29   :  { %v9770_v21 = vpop.eup %9769  ;;  %v6681_v8 = vsel %vm6678_vm11, %v6680_v13, %v6676_v46  ;;  %v6401_v2 = vmul.f32 %v15790_v11, %v15790_v11  ;;  %vm6989_vm12 = vweird.f32 %v9768_v41  ;;  %v6359_v5 = vmul.f32 %v6319_v17, %v15723_v9 }
 0xe2a   :  { %v15800_v31 = vmul.f32 %v6681_v8, %v6338_v10  ;;  %v6986_v49 = vmul.f32 %v9768_v41, %v6985_v57  ;;  %v6684_v63 = vmul.f32 %v9770_v21, %v15767_v27  ;;  %vm6988_vm13 = vweird.f32 %v15748_v39 }
 0xe2b   :  { %v6339_v20 = vmul.f32 %v6299_v38, %v15739_v3  ;;  %v15808_v7 = vadd.f32 1.0, %v6401_v2  ;;  %v6692_v52 = vand.u32 2147483647, %v15767_v27  ;;  %v6381_v6 = vmul.f32 %v15784_v0, %v15784_v0  ;;  %vm6990_vm14 = vmor %vm6988_vm13, %vm6989_vm12  ;;  %v15820_v46 = vpop.xlane.xlu2 %6281 }
 0xe2c   :  { %v6987_v50 = vadd.f32 %v9768_v41, %v6986_v49  ;;  %v6685_v33 = vsub.f32 1.0, %v6684_v63  ;;  %vm6993_vm15 = vcmp.eq.f32.partialorder %v6992_v40, 8.507059e+37  ;;  %v6995_v47 = vor.u32 1.1754944e-38, %v6994_v4 }
 0xe2d   :  { %v9772_v42 = vpop.eup %9771  ;;  %v6694_v13 = vand.u32 2147483648, %v15767_v27  ;;  %9773 = vrcp.f32 %v15808_v7  ;;  %vm6689_vm1 = vweird.f32 %v9770_v21  ;;  %vm6688_vm2 = vweird.f32 %v15767_v27 }
 0xe2e   :  { %v6991_v9 = vsel %vm6990_vm14, %v9768_v41, %v6987_v50  ;;  %v6686_v39 = vmul.f32 %v9770_v21, %v6685_v33  ;;  %v6699_v3 = vmul.f32 %v9772_v42, %v15782_v59  ;;  %v6300_v38 = vand.u32 2147483647, %v15743_v44  ;;  %vm6690_vm3 = vmor %vm6688_vm2, %vm6689_vm1 }
 0xe2f   :  { %v6996_v17 = vsel %vm6993_vm15, %v6995_v47, %v6991_v9  ;;  %v15818_v10 = vadd.f32 1.0, %v6381_v6  ;;  %vm6693_vm4 = vcmp.eq.f32.partialorder %v6692_v52, 8.507059e+37  ;;  %v6695_v41 = vor.u32 1.1754944e-38, %v6694_v13 }
 0xe30   :  { %v15822_v57 = vmul.f32 %v6996_v17, %v6359_v5  ;;  %v6687_v8 = vadd.f32 %v9770_v21, %v6686_v39  ;;  %v6700_v40 = vsub.f32 1.0, %v6699_v3  ;;  %v6707_v4 = vand.u32 2147483647, %v15782_v59 }
 0xe31   :  { %v6709_v2 = vand.u32 2147483648, %v15782_v59  ;;  %9775 = vrcp.f32 %v15818_v10  ;;  %vm6704_vm5 = vweird.f32 %v9772_v42  ;;  %v6402_v63 = vmul.f32 %v15820_v46, %v15820_v46 }
 0xe32   :  { %v6691_v27 = vsel %vm6690_vm3, %v9770_v21, %v6687_v8  ;;  %v6701_v49 = vmul.f32 %v9772_v42, %v6700_v40  ;;  %v6340_v33 = vmul.f32 %v6300_v38, %v15743_v44  ;;  %v6382_v52 = vmul.f32 %v15803_v29, %v15803_v29  ;;  %v15836_v21 = vpop.xlane.xlu0 %6277 }
 0xe33   :  { %v9774_v50 = vpop.eup %9773  ;;  %v6696_v5 = vsel %vm6693_vm4, %v6695_v41, %v6691_v27  ;;  %vm6703_vm6 = vweird.f32 %v15782_v59  ;;  %v6710_v9 = vor.u32 1.1754944e-38, %v6709_v2  ;;  %v6321_v39 = vand.u32 2147483647, %v15790_v11 }
 0xe34   :  { %v15832_v6 = vmul.f32 %v6696_v5, %v6339_v20  ;;  %v6702_v47 = vadd.f32 %v9772_v42, %v6701_v49  ;;  %v7014_v13 = vmul.f32 %v9774_v50, %v15808_v7  ;;  %vm6705_vm7 = vmor %vm6703_vm6, %vm6704_vm5  ;;  %v15839_v3 = vadd.f32 1.0, %v6402_v63 }
 0xe35   :  { %v15841_v17 = vadd.f32 1.0, %v6382_v52  ;;  %vm6708_vm8 = vcmp.eq.f32.partialorder %v6707_v4, 8.507059e+37  ;;  %v7022_v20 = vand.u32 2147483647, %v15808_v7  ;;  %v7024_v59 = vand.u32 2147483648, %v15808_v7 }
 0xe36   :  { %v6706_v44 = vsel %vm6705_vm7, %v9772_v42, %v6702_v47  ;;  %v7015_v38 = vsub.f32 1.0, %v7014_v13  ;;  %9777 = vrcp.f32 %v15839_v3  ;;  %v6400_v41 = vmul.f32 %v15836_v21, %v15836_v21 }
 0xe37   :  { %v9776_v8 = vpop.eup %9775  ;;  %v6711_v40 = vsel %vm6708_vm8, %v6710_v9, %v6706_v44  ;;  %vm7019_vm9 = vweird.f32 %v9774_v50  ;;  %v6301_v42 = vand.u32 2147483647, %v15784_v0  ;;  %9779 = vrcp.f32 %v15841_v17 }
 0xe38   :  { %v15848_v2 = vmul.f32 %v6711_v40, %v6340_v33  ;;  %v7016_v27 = vmul.f32 %v9774_v50, %v7015_v38  ;;  %v6714_v49 = vmul.f32 %v9776_v8, %v15818_v10  ;;  %v6361_v4 = vmul.f32 %v6321_v39, %v15790_v11 }
 0xe39   :  { %vm7018_vm10 = vweird.f32 %v15808_v7  ;;  %vm7023_vm12 = vcmp.eq.f32.partialorder %v7022_v20, 8.507059e+37  ;;  %v7025_v52 = vor.u32 1.1754944e-38, %v7024_v59  ;;  %v6724_v33 = vand.u32 2147483648, %v15818_v10 }
 0xe3a   :  { %v7017_v63 = vadd.f32 %v9774_v50, %v7016_v27  ;;  %v6715_v5 = vsub.f32 1.0, %v6714_v49  ;;  %vm7020_vm11 = vmor %vm7018_vm10, %vm7019_vm9  ;;  %v15856_v47 = vadd.f32 1.0, %v6400_v41  ;;  %vm6719_vm13 = vweird.f32 %v9776_v8 }
 0xe3b   :  { %v6722_v44 = vand.u32 2147483647, %v15818_v10  ;;  %vm6718_vm14 = vweird.f32 %v15818_v10  ;;  %v6341_v59 = vmul.f32 %v6301_v42, %v15784_v0  ;;  %v6322_v41 = vand.u32 2147483647, %v15820_v46 }
 0xe3c   :  { %v7021_v13 = vsel %vm7020_vm11, %v9774_v50, %v7017_v63  ;;  %v6716_v9 = vmul.f32 %v9776_v8, %v6715_v5  ;;  %v9778_v38 = vpop.eup %9777  ;;  %9781 = vrcp.f32 %v15856_v47  ;;  %vm6720_vm15 = vmor %vm6718_vm14, %vm6719_vm13  ;;  %v6725_v50 = vor.u32 1.1754944e-38, %v6724_v33 }
 0xe3d   :  { %v7026_v40 = vsel %vm7023_vm12, %v7025_v52, %v7021_v13  ;;  %v7029_v39 = vmul.f32 %v9778_v38, %v15839_v3  ;;  %v9780_v20 = vpop.eup %9779  ;;  %v6302_v27 = vand.u32 2147483647, %v15803_v29  ;;  %vm6723_vm1 = vcmp.eq.f32.partialorder %v6722_v44, 8.507059e+37 }
 0xe3e   :  { %v15860_v11 = vmul.f32 %v7026_v40, %v6361_v4  ;;  %v6717_v7 = vadd.f32 %v9776_v8, %v6716_v9  ;;  %v6729_v4 = vmul.f32 %v9780_v20, %v15841_v17  ;;  %v7037_v52 = vand.u32 2147483647, %v15839_v3 }
 0xe3f   :  { %v7030_v63 = vsub.f32 1.0, %v7029_v39  ;;  %v7039_v10 = vand.u32 2147483648, %v15839_v3  ;;  %v6737_v13 = vand.u32 2147483647, %v15841_v17  ;;  %vm7034_vm2 = vweird.f32 %v9778_v38 }
 0xe40   :  { %v6721_v49 = vsel %vm6720_vm15, %v9776_v8, %v6717_v7  ;;  %v6730_v42 = vsub.f32 1.0, %v6729_v4  ;;  %v6362_v40 = vmul.f32 %v6322_v41, %v15820_v46  ;;  %vm7033_vm4 = vweird.f32 %v15839_v3 }
 0xe41   :  { %v6726_v5 = vsel %vm6723_vm1, %v6725_v50, %v6721_v49  ;;  %v7031_v0 = vmul.f32 %v9778_v38, %v7030_v63  ;;  %v6342_v8 = vmul.f32 %v6302_v27, %v15803_v29  ;;  %v6739_v44 = vand.u32 2147483648, %v15841_v17  ;;  %vm7035_vm5 = vmor %vm7033_vm4, %vm7034_vm2 }
 0xe42   :  { %v15871_v9 = vmul.f32 %v6726_v5, %v6341_v59  ;;  %v9782_v33 = vpop.eup %9781  ;;  %v6731_v39 = vmul.f32 %v9780_v20, %v6730_v42  ;;  %vm6734_vm3 = vweird.f32 %v9780_v20  ;;  %vm7038_vm6 = vcmp.eq.f32.partialorder %v7037_v52, 8.507059e+37 }
 0xe43   :  { %v7032_v7 = vadd.f32 %v9778_v38, %v7031_v0  ;;  %v6999_v50 = vmul.f32 %v9782_v33, %v15856_v47  ;;  %v7040_v59 = vor.u32 1.1754944e-38, %v7039_v10  ;;  %vm6733_vm7 = vweird.f32 %v15841_v17 }
 0xe44   :  { %v6320_v49 = vand.u32 2147483647, %v15836_v21  ;;  %v6732_v46 = vadd.f32 %v9780_v20, %v6731_v39  ;;  %vm6738_vm8 = vcmp.eq.f32.partialorder %v6737_v13, 8.507059e+37  ;;  %vm6735_vm9 = vmor %vm6733_vm7, %vm6734_vm3  ;;  %v6740_v29 = vor.u32 1.1754944e-38, %v6739_v44 }
 0xe45   :  { %v7036_v63 = vsel %vm7035_vm5, %v9778_v38, %v7032_v7  ;;  %v7000_v3 = vsub.f32 1.0, %v6999_v50  ;;  %v7007_v27 = vand.u32 2147483647, %v15856_v47  ;;  %v7009_v4 = vand.u32 2147483648, %v15856_v47 }
 0xe46   :  { %v7041_v41 = vsel %vm7038_vm6, %v7040_v59, %v7036_v63  ;;  %v6736_v0 = vsel %vm6735_vm9, %v9780_v20, %v6732_v46  ;;  %vm7004_vm10 = vweird.f32 %v9782_v33  ;;  %vm7003_vm11 = vweird.f32 %v15856_v47 }
 0xe47   :  { %v15882_v5 = vmul.f32 %v7041_v41, %v6362_v40  ;;  %v7001_v52 = vmul.f32 %v9782_v33, %v7000_v3  ;;  %v6741_v10 = vsel %vm6738_vm8, %v6740_v29, %v6736_v0  ;;  %vm7005_vm12 = vmor %vm7003_vm11, %vm7004_vm10  ;;  %v7010_v38 = vor.u32 1.1754944e-38, %v7009_v4 }
 0xe48   :  { %v15884_v17 = vmul.f32 %v6741_v10, %v6342_v8  ;;  %v6360_v13 = vmul.f32 %v6320_v49, %v15836_v21  ;;  %vm7008_vm13 = vcmp.eq.f32.partialorder %v7007_v27, 8.507059e+37 }
 0xe49   :  { %v7002_v42 = vadd.f32 %v9782_v33, %v7001_v52 }
 0xe4b   :  { %v7006_v44 = vsel %vm7005_vm12, %v9782_v33, %v7002_v42 }
 0xe4c   :  { %v7011_v7 = vsel %vm7008_vm13, %v7010_v38, %v7006_v44 }
 0xe4d   :  { %v15888_v39 = vmul.f32 %v7011_v7, %v6360_v13 }
 0xe4e   :  { %9858 = dma.done.wait [#allocation4 + $0x1], 5120 }
 0xe4f   :  { %9859 = vsyncadd [#allocation4 + $0x1], 4294962176  ;;  %v15892_v20 = vpack.c.bf16 %v15264_v36, %v15241_v60  ;;  %v15896_v40 = vpack.c.bf16 %v15339_v12, %v15313_v53  ;;  %v15900_v47 = vpack.c.bf16 %v15435_v16, %v15395_v14  ;;  %v15904_v21 = vpack.c.bf16 %v15489_v15, %v15455_v62  ;;  %v15969_v8 = vld [vmem:[#allocation3 + $0x8c] sm:$0xf0]  ;;  %v15971_v50 = vld [vmem:[#allocation3 + $0x60] sm:$0xf] }
 0xe50   :  { %v15908_v33 = vpack.c.bf16 %v15570_v25, %v15534_v51  ;;  %v15912_v60 = vpack.c.bf16 %v15643_v58, %v15620_v35  ;;  %v15916_v36 = vpack.c.bf16 %v15730_v24, %v15693_v45  ;;  %v15920_v53 = vpack.c.bf16 %v15800_v31, %v15778_v34  ;;  %v8758_v51 = vld [vmem:[#allocation3 + $0xe0] sm:$0xf]  ;;  %v9066_v45 = vld [vmem:[#allocation3 + $0xcc] sm:$0xf0]  ;;  %v9068_v27 = vld [vmem:[#allocation3 + $0xe4] sm:$0xf] }
 0xe51   :  { %v15924_v12 = vpack.c.bf16 %v15261_v28, %v15236_v43  ;;  %v15928_v14 = vpack.c.bf16 %v15328_v32, %v15293_v61  ;;  %v15932_v16 = vpack.c.bf16 %v15410_v55, %v15374_v22  ;;  %v15936_v62 = vpack.c.bf16 %v15473_v26, %v15447_v19  ;;  %v8742_v25 = vld [vmem:[#allocation3 + $0xc0] sm:$0xf]  ;;  %v9062_v24 = vld [vmem:[#allocation3 + $0xac] sm:$0xf0]  ;;  %v8760_v4 = vld [vmem:[#allocation3 + $0xf0] sm:$0xf0] }
 0xe52   :  { %v15940_v15 = vpack.c.bf16 %v15550_v1, %v15518_v56  ;;  %v15944_v43 = vpack.c.bf16 %v15627_v48, %v15588_v54  ;;  %v15948_v28 = vpack.c.bf16 %v15710_v18, %v15670_v23  ;;  %v15952_v61 = vpack.c.bf16 %v15786_v30, %v15750_v37  ;;  %v9070_v1 = vld [vmem:[#allocation3 + $0xec] sm:$0xf0]  ;;  %v8726_v18 = vld [vmem:[#allocation3 + $0xa0] sm:$0xf]  ;;  %v9064_v44 = vld [vmem:[#allocation3 + $0xc4] sm:$0xf] }
 0xe53   :  { %v7137_v32 = vunpack.c.l.b16 %v15892_v20  ;;  %v7138_v22 = vunpack.c.h.b16 %v15892_v20  ;;  %v7139_v55 = vunpack.c.l.b16 %v15896_v40  ;;  %v7140_v19 = vunpack.c.h.b16 %v15896_v40  ;;  %v15967_v31 = vld [vmem:[#allocation3 + $0x80] sm:$0xf]  ;;  %v15977_v29 = vld [vmem:[#allocation3 + $0x6c] sm:$0xf0]  ;;  %v8728_v63 = vld [vmem:[#allocation3 + $0xb0] sm:$0xf0] }
 0xe54   :  { %v7141_v26 = vunpack.c.l.b16 %v15900_v47  ;;  %v7142_v56 = vunpack.c.h.b16 %v15900_v47  ;;  %v7143_v54 = vunpack.c.l.b16 %v15904_v21  ;;  %v7144_v35 = vunpack.c.h.b16 %v15904_v21  ;;  %v15983_v38 = vld [vmem:[#allocation3 + $0x40] sm:$0xf]  ;;  %v15985_v13 = vld [vmem:[#allocation3 + $0x4c] sm:$0xf0]  ;;  %s7946_s2 = sshll.u32 %s16309_s11, 4  ;;  %s7947_s2 = int_to_ptr.hbm [resolvable:$true] %s7946_s2 }
 0xe55   :  { %v7145_v48 = vunpack.c.l.b16 %v15908_v33  ;;  %v7146_v58 = vunpack.c.h.b16 %v15908_v33  ;;  %v8759_v23 = vor.u32 %v9070_v1, %v8758_v51  ;;  %v7147_v37 = vunpack.c.l.b16 %v15912_v60  ;;  %v16000_v49 = vld [vmem:[#allocation3] sm:$0xf]  ;;  %v16004_v52 = vld [vmem:[#allocation3 + $0xc] sm:$0xf0] }
 0xe56   :  { %v7148_v34 = vunpack.c.h.b16 %v15912_v60  ;;  %v7149_v30 = vunpack.c.l.b16 %v15916_v36  ;;  %v7150_v59 = vunpack.c.h.b16 %v15916_v36  ;;  %v7157_v46 = vunpack.c.l.b16 %v15924_v12 }
 0xe57   :  { %7494 = vmatpush.bf16.msra.mxu2 %v8759_v23  ;;  %v8743_v3 = vor.u32 %v9066_v45, %v8742_v25  ;;  %v8727_v41 = vor.u32 %v9062_v24, %v8726_v18  ;;  %v8711_v10 = vor.u32 %v15969_v8, %v15967_v31  ;;  %v8763_v42 = vor.u32 %v9068_v27, %v8760_v4  ;;  %v8744_v25 = vld [vmem:[#allocation3 + $0xd0] sm:$0xf0]  ;;  %v15991_v23 = vld [vmem:[#allocation3 + $0x20] sm:$0xf]  ;;  %v15993_v45 = vld [vmem:[#allocation3 + $0x2c] sm:$0xf0] }
 0xe58   :  { %v8695_v1 = vor.u32 %v15977_v29, %v15971_v50  ;;  %v8747_v27 = vor.u32 %v9064_v44, %v8744_v25  ;;  %v9060_v4 = vld [vmem:[#allocation3 + $0xa4] sm:$0xf]  ;;  %v7177_v18 = vlaneseq  ;;  %vm7182_vm14 = vcmask 130112  }
 0xe59   :  { %7520 = vmatpush.bf16.msrb.mxu1 %v8763_v42  ;;  %v8731_v25 = vor.u32 %v9060_v4, %v8728_v63  ;;  %vm7186_vm15 = vcmask 195712   ;;  %vm7190_vm1 = vcmask 261312   ;;  %vm7194_vm2 = vcmask 326912  }
 0xe5a   :  { %v16016_v0 = vand.u32 127, %v7177_v18  ;;  %vm7198_vm4 = vcmask 392512   ;;  %vm7202_vm3 = vcmask 458112   ;;  %vm7206_vm5 = vcmask 523712  }
 0xe5b   :  { %7495 = vmatpush.bf16.msra.mxu2 %v8743_v3  ;;  %vm7210_vm6 = vcmask 589312   ;;  %vm7214_vm7 = vcmask 654912   ;;  %vm7218_vm8 = vcmask 720512   ;;  %vm7222_vm9 = vcmask 786112  }
 0xe5c   :  { %v7179_v63 = vperm.slane %v7137_v32, %v16016_v0  ;;  %v16022_v4 = vadd.s32 4294967288, %v16016_v0  ;;  %v16025_v3 = vadd.s32 4294967280, %v16016_v0  ;;  %v16028_v18 = vadd.s32 4294967272, %v16016_v0 }
 0xe5d   :  { %7521 = vmatpush.bf16.msrb.mxu1 %v8747_v27  ;;  %v7192_v27 = vadd.s32 4294967264, %v16016_v0  ;;  %v7196_v7 = vadd.s32 4294967256, %v16016_v0  ;;  %v7200_v51 = vadd.s32 4294967248, %v16016_v0  ;;  %v7204_v42 = vadd.s32 4294967240, %v16016_v0 }
 0xe5e   :  { %v7181_v32 = vperm.slane %v7138_v22, %v16022_v4  ;;  %v7189_v8 = vperm.slane %v7140_v19, %v16028_v18  ;;  %v7208_v24 = vadd.s32 4294967232, %v16016_v0  ;;  %v7216_v40 = vadd.s32 4294967216, %v16016_v0 }
 0xe5f   :  { %7496 = vmatpush.bf16.msra.mxu2 %v8727_v41  ;;  %v7185_v41 = vperm.slane %v7139_v55, %v16025_v3  ;;  %v7193_v31 = vperm.slane %v7141_v26, %v7192_v27  ;;  %v7197_v22 = vperm.slane %v7142_v56, %v7196_v7  ;;  %v7212_v55 = vadd.s32 4294967224, %v16016_v0 }
 0xe60   :  { %v7183_v20 = vsel %vm7182_vm14, %v7181_v32, %v7179_v63  ;;  %v7220_v26 = vadd.s32 4294967208, %v16016_v0  ;;  %v7224_v44 = vadd.s32 4294967200, %v16016_v0  ;;  %v7205_v63 = vperm.slane %v7144_v35, %v7204_v42 }
 0xe61   :  { %7522 = vmatpush.bf16.msrb.mxu1 %v8731_v25  ;;  %v7187_v19 = vsel %vm7186_vm15, %v7185_v41, %v7183_v20  ;;  %v7201_v25 = vperm.slane %v7143_v54, %v7200_v51  ;;  %v7228_v47 = vadd.s32 4294967192, %v16016_v0  ;;  %v7209_v32 = vperm.slane %v7145_v48, %v7208_v24 }
 0xe62   :  { %v7213_v21 = vperm.slane %v7146_v58, %v7212_v55  ;;  %v7217_v35 = vperm.slane %v7147_v37, %v7216_v40  ;;  %vm7226_vm10 = vcmask 851712   ;;  %v7221_v48 = vperm.slane %v7148_v34, %v7220_v26 }
 0xe63   :  { %7497 = vmatpush.bf16.msra.mxu2 %v8711_v10  ;;  %v7191_v10 = vsel %vm7190_vm1, %v7189_v8, %v7187_v19  ;;  %v7225_v8 = vperm.slane %v7149_v30, %v7224_v44  ;;  %v7247_v50 = vperm.slane %v7157_v46, %v16016_v0  ;;  %v7229_v33 = vperm.slane %v7150_v59, %v7228_v47 }
 0xe64   :  { %v7195_v56 = vsel %vm7194_vm2, %v7193_v31, %v7191_v10  ;;  %v17182_v58 = vunpack.c.h.b16 %v15924_v12  ;;  %v17183_v60 = vunpack.c.l.b16 %v15928_v14  ;;  %v7232_v30 = vadd.s32 4294967184, %v16016_v0 }
 0xe65   :  { %v7199_v54 = vsel %vm7198_vm4, %v7197_v22, %v7195_v56  ;;  %v17184_v46 = vunpack.c.h.b16 %v15928_v14  ;;  %v17185_v20 = vunpack.c.l.b16 %v15932_v16  ;;  %v17186_v59 = vor.u32 %v15985_v13, %v15983_v38 }
 0xe66   :  { %v7203_v31 = vsel %vm7202_vm3, %v7201_v25, %v7199_v54  ;;  %v7248_v37 = vperm.slane %v17182_v58, %v16022_v4  ;;  %v7250_v34 = vperm.slane %v17183_v60, %v16025_v3  ;;  %v7236_v22 = vadd.s32 4294967176, %v16016_v0  ;;  %v9078_v58 = vld [vmem:[#allocation3 + $0x12c] sm:$0xf0] }
 0xe67   :  { %7498 = vmatpush.bf16.msra.mxu2 %v8695_v1  ;;  %v7207_v29 = vsel %vm7206_vm5, %v7205_v63, %v7203_v31  ;;  %v7252_v41 = vperm.slane %v17184_v46, %v16028_v18  ;;  %v7254_v36 = vperm.slane %v17185_v20, %v7192_v27  ;;  %v17187_v25 = vunpack.c.h.b16 %v15932_v16  ;;  %v9052_v46 = vld [vmem:[#allocation3 + $0x64] sm:$0xf] }
 0xe68   :  { %v7211_v1 = vsel %vm7210_vm6, %v7209_v32, %v7207_v29  ;;  %v7249_v19 = vsel %vm7182_vm14, %v7248_v37, %v7247_v50  ;;  %vm7230_vm11 = vcmask 917312   ;;  %v17188_v27 = vunpack.c.l.b16 %v15936_v62 }
 0xe69   :  { %v7215_v12 = vsel %vm7214_vm7, %v7213_v21, %v7211_v1  ;;  %v7256_v10 = vperm.slane %v17187_v25, %v7196_v7  ;;  %v7251_v14 = vsel %vm7186_vm15, %v7250_v34, %v7249_v19  ;;  %vm7234_vm12 = vcmask 982912   ;;  %v9056_v21 = vld [vmem:[#allocation3 + $0x84] sm:$0xf] }
 0xe6a   :  { %v7219_v63 = vsel %vm7218_vm8, %v7217_v35, %v7215_v12  ;;  %v7258_v56 = vperm.slane %v17188_v27, %v7200_v51  ;;  %v7253_v13 = vsel %vm7190_vm1, %v7252_v41, %v7251_v14  ;;  %v17189_v32 = vunpack.c.h.b16 %v15936_v62  ;;  %v8790_v51 = vld [vmem:[#allocation3 + $0x120] sm:$0xf]  ;;  %v8696_v41 = vld [vmem:[#allocation3 + $0x70] sm:$0xf0]  ;;  %v9074_v12 = vld [vmem:[#allocation3 + $0x10c] sm:$0xf0] }
 0xe6b   :  { %7499 = vmatpush.bf16.msra.mxu2 %v17186_v59  ;;  %v7223_v38 = vsel %vm7222_vm9, %v7221_v48, %v7219_v63  ;;  %v17190_v7 = vunpack.c.l.b16 %v15920_v53  ;;  %v7255_v31 = vsel %vm7194_vm2, %v7254_v36, %v7253_v13  ;;  %v17191_v50 = vunpack.c.l.b16 %v15940_v15  ;;  %v8712_v48 = vld [vmem:[#allocation3 + $0x90] sm:$0xf0] }
 0xe6c   :  { %v7260_v54 = vperm.slane %v17189_v32, %v7204_v42  ;;  %v7227_v16 = vsel %vm7226_vm10, %v7225_v8, %v7223_v38  ;;  %v17192_v37 = vor.u32 %v15993_v45, %v15991_v23  ;;  %v17193_v42 = vunpack.c.h.b16 %v15920_v53  ;;  %v8774_v53 = vld [vmem:[#allocation3 + $0x100] sm:$0xf]  ;;  %v9048_v38 = vld [vmem:[#allocation3 + $0x44] sm:$0xf]  ;;  %v8680_v13 = vld [vmem:[#allocation3 + $0x50] sm:$0xf0] }
 0xe6d   :  { %v7233_v35 = vperm.slane %v17190_v7, %v7232_v30  ;;  %v7262_v29 = vperm.slane %v17191_v50, %v7208_v24  ;;  %v7231_v62 = vsel %vm7230_vm11, %v7229_v33, %v7227_v16  ;;  %v7257_v60 = vsel %vm7198_vm4, %v7256_v10, %v7255_v31  ;;  %v9076_v50 = vld [vmem:[#allocation3 + $0x124] sm:$0xf] }
 0xe6e   :  { %v7237_v8 = vperm.slane %v17193_v42, %v7236_v22  ;;  %v17194_v34 = vunpack.c.h.b16 %v15940_v15  ;;  %v7259_v24 = vsel %vm7202_vm3, %v7258_v56, %v7257_v60  ;;  %v17195_v20 = vunpack.c.l.b16 %v15944_v43 }
 0xe6f   :  { %7500 = vmatpush.bf16.msra.mxu2 %v17192_v37  ;;  %v17196_v23 = vunpack.c.h.b16 %v15944_v43  ;;  %v17197_v33 = vunpack.c.l.b16 %v15948_v28  ;;  %v7261_v19 = vsel %vm7206_vm5, %v7260_v54, %v7259_v24  ;;  %v17198_v15 = vunpack.c.h.b16 %v15948_v28 }
 0xe70   :  { %v7264_v1 = vperm.slane %v17194_v34, %v7212_v55  ;;  %v7266_v36 = vperm.slane %v17195_v20, %v7216_v40  ;;  %v8791_v25 = vor.u32 %v9078_v58, %v8790_v51  ;;  %v8715_v10 = vor.u32 %v9056_v21, %v8712_v48 }
 0xe71   :  { %v7268_v45 = vperm.slane %v17196_v23, %v7220_v26  ;;  %v7270_v59 = vperm.slane %v17197_v33, %v7224_v44  ;;  %v7272_v55 = vperm.slane %v17198_v15, %v7228_v47  ;;  %v7235_v63 = vsel %vm7234_vm12, %v7233_v35, %v7231_v62  ;;  %v8648_v23 = vld [vmem:[#allocation3 + $0x10] sm:$0xf0]  ;;  %v9071_v33 = vld [vmem:[#allocation3 + $0xf4] sm:$0xf0] }
 0xe72   :  { %v7263_v14 = vsel %vm7210_vm6, %v7262_v29, %v7261_v19  ;;  %v17199_v40 = vunpack.c.l.b16 %v15952_v61  ;;  %v8699_v26 = vor.u32 %v9052_v46, %v8696_v41  ;;  %v17200_v44 = vor.u32 %v16004_v52, %v16000_v49  ;;  %7523 = vmatpush.bf16.msrb.mxu1 %v8715_v10  ;;  %v8792_v29 = vld [vmem:[#allocation3 + $0x130] sm:$0xf0]  ;;  %v9072_v46 = vld [vmem:[#allocation3 + $0x104] sm:$0xf]  ;;  %v9067_v10 = vld [vmem:[#allocation3 + $0xd4] sm:$0xf0] }
 0xe73   :  { %vm7238_vm13 = vcmask 1048512   ;;  %v7265_v27 = vsel %vm7214_vm7, %v7264_v1, %v7263_v14  ;;  %v8775_v28 = vor.u32 %v9074_v12, %v8774_v53  ;;  %v7055_v47 = vpack.c.bf16 %v15848_v2, %v15832_v6  ;;  %v8776_v41 = vld [vmem:[#allocation3 + $0x110] sm:$0xf0] }
 0xe74   :  { %v7274_v43 = vperm.slane %v17199_v40, %v7232_v30  ;;  %7501 = vmatpush.bf16.msra.mxu2 %v17200_v44  ;;  %v7267_v56 = vsel %vm7218_vm8, %v7266_v36, %v7265_v27  ;;  %v7056_v30 = vpack.c.bf16 %v15884_v17, %v15871_v9  ;;  %v7065_v49 = vpack.c.bf16 %v15888_v39, %v15822_v57  ;;  %v9044_v17 = vld [vmem:[#allocation3 + $0x24] sm:$0xf]  ;;  %v8664_v39 = vld [vmem:[#allocation3 + $0x30] sm:$0xf0]  ;;  %v8798_v44 = vld [vmem:[#allocation3 + $0x128] sm:$0xf] }
 0xe75   :  { %v7066_v52 = vpack.c.bf16 %v15882_v5, %v15860_v11  ;;  %v7269_v32 = vsel %vm7222_vm9, %v7268_v45, %v7267_v56  ;;  %v17201_v54 = vunpack.c.h.b16 %v15952_v61  ;;  %v7153_v6 = vunpack.c.l.b16 %v7055_v47  ;;  %v9040_v36 = vld [vmem:[#allocation3 + $0x4] sm:$0xf]  ;;  %v8766_v45 = vld [vmem:[#allocation3 + $0xe8] sm:$0xf]  ;;  %v9079_v27 = vld [vmem:[#allocation3 + $0x134] sm:$0xf0] }
 0xe76   :  { %v7154_v2 = vunpack.c.h.b16 %v7055_v47  ;;  %v7271_v16 = vsel %vm7226_vm10, %v7270_v59, %v7269_v32  ;;  %vm7285_vm2 = vcmask 1041409   ;;  %v7173_v7 = vunpack.c.l.b16 %v7065_v49  ;;  %7524 = vmatpush.bf16.msrb.mxu1 %v8699_v26  ;;  %v9063_v26 = vld [vmem:[#allocation3 + $0xb4] sm:$0xf0]  ;;  %v8718_v56 = vld [vmem:[#allocation3 + $0x88] sm:$0xf] }
 0xe77   :  { %v7276_v21 = vperm.slane %v17201_v54, %v7236_v22  ;;  %v7239_v35 = vsel %vm7238_vm13, %v7237_v8, %v7235_v63  ;;  %v7273_v9 = vsel %vm7230_vm11, %v7272_v55, %v7271_v16  ;;  %v8683_v57 = vor.u32 %v9048_v38, %v8680_v13  ;;  %v9059_v38 = vld [vmem:[#allocation3 + $0x94] sm:$0xf0]  ;;  %v8702_v32 = vld [vmem:[#allocation3 + $0x68] sm:$0xf] }
 0xe78   :  { %7513 = vmatpush.bf16.msrb.mxu2 %v8791_v25  ;;  %v7174_v11 = vunpack.c.h.b16 %v7065_v49  ;;  %v7275_v5 = vsel %vm7234_vm12, %v7274_v43, %v7273_v9  ;;  %v7155_v61 = vunpack.c.l.b16 %v7056_v30  ;;  %v7175_v22 = vunpack.c.l.b16 %v7066_v52  ;;  %v8750_v25 = vld [vmem:[#allocation3 + $0xc8] sm:$0xf]  ;;  %v9075_v49 = vld [vmem:[#allocation3 + $0x114] sm:$0xf0] }
 0xe79   :  { %v7240_v31 = vperm.slane %v7153_v6, %v16016_v0  ;;  %v7277_v51 = vsel %vm7238_vm13, %v7276_v21, %v7275_v5  ;;  %v7241_v58 = vperm.slane %v7154_v2, %v16022_v4  ;;  %v7278_v48 = vperm.slane %v7173_v7, %v16016_v0  ;;  %v8734_v43 = vld [vmem:[#allocation3 + $0xa8] sm:$0xf]  ;;  %v9055_v54 = vld [vmem:[#allocation3 + $0x74] sm:$0xf0] }
 0xe7a   :  { %v7279_v37 = vperm.slane %v7174_v11, %v16022_v4  ;;  %v7286_v62 = vsel %vm7285_vm2, %v7277_v51, %v7239_v35  ;;  %v8667_v42 = vor.u32 %v9044_v17, %v8664_v39  ;;  %7525 = vmatpush.bf16.msrb.mxu1 %v8683_v57  ;;  %v7156_v60 = vunpack.c.h.b16 %v7056_v30  ;;  %v8782_v30 = vld [vmem:[#allocation3 + $0x108] sm:$0xf]  ;;  %v9051_v16 = vld [vmem:[#allocation3 + $0x54] sm:$0xf0]  ;;  %v9069_v57 = vld [vmem:[#allocation3 + $0xec] sm:$0xf] }
 0xe7b   :  { %v16166_v8 = vpack.c.b16 %v7286_v62, %v7286_v62  ;;  %v7176_v34 = vunpack.c.h.b16 %v7066_v52  ;;  %v8795_v1 = vor.u32 %v9076_v50, %v8792_v29  ;;  %v7243_v24 = vperm.slane %v7155_v61, %v16025_v3  ;;  %v8686_v2 = vld [vmem:[#allocation3 + $0x48] sm:$0xf]  ;;  %v9047_v9 = vld [vmem:[#allocation3 + $0x34] sm:$0xf0]  ;;  %v8768_v17 = vld [vmem:[#allocation3 + $0xf8] sm:$0xf0] }
 0xe7c   :  { %7514 = vmatpush.bf16.msrb.mxu2 %v8775_v28  ;;  %v7281_v20 = vperm.slane %v7175_v22, %v16025_v3  ;;  %v7242_v0 = vsel %vm7182_vm14, %v7241_v58, %v7240_v31  ;;  %v7280_v4 = vsel %vm7182_vm14, %v7279_v37, %v7278_v48  ;;  %v8779_v59 = vor.u32 %v9072_v46, %v8776_v41  ;;  %v8670_v35 = vld [vmem:[#allocation3 + $0x28] sm:$0xf]  ;;  %v9043_v5 = vld [vmem:[#allocation3 + $0x14] sm:$0xf0]  ;;  %v9077_v22 = vld [vmem:[#allocation3 + $0x12c] sm:$0xf] }
 0xe7d   :  { %7502 = vmatmul.bf16.vlgmr.msra.gmra.mxu2 %v16166_v8  ;;  %v7245_v53 = vperm.slane %v7156_v60, %v16028_v18  ;;  %v7283_v12 = vperm.slane %v7176_v34, %v16028_v18  ;;  %v8651_v19 = vor.u32 %v9040_v36, %v8648_v23  ;;  %v7244_v3 = vsel %vm7186_vm15, %v7243_v24, %v7242_v0  ;;  %v8654_v11 = vld [vmem:[#allocation3 + $0x8] sm:$0xf]  ;;  %v8800_v31 = vld [vmem:[#allocation3 + $0x138] sm:$0xf0]  ;;  %v9065_v50 = vld [vmem:[#allocation3 + $0xcc] sm:$0xf] }
 0xe7e   :  { %7526 = vmatpush.bf16.msrb.mxu1 %v8667_v42  ;;  %v7282_v15 = vsel %vm7186_vm15, %v7281_v20, %v7280_v4  ;;  %v8767_v55 = vor.u32 %v9071_v33, %v8766_v45  ;;  %v8751_v40 = vor.u32 %v9067_v10, %v8750_v25  ;;  %v8735_v28 = vor.u32 %v9063_v26, %v8734_v43  ;;  %v8752_v29 = vld [vmem:[#allocation3 + $0xd8] sm:$0xf0]  ;;  %v9073_v62 = vld [vmem:[#allocation3 + $0x10c] sm:$0xf]  ;;  %v9084_v10 = vld [vmem:[%s16305_s7 + $0x20] sm:$0xff] }
 0xe7f   :  { %v7246_v63 = vsel %vm7190_vm1, %v7245_v53, %v7244_v3  ;;  %v7284_v14 = vsel %vm7190_vm1, %v7283_v12, %v7282_v15  ;;  %v8799_v13 = vor.u32 %v9079_v27, %v8798_v44  ;;  %v8719_v52 = vor.u32 %v9059_v38, %v8718_v56  ;;  %v9087_v48 = vld [vmem:[%s16305_s7 + $0x38] sm:$0xff]  ;;  %v9061_v60 = vld [vmem:[#allocation3 + $0xac] sm:$0xf]  ;;  %v9092_v44 = vld [vmem:[%s16305_s7 + $0x60] sm:$0xff] }
 0xe80   :  { %7539 = vmatpush.bf16.msra.mxu2 %v8795_v1  ;;  %v7287_v18 = vsel %vm7285_vm2, %v7284_v14, %v7246_v63  ;;  %v8783_v21 = vor.u32 %v9075_v49, %v8782_v30  ;;  %v8703_v6 = vor.u32 %v9055_v54, %v8702_v32  ;;  %v8687_v7 = vor.u32 %v9051_v16, %v8686_v2  ;;  %v8784_v42 = vld [vmem:[#allocation3 + $0x118] sm:$0xf0]  ;;  %v9086_v1 = vld [vmem:[%s16305_s7 + $0x30] sm:$0xff]  ;;  %v9057_v24 = vld [vmem:[#allocation3 + $0x8c] sm:$0xf] }
 0xe81   :  { %v16181_v47 = vpack.c.b16 %v7287_v18, %v7287_v18  ;;  %v8671_v39 = vor.u32 %v9047_v9, %v8670_v35  ;;  %v8771_v61 = vor.u32 %v9069_v57, %v8768_v17  ;;  %v8655_v51 = vor.u32 %v9043_v5, %v8654_v11  ;;  %v8736_v34 = vld [vmem:[#allocation3 + $0xb8] sm:$0xf0]  ;;  %7866 = vmatpush.bf16.msra.mxu3 %v9087_v48  ;;  %v9053_v23 = vld [vmem:[#allocation3 + $0x6c] sm:$0xf]  ;;  %v9080_v18 = vld [vmem:[%s16305_s7] sm:$0xff] }
 0xe82   :  { %7527 = vmatpush.bf16.msrb.mxu1 %v8651_v19  ;;  %v8803_v58 = vor.u32 %v9077_v22, %v8800_v31  ;;  %v8755_v37 = vor.u32 %v9065_v50, %v8752_v29  ;;  %v8787_v46 = vor.u32 %v9073_v62, %v8784_v42  ;;  %v8739_v41 = vor.u32 %v9061_v60, %v8736_v34  ;;  %v8720_v20 = vld [vmem:[#allocation3 + $0x98] sm:$0xf0]  ;;  %v9049_v45 = vld [vmem:[#allocation3 + $0x4c] sm:$0xf]  ;;  %v9102_v56 = vld [vmem:[%s16305_s7 + $0xb0] sm:$0xff] }
 0xe83   :  { %v8723_v36 = vor.u32 %v9057_v24, %v8720_v20  ;;  %v8704_v0 = vld [vmem:[#allocation3 + $0x78] sm:$0xf0]  ;;  %v9045_v53 = vld [vmem:[#allocation3 + $0x2c] sm:$0xf]  ;;  %v9088_v49 = vld [vmem:[%s16305_s7 + $0x40] sm:$0xff]  ;;  %vm7937_vm1 = vcmask 66560  }
 0xe84   :  { %7540 = vmatpush.bf16.msra.mxu2 %v8779_v59  ;;  %v8707_v4 = vor.u32 %v9053_v23, %v8704_v0  ;;  %v8688_v33 = vld [vmem:[#allocation3 + $0x58] sm:$0xf0]  ;;  %v9041_v3 = vld [vmem:[#allocation3 + $0xc] sm:$0xf]  ;;  %v9098_v16 = vld [vmem:[%s16305_s7 + $0x90] sm:$0xff] }
 0xe85   :  { %7528 = vmatmul.bf16.vlgmr.msrb.gmra.mxu1 %v16166_v8  ;;  %7867 = vmatpush.bf16.msra.mxu3 %v9086_v1  ;;  %v8691_v59 = vor.u32 %v9049_v45, %v8688_v33  ;;  %v8672_v12 = vld [vmem:[#allocation3 + $0x38] sm:$0xf0]  ;;  %v9085_v25 = vld [vmem:[%s16305_s7 + $0x28] sm:$0xff]  ;;  %v9108_v31 = vld [vmem:[%s16305_s7 + $0xe0] sm:$0xff] }
 0xe86   :  { %7546 = vmatpush.bf16.msra.mxu1 %v8767_v55  ;;  %v8675_v19 = vor.u32 %v9045_v53, %v8672_v12  ;;  %v8656_v15 = vld [vmem:[#allocation3 + $0x18] sm:$0xf0]  ;;  %v9081_v43 = vld [vmem:[%s16305_s7 + $0x8] sm:$0xff]  ;;  %v9106_v48 = vld [vmem:[%s16305_s7 + $0xd0] sm:$0xff] }
 0xe87   :  { %v8659_v55 = vor.u32 %v9041_v3, %v8656_v15  ;;  %v9083_v63 = vld [vmem:[%s16305_s7 + $0x18] sm:$0xff]  ;;  %v9093_v26 = vld [vmem:[%s16305_s7 + $0x68] sm:$0xff] }
 0xe88   :  { %v9095_v14 = vld [vmem:[%s16305_s7 + $0x78] sm:$0xff]  ;;  %v9089_v38 = vld [vmem:[%s16305_s7 + $0x48] sm:$0xff] }
 0xe89   :  { %7868 = vmatpush.bf16.msra.mxu3 %v9085_v25  ;;  %v9091_v27 = vld [vmem:[%s16305_s7 + $0x58] sm:$0xff]  ;;  %v9097_v57 = vld [vmem:[%s16305_s7 + $0x88] sm:$0xff] }
 0xe8a   :  { %7547 = vmatpush.bf16.msra.mxu1 %v8751_v40  ;;  %v9094_v40 = vld [vmem:[%s16305_s7 + $0x70] sm:$0xff]  ;;  %v9099_v54 = vld [vmem:[%s16305_s7 + $0x98] sm:$0xff]  ;;  %v9109_v11 = vld [vmem:[%s16305_s7 + $0xe8] sm:$0xff] }
 0xe8b   :  { %v9111_v2 = vld [vmem:[%s16305_s7 + $0xf8] sm:$0xff]  ;;  %v9105_v60 = vld [vmem:[%s16305_s7 + $0xc8] sm:$0xff] }
 0xe8d   :  { %8804 = vmatmul.msk.bf16.vlgmr.msrb.gmra.mxu2 %vm675_vm0, %v16181_v47  ;;  %7869 = vmatpush.bf16.msra.mxu3 %v9084_v10 }
 0xe8e   :  { %7548 = vmatpush.bf16.msra.mxu1 %v8735_v28  ;;  %7565 = vmatpush.bf16.msrb.mxu2 %v8799_v13  ;;  %v9103_v28 = vld [vmem:[%s16305_s7 + $0xb8] sm:$0xff]  ;;  %v9101_v13 = vld [vmem:[%s16305_s7 + $0xa8] sm:$0xff] }
 0xe91   :  { %7870 = vmatpush.bf16.msra.mxu3 %v9083_v63 }
 0xe92   :  { %7549 = vmatpush.bf16.msra.mxu1 %v8719_v52  ;;  %7566 = vmatpush.bf16.msrb.mxu2 %v8783_v21  ;;  %v9100_v52 = vld [vmem:[%s16305_s7 + $0xa0] sm:$0xff] }
 0xe93   :  { %v7107_v21 = vld [vmem:[%s16304_s6] sm:$0xf] }
 0xe94   :  { %v7109_v35 = vperm.slane %v7107_v21, 0 }
 0xe96   :  { %7550 = vmatpush.bf16.msra.mxu1 %v8703_v6 }
 0xe9a   :  { %7551 = vmatpush.bf16.msra.mxu1 %v8687_v7  ;;  %v9110_v7 = vld [vmem:[%s16305_s7 + $0xf0] sm:$0xff] }
 0xe9d   :  { %8805 = vmatmul.msk.bf16.vlgmr.msra.gmra.mxu2 %vm675_vm0, %v16181_v47 }
 0xe9e   :  { %7552 = vmatpush.bf16.msra.mxu1 %v8671_v39  ;;  %7572 = vmatpush.bf16.msra.mxu2 %v8771_v61  ;;  %v9096_v61 = vld [vmem:[%s16305_s7 + $0x80] sm:$0xff] }
 0xea2   :  { %7553 = vmatpush.bf16.msra.mxu1 %v8655_v51  ;;  %7573 = vmatpush.bf16.msra.mxu2 %v8755_v37  ;;  %v9107_v51 = vld [vmem:[%s16305_s7 + $0xd8] sm:$0xff] }
 0xea5   :  { %7554 = vmatmul.bf16.vlgmr.msra.gmra.mxu1 %v16166_v8 }
 0xea6   :  { %7591 = vmatpush.bf16.msrb.mxu1 %v8803_v58  ;;  %7574 = vmatpush.bf16.msra.mxu2 %v8739_v41  ;;  %v7110_v58 = vperm.slane %v7107_v21, 1 }
 0xeaa   :  { %7592 = vmatpush.bf16.msrb.mxu1 %v8787_v46  ;;  %7575 = vmatpush.bf16.msra.mxu2 %v8723_v36  ;;  %v9104_v46 = vld [vmem:[%s16305_s7 + $0xc0] sm:$0xff]  ;;  %v7111_v36 = vperm.slane %v7107_v21, 2 }
 0xead   :  { %8806 = vmatmul.msk.bf16.vlgmr.msrb.gmra.mxu2 %vm675_vm0, %v16181_v47 }
 0xeae   :  { %7576 = vmatpush.bf16.msra.mxu2 %v8707_v4  ;;  %7879 = vmatpush.bf16.msra.mxu1 %v9095_v14 }
 0xeb2   :  { %7577 = vmatpush.bf16.msra.mxu2 %v8691_v59  ;;  %7880 = vmatpush.bf16.msra.mxu1 %v9094_v40 }
 0xeb5   :  { %8807 = vmatmul.msk.bf16.vlgmr.msrb.gmra.mxu1 %vm675_vm0, %v16181_v47  ;;  %v9090_v47 = vld [vmem:[%s16305_s7 + $0x50] sm:$0xff] }
 0xeb6   :  { %7578 = vmatpush.bf16.msra.mxu2 %v8675_v19  ;;  %7881 = vmatpush.bf16.msra.mxu1 %v9093_v26  ;;  %v7112_v19 = vperm.slane %v7107_v21, 3 }
 0xeba   :  { %7579 = vmatpush.bf16.msra.mxu2 %v8659_v55  ;;  %7882 = vmatpush.bf16.msra.mxu1 %v9092_v44  ;;  %v9827_v44 = vld [vmem:[%s16306_s8] ss:$0 sm:$0xff]  ;;  %s9865_s8 = smov [#allocation5]  }
 0xebb   :  { %s7944_s27 = sshll.u32 %s9865_s8, 4  ;;  %s7945_s27 = int_to_ptr.vmem [resolvable:$true] %s7944_s27 }
 0xebd   :  { %7580 = vmatmul.bf16.vlgmr.msra.gmra.mxu2 %v16166_v8  ;;  %v9082_v8 = vld [vmem:[%s16305_s7 + $0x10] sm:$0xff] }
 0xebe   :  { %7871 = vmatpush.bf16.msra.mxu3 %v9082_v8  ;;  %7883 = vmatpush.bf16.msra.mxu1 %v9091_v27 }
 0xebf   :  { %7892 = vmatpush.bf16.msrb.mxu2 %v9103_v28 }
 0xec2   :  { %7872 = vmatpush.bf16.msra.mxu3 %v9081_v43  ;;  %7884 = vmatpush.bf16.msra.mxu1 %v9090_v47 }
 0xec3   :  { %7893 = vmatpush.bf16.msrb.mxu2 %v9102_v56 }
 0xec6   :  { %7873 = vmatpush.bf16.msra.mxu3 %v9080_v18  ;;  %7885 = vmatpush.bf16.msra.mxu1 %v9089_v38 }
 0xec7   :  { %7894 = vmatpush.bf16.msrb.mxu2 %v9101_v13 }
 0xeca   :  { %7886 = vmatpush.bf16.msra.mxu1 %v9088_v49  ;;  %7905 = vmatpush.bf16.msrb.mxu3 %v9111_v2 }
 0xecb   :  { %7895 = vmatpush.bf16.msrb.mxu2 %v9100_v52 }
 0xece   :  { %7906 = vmatpush.bf16.msrb.mxu3 %v9110_v7 }
 0xecf   :  { %7896 = vmatpush.bf16.msrb.mxu2 %v9099_v54 }
 0xed2   :  { %7907 = vmatpush.bf16.msrb.mxu3 %v9109_v11 }
 0xed3   :  { %7897 = vmatpush.bf16.msrb.mxu2 %v9098_v16 }
 0xed6   :  { %7908 = vmatpush.bf16.msrb.mxu3 %v9108_v31 }
 0xed7   :  { %7898 = vmatpush.bf16.msrb.mxu2 %v9097_v57 }
 0xeda   :  { %7909 = vmatpush.bf16.msrb.mxu3 %v9107_v51 }
 0xedb   :  { %7899 = vmatpush.bf16.msrb.mxu2 %v9096_v61 }
 0xede   :  { %7910 = vmatpush.bf16.msrb.mxu3 %v9106_v48 }
 0xee2   :  { %7911 = vmatpush.bf16.msrb.mxu3 %v9105_v60 }
 0xee6   :  { %7912 = vmatpush.bf16.msrb.mxu3 %v9104_v46 }
 0xf00   :  { %v7503_v30 = vpop.f32.mrf.mxu2 }
 0xf01   :  { %v7504_v17 = vadd.f32 %v7503_v30, %v7109_v35 }
 0xf02   :  { %v7529_v32 = vpop.f32.mrf.mxu1 }
 0xf03   :  { %v7530_v37 = vadd.f32 %v7529_v32, %v7110_v58 }
 0xf08   :  { %v7505_v6 = vpop.f32.mrf.mxu2 }
 0xf0a   :  { %v7531_v9 = vpop.f32.mrf.mxu1 }
 0xf10   :  { %v7516_v39 = vpop.f32.mrf.mxu2 }
 0xf11   :  { %v7517_v5 = vadd.f32 %v7516_v39, %v7504_v17 }
 0xf13   :  { %v7598_v22 = vmax.f32 %v7517_v5, 0.0 }
 0xf15   :  { %v7602_v50 = vpack.c.bf16 %v7598_v22, %v7598_v22 }
 0xf17   :  { %7874 = vmatmul.bf16.vlgmr.msra.gmra.mxu3 %v7602_v50 }
 0xf18   :  { %v7518_v29 = vpop.f32.mrf.mxu2 }
 0xf20   :  { %v7542_v62 = vpop.f32.mrf.mxu2 }
 0xf21   :  { %v7543_v34 = vadd.f32 %v7542_v62, %v7530_v37 }
 0xf22   :  { %v7555_v42 = vpop.f32.mrf.mxu1 }
 0xf23   :  { %v7599_v1 = vmax.f32 %v7543_v34, 0.0  ;;  %v7556_v23 = vadd.f32 %v7555_v42, %v7111_v36 }
 0xf25   :  { %v7603_v41 = vpack.c.bf16 %v7599_v1, %v7599_v1 }
 0xf27   :  { %7887 = vmatmul.bf16.vlgmr.msra.gmra.mxu1 %v7603_v41 }
 0xf28   :  { %v7544_v24 = vpop.f32.mrf.mxu2 }
 0xf2a   :  { %v7557_v20 = vpop.f32.mrf.mxu1 }
 0xf30   :  { %v7568_v0 = vpop.f32.mrf.mxu2 }
 0xf31   :  { %v7569_v45 = vadd.f32 %v7568_v0, %v7556_v23 }
 0xf32   :  { %v7594_v4 = vpop.f32.mrf.mxu1 }
 0xf33   :  { %v7600_v33 = vmax.f32 %v7569_v45, 0.0 }
 0xf35   :  { %v7604_v59 = vpack.c.bf16 %v7600_v33, %v7600_v33 }
 0xf37   :  { %7900 = vmatmul.bf16.vlgmr.msrb.gmra.mxu2 %v7604_v59 }
 0xf38   :  { %v7570_v53 = vpop.f32.mrf.mxu2 }
 0xf3a   :  { %v7596_v12 = vpop.f32.mrf.mxu1 }
 0xf40   :  { %v7581_v3 = vpop.f32.mrf.mxu2 }
 0xf41   :  { %v7582_v15 = vadd.f32 %v7581_v3, %v7112_v19 }
 0xf43   :  { %v7595_v55 = vadd.f32 %v7594_v4, %v7582_v15 }
 0xf45   :  { %v7601_v25 = vmax.f32 %v7595_v55, 0.0 }
 0xf47   :  { %v7605_v10 = vpack.c.bf16 %v7601_v25, %v7601_v25 }
 0xf48   :  { %v7583_v63 = vpop.f32.mrf.mxu2 }
 0xf49   :  { %7913 = vmatmul.bf16.vlgmr.msrb.gmra.mxu3 %v7605_v10 }
 0xf9a   :  { %v7875_v14 = vpop.f32.mrf.mxu3 }
 0xf9b   :  { %v7876_v27 = vadd.f32 %v9827_v44, %v7875_v14 }
 0xfa2   :  { %v7877_v8 = vpop.f32.mrf.mxu3 }
 0xfa4   :  { %v7888_v40 = vpop.f32.mrf.mxu1 }
 0xfa5   :  { %v7889_v28 = vadd.f32 %v7888_v40, %v7876_v27 }
 0xfac   :  { %v7890_v43 = vpop.f32.mrf.mxu1 }
 0xfba   :  { %v7901_v26 = vpop.f32.mrf.mxu2 }
 0xfbb   :  { %v7902_v47 = vadd.f32 %v7901_v26, %v7889_v28 }
 0xfc2   :  { %v7903_v18 = vpop.f32.mrf.mxu2 }
 0xfcc   :  { %v7914_v56 = vpop.f32.mrf.mxu3 }
 0xfcd   :  { %v7915_v38 = vadd.f32 %v7914_v56, %v7902_v47 }
 0xfcf   :  { %v7918_v13 = vsub.f32 0.0, %v7915_v38 }
 0xfd1   :  { %v7919_v30 = vmul.f32 1.442695, %v7918_v13 }
 0xfd3   :  { %9828 = vpow2.f32 %v7919_v30 }
 0xfd4   :  { %v7916_v49 = vpop.f32.mrf.mxu3 }
 0xfd9   :  { %v9829_v52 = vpop.eup %9828 }
 0xfda   :  { %v7921_v32 = vadd.f32 1.0, %v9829_v52 }
 0xfdc   :  { %9830 = vrcp.f32 %v7921_v32  ;;  %v7933_v2 = vand.u32 2147483648, %v7921_v32  ;;  %v7931_v7 = vand.u32 2147483647, %v7921_v32  ;;  %vm7927_vm14 = vweird.f32 %v7921_v32 }
 0xfde   :  { %v7934_v9 = vor.u32 1.1754944e-38, %v7933_v2  ;;  %vm7932_vm4 = vcmp.eq.f32.partialorder %v7931_v7, 8.507059e+37 }
 0xfe2   :  { %v9831_v54 = vpop.eup %9830 }
 0xfe3   :  { %v7923_v21 = vmul.f32 %v9831_v54, %v7921_v32  ;;  %vm7928_vm0 = vweird.f32 %v9831_v54 }
 0xfe4   :  { %vm7929_vm15 = vmor %vm7927_vm14, %vm7928_vm0 }
 0xfe5   :  { %v7924_v6 = vsub.f32 1.0, %v7923_v21 }
 0xfe7   :  { %v7925_v16 = vmul.f32 %v9831_v54, %v7924_v6 }
 0xfe9   :  { %v7926_v35 = vadd.f32 %v9831_v54, %v7925_v16 }
 0xfeb   :  { %v7930_v57 = vsel %vm7929_vm15, %v9831_v54, %v7926_v35 }
 0xfec   :  { %v7935_v17 = vsel %vm7932_vm4, %v7934_v9, %v7930_v57 }
 0xfed   :  { %7938 = vst.msk [vmem:[#allocation5] sm:$0x3] %vm7937_vm1, %v7935_v17 }
 0xfee   :  { %7949 = dma.vmem_to_hbm [thread:$0]  %s7945_s27, 32, %s7947_s2, [#allocation6]  }
 0xfef   :  { %9860 = dma.done.wait [#allocation6], 32  }
 0xff0   :  { %9861 = vsyncadd [#allocation6], 4294967264 }
 0xff1   :  { %7954 = vsyncpa [#allocation6], 1 }
 0xff2   :  { %7955 = vsyncmov [#allocation4] }
 0xff5   :  { %s7956_s29 = vpop.sfrf %7955 }
 0xff6   :  { %p8936_p0 = scmp.ne.s32.totalorder %s7956_s29, 0 }
 0xff8   :  { %7960 = shalt.err (%p8936_p0)  }
 0xff9   :  { %7962 = vsyncmov [#allocation4 + $0x1] }
 0xffc   :  { %s7963_s11 = vpop.sfrf %7962 }
 0xffd   :  { %p8937_p1 = scmp.ne.s32.totalorder %s7963_s11, 0 }
 0xfff   :  { %7967 = shalt.err (%p8937_p1)  }

</bundles_post_ra>
